<compile_context>
chip_gen: v6e
topology: v6e:2x2x1
jax: 0.10.0
libtpu: 0.0.40
codegen_flags: <defaults>
</compile_context>

<pallas_src>
import functools

import jax
import jax.numpy as jnp
from jax import lax
from jax.experimental import pallas as pl
from jax.experimental.pallas import tpu as pltpu


# ----------------------------------------------------------------------------
# Fused 3x3 Conv (K-folded taps) + folded-BN + (Leaky)ReLU Pallas kernel
# ----------------------------------------------------------------------------
def _conv_bn_act_kernel(taps_ref, w_ref, bias_ref, o_ref, *, slope):
    # (Cout, 9*Cin) @ (9*Cin, TM) on the MXU, bf16 inputs, f32 accumulate.
    acc = jnp.dot(w_ref[...], taps_ref[...], preferred_element_type=jnp.float32)
    y = acc + bias_ref[...]
    if slope == 0.0:
        y = jnp.maximum(y, 0.0)          # ReLU
    else:
        y = jnp.maximum(y, y * slope)    # LeakyReLU(slope)
    o_ref[...] = y.astype(o_ref.dtype)


def _round_up(x, m):
    return (x + m - 1) // m * m


def _pick_m_tile(bmp, k, cout):
    # Cap tiles at 1024 lanes and keep the double-buffered operand set small so
    # the same tiling is safe on v5e's 16 MiB scoped-VMEM default.
    budget = 8 * 1024 * 1024
    for t in (1024, 512, 256, 128):
        if bmp % t == 0 and 2 * 2 * (k + cout) * t <= budget:
            return t
    return 128


def _extract_taps(x, stride):
    """x: (B, C, H, W) -> taps (9*C, B*Mp) bf16 (K-folded, batch folded into M).

    K-axis order is (kh, kw, cin); M-axis order is batch-major with each image
    lane-padded to Mp (a multiple of 128), so tiles stay lane-dense.
    """
    B, C, H, W = x.shape
    xb = jnp.transpose(x.astype(jnp.bfloat16), (1, 0, 2, 3))      # (C, B, H, W)
    xp = jnp.pad(xb, ((0, 0), (0, 0), (1, 1), (1, 1)))
    Ho = (H + 2 - 3) // stride + 1
    Wo = (W + 2 - 3) // stride + 1
    M = Ho * Wo
    Mp = _round_up(M, 128)
    taps = []
    for kh in range(3):           # tap order (kh-major, kw-minor, cin) must match
        for kw in range(3):       # the (Cout, kh, kw, Cin) weight reshape below
            tp = xp[:, :, kh:kh + stride * (Ho - 1) + 1:stride,
                          kw:kw + stride * (Wo - 1) + 1:stride]
            tp = tp.reshape(C, B, M)
            if Mp != M:
                tp = jnp.pad(tp, ((0, 0), (0, 0), (0, Mp - M)))
            taps.append(tp.reshape(C, B * Mp))
    taps = jnp.concatenate(taps, axis=0)          # (9*C, B*Mp)
    return taps, Ho, Wo, Mp


def conv_bn_act(x, p, stride=1):
    """Fused Conv2d(3x3, pad=1, bias=False) + folded BN + (Leaky)ReLU.

    x: (B, Cin, H, W) f32/bf16.  p: dict(w=(Cout, 9*Cin) bf16 with BN scale
    folded in, bias=(Cout, 1) f32, slope=float).  Returns (B, Cout, Ho, Wo) bf16.
    """
    assert stride in (1, 2)
    taps, Ho, Wo, Mp = _extract_taps(x, stride)
    K, BMp = taps.shape
    B = x.shape[0]
    Cout = p['w'].shape[0]
    TM = _pick_m_tile(BMp, K, Cout)

    out = pl.pallas_call(
        functools.partial(_conv_bn_act_kernel, slope=p['slope']),
        out_shape=jax.ShapeDtypeStruct((Cout, BMp), jnp.bfloat16),
        grid=(BMp // TM,),
        in_specs=[
            pl.BlockSpec((K, TM), lambda m: (0, m)),
            pl.BlockSpec((Cout, K), lambda m: (0, 0)),
            pl.BlockSpec((Cout, 1), lambda m: (0, 0)),
        ],
        out_specs=pl.BlockSpec((Cout, TM), lambda m: (0, m)),
        compiler_params=pltpu.CompilerParams(
            dimension_semantics=("parallel",)),
    )(taps, p['w'], p['bias'])

    M = Ho * Wo
    out = out.reshape(Cout, B, Mp)[:, :, :M]
    return jnp.transpose(out, (1, 0, 2)).reshape(B, Cout, Ho, Wo)


# ----------------------------------------------------------------------------
# SENet:  out = sigmoid(x * fc2(relu(fc1(avg_pool(x)))))   (sigmoid on product,
# exactly as in the PyTorch reference)
# ----------------------------------------------------------------------------
def _se_apply_kernel(x_ref, se_ref, o_ref):
    v = x_ref[0].astype(jnp.float32) * se_ref[0]            # (C, TM) * (C, 1)
    sig = pl.reciprocal(1.0 + jnp.exp(-v), approx=True)     # EUP exp + recip
    o_ref[0] = sig.astype(o_ref.dtype)


def senet(x, p):
    B, C, H, W = x.shape
    M = H * W
    xf32 = x.astype(jnp.float32)
    pooled = jnp.mean(xf32.reshape(B, C, M), axis=-1)        # global avg-pool (f32)
    h = jnp.maximum(pooled @ p['w1'].T, 0.0)                 # fc1 (1x1 conv) + ReLU
    se = (h @ p['w2'].T).reshape(B, C, 1)                    # fc2 (1x1 conv), f32

    Mp = _round_up(M, 128)
    xf = x.astype(jnp.bfloat16).reshape(B, C, M)
    if Mp != M:
        xf = jnp.pad(xf, ((0, 0), (0, 0), (0, Mp - M)))
    TM = 128
    for t in (1024, 512, 256, 128):
        if Mp % t == 0:
            TM = t
            break

    out = pl.pallas_call(
        _se_apply_kernel,
        out_shape=jax.ShapeDtypeStruct((B, C, Mp), jnp.bfloat16),
        grid=(B, Mp // TM),
        in_specs=[
            pl.BlockSpec((1, C, TM), lambda b, m: (b, 0, m)),
            pl.BlockSpec((1, C, 1), lambda b, m: (b, 0, 0)),
        ],
        out_specs=pl.BlockSpec((1, C, TM), lambda b, m: (b, 0, m)),
        compiler_params=pltpu.CompilerParams(
            dimension_semantics=("parallel", "parallel")),
    )(xf, se)
    return out[:, :, :M].reshape(B, C, H, W)


# ----------------------------------------------------------------------------
# XLA glue ops (memory-bound): maxpool, nearest-x2 upsample, bf16 concat
# ----------------------------------------------------------------------------
def maxpool2d(x, k, stride, pad):
    return lax.reduce_window(
        x, jnp.array(-jnp.inf, x.dtype), lax.max,
        (1, 1, k, k), (1, 1, stride, stride),
        ((0, 0), (0, 0), (pad, pad), (pad, pad)))


def upsample2(x):
    return jnp.repeat(jnp.repeat(x, 2, axis=2), 2, axis=3)


def _cat_bf16(arrs):
    return jnp.concatenate([a.astype(jnp.bfloat16) for a in arrs], axis=1)


# ----------------------------------------------------------------------------
# Sub-modules
# ----------------------------------------------------------------------------
def cm_forward(x, z, p):
    out = jnp.concatenate([x.astype(jnp.float32), z.astype(jnp.float32)], axis=1)
    out = senet(out, p['se'])
    out = conv_bn_act(out, p['cbr1'])
    in_c = p['in_c']
    x_out = conv_bn_act(out[:, :in_c], p['cbr2'])
    return x_out, out[:, in_c:]


_NE_POOL_K = (3, 5, 7)


def ne_forward(x, p):
    x = conv_bn_act(x, p['con1'])                     # LeakyReLU(0.1)
    for i, k in enumerate(_NE_POOL_K):
        up = upsample2(maxpool2d(x, k, 2, (k - 1) // 2))
        res = up.astype(jnp.float32) + x.astype(jnp.float32)   # residual add in f32
        x = conv_bn_act(res, p['cbrs'][i])            # ReLU
    return conv_bn_act(x, p['con2'])                  # LeakyReLU(0.1)


def zpg_ma_be_forward(xs, z, params, ma_k=2):
    xs = list(xs)
    zs = [maxpool2d(z, 7, 4, 3), maxpool2d(z, 3, 2, 1), maxpool2d(z, 3, 1, 1)]
    for i in range(ma_k):
        m = zs[0] if i == 0 else zs[i] + upsample2(zs[i - 1]).astype(zs[i].dtype)
        xs[i], zs[i] = cm_forward(xs[i], m, params['cm'][i])

    lx3_in = conv_bn_act(ne_forward(xs[3], params['ne']), params['l_c3'], stride=2)

    bx0 = upsample2(conv_bn_act(xs[0], params['b1_cbr1']))
    bx1_in = conv_bn_act(_cat_bf16([bx0, xs[1]]), params['b1_cbr2'])

    bx1 = upsample2(conv_bn_act(xs[1], params['b2_cbr1']))
    bx2_in = conv_bn_act(_cat_bf16([bx1, xs[2]]), params['b2_cbr2'])

    x2_out = conv_bn_act(_cat_bf16([lx3_in, bx2_in, xs[2]]), params['l_cbr2'])
    lx2_in = conv_bn_act(x2_out, params['l_c2'], stride=2)
    x1_out = conv_bn_act(_cat_bf16([lx2_in, bx1_in, xs[1]]), params['l_cbr1'])
    lx1_in = conv_bn_act(x1_out, params['l_c1'], stride=2)
    x0_out = conv_bn_act(_cat_bf16([lx1_in, xs[0]]), params['l_cbr0'])
    return x0_out, x1_out, x2_out


# ----------------------------------------------------------------------------
# Deterministic parameter init (BatchNorm in eval mode, folded into conv)
# ----------------------------------------------------------------------------
def _init_conv_bn(key, cin, cout, slope=0.0):
    kw, kg, kb = jax.random.split(key, 3)
    w = jax.random.normal(kw, (cout, cin, 3, 3), jnp.float32) / jnp.sqrt(
        jnp.float32(cin * 9))
    gamma = 1.0 + 0.1 * jax.random.normal(kg, (cout,), jnp.float32)
    beta = 0.1 * jax.random.normal(kb, (cout,), jnp.float32)
    mean = jnp.zeros((cout,), jnp.float32)
    var = jnp.ones((cout,), jnp.float32)
    scale = gamma / jnp.sqrt(var + 1e-5)
    bias = beta - mean * scale
    # Fold BN scale into the weights in f32, THEN cast to bf16.
    w_scaled = w * scale[:, None, None, None]
    # (Cout, Cin, kh, kw) -> (Cout, kh, kw, Cin) -> (Cout, 9*Cin):
    # K order (kh, kw, cin) must match _extract_taps.
    w_folded = jnp.transpose(w_scaled, (0, 2, 3, 1)).reshape(cout, 9 * cin)
    return dict(w=w_folded.astype(jnp.bfloat16),
                bias=bias.reshape(cout, 1),
                slope=float(slope))


def _init_senet(key, c):
    cr = max(c // 16, 1)
    k1, k2 = jax.random.split(key)
    w1 = jax.random.normal(k1, (cr, c), jnp.float32) / jnp.sqrt(jnp.float32(c))
    w2 = jax.random.normal(k2, (c, cr), jnp.float32) / jnp.sqrt(jnp.float32(cr))
    return dict(w1=w1, w2=w2)


def init_params(key, out_filters, ma_k=2, z_c=8):
    f1, f2, f3, f4 = (out_filters[-1], out_filters[-2],
                      out_filters[-3], out_filters[-4])
    keys = iter(jax.random.split(key, 64))
    params = {}

    cms = []
    for k_i in range(1, ma_k + 1):
        in_c = out_filters[-k_i]
        c = in_c + z_c
        cms.append(dict(se=_init_senet(next(keys), c),
                        cbr1=_init_conv_bn(next(keys), c, c),
                        cbr2=_init_conv_bn(next(keys), in_c, in_c),
                        in_c=in_c))
    params['cm'] = cms

    params['b1_cbr1'] = _init_conv_bn(next(keys), f1, f2)
    params['b1_cbr2'] = _init_conv_bn(next(keys), f2 * 2, f2)
    params['b2_cbr1'] = _init_conv_bn(next(keys), f2, f3)
    params['b2_cbr2'] = _init_conv_bn(next(keys), f3 * 2, f3)

    hidden = f4 // 2
    params['ne'] = dict(
        con1=_init_conv_bn(next(keys), f4, hidden, slope=0.1),
        cbrs=[_init_conv_bn(next(keys), hidden, hidden) for _ in range(3)],
        con2=_init_conv_bn(next(keys), hidden, f4, slope=0.1))

    params['l_c3'] = _init_conv_bn(next(keys), f4, f3)
    params['l_c2'] = _init_conv_bn(next(keys), f3, f2)
    params['l_c1'] = _init_conv_bn(next(keys), f2, f1)
    params['l_cbr2'] = _init_conv_bn(next(keys), f3 * 3, f3)
    params['l_cbr1'] = _init_conv_bn(next(keys), f2 * 3, f2)
    params['l_cbr0'] = _init_conv_bn(next(keys), f1 * 2, f1)
    return params


if __name__ == "__main__":
    key = jax.random.PRNGKey(0)
    kp, kx0, kx1, kx2, kx3, kz = jax.random.split(key, 6)

    out_filters = (8, 16, 32, 64)   # (-4, -3, -2, -1): small yolov5-style pyramid
    B = 2
    params = init_params(kp, out_filters)

    # x[0] deepest/smallest ... x[3] shallowest/largest; z at 4x the x[0] stride.
    xs = [
        jax.random.normal(kx0, (B, out_filters[-1], 4, 4), jnp.float32),
        jax.random.normal(kx1, (B, out_filters[-2], 8, 8), jnp.float32),
        jax.random.normal(kx2, (B, out_filters[-3], 16, 16), jnp.float32),
        jax.random.normal(kx3, (B, out_filters[-4], 32, 32), jnp.float32),
    ]
    z = jax.random.normal(kz, (B, 8, 16, 16), jnp.float32)

    fwd = jax.jit(lambda xs_, z_: zpg_ma_be_forward(xs_, z_, params))
    x0_out, x1_out, x2_out = jax.block_until_ready(fwd(xs, z))

    assert x0_out.shape == (B, out_filters[-1], 4, 4), x0_out.shape
    assert x1_out.shape == (B, out_filters[-2], 8, 8), x1_out.shape
    assert x2_out.shape == (B, out_filters[-3], 16, 16), x2_out.shape
    for o in (x0_out, x1_out, x2_out):
        assert bool(jnp.all(jnp.isfinite(o)))
    print("KERNEL_OK")
</pallas_src>

<mosaic_0001>
module attributes {stable_mosaic.version = 11 : i64} {
  func.func @_se_apply_kernel(%arg0: i32, %arg1: i32, %arg2: memref<1x72x128xbf16, #tpu.memory_space<vmem>>, %arg3: memref<1x72x1xf32, #tpu.memory_space<vmem>>, %arg4: memref<1x72x128xbf16, #tpu.memory_space<vmem>>) attributes {dimension_semantics = [#tpu.dimension_semantics<parallel>, #tpu.dimension_semantics<parallel>], iteration_bounds = array<i64: 2, 1>, scalar_prefetch = 0 : i64, scratch_operands = 0 : i64, tpu.core_type = #tpu.core_type<tc>, window_params = [{transform_indices = @transform_0, window_bounds = array<i64: 1, 72, 128>}, {transform_indices = @transform_1, window_bounds = array<i64: 1, 72, 1>}, {transform_indices = @transform_2, window_bounds = array<i64: 1, 72, 128>}]} {
    %c0 = arith.constant 0 : index
    %c0_0 = arith.constant 0 : index
    %c0_1 = arith.constant 0 : index
    %0 = vector.load %arg2[%c0, %c0_0, %c0_1] : memref<1x72x128xbf16, #tpu.memory_space<vmem>>, vector<1x72x128xbf16>
    %1 = vector.shape_cast %0 : vector<1x72x128xbf16> to vector<72x128xbf16>
    %2 = arith.extf %1 : vector<72x128xbf16> to vector<72x128xf32>
    %c0_2 = arith.constant 0 : index
    %c0_3 = arith.constant 0 : index
    %c0_4 = arith.constant 0 : index
    %3 = vector.load %arg3[%c0_2, %c0_3, %c0_4] : memref<1x72x1xf32, #tpu.memory_space<vmem>>, vector<1x72x1xf32>
    %4 = vector.shape_cast %3 : vector<1x72x1xf32> to vector<72x1xf32>
    %5 = vector.broadcast %4 : vector<72x1xf32> to vector<72x128xf32>
    %6 = arith.mulf %2, %5 : vector<72x128xf32>
    %cst = arith.constant 0.000000e+00 : f32
    %7 = vector.broadcast %cst : f32 to vector<72x128xf32>
    %8 = arith.subf %7, %6 : vector<72x128xf32>
    %9 = math.exp %8 : vector<72x128xf32>
    %cst_5 = arith.constant 1.000000e+00 : f32
    %10 = vector.broadcast %cst_5 : f32 to vector<72x128xf32>
    %11 = arith.addf %10, %9 : vector<72x128xf32>
    %12 = tpu.reciprocal %11 {approx = true} : vector<72x128xf32> -> vector<72x128xf32>
    %13 = arith.truncf %12 : vector<72x128xf32> to vector<72x128xbf16>
    %c0_6 = arith.constant 0 : index
    %c0_7 = arith.constant 0 : index
    %c0_8 = arith.constant 0 : index
    %14 = vector.load %arg4[%c0_6, %c0_7, %c0_8] : memref<1x72x128xbf16, #tpu.memory_space<vmem>>, vector<1x72x128xbf16>
    %15 = vector.shape_cast %14 : vector<1x72x128xbf16> to vector<72x128xbf16>
    %16 = vector.shape_cast %13 : vector<72x128xbf16> to vector<1x72x128xbf16>
    tpu.vector_store %arg4[%c0_6, %c0_7, %c0_8], %16 {strides = array<i32>} : memref<1x72x128xbf16, #tpu.memory_space<vmem>>, vector<1x72x128xbf16>,
    return
  }
  func.func @transform_0(%arg0: i32, %arg1: i32) -> (i32, i32, i32) {
    %c0_i32 = arith.constant 0 : i32
    %c0_i32_0 = arith.constant 0 : i32
    return %arg0, %c0_i32, %arg1 : i32, i32, i32
  }
  func.func @transform_1(%arg0: i32, %arg1: i32) -> (i32, i32, i32) {
    %c0_i32 = arith.constant 0 : i32
    %c0_i32_0 = arith.constant 0 : i32
    %c0_i32_1 = arith.constant 0 : i32
    return %arg0, %c0_i32, %c0_i32_0 : i32, i32, i32
  }
  func.func @transform_2(%arg0: i32, %arg1: i32) -> (i32, i32, i32) {
    %c0_i32 = arith.constant 0 : i32
    %c0_i32_0 = arith.constant 0 : i32
    return %arg0, %c0_i32, %arg1 : i32, i32, i32
  }
}

module attributes {stable_mosaic.version = 11 : i64} {
  func.func @_conv_bn_act_kernel(%arg0: i32, %arg1: memref<648x256xbf16, #tpu.memory_space<vmem>>, %arg2: memref<72x648xbf16, #tpu.memory_space<vmem>>, %arg3: memref<72x1xf32, #tpu.memory_space<vmem>>, %arg4: memref<72x256xbf16, #tpu.memory_space<vmem>>) attributes {dimension_semantics = [#tpu.dimension_semantics<parallel>], iteration_bounds = array<i64: 1>, scalar_prefetch = 0 : i64, scratch_operands = 0 : i64, tpu.core_type = #tpu.core_type<tc>, window_params = [{transform_indices = @transform_0, window_bounds = array<i64: 648, 256>}, {pipeline_mode = #tpu.pipeline_mode<synchronous>, transform_indices = @transform_1, window_bounds = array<i64: 72, 648>}, {pipeline_mode = #tpu.pipeline_mode<synchronous>, transform_indices = @transform_2, window_bounds = array<i64: 72, 1>}, {transform_indices = @transform_3, window_bounds = array<i64: 72, 256>}]} {
    %c0 = arith.constant 0 : index
    %c0_0 = arith.constant 0 : index
    %0 = vector.load %arg2[%c0, %c0_0] : memref<72x648xbf16, #tpu.memory_space<vmem>>, vector<72x648xbf16>
    %c0_1 = arith.constant 0 : index
    %c0_2 = arith.constant 0 : index
    %1 = vector.load %arg1[%c0_1, %c0_2] : memref<648x256xbf16, #tpu.memory_space<vmem>>, vector<648x256xbf16>
    %cst = arith.constant dense<0.000000e+00> : vector<72x256xf32>
    %2 = tpu.matmul %0, %1, %cst {dimension_numbers = #tpu.dot_dimension_numbers<[1], [0], [0], [1], [0, 0, 1, 1], [], []>} : vector<72x648xbf16>, vector<648x256xbf16>, vector<72x256xf32> -> vector<72x256xf32>
    %c0_3 = arith.constant 0 : index
    %c0_4 = arith.constant 0 : index
    %3 = vector.load %arg3[%c0_3, %c0_4] : memref<72x1xf32, #tpu.memory_space<vmem>>, vector<72x1xf32>
    %4 = vector.broadcast %3 : vector<72x1xf32> to vector<72x256xf32>
    %5 = arith.addf %2, %4 : vector<72x256xf32>
    %cst_5 = arith.constant 0.000000e+00 : f32
    %6 = vector.broadcast %cst_5 : f32 to vector<72x256xf32>
    %7 = arith.maximumf %5, %6 : vector<72x256xf32>
    %8 = arith.truncf %7 : vector<72x256xf32> to vector<72x256xbf16>
    %c0_6 = arith.constant 0 : index
    %c0_7 = arith.constant 0 : index
    %9 = vector.load %arg4[%c0_6, %c0_7] : memref<72x256xbf16, #tpu.memory_space<vmem>>, vector<72x256xbf16>
    tpu.vector_store %arg4[%c0_6, %c0_7], %8 {strides = array<i32>} : memref<72x256xbf16, #tpu.memory_space<vmem>>, vector<72x256xbf16>,
    return
  }
  func.func @transform_0(%arg0: i32) -> (i32, i32) {
    %c0_i32 = arith.constant 0 : i32
    %c0_i32_0 = arith.constant 0 : i32
    return %c0_i32, %arg0 : i32, i32
  }
  func.func @transform_1(%arg0: i32) -> (i32, i32) {
    %c0_i32 = arith.constant 0 : i32
    %c0_i32_0 = arith.constant 0 : i32
    %c0_i32_1 = arith.constant 0 : i32
    return %c0_i32, %c0_i32_0 : i32, i32
  }
  func.func @transform_2(%arg0: i32) -> (i32, i32) {
    %c0_i32 = arith.constant 0 : i32
    %c0_i32_0 = arith.constant 0 : i32
    %c0_i32_1 = arith.constant 0 : i32
    return %c0_i32, %c0_i32_0 : i32, i32
  }
  func.func @transform_3(%arg0: i32) -> (i32, i32) {
    %c0_i32 = arith.constant 0 : i32
    %c0_i32_0 = arith.constant 0 : i32
    return %c0_i32, %arg0 : i32, i32
  }
}

module attributes {stable_mosaic.version = 11 : i64} {
  func.func @_se_apply_kernel(%arg0: i32, %arg1: i32, %arg2: memref<1x40x128xbf16, #tpu.memory_space<vmem>>, %arg3: memref<1x40x1xf32, #tpu.memory_space<vmem>>, %arg4: memref<1x40x128xbf16, #tpu.memory_space<vmem>>) attributes {dimension_semantics = [#tpu.dimension_semantics<parallel>, #tpu.dimension_semantics<parallel>], iteration_bounds = array<i64: 2, 1>, scalar_prefetch = 0 : i64, scratch_operands = 0 : i64, tpu.core_type = #tpu.core_type<tc>, window_params = [{transform_indices = @transform_0, window_bounds = array<i64: 1, 40, 128>}, {transform_indices = @transform_1, window_bounds = array<i64: 1, 40, 1>}, {transform_indices = @transform_2, window_bounds = array<i64: 1, 40, 128>}]} {
    %c0 = arith.constant 0 : index
    %c0_0 = arith.constant 0 : index
    %c0_1 = arith.constant 0 : index
    %0 = vector.load %arg2[%c0, %c0_0, %c0_1] : memref<1x40x128xbf16, #tpu.memory_space<vmem>>, vector<1x40x128xbf16>
    %1 = vector.shape_cast %0 : vector<1x40x128xbf16> to vector<40x128xbf16>
    %2 = arith.extf %1 : vector<40x128xbf16> to vector<40x128xf32>
    %c0_2 = arith.constant 0 : index
    %c0_3 = arith.constant 0 : index
    %c0_4 = arith.constant 0 : index
    %3 = vector.load %arg3[%c0_2, %c0_3, %c0_4] : memref<1x40x1xf32, #tpu.memory_space<vmem>>, vector<1x40x1xf32>
    %4 = vector.shape_cast %3 : vector<1x40x1xf32> to vector<40x1xf32>
    %5 = vector.broadcast %4 : vector<40x1xf32> to vector<40x128xf32>
    %6 = arith.mulf %2, %5 : vector<40x128xf32>
    %cst = arith.constant 0.000000e+00 : f32
    %7 = vector.broadcast %cst : f32 to vector<40x128xf32>
    %8 = arith.subf %7, %6 : vector<40x128xf32>
    %9 = math.exp %8 : vector<40x128xf32>
    %cst_5 = arith.constant 1.000000e+00 : f32
    %10 = vector.broadcast %cst_5 : f32 to vector<40x128xf32>
    %11 = arith.addf %10, %9 : vector<40x128xf32>
    %12 = tpu.reciprocal %11 {approx = true} : vector<40x128xf32> -> vector<40x128xf32>
    %13 = arith.truncf %12 : vector<40x128xf32> to vector<40x128xbf16>
    %c0_6 = arith.constant 0 : index
    %c0_7 = arith.constant 0 : index
    %c0_8 = arith.constant 0 : index
    %14 = vector.load %arg4[%c0_6, %c0_7, %c0_8] : memref<1x40x128xbf16, #tpu.memory_space<vmem>>, vector<1x40x128xbf16>
    %15 = vector.shape_cast %14 : vector<1x40x128xbf16> to vector<40x128xbf16>
    %16 = vector.shape_cast %13 : vector<40x128xbf16> to vector<1x40x128xbf16>
    tpu.vector_store %arg4[%c0_6, %c0_7, %c0_8], %16 {strides = array<i32>} : memref<1x40x128xbf16, #tpu.memory_space<vmem>>, vector<1x40x128xbf16>,
    return
  }
  func.func @transform_0(%arg0: i32, %arg1: i32) -> (i32, i32, i32) {
    %c0_i32 = arith.constant 0 : i32
    %c0_i32_0 = arith.constant 0 : i32
    return %arg0, %c0_i32, %arg1 : i32, i32, i32
  }
  func.func @transform_1(%arg0: i32, %arg1: i32) -> (i32, i32, i32) {
    %c0_i32 = arith.constant 0 : i32
    %c0_i32_0 = arith.constant 0 : i32
    %c0_i32_1 = arith.constant 0 : i32
    return %arg0, %c0_i32, %c0_i32_0 : i32, i32, i32
  }
  func.func @transform_2(%arg0: i32, %arg1: i32) -> (i32, i32, i32) {
    %c0_i32 = arith.constant 0 : i32
    %c0_i32_0 = arith.constant 0 : i32
    return %arg0, %c0_i32, %arg1 : i32, i32, i32
  }
}

module attributes {stable_mosaic.version = 11 : i64} {
  func.func @_conv_bn_act_kernel(%arg0: i32, %arg1: memref<576x256xbf16, #tpu.memory_space<vmem>>, %arg2: memref<32x576xbf16, #tpu.memory_space<vmem>>, %arg3: memref<32x1xf32, #tpu.memory_space<vmem>>, %arg4: memref<32x256xbf16, #tpu.memory_space<vmem>>) attributes {dimension_semantics = [#tpu.dimension_semantics<parallel>], iteration_bounds = array<i64: 1>, scalar_prefetch = 0 : i64, scratch_operands = 0 : i64, tpu.core_type = #tpu.core_type<tc>, window_params = [{transform_indices = @transform_0, window_bounds = array<i64: 576, 256>}, {pipeline_mode = #tpu.pipeline_mode<synchronous>, transform_indices = @transform_1, window_bounds = array<i64: 32, 576>}, {pipeline_mode = #tpu.pipeline_mode<synchronous>, transform_indices = @transform_2, window_bounds = array<i64: 32, 1>}, {transform_indices = @transform_3, window_bounds = array<i64: 32, 256>}]} {
    %c0 = arith.constant 0 : index
    %c0_0 = arith.constant 0 : index
    %0 = vector.load %arg2[%c0, %c0_0] : memref<32x576xbf16, #tpu.memory_space<vmem>>, vector<32x576xbf16>
    %c0_1 = arith.constant 0 : index
    %c0_2 = arith.constant 0 : index
    %1 = vector.load %arg1[%c0_1, %c0_2] : memref<576x256xbf16, #tpu.memory_space<vmem>>, vector<576x256xbf16>
    %cst = arith.constant dense<0.000000e+00> : vector<32x256xf32>
    %2 = tpu.matmul %0, %1, %cst {dimension_numbers = #tpu.dot_dimension_numbers<[1], [0], [0], [1], [0, 0, 1, 1], [], []>} : vector<32x576xbf16>, vector<576x256xbf16>, vector<32x256xf32> -> vector<32x256xf32>
    %c0_3 = arith.constant 0 : index
    %c0_4 = arith.constant 0 : index
    %3 = vector.load %arg3[%c0_3, %c0_4] : memref<32x1xf32, #tpu.memory_space<vmem>>, vector<32x1xf32>
    %4 = vector.broadcast %3 : vector<32x1xf32> to vector<32x256xf32>
    %5 = arith.addf %2, %4 : vector<32x256xf32>
    %cst_5 = arith.constant 0.000000e+00 : f32
    %6 = vector.broadcast %cst_5 : f32 to vector<32x256xf32>
    %7 = arith.maximumf %5, %6 : vector<32x256xf32>
    %8 = arith.truncf %7 : vector<32x256xf32> to vector<32x256xbf16>
    %c0_6 = arith.constant 0 : index
    %c0_7 = arith.constant 0 : index
    %9 = vector.load %arg4[%c0_6, %c0_7] : memref<32x256xbf16, #tpu.memory_space<vmem>>, vector<32x256xbf16>
    tpu.vector_store %arg4[%c0_6, %c0_7], %8 {strides = array<i32>} : memref<32x256xbf16, #tpu.memory_space<vmem>>, vector<32x256xbf16>,
    return
  }
  func.func @transform_0(%arg0: i32) -> (i32, i32) {
    %c0_i32 = arith.constant 0 : i32
    %c0_i32_0 = arith.constant 0 : i32
    return %c0_i32, %arg0 : i32, i32
  }
  func.func @transform_1(%arg0: i32) -> (i32, i32) {
    %c0_i32 = arith.constant 0 : i32
    %c0_i32_0 = arith.constant 0 : i32
    %c0_i32_1 = arith.constant 0 : i32
    return %c0_i32, %c0_i32_0 : i32, i32
  }
  func.func @transform_2(%arg0: i32) -> (i32, i32) {
    %c0_i32 = arith.constant 0 : i32
    %c0_i32_0 = arith.constant 0 : i32
    %c0_i32_1 = arith.constant 0 : i32
    return %c0_i32, %c0_i32_0 : i32, i32
  }
  func.func @transform_3(%arg0: i32) -> (i32, i32) {
    %c0_i32 = arith.constant 0 : i32
    %c0_i32_0 = arith.constant 0 : i32
    return %c0_i32, %arg0 : i32, i32
  }
}

module attributes {stable_mosaic.version = 11 : i64} {
  func.func @_conv_bn_act_kernel(%arg0: i32, %arg1: memref<576x256xbf16, #tpu.memory_space<vmem>>, %arg2: memref<64x576xbf16, #tpu.memory_space<vmem>>, %arg3: memref<64x1xf32, #tpu.memory_space<vmem>>, %arg4: memref<64x256xbf16, #tpu.memory_space<vmem>>) attributes {dimension_semantics = [#tpu.dimension_semantics<parallel>], iteration_bounds = array<i64: 1>, scalar_prefetch = 0 : i64, scratch_operands = 0 : i64, tpu.core_type = #tpu.core_type<tc>, window_params = [{transform_indices = @transform_0, window_bounds = array<i64: 576, 256>}, {pipeline_mode = #tpu.pipeline_mode<synchronous>, transform_indices = @transform_1, window_bounds = array<i64: 64, 576>}, {pipeline_mode = #tpu.pipeline_mode<synchronous>, transform_indices = @transform_2, window_bounds = array<i64: 64, 1>}, {transform_indices = @transform_3, window_bounds = array<i64: 64, 256>}]} {
    %c0 = arith.constant 0 : index
    %c0_0 = arith.constant 0 : index
    %0 = vector.load %arg2[%c0, %c0_0] : memref<64x576xbf16, #tpu.memory_space<vmem>>, vector<64x576xbf16>
    %c0_1 = arith.constant 0 : index
    %c0_2 = arith.constant 0 : index
    %1 = vector.load %arg1[%c0_1, %c0_2] : memref<576x256xbf16, #tpu.memory_space<vmem>>, vector<576x256xbf16>
    %cst = arith.constant dense<0.000000e+00> : vector<64x256xf32>
    %2 = tpu.matmul %0, %1, %cst {dimension_numbers = #tpu.dot_dimension_numbers<[1], [0], [0], [1], [0, 0, 1, 1], [], []>} : vector<64x576xbf16>, vector<576x256xbf16>, vector<64x256xf32> -> vector<64x256xf32>
    %c0_3 = arith.constant 0 : index
    %c0_4 = arith.constant 0 : index
    %3 = vector.load %arg3[%c0_3, %c0_4] : memref<64x1xf32, #tpu.memory_space<vmem>>, vector<64x1xf32>
    %4 = vector.broadcast %3 : vector<64x1xf32> to vector<64x256xf32>
    %5 = arith.addf %2, %4 : vector<64x256xf32>
    %cst_5 = arith.constant 0.000000e+00 : f32
    %6 = vector.broadcast %cst_5 : f32 to vector<64x256xf32>
    %7 = arith.maximumf %5, %6 : vector<64x256xf32>
    %8 = arith.truncf %7 : vector<64x256xf32> to vector<64x256xbf16>
    %c0_6 = arith.constant 0 : index
    %c0_7 = arith.constant 0 : index
    %9 = vector.load %arg4[%c0_6, %c0_7] : memref<64x256xbf16, #tpu.memory_space<vmem>>, vector<64x256xbf16>
    tpu.vector_store %arg4[%c0_6, %c0_7], %8 {strides = array<i32>} : memref<64x256xbf16, #tpu.memory_space<vmem>>, vector<64x256xbf16>,
    return
  }
  func.func @transform_0(%arg0: i32) -> (i32, i32) {
    %c0_i32 = arith.constant 0 : i32
    %c0_i32_0 = arith.constant 0 : i32
    return %c0_i32, %arg0 : i32, i32
  }
  func.func @transform_1(%arg0: i32) -> (i32, i32) {
    %c0_i32 = arith.constant 0 : i32
    %c0_i32_0 = arith.constant 0 : i32
    %c0_i32_1 = arith.constant 0 : i32
    return %c0_i32, %c0_i32_0 : i32, i32
  }
  func.func @transform_2(%arg0: i32) -> (i32, i32) {
    %c0_i32 = arith.constant 0 : i32
    %c0_i32_0 = arith.constant 0 : i32
    %c0_i32_1 = arith.constant 0 : i32
    return %c0_i32, %c0_i32_0 : i32, i32
  }
  func.func @transform_3(%arg0: i32) -> (i32, i32) {
    %c0_i32 = arith.constant 0 : i32
    %c0_i32_0 = arith.constant 0 : i32
    return %c0_i32, %arg0 : i32, i32
  }
}

module attributes {stable_mosaic.version = 11 : i64} {
  func.func @_conv_bn_act_kernel(%arg0: i32, %arg1: memref<360x256xbf16, #tpu.memory_space<vmem>>, %arg2: memref<40x360xbf16, #tpu.memory_space<vmem>>, %arg3: memref<40x1xf32, #tpu.memory_space<vmem>>, %arg4: memref<40x256xbf16, #tpu.memory_space<vmem>>) attributes {dimension_semantics = [#tpu.dimension_semantics<parallel>], iteration_bounds = array<i64: 1>, scalar_prefetch = 0 : i64, scratch_operands = 0 : i64, tpu.core_type = #tpu.core_type<tc>, window_params = [{transform_indices = @transform_0, window_bounds = array<i64: 360, 256>}, {pipeline_mode = #tpu.pipeline_mode<synchronous>, transform_indices = @transform_1, window_bounds = array<i64: 40, 360>}, {pipeline_mode = #tpu.pipeline_mode<synchronous>, transform_indices = @transform_2, window_bounds = array<i64: 40, 1>}, {transform_indices = @transform_3, window_bounds = array<i64: 40, 256>}]} {
    %c0 = arith.constant 0 : index
    %c0_0 = arith.constant 0 : index
    %0 = vector.load %arg2[%c0, %c0_0] : memref<40x360xbf16, #tpu.memory_space<vmem>>, vector<40x360xbf16>
    %c0_1 = arith.constant 0 : index
    %c0_2 = arith.constant 0 : index
    %1 = vector.load %arg1[%c0_1, %c0_2] : memref<360x256xbf16, #tpu.memory_space<vmem>>, vector<360x256xbf16>
    %cst = arith.constant dense<0.000000e+00> : vector<40x256xf32>
    %2 = tpu.matmul %0, %1, %cst {dimension_numbers = #tpu.dot_dimension_numbers<[1], [0], [0], [1], [0, 0, 1, 1], [], []>} : vector<40x360xbf16>, vector<360x256xbf16>, vector<40x256xf32> -> vector<40x256xf32>
    %c0_3 = arith.constant 0 : index
    %c0_4 = arith.constant 0 : index
    %3 = vector.load %arg3[%c0_3, %c0_4] : memref<40x1xf32, #tpu.memory_space<vmem>>, vector<40x1xf32>
    %4 = vector.broadcast %3 : vector<40x1xf32> to vector<40x256xf32>
    %5 = arith.addf %2, %4 : vector<40x256xf32>
    %cst_5 = arith.constant 0.000000e+00 : f32
    %6 = vector.broadcast %cst_5 : f32 to vector<40x256xf32>
    %7 = arith.maximumf %5, %6 : vector<40x256xf32>
    %8 = arith.truncf %7 : vector<40x256xf32> to vector<40x256xbf16>
    %c0_6 = arith.constant 0 : index
    %c0_7 = arith.constant 0 : index
    %9 = vector.load %arg4[%c0_6, %c0_7] : memref<40x256xbf16, #tpu.memory_space<vmem>>, vector<40x256xbf16>
    tpu.vector_store %arg4[%c0_6, %c0_7], %8 {strides = array<i32>} : memref<40x256xbf16, #tpu.memory_space<vmem>>, vector<40x256xbf16>,
    return
  }
  func.func @transform_0(%arg0: i32) -> (i32, i32) {
    %c0_i32 = arith.constant 0 : i32
    %c0_i32_0 = arith.constant 0 : i32
    return %c0_i32, %arg0 : i32, i32
  }
  func.func @transform_1(%arg0: i32) -> (i32, i32) {
    %c0_i32 = arith.constant 0 : i32
    %c0_i32_0 = arith.constant 0 : i32
    %c0_i32_1 = arith.constant 0 : i32
    return %c0_i32, %c0_i32_0 : i32, i32
  }
  func.func @transform_2(%arg0: i32) -> (i32, i32) {
    %c0_i32 = arith.constant 0 : i32
    %c0_i32_0 = arith.constant 0 : i32
    %c0_i32_1 = arith.constant 0 : i32
    return %c0_i32, %c0_i32_0 : i32, i32
  }
  func.func @transform_3(%arg0: i32) -> (i32, i32) {
    %c0_i32 = arith.constant 0 : i32
    %c0_i32_0 = arith.constant 0 : i32
    return %c0_i32, %arg0 : i32, i32
  }
}

module attributes {stable_mosaic.version = 11 : i64} {
  func.func @_conv_bn_act_kernel(%arg0: i32, %arg1: memref<288x256xbf16, #tpu.memory_space<vmem>>, %arg2: memref<32x288xbf16, #tpu.memory_space<vmem>>, %arg3: memref<32x1xf32, #tpu.memory_space<vmem>>, %arg4: memref<32x256xbf16, #tpu.memory_space<vmem>>) attributes {dimension_semantics = [#tpu.dimension_semantics<parallel>], iteration_bounds = array<i64: 1>, scalar_prefetch = 0 : i64, scratch_operands = 0 : i64, tpu.core_type = #tpu.core_type<tc>, window_params = [{transform_indices = @transform_0, window_bounds = array<i64: 288, 256>}, {pipeline_mode = #tpu.pipeline_mode<synchronous>, transform_indices = @transform_1, window_bounds = array<i64: 32, 288>}, {pipeline_mode = #tpu.pipeline_mode<synchronous>, transform_indices = @transform_2, window_bounds = array<i64: 32, 1>}, {transform_indices = @transform_3, window_bounds = array<i64: 32, 256>}]} {
    %c0 = arith.constant 0 : index
    %c0_0 = arith.constant 0 : index
    %0 = vector.load %arg2[%c0, %c0_0] : memref<32x288xbf16, #tpu.memory_space<vmem>>, vector<32x288xbf16>
    %c0_1 = arith.constant 0 : index
    %c0_2 = arith.constant 0 : index
    %1 = vector.load %arg1[%c0_1, %c0_2] : memref<288x256xbf16, #tpu.memory_space<vmem>>, vector<288x256xbf16>
    %cst = arith.constant dense<0.000000e+00> : vector<32x256xf32>
    %2 = tpu.matmul %0, %1, %cst {dimension_numbers = #tpu.dot_dimension_numbers<[1], [0], [0], [1], [0, 0, 1, 1], [], []>} : vector<32x288xbf16>, vector<288x256xbf16>, vector<32x256xf32> -> vector<32x256xf32>
    %c0_3 = arith.constant 0 : index
    %c0_4 = arith.constant 0 : index
    %3 = vector.load %arg3[%c0_3, %c0_4] : memref<32x1xf32, #tpu.memory_space<vmem>>, vector<32x1xf32>
    %4 = vector.broadcast %3 : vector<32x1xf32> to vector<32x256xf32>
    %5 = arith.addf %2, %4 : vector<32x256xf32>
    %cst_5 = arith.constant 0.000000e+00 : f32
    %6 = vector.broadcast %cst_5 : f32 to vector<32x256xf32>
    %7 = arith.maximumf %5, %6 : vector<32x256xf32>
    %8 = arith.truncf %7 : vector<32x256xf32> to vector<32x256xbf16>
    %c0_6 = arith.constant 0 : index
    %c0_7 = arith.constant 0 : index
    %9 = vector.load %arg4[%c0_6, %c0_7] : memref<32x256xbf16, #tpu.memory_space<vmem>>, vector<32x256xbf16>
    tpu.vector_store %arg4[%c0_6, %c0_7], %8 {strides = array<i32>} : memref<32x256xbf16, #tpu.memory_space<vmem>>, vector<32x256xbf16>,
    return
  }
  func.func @transform_0(%arg0: i32) -> (i32, i32) {
    %c0_i32 = arith.constant 0 : i32
    %c0_i32_0 = arith.constant 0 : i32
    return %c0_i32, %arg0 : i32, i32
  }
  func.func @transform_1(%arg0: i32) -> (i32, i32) {
    %c0_i32 = arith.constant 0 : i32
    %c0_i32_0 = arith.constant 0 : i32
    %c0_i32_1 = arith.constant 0 : i32
    return %c0_i32, %c0_i32_0 : i32, i32
  }
  func.func @transform_2(%arg0: i32) -> (i32, i32) {
    %c0_i32 = arith.constant 0 : i32
    %c0_i32_0 = arith.constant 0 : i32
    %c0_i32_1 = arith.constant 0 : i32
    return %c0_i32, %c0_i32_0 : i32, i32
  }
  func.func @transform_3(%arg0: i32) -> (i32, i32) {
    %c0_i32 = arith.constant 0 : i32
    %c0_i32_0 = arith.constant 0 : i32
    return %c0_i32, %arg0 : i32, i32
  }
}

module attributes {stable_mosaic.version = 11 : i64} {
  func.func @_conv_bn_act_kernel(%arg0: i32, %arg1: memref<288x256xbf16, #tpu.memory_space<vmem>>, %arg2: memref<16x288xbf16, #tpu.memory_space<vmem>>, %arg3: memref<16x1xf32, #tpu.memory_space<vmem>>, %arg4: memref<16x256xbf16, #tpu.memory_space<vmem>>) attributes {dimension_semantics = [#tpu.dimension_semantics<parallel>], iteration_bounds = array<i64: 1>, scalar_prefetch = 0 : i64, scratch_operands = 0 : i64, tpu.core_type = #tpu.core_type<tc>, window_params = [{transform_indices = @transform_0, window_bounds = array<i64: 288, 256>}, {pipeline_mode = #tpu.pipeline_mode<synchronous>, transform_indices = @transform_1, window_bounds = array<i64: 16, 288>}, {pipeline_mode = #tpu.pipeline_mode<synchronous>, transform_indices = @transform_2, window_bounds = array<i64: 16, 1>}, {transform_indices = @transform_3, window_bounds = array<i64: 16, 256>}]} {
    %c0 = arith.constant 0 : index
    %c0_0 = arith.constant 0 : index
    %0 = vector.load %arg2[%c0, %c0_0] : memref<16x288xbf16, #tpu.memory_space<vmem>>, vector<16x288xbf16>
    %c0_1 = arith.constant 0 : index
    %c0_2 = arith.constant 0 : index
    %1 = vector.load %arg1[%c0_1, %c0_2] : memref<288x256xbf16, #tpu.memory_space<vmem>>, vector<288x256xbf16>
    %cst = arith.constant dense<0.000000e+00> : vector<16x256xf32>
    %2 = tpu.matmul %0, %1, %cst {dimension_numbers = #tpu.dot_dimension_numbers<[1], [0], [0], [1], [0, 0, 1, 1], [], []>} : vector<16x288xbf16>, vector<288x256xbf16>, vector<16x256xf32> -> vector<16x256xf32>
    %c0_3 = arith.constant 0 : index
    %c0_4 = arith.constant 0 : index
    %3 = vector.load %arg3[%c0_3, %c0_4] : memref<16x1xf32, #tpu.memory_space<vmem>>, vector<16x1xf32>
    %4 = vector.broadcast %3 : vector<16x1xf32> to vector<16x256xf32>
    %5 = arith.addf %2, %4 : vector<16x256xf32>
    %cst_5 = arith.constant 0.000000e+00 : f32
    %6 = vector.broadcast %cst_5 : f32 to vector<16x256xf32>
    %7 = arith.maximumf %5, %6 : vector<16x256xf32>
    %8 = arith.truncf %7 : vector<16x256xf32> to vector<16x256xbf16>
    %c0_6 = arith.constant 0 : index
    %c0_7 = arith.constant 0 : index
    %9 = vector.load %arg4[%c0_6, %c0_7] : memref<16x256xbf16, #tpu.memory_space<vmem>>, vector<16x256xbf16>
    tpu.vector_store %arg4[%c0_6, %c0_7], %8 {strides = array<i32>} : memref<16x256xbf16, #tpu.memory_space<vmem>>, vector<16x256xbf16>,
    return
  }
  func.func @transform_0(%arg0: i32) -> (i32, i32) {
    %c0_i32 = arith.constant 0 : i32
    %c0_i32_0 = arith.constant 0 : i32
    return %c0_i32, %arg0 : i32, i32
  }
  func.func @transform_1(%arg0: i32) -> (i32, i32) {
    %c0_i32 = arith.constant 0 : i32
    %c0_i32_0 = arith.constant 0 : i32
    %c0_i32_1 = arith.constant 0 : i32
    return %c0_i32, %c0_i32_0 : i32, i32
  }
  func.func @transform_2(%arg0: i32) -> (i32, i32) {
    %c0_i32 = arith.constant 0 : i32
    %c0_i32_0 = arith.constant 0 : i32
    %c0_i32_1 = arith.constant 0 : i32
    return %c0_i32, %c0_i32_0 : i32, i32
  }
  func.func @transform_3(%arg0: i32) -> (i32, i32) {
    %c0_i32 = arith.constant 0 : i32
    %c0_i32_0 = arith.constant 0 : i32
    return %c0_i32, %arg0 : i32, i32
  }
}

module attributes {stable_mosaic.version = 11 : i64} {
  func.func @_conv_bn_act_kernel(%arg0: i32, %arg1: memref<72x1024xbf16, #tpu.memory_space<vmem>>, %arg2: memref<4x72xbf16, #tpu.memory_space<vmem>>, %arg3: memref<4x1xf32, #tpu.memory_space<vmem>>, %arg4: memref<4x1024xbf16, #tpu.memory_space<vmem>>) attributes {dimension_semantics = [#tpu.dimension_semantics<parallel>], iteration_bounds = array<i64: 2>, scalar_prefetch = 0 : i64, scratch_operands = 0 : i64, tpu.core_type = #tpu.core_type<tc>, window_params = [{transform_indices = @transform_0, window_bounds = array<i64: 72, 1024>}, {pipeline_mode = #tpu.pipeline_mode<synchronous>, transform_indices = @transform_1, window_bounds = array<i64: 4, 72>}, {pipeline_mode = #tpu.pipeline_mode<synchronous>, transform_indices = @transform_2, window_bounds = array<i64: 4, 1>}, {transform_indices = @transform_3, window_bounds = array<i64: 4, 1024>}]} {
    %c0 = arith.constant 0 : index
    %c0_0 = arith.constant 0 : index
    %0 = vector.load %arg2[%c0, %c0_0] : memref<4x72xbf16, #tpu.memory_space<vmem>>, vector<4x72xbf16>
    %c0_1 = arith.constant 0 : index
    %c0_2 = arith.constant 0 : index
    %1 = vector.load %arg1[%c0_1, %c0_2] : memref<72x1024xbf16, #tpu.memory_space<vmem>>, vector<72x1024xbf16>
    %cst = arith.constant dense<0.000000e+00> : vector<4x1024xf32>
    %2 = tpu.matmul %0, %1, %cst {dimension_numbers = #tpu.dot_dimension_numbers<[1], [0], [0], [1], [0, 0, 1, 1], [], []>} : vector<4x72xbf16>, vector<72x1024xbf16>, vector<4x1024xf32> -> vector<4x1024xf32>
    %c0_3 = arith.constant 0 : index
    %c0_4 = arith.constant 0 : index
    %3 = vector.load %arg3[%c0_3, %c0_4] : memref<4x1xf32, #tpu.memory_space<vmem>>, vector<4x1xf32>
    %4 = vector.broadcast %3 : vector<4x1xf32> to vector<4x1024xf32>
    %5 = arith.addf %2, %4 : vector<4x1024xf32>
    %cst_5 = arith.constant 1.000000e-01 : f32
    %6 = vector.broadcast %cst_5 : f32 to vector<4x1024xf32>
    %7 = arith.mulf %5, %6 : vector<4x1024xf32>
    %8 = arith.maximumf %5, %7 : vector<4x1024xf32>
    %9 = arith.truncf %8 : vector<4x1024xf32> to vector<4x1024xbf16>
    %c0_6 = arith.constant 0 : index
    %c0_7 = arith.constant 0 : index
    %10 = vector.load %arg4[%c0_6, %c0_7] : memref<4x1024xbf16, #tpu.memory_space<vmem>>, vector<4x1024xbf16>
    tpu.vector_store %arg4[%c0_6, %c0_7], %9 {strides = array<i32>} : memref<4x1024xbf16, #tpu.memory_space<vmem>>, vector<4x1024xbf16>,
    return
  }
  func.func @transform_0(%arg0: i32) -> (i32, i32) {
    %c0_i32 = arith.constant 0 : i32
    %c0_i32_0 = arith.constant 0 : i32
    return %c0_i32, %arg0 : i32, i32
  }
  func.func @transform_1(%arg0: i32) -> (i32, i32) {
    %c0_i32 = arith.constant 0 : i32
    %c0_i32_0 = arith.constant 0 : i32
    %c0_i32_1 = arith.constant 0 : i32
    return %c0_i32, %c0_i32_0 : i32, i32
  }
  func.func @transform_2(%arg0: i32) -> (i32, i32) {
    %c0_i32 = arith.constant 0 : i32
    %c0_i32_0 = arith.constant 0 : i32
    %c0_i32_1 = arith.constant 0 : i32
    return %c0_i32, %c0_i32_0 : i32, i32
  }
  func.func @transform_3(%arg0: i32) -> (i32, i32) {
    %c0_i32 = arith.constant 0 : i32
    %c0_i32_0 = arith.constant 0 : i32
    return %c0_i32, %arg0 : i32, i32
  }
}

module attributes {stable_mosaic.version = 11 : i64} {
  func.func @_conv_bn_act_kernel(%arg0: i32, %arg1: memref<36x1024xbf16, #tpu.memory_space<vmem>>, %arg2: memref<4x36xbf16, #tpu.memory_space<vmem>>, %arg3: memref<4x1xf32, #tpu.memory_space<vmem>>, %arg4: memref<4x1024xbf16, #tpu.memory_space<vmem>>) attributes {dimension_semantics = [#tpu.dimension_semantics<parallel>], iteration_bounds = array<i64: 2>, scalar_prefetch = 0 : i64, scratch_operands = 0 : i64, tpu.core_type = #tpu.core_type<tc>, window_params = [{transform_indices = @transform_0, window_bounds = array<i64: 36, 1024>}, {pipeline_mode = #tpu.pipeline_mode<synchronous>, transform_indices = @transform_1, window_bounds = array<i64: 4, 36>}, {pipeline_mode = #tpu.pipeline_mode<synchronous>, transform_indices = @transform_2, window_bounds = array<i64: 4, 1>}, {transform_indices = @transform_3, window_bounds = array<i64: 4, 1024>}]} {
    %c0 = arith.constant 0 : index
    %c0_0 = arith.constant 0 : index
    %0 = vector.load %arg2[%c0, %c0_0] : memref<4x36xbf16, #tpu.memory_space<vmem>>, vector<4x36xbf16>
    %c0_1 = arith.constant 0 : index
    %c0_2 = arith.constant 0 : index
    %1 = vector.load %arg1[%c0_1, %c0_2] : memref<36x1024xbf16, #tpu.memory_space<vmem>>, vector<36x1024xbf16>
    %cst = arith.constant dense<0.000000e+00> : vector<4x1024xf32>
    %2 = tpu.matmul %0, %1, %cst {dimension_numbers = #tpu.dot_dimension_numbers<[1], [0], [0], [1], [0, 0, 1, 1], [], []>} : vector<4x36xbf16>, vector<36x1024xbf16>, vector<4x1024xf32> -> vector<4x1024xf32>
    %c0_3 = arith.constant 0 : index
    %c0_4 = arith.constant 0 : index
    %3 = vector.load %arg3[%c0_3, %c0_4] : memref<4x1xf32, #tpu.memory_space<vmem>>, vector<4x1xf32>
    %4 = vector.broadcast %3 : vector<4x1xf32> to vector<4x1024xf32>
    %5 = arith.addf %2, %4 : vector<4x1024xf32>
    %cst_5 = arith.constant 0.000000e+00 : f32
    %6 = vector.broadcast %cst_5 : f32 to vector<4x1024xf32>
    %7 = arith.maximumf %5, %6 : vector<4x1024xf32>
    %8 = arith.truncf %7 : vector<4x1024xf32> to vector<4x1024xbf16>
    %c0_6 = arith.constant 0 : index
    %c0_7 = arith.constant 0 : index
    %9 = vector.load %arg4[%c0_6, %c0_7] : memref<4x1024xbf16, #tpu.memory_space<vmem>>, vector<4x1024xbf16>
    tpu.vector_store %arg4[%c0_6, %c0_7], %8 {strides = array<i32>} : memref<4x1024xbf16, #tpu.memory_space<vmem>>, vector<4x1024xbf16>,
    return
  }
  func.func @transform_0(%arg0: i32) -> (i32, i32) {
    %c0_i32 = arith.constant 0 : i32
    %c0_i32_0 = arith.constant 0 : i32
    return %c0_i32, %arg0 : i32, i32
  }
  func.func @transform_1(%arg0: i32) -> (i32, i32) {
    %c0_i32 = arith.constant 0 : i32
    %c0_i32_0 = arith.constant 0 : i32
    %c0_i32_1 = arith.constant 0 : i32
    return %c0_i32, %c0_i32_0 : i32, i32
  }
  func.func @transform_2(%arg0: i32) -> (i32, i32) {
    %c0_i32 = arith.constant 0 : i32
    %c0_i32_0 = arith.constant 0 : i32
    %c0_i32_1 = arith.constant 0 : i32
    return %c0_i32, %c0_i32_0 : i32, i32
  }
  func.func @transform_3(%arg0: i32) -> (i32, i32) {
    %c0_i32 = arith.constant 0 : i32
    %c0_i32_0 = arith.constant 0 : i32
    return %c0_i32, %arg0 : i32, i32
  }
}

module attributes {stable_mosaic.version = 11 : i64} {
  func.func @_conv_bn_act_kernel(%arg0: i32, %arg1: memref<36x1024xbf16, #tpu.memory_space<vmem>>, %arg2: memref<8x36xbf16, #tpu.memory_space<vmem>>, %arg3: memref<8x1xf32, #tpu.memory_space<vmem>>, %arg4: memref<8x1024xbf16, #tpu.memory_space<vmem>>) attributes {dimension_semantics = [#tpu.dimension_semantics<parallel>], iteration_bounds = array<i64: 2>, scalar_prefetch = 0 : i64, scratch_operands = 0 : i64, tpu.core_type = #tpu.core_type<tc>, window_params = [{transform_indices = @transform_0, window_bounds = array<i64: 36, 1024>}, {pipeline_mode = #tpu.pipeline_mode<synchronous>, transform_indices = @transform_1, window_bounds = array<i64: 8, 36>}, {pipeline_mode = #tpu.pipeline_mode<synchronous>, transform_indices = @transform_2, window_bounds = array<i64: 8, 1>}, {transform_indices = @transform_3, window_bounds = array<i64: 8, 1024>}]} {
    %c0 = arith.constant 0 : index
    %c0_0 = arith.constant 0 : index
    %0 = vector.load %arg2[%c0, %c0_0] : memref<8x36xbf16, #tpu.memory_space<vmem>>, vector<8x36xbf16>
    %c0_1 = arith.constant 0 : index
    %c0_2 = arith.constant 0 : index
    %1 = vector.load %arg1[%c0_1, %c0_2] : memref<36x1024xbf16, #tpu.memory_space<vmem>>, vector<36x1024xbf16>
    %cst = arith.constant dense<0.000000e+00> : vector<8x1024xf32>
    %2 = tpu.matmul %0, %1, %cst {dimension_numbers = #tpu.dot_dimension_numbers<[1], [0], [0], [1], [0, 0, 1, 1], [], []>} : vector<8x36xbf16>, vector<36x1024xbf16>, vector<8x1024xf32> -> vector<8x1024xf32>
    %c0_3 = arith.constant 0 : index
    %c0_4 = arith.constant 0 : index
    %3 = vector.load %arg3[%c0_3, %c0_4] : memref<8x1xf32, #tpu.memory_space<vmem>>, vector<8x1xf32>
    %4 = vector.broadcast %3 : vector<8x1xf32> to vector<8x1024xf32>
    %5 = arith.addf %2, %4 : vector<8x1024xf32>
    %cst_5 = arith.constant 1.000000e-01 : f32
    %6 = vector.broadcast %cst_5 : f32 to vector<8x1024xf32>
    %7 = arith.mulf %5, %6 : vector<8x1024xf32>
    %8 = arith.maximumf %5, %7 : vector<8x1024xf32>
    %9 = arith.truncf %8 : vector<8x1024xf32> to vector<8x1024xbf16>
    %c0_6 = arith.constant 0 : index
    %c0_7 = arith.constant 0 : index
    %10 = vector.load %arg4[%c0_6, %c0_7] : memref<8x1024xbf16, #tpu.memory_space<vmem>>, vector<8x1024xbf16>
    tpu.vector_store %arg4[%c0_6, %c0_7], %9 {strides = array<i32>} : memref<8x1024xbf16, #tpu.memory_space<vmem>>, vector<8x1024xbf16>,
    return
  }
  func.func @transform_0(%arg0: i32) -> (i32, i32) {
    %c0_i32 = arith.constant 0 : i32
    %c0_i32_0 = arith.constant 0 : i32
    return %c0_i32, %arg0 : i32, i32
  }
  func.func @transform_1(%arg0: i32) -> (i32, i32) {
    %c0_i32 = arith.constant 0 : i32
    %c0_i32_0 = arith.constant 0 : i32
    %c0_i32_1 = arith.constant 0 : i32
    return %c0_i32, %c0_i32_0 : i32, i32
  }
  func.func @transform_2(%arg0: i32) -> (i32, i32) {
    %c0_i32 = arith.constant 0 : i32
    %c0_i32_0 = arith.constant 0 : i32
    %c0_i32_1 = arith.constant 0 : i32
    return %c0_i32, %c0_i32_0 : i32, i32
  }
  func.func @transform_3(%arg0: i32) -> (i32, i32) {
    %c0_i32 = arith.constant 0 : i32
    %c0_i32_0 = arith.constant 0 : i32
    return %c0_i32, %arg0 : i32, i32
  }
}

module attributes {stable_mosaic.version = 11 : i64} {
  func.func @_conv_bn_act_kernel(%arg0: i32, %arg1: memref<72x512xbf16, #tpu.memory_space<vmem>>, %arg2: memref<16x72xbf16, #tpu.memory_space<vmem>>, %arg3: memref<16x1xf32, #tpu.memory_space<vmem>>, %arg4: memref<16x512xbf16, #tpu.memory_space<vmem>>) attributes {dimension_semantics = [#tpu.dimension_semantics<parallel>], iteration_bounds = array<i64: 1>, scalar_prefetch = 0 : i64, scratch_operands = 0 : i64, tpu.core_type = #tpu.core_type<tc>, window_params = [{transform_indices = @transform_0, window_bounds = array<i64: 72, 512>}, {pipeline_mode = #tpu.pipeline_mode<synchronous>, transform_indices = @transform_1, window_bounds = array<i64: 16, 72>}, {pipeline_mode = #tpu.pipeline_mode<synchronous>, transform_indices = @transform_2, window_bounds = array<i64: 16, 1>}, {transform_indices = @transform_3, window_bounds = array<i64: 16, 512>}]} {
    %c0 = arith.constant 0 : index
    %c0_0 = arith.constant 0 : index
    %0 = vector.load %arg2[%c0, %c0_0] : memref<16x72xbf16, #tpu.memory_space<vmem>>, vector<16x72xbf16>
    %c0_1 = arith.constant 0 : index
    %c0_2 = arith.constant 0 : index
    %1 = vector.load %arg1[%c0_1, %c0_2] : memref<72x512xbf16, #tpu.memory_space<vmem>>, vector<72x512xbf16>
    %cst = arith.constant dense<0.000000e+00> : vector<16x512xf32>
    %2 = tpu.matmul %0, %1, %cst {dimension_numbers = #tpu.dot_dimension_numbers<[1], [0], [0], [1], [0, 0, 1, 1], [], []>} : vector<16x72xbf16>, vector<72x512xbf16>, vector<16x512xf32> -> vector<16x512xf32>
    %c0_3 = arith.constant 0 : index
    %c0_4 = arith.constant 0 : index
    %3 = vector.load %arg3[%c0_3, %c0_4] : memref<16x1xf32, #tpu.memory_space<vmem>>, vector<16x1xf32>
    %4 = vector.broadcast %3 : vector<16x1xf32> to vector<16x512xf32>
    %5 = arith.addf %2, %4 : vector<16x512xf32>
    %cst_5 = arith.constant 0.000000e+00 : f32
    %6 = vector.broadcast %cst_5 : f32 to vector<16x512xf32>
    %7 = arith.maximumf %5, %6 : vector<16x512xf32>
    %8 = arith.truncf %7 : vector<16x512xf32> to vector<16x512xbf16>
    %c0_6 = arith.constant 0 : index
    %c0_7 = arith.constant 0 : index
    %9 = vector.load %arg4[%c0_6, %c0_7] : memref<16x512xbf16, #tpu.memory_space<vmem>>, vector<16x512xbf16>
    tpu.vector_store %arg4[%c0_6, %c0_7], %8 {strides = array<i32>} : memref<16x512xbf16, #tpu.memory_space<vmem>>, vector<16x512xbf16>,
    return
  }
  func.func @transform_0(%arg0: i32) -> (i32, i32) {
    %c0_i32 = arith.constant 0 : i32
    %c0_i32_0 = arith.constant 0 : i32
    return %c0_i32, %arg0 : i32, i32
  }
  func.func @transform_1(%arg0: i32) -> (i32, i32) {
    %c0_i32 = arith.constant 0 : i32
    %c0_i32_0 = arith.constant 0 : i32
    %c0_i32_1 = arith.constant 0 : i32
    return %c0_i32, %c0_i32_0 : i32, i32
  }
  func.func @transform_2(%arg0: i32) -> (i32, i32) {
    %c0_i32 = arith.constant 0 : i32
    %c0_i32_0 = arith.constant 0 : i32
    %c0_i32_1 = arith.constant 0 : i32
    return %c0_i32, %c0_i32_0 : i32, i32
  }
  func.func @transform_3(%arg0: i32) -> (i32, i32) {
    %c0_i32 = arith.constant 0 : i32
    %c0_i32_0 = arith.constant 0 : i32
    return %c0_i32, %arg0 : i32, i32
  }
}

module attributes {stable_mosaic.version = 11 : i64} {
  func.func @_conv_bn_act_kernel(%arg0: i32, %arg1: memref<288x512xbf16, #tpu.memory_space<vmem>>, %arg2: memref<16x288xbf16, #tpu.memory_space<vmem>>, %arg3: memref<16x1xf32, #tpu.memory_space<vmem>>, %arg4: memref<16x512xbf16, #tpu.memory_space<vmem>>) attributes {dimension_semantics = [#tpu.dimension_semantics<parallel>], iteration_bounds = array<i64: 1>, scalar_prefetch = 0 : i64, scratch_operands = 0 : i64, tpu.core_type = #tpu.core_type<tc>, window_params = [{transform_indices = @transform_0, window_bounds = array<i64: 288, 512>}, {pipeline_mode = #tpu.pipeline_mode<synchronous>, transform_indices = @transform_1, window_bounds = array<i64: 16, 288>}, {pipeline_mode = #tpu.pipeline_mode<synchronous>, transform_indices = @transform_2, window_bounds = array<i64: 16, 1>}, {transform_indices = @transform_3, window_bounds = array<i64: 16, 512>}]} {
    %c0 = arith.constant 0 : index
    %c0_0 = arith.constant 0 : index
    %0 = vector.load %arg2[%c0, %c0_0] : memref<16x288xbf16, #tpu.memory_space<vmem>>, vector<16x288xbf16>
    %c0_1 = arith.constant 0 : index
    %c0_2 = arith.constant 0 : index
    %1 = vector.load %arg1[%c0_1, %c0_2] : memref<288x512xbf16, #tpu.memory_space<vmem>>, vector<288x512xbf16>
    %cst = arith.constant dense<0.000000e+00> : vector<16x512xf32>
    %2 = tpu.matmul %0, %1, %cst {dimension_numbers = #tpu.dot_dimension_numbers<[1], [0], [0], [1], [0, 0, 1, 1], [], []>} : vector<16x288xbf16>, vector<288x512xbf16>, vector<16x512xf32> -> vector<16x512xf32>
    %c0_3 = arith.constant 0 : index
    %c0_4 = arith.constant 0 : index
    %3 = vector.load %arg3[%c0_3, %c0_4] : memref<16x1xf32, #tpu.memory_space<vmem>>, vector<16x1xf32>
    %4 = vector.broadcast %3 : vector<16x1xf32> to vector<16x512xf32>
    %5 = arith.addf %2, %4 : vector<16x512xf32>
    %cst_5 = arith.constant 0.000000e+00 : f32
    %6 = vector.broadcast %cst_5 : f32 to vector<16x512xf32>
    %7 = arith.maximumf %5, %6 : vector<16x512xf32>
    %8 = arith.truncf %7 : vector<16x512xf32> to vector<16x512xbf16>
    %c0_6 = arith.constant 0 : index
    %c0_7 = arith.constant 0 : index
    %9 = vector.load %arg4[%c0_6, %c0_7] : memref<16x512xbf16, #tpu.memory_space<vmem>>, vector<16x512xbf16>
    tpu.vector_store %arg4[%c0_6, %c0_7], %8 {strides = array<i32>} : memref<16x512xbf16, #tpu.memory_space<vmem>>, vector<16x512xbf16>,
    return
  }
  func.func @transform_0(%arg0: i32) -> (i32, i32) {
    %c0_i32 = arith.constant 0 : i32
    %c0_i32_0 = arith.constant 0 : i32
    return %c0_i32, %arg0 : i32, i32
  }
  func.func @transform_1(%arg0: i32) -> (i32, i32) {
    %c0_i32 = arith.constant 0 : i32
    %c0_i32_0 = arith.constant 0 : i32
    %c0_i32_1 = arith.constant 0 : i32
    return %c0_i32, %c0_i32_0 : i32, i32
  }
  func.func @transform_2(%arg0: i32) -> (i32, i32) {
    %c0_i32 = arith.constant 0 : i32
    %c0_i32_0 = arith.constant 0 : i32
    %c0_i32_1 = arith.constant 0 : i32
    return %c0_i32, %c0_i32_0 : i32, i32
  }
  func.func @transform_3(%arg0: i32) -> (i32, i32) {
    %c0_i32 = arith.constant 0 : i32
    %c0_i32_0 = arith.constant 0 : i32
    return %c0_i32, %arg0 : i32, i32
  }
}

module attributes {stable_mosaic.version = 11 : i64} {
  func.func @_conv_bn_act_kernel(%arg0: i32, %arg1: memref<432x512xbf16, #tpu.memory_space<vmem>>, %arg2: memref<16x432xbf16, #tpu.memory_space<vmem>>, %arg3: memref<16x1xf32, #tpu.memory_space<vmem>>, %arg4: memref<16x512xbf16, #tpu.memory_space<vmem>>) attributes {dimension_semantics = [#tpu.dimension_semantics<parallel>], iteration_bounds = array<i64: 1>, scalar_prefetch = 0 : i64, scratch_operands = 0 : i64, tpu.core_type = #tpu.core_type<tc>, window_params = [{transform_indices = @transform_0, window_bounds = array<i64: 432, 512>}, {pipeline_mode = #tpu.pipeline_mode<synchronous>, transform_indices = @transform_1, window_bounds = array<i64: 16, 432>}, {pipeline_mode = #tpu.pipeline_mode<synchronous>, transform_indices = @transform_2, window_bounds = array<i64: 16, 1>}, {transform_indices = @transform_3, window_bounds = array<i64: 16, 512>}]} {
    %c0 = arith.constant 0 : index
    %c0_0 = arith.constant 0 : index
    %0 = vector.load %arg2[%c0, %c0_0] : memref<16x432xbf16, #tpu.memory_space<vmem>>, vector<16x432xbf16>
    %c0_1 = arith.constant 0 : index
    %c0_2 = arith.constant 0 : index
    %1 = vector.load %arg1[%c0_1, %c0_2] : memref<432x512xbf16, #tpu.memory_space<vmem>>, vector<432x512xbf16>
    %cst = arith.constant dense<0.000000e+00> : vector<16x512xf32>
    %2 = tpu.matmul %0, %1, %cst {dimension_numbers = #tpu.dot_dimension_numbers<[1], [0], [0], [1], [0, 0, 1, 1], [], []>} : vector<16x432xbf16>, vector<432x512xbf16>, vector<16x512xf32> -> vector<16x512xf32>
    %c0_3 = arith.constant 0 : index
    %c0_4 = arith.constant 0 : index
    %3 = vector.load %arg3[%c0_3, %c0_4] : memref<16x1xf32, #tpu.memory_space<vmem>>, vector<16x1xf32>
    %4 = vector.broadcast %3 : vector<16x1xf32> to vector<16x512xf32>
    %5 = arith.addf %2, %4 : vector<16x512xf32>
    %cst_5 = arith.constant 0.000000e+00 : f32
    %6 = vector.broadcast %cst_5 : f32 to vector<16x512xf32>
    %7 = arith.maximumf %5, %6 : vector<16x512xf32>
    %8 = arith.truncf %7 : vector<16x512xf32> to vector<16x512xbf16>
    %c0_6 = arith.constant 0 : index
    %c0_7 = arith.constant 0 : index
    %9 = vector.load %arg4[%c0_6, %c0_7] : memref<16x512xbf16, #tpu.memory_space<vmem>>, vector<16x512xbf16>
    tpu.vector_store %arg4[%c0_6, %c0_7], %8 {strides = array<i32>} : memref<16x512xbf16, #tpu.memory_space<vmem>>, vector<16x512xbf16>,
    return
  }
  func.func @transform_0(%arg0: i32) -> (i32, i32) {
    %c0_i32 = arith.constant 0 : i32
    %c0_i32_0 = arith.constant 0 : i32
    return %c0_i32, %arg0 : i32, i32
  }
  func.func @transform_1(%arg0: i32) -> (i32, i32) {
    %c0_i32 = arith.constant 0 : i32
    %c0_i32_0 = arith.constant 0 : i32
    %c0_i32_1 = arith.constant 0 : i32
    return %c0_i32, %c0_i32_0 : i32, i32
  }
  func.func @transform_2(%arg0: i32) -> (i32, i32) {
    %c0_i32 = arith.constant 0 : i32
    %c0_i32_0 = arith.constant 0 : i32
    %c0_i32_1 = arith.constant 0 : i32
    return %c0_i32, %c0_i32_0 : i32, i32
  }
  func.func @transform_3(%arg0: i32) -> (i32, i32) {
    %c0_i32 = arith.constant 0 : i32
    %c0_i32_0 = arith.constant 0 : i32
    return %c0_i32, %arg0 : i32, i32
  }
}

module attributes {stable_mosaic.version = 11 : i64} {
  func.func @_conv_bn_act_kernel(%arg0: i32, %arg1: memref<144x256xbf16, #tpu.memory_space<vmem>>, %arg2: memref<32x144xbf16, #tpu.memory_space<vmem>>, %arg3: memref<32x1xf32, #tpu.memory_space<vmem>>, %arg4: memref<32x256xbf16, #tpu.memory_space<vmem>>) attributes {dimension_semantics = [#tpu.dimension_semantics<parallel>], iteration_bounds = array<i64: 1>, scalar_prefetch = 0 : i64, scratch_operands = 0 : i64, tpu.core_type = #tpu.core_type<tc>, window_params = [{transform_indices = @transform_0, window_bounds = array<i64: 144, 256>}, {pipeline_mode = #tpu.pipeline_mode<synchronous>, transform_indices = @transform_1, window_bounds = array<i64: 32, 144>}, {pipeline_mode = #tpu.pipeline_mode<synchronous>, transform_indices = @transform_2, window_bounds = array<i64: 32, 1>}, {transform_indices = @transform_3, window_bounds = array<i64: 32, 256>}]} {
    %c0 = arith.constant 0 : index
    %c0_0 = arith.constant 0 : index
    %0 = vector.load %arg2[%c0, %c0_0] : memref<32x144xbf16, #tpu.memory_space<vmem>>, vector<32x144xbf16>
    %c0_1 = arith.constant 0 : index
    %c0_2 = arith.constant 0 : index
    %1 = vector.load %arg1[%c0_1, %c0_2] : memref<144x256xbf16, #tpu.memory_space<vmem>>, vector<144x256xbf16>
    %cst = arith.constant dense<0.000000e+00> : vector<32x256xf32>
    %2 = tpu.matmul %0, %1, %cst {dimension_numbers = #tpu.dot_dimension_numbers<[1], [0], [0], [1], [0, 0, 1, 1], [], []>} : vector<32x144xbf16>, vector<144x256xbf16>, vector<32x256xf32> -> vector<32x256xf32>
    %c0_3 = arith.constant 0 : index
    %c0_4 = arith.constant 0 : index
    %3 = vector.load %arg3[%c0_3, %c0_4] : memref<32x1xf32, #tpu.memory_space<vmem>>, vector<32x1xf32>
    %4 = vector.broadcast %3 : vector<32x1xf32> to vector<32x256xf32>
    %5 = arith.addf %2, %4 : vector<32x256xf32>
    %cst_5 = arith.constant 0.000000e+00 : f32
    %6 = vector.broadcast %cst_5 : f32 to vector<32x256xf32>
    %7 = arith.maximumf %5, %6 : vector<32x256xf32>
    %8 = arith.truncf %7 : vector<32x256xf32> to vector<32x256xbf16>
    %c0_6 = arith.constant 0 : index
    %c0_7 = arith.constant 0 : index
    %9 = vector.load %arg4[%c0_6, %c0_7] : memref<32x256xbf16, #tpu.memory_space<vmem>>, vector<32x256xbf16>
    tpu.vector_store %arg4[%c0_6, %c0_7], %8 {strides = array<i32>} : memref<32x256xbf16, #tpu.memory_space<vmem>>, vector<32x256xbf16>,
    return
  }
  func.func @transform_0(%arg0: i32) -> (i32, i32) {
    %c0_i32 = arith.constant 0 : i32
    %c0_i32_0 = arith.constant 0 : i32
    return %c0_i32, %arg0 : i32, i32
  }
  func.func @transform_1(%arg0: i32) -> (i32, i32) {
    %c0_i32 = arith.constant 0 : i32
    %c0_i32_0 = arith.constant 0 : i32
    %c0_i32_1 = arith.constant 0 : i32
    return %c0_i32, %c0_i32_0 : i32, i32
  }
  func.func @transform_2(%arg0: i32) -> (i32, i32) {
    %c0_i32 = arith.constant 0 : i32
    %c0_i32_0 = arith.constant 0 : i32
    %c0_i32_1 = arith.constant 0 : i32
    return %c0_i32, %c0_i32_0 : i32, i32
  }
  func.func @transform_3(%arg0: i32) -> (i32, i32) {
    %c0_i32 = arith.constant 0 : i32
    %c0_i32_0 = arith.constant 0 : i32
    return %c0_i32, %arg0 : i32, i32
  }
}

module attributes {stable_mosaic.version = 11 : i64} {
  func.func @_conv_bn_act_kernel(%arg0: i32, %arg1: memref<864x256xbf16, #tpu.memory_space<vmem>>, %arg2: memref<32x864xbf16, #tpu.memory_space<vmem>>, %arg3: memref<32x1xf32, #tpu.memory_space<vmem>>, %arg4: memref<32x256xbf16, #tpu.memory_space<vmem>>) attributes {dimension_semantics = [#tpu.dimension_semantics<parallel>], iteration_bounds = array<i64: 1>, scalar_prefetch = 0 : i64, scratch_operands = 0 : i64, tpu.core_type = #tpu.core_type<tc>, window_params = [{transform_indices = @transform_0, window_bounds = array<i64: 864, 256>}, {pipeline_mode = #tpu.pipeline_mode<synchronous>, transform_indices = @transform_1, window_bounds = array<i64: 32, 864>}, {pipeline_mode = #tpu.pipeline_mode<synchronous>, transform_indices = @transform_2, window_bounds = array<i64: 32, 1>}, {transform_indices = @transform_3, window_bounds = array<i64: 32, 256>}]} {
    %c0 = arith.constant 0 : index
    %c0_0 = arith.constant 0 : index
    %0 = vector.load %arg2[%c0, %c0_0] : memref<32x864xbf16, #tpu.memory_space<vmem>>, vector<32x864xbf16>
    %c0_1 = arith.constant 0 : index
    %c0_2 = arith.constant 0 : index
    %1 = vector.load %arg1[%c0_1, %c0_2] : memref<864x256xbf16, #tpu.memory_space<vmem>>, vector<864x256xbf16>
    %cst = arith.constant dense<0.000000e+00> : vector<32x256xf32>
    %2 = tpu.matmul %0, %1, %cst {dimension_numbers = #tpu.dot_dimension_numbers<[1], [0], [0], [1], [0, 0, 1, 1], [], []>} : vector<32x864xbf16>, vector<864x256xbf16>, vector<32x256xf32> -> vector<32x256xf32>
    %c0_3 = arith.constant 0 : index
    %c0_4 = arith.constant 0 : index
    %3 = vector.load %arg3[%c0_3, %c0_4] : memref<32x1xf32, #tpu.memory_space<vmem>>, vector<32x1xf32>
    %4 = vector.broadcast %3 : vector<32x1xf32> to vector<32x256xf32>
    %5 = arith.addf %2, %4 : vector<32x256xf32>
    %cst_5 = arith.constant 0.000000e+00 : f32
    %6 = vector.broadcast %cst_5 : f32 to vector<32x256xf32>
    %7 = arith.maximumf %5, %6 : vector<32x256xf32>
    %8 = arith.truncf %7 : vector<32x256xf32> to vector<32x256xbf16>
    %c0_6 = arith.constant 0 : index
    %c0_7 = arith.constant 0 : index
    %9 = vector.load %arg4[%c0_6, %c0_7] : memref<32x256xbf16, #tpu.memory_space<vmem>>, vector<32x256xbf16>
    tpu.vector_store %arg4[%c0_6, %c0_7], %8 {strides = array<i32>} : memref<32x256xbf16, #tpu.memory_space<vmem>>, vector<32x256xbf16>,
    return
  }
  func.func @transform_0(%arg0: i32) -> (i32, i32) {
    %c0_i32 = arith.constant 0 : i32
    %c0_i32_0 = arith.constant 0 : i32
    return %c0_i32, %arg0 : i32, i32
  }
  func.func @transform_1(%arg0: i32) -> (i32, i32) {
    %c0_i32 = arith.constant 0 : i32
    %c0_i32_0 = arith.constant 0 : i32
    %c0_i32_1 = arith.constant 0 : i32
    return %c0_i32, %c0_i32_0 : i32, i32
  }
  func.func @transform_2(%arg0: i32) -> (i32, i32) {
    %c0_i32 = arith.constant 0 : i32
    %c0_i32_0 = arith.constant 0 : i32
    %c0_i32_1 = arith.constant 0 : i32
    return %c0_i32, %c0_i32_0 : i32, i32
  }
  func.func @transform_3(%arg0: i32) -> (i32, i32) {
    %c0_i32 = arith.constant 0 : i32
    %c0_i32_0 = arith.constant 0 : i32
    return %c0_i32, %arg0 : i32, i32
  }
}

module attributes {stable_mosaic.version = 11 : i64} {
  func.func @_conv_bn_act_kernel(%arg0: i32, %arg1: memref<288x256xbf16, #tpu.memory_space<vmem>>, %arg2: memref<64x288xbf16, #tpu.memory_space<vmem>>, %arg3: memref<64x1xf32, #tpu.memory_space<vmem>>, %arg4: memref<64x256xbf16, #tpu.memory_space<vmem>>) attributes {dimension_semantics = [#tpu.dimension_semantics<parallel>], iteration_bounds = array<i64: 1>, scalar_prefetch = 0 : i64, scratch_operands = 0 : i64, tpu.core_type = #tpu.core_type<tc>, window_params = [{transform_indices = @transform_0, window_bounds = array<i64: 288, 256>}, {pipeline_mode = #tpu.pipeline_mode<synchronous>, transform_indices = @transform_1, window_bounds = array<i64: 64, 288>}, {pipeline_mode = #tpu.pipeline_mode<synchronous>, transform_indices = @transform_2, window_bounds = array<i64: 64, 1>}, {transform_indices = @transform_3, window_bounds = array<i64: 64, 256>}]} {
    %c0 = arith.constant 0 : index
    %c0_0 = arith.constant 0 : index
    %0 = vector.load %arg2[%c0, %c0_0] : memref<64x288xbf16, #tpu.memory_space<vmem>>, vector<64x288xbf16>
    %c0_1 = arith.constant 0 : index
    %c0_2 = arith.constant 0 : index
    %1 = vector.load %arg1[%c0_1, %c0_2] : memref<288x256xbf16, #tpu.memory_space<vmem>>, vector<288x256xbf16>
    %cst = arith.constant dense<0.000000e+00> : vector<64x256xf32>
    %2 = tpu.matmul %0, %1, %cst {dimension_numbers = #tpu.dot_dimension_numbers<[1], [0], [0], [1], [0, 0, 1, 1], [], []>} : vector<64x288xbf16>, vector<288x256xbf16>, vector<64x256xf32> -> vector<64x256xf32>
    %c0_3 = arith.constant 0 : index
    %c0_4 = arith.constant 0 : index
    %3 = vector.load %arg3[%c0_3, %c0_4] : memref<64x1xf32, #tpu.memory_space<vmem>>, vector<64x1xf32>
    %4 = vector.broadcast %3 : vector<64x1xf32> to vector<64x256xf32>
    %5 = arith.addf %2, %4 : vector<64x256xf32>
    %cst_5 = arith.constant 0.000000e+00 : f32
    %6 = vector.broadcast %cst_5 : f32 to vector<64x256xf32>
    %7 = arith.maximumf %5, %6 : vector<64x256xf32>
    %8 = arith.truncf %7 : vector<64x256xf32> to vector<64x256xbf16>
    %c0_6 = arith.constant 0 : index
    %c0_7 = arith.constant 0 : index
    %9 = vector.load %arg4[%c0_6, %c0_7] : memref<64x256xbf16, #tpu.memory_space<vmem>>, vector<64x256xbf16>
    tpu.vector_store %arg4[%c0_6, %c0_7], %8 {strides = array<i32>} : memref<64x256xbf16, #tpu.memory_space<vmem>>, vector<64x256xbf16>,
    return
  }
  func.func @transform_0(%arg0: i32) -> (i32, i32) {
    %c0_i32 = arith.constant 0 : i32
    %c0_i32_0 = arith.constant 0 : i32
    return %c0_i32, %arg0 : i32, i32
  }
  func.func @transform_1(%arg0: i32) -> (i32, i32) {
    %c0_i32 = arith.constant 0 : i32
    %c0_i32_0 = arith.constant 0 : i32
    %c0_i32_1 = arith.constant 0 : i32
    return %c0_i32, %c0_i32_0 : i32, i32
  }
  func.func @transform_2(%arg0: i32) -> (i32, i32) {
    %c0_i32 = arith.constant 0 : i32
    %c0_i32_0 = arith.constant 0 : i32
    %c0_i32_1 = arith.constant 0 : i32
    return %c0_i32, %c0_i32_0 : i32, i32
  }
  func.func @transform_3(%arg0: i32) -> (i32, i32) {
    %c0_i32 = arith.constant 0 : i32
    %c0_i32_0 = arith.constant 0 : i32
    return %c0_i32, %arg0 : i32, i32
  }
}

module attributes {stable_mosaic.version = 11 : i64} {
  func.func @_conv_bn_act_kernel(%arg0: i32, %arg1: memref<1152x256xbf16, #tpu.memory_space<vmem>>, %arg2: memref<64x1152xbf16, #tpu.memory_space<vmem>>, %arg3: memref<64x1xf32, #tpu.memory_space<vmem>>, %arg4: memref<64x256xbf16, #tpu.memory_space<vmem>>) attributes {dimension_semantics = [#tpu.dimension_semantics<parallel>], iteration_bounds = array<i64: 1>, scalar_prefetch = 0 : i64, scratch_operands = 0 : i64, tpu.core_type = #tpu.core_type<tc>, window_params = [{transform_indices = @transform_0, window_bounds = array<i64: 1152, 256>}, {pipeline_mode = #tpu.pipeline_mode<synchronous>, transform_indices = @transform_1, window_bounds = array<i64: 64, 1152>}, {pipeline_mode = #tpu.pipeline_mode<synchronous>, transform_indices = @transform_2, window_bounds = array<i64: 64, 1>}, {transform_indices = @transform_3, window_bounds = array<i64: 64, 256>}]} {
    %c0 = arith.constant 0 : index
    %c0_0 = arith.constant 0 : index
    %0 = vector.load %arg2[%c0, %c0_0] : memref<64x1152xbf16, #tpu.memory_space<vmem>>, vector<64x1152xbf16>
    %c0_1 = arith.constant 0 : index
    %c0_2 = arith.constant 0 : index
    %1 = vector.load %arg1[%c0_1, %c0_2] : memref<1152x256xbf16, #tpu.memory_space<vmem>>, vector<1152x256xbf16>
    %cst = arith.constant dense<0.000000e+00> : vector<64x256xf32>
    %2 = tpu.matmul %0, %1, %cst {dimension_numbers = #tpu.dot_dimension_numbers<[1], [0], [0], [1], [0, 0, 1, 1], [], []>} : vector<64x1152xbf16>, vector<1152x256xbf16>, vector<64x256xf32> -> vector<64x256xf32>
    %c0_3 = arith.constant 0 : index
    %c0_4 = arith.constant 0 : index
    %3 = vector.load %arg3[%c0_3, %c0_4] : memref<64x1xf32, #tpu.memory_space<vmem>>, vector<64x1xf32>
    %4 = vector.broadcast %3 : vector<64x1xf32> to vector<64x256xf32>
    %5 = arith.addf %2, %4 : vector<64x256xf32>
    %cst_5 = arith.constant 0.000000e+00 : f32
    %6 = vector.broadcast %cst_5 : f32 to vector<64x256xf32>
    %7 = arith.maximumf %5, %6 : vector<64x256xf32>
    %8 = arith.truncf %7 : vector<64x256xf32> to vector<64x256xbf16>
    %c0_6 = arith.constant 0 : index
    %c0_7 = arith.constant 0 : index
    %9 = vector.load %arg4[%c0_6, %c0_7] : memref<64x256xbf16, #tpu.memory_space<vmem>>, vector<64x256xbf16>
    tpu.vector_store %arg4[%c0_6, %c0_7], %8 {strides = array<i32>} : memref<64x256xbf16, #tpu.memory_space<vmem>>, vector<64x256xbf16>,
    return
  }
  func.func @transform_0(%arg0: i32) -> (i32, i32) {
    %c0_i32 = arith.constant 0 : i32
    %c0_i32_0 = arith.constant 0 : i32
    return %c0_i32, %arg0 : i32, i32
  }
  func.func @transform_1(%arg0: i32) -> (i32, i32) {
    %c0_i32 = arith.constant 0 : i32
    %c0_i32_0 = arith.constant 0 : i32
    %c0_i32_1 = arith.constant 0 : i32
    return %c0_i32, %c0_i32_0 : i32, i32
  }
  func.func @transform_2(%arg0: i32) -> (i32, i32) {
    %c0_i32 = arith.constant 0 : i32
    %c0_i32_0 = arith.constant 0 : i32
    %c0_i32_1 = arith.constant 0 : i32
    return %c0_i32, %c0_i32_0 : i32, i32
  }
  func.func @transform_3(%arg0: i32) -> (i32, i32) {
    %c0_i32 = arith.constant 0 : i32
    %c0_i32_0 = arith.constant 0 : i32
    return %c0_i32, %arg0 : i32, i32
  }
}

</mosaic_0001>

<bundles_post_ra>
// kernel: _lambda_.21
= control target key start
LH: loop header
LB: loop body
LE: loop exit
PB: predicated region body
PF: predicated region fallthrough
CT: control target
= control target key end

     0   :  { %s637_s9 = smov 0   ;;  %s639_s10 = smov 0   ;;  %s688_s0 = inlined_call_operand.vmem [shape: bf16[2,72,128], index: 0, kind: input, shape index: {}]   ;;  %s689_s1 = inlined_call_operand.vmem [shape: f32[2,72,1], index: 1, kind: input, shape index: {}]   ;;  %s690_s2 = inlined_call_operand.vmem [shape: bf16[2,72,128], index: 2, kind: output, shape index: {}]  }
   0x1   :  { %s641_s11 = smov 0  }
   0x2 LB: > { %s24_s12 = sadd.s32 1, %s615_s10  ;;  %p466_p0 = scmp.ge.s32.totalorder %s619_s11, 1  ;;  %s619_s11 = sphi %s641_s11, %s12_s11   ;;  %s615_s10 = sphi %s639_s10, %s692_s10   ;;  %s611_s9 = sphi %s637_s9, %s691_s9  }
   0x3   : > { %p26_p1 = scmp.ge.s32.totalorder %s24_s12, 2  ;;  %p141_p2 = scmp.lt.s32.totalorder %s619_s11, 3 }
   0x5   : > { %s694_s12 = smov (%p26_p1, %s24_s12), 0  ;;  %p142_p3 = pnand %p466_p0, %p141_p2 }
   0x6   : > { %p174_p4 = scmp.lt.s32.totalorder (!%p142_p3), %s611_s9, 1 }
   0x7   : > { %145 = sbr.rel (%p142_p3) target bundleno = 197 (0xc5), region = 28 }
   0xc   : > { %v621_v0 = vmov 0   ;;  %s696_s9 = smov (!%p174_p4, %s611_s9), 1 }
   0xd   : > { %560 = vset.pattern.permute.xlu1 %v621_v0  ;;  %559 = vset.pattern.permute.xlu0 %v621_v0  ;;  %s533_s13 = smul.u32 72, %s696_s9 }
   0xe   : > { %s532_s17 = smul.u32 36, %s696_s9 }
   0xf   : > { %s186_s16 = scalar_lea.vmem %s689_s1, %s533_s13 }
  0x10   : > { %v215_v1 = vld [vmem:[%s186_s16 + $0x10] sm:$0xff]  ;;  %v213_v2 = vld [vmem:[%s186_s16] sm:$0xff]  ;;  %v216_v3 = vld [vmem:[%s186_s16 + $0x18] sm:$0xff]  ;;  %s667_s20 = scalar_lea.vmem %s688_s0, %s532_s17  ;;  %s194_s23 = scalar_lea.vmem %s690_s2, %s532_s17 }
  0x11   : > { %234 = vperm.xlu1 %560, %v215_v1   ;;  %224 = vperm.xlu0 %559, %v213_v2   ;;  %v214_v4 = vld [vmem:[%s186_s16 + $0x8] sm:$0xff]  ;;  %v217_v6 = vld [vmem:[%s186_s16 + $0x20] sm:$0xff]  ;;  %v220_v7 = vld [vmem:[%s186_s16 + $0x38] sm:$0xff] }
  0x12   : > { %v218_v5 = vld [vmem:[%s186_s16 + $0x28] sm:$0xff]  ;;  %v219_v8 = vld [vmem:[%s186_s16 + $0x30] sm:$0xff]  ;;  %v221_v9 = vld [vmem:[%s186_s16 + $0x40] sm:$0xff] }
  0x13   : > { %v526_v10 = vld [vmem:[%s667_s20 + $0x8] sm:$0xff]   ;;  %v491_v11 = vld [vmem:[%s667_s20] sm:$0xff]   ;;  %v527_v20 = vld [vmem:[%s667_s20 + $0x10] sm:$0xff]  }
  0x14   : > { %v496_v12 = vunpack.c.l.bf16 %v526_v10  ;;  %v492_v13 = vunpack.c.l.bf16 %v491_v11  ;;  %v497_v18 = vunpack.c.h.bf16 %v526_v10  ;;  %v493_v19 = vunpack.c.h.bf16 %v491_v11  ;;  %v528_v31 = vld [vmem:[%s667_s20 + $0x18] sm:$0xff]   ;;  %v203_v42 = vld [vmem:[%s667_s20 + $0x20] sm:$0xf] }
  0x15   : > { %239 = vperm.xlu1 %560, %v216_v3   ;;  %229 = vperm.xlu0 %559, %v214_v4   ;;  %v501_v25 = vunpack.c.h.bf16 %v527_v20  ;;  %v500_v26 = vunpack.c.l.bf16 %v527_v20  ;;  %v505_v36 = vunpack.c.h.bf16 %v528_v31  ;;  %v504_v37 = vunpack.c.l.bf16 %v528_v31 }
  0x16   : > { %v212_v47 = vunpack.c.l.bf16 %v203_v42 }
  0x19   : > { %249 = vperm.xlu1 %560, %v218_v5   ;;  %244 = vperm.xlu0 %559, %v217_v6  }
  0x1d   : > { %259 = vperm.xlu1 %560, %v220_v7   ;;  %254 = vperm.xlu0 %559, %v219_v8  }
  0x21   : > { %264 = vperm.xlu0 %559, %v221_v9  }
  0x8c   : > { %v235_v14 = vpop.permute.xlu1 %234  ;;  %v225_v15 = vpop.permute.xlu0 %224 }
  0x8d   : > { %v269_v16 = vmul.f32 %v496_v12, %v235_v14  ;;  %v267_v17 = vmul.f32 %v492_v13, %v225_v15 }
  0x8f   : > { %v278_v21 = vsub.f32 0.0, %v269_v16  ;;  %v276_v22 = vsub.f32 0.0, %v267_v17 }
  0x90   : > { %v240_v23 = vpop.permute.xlu1 %239  ;;  %v230_v24 = vpop.permute.xlu0 %229 }
  0x91   : > { %v289_v27 = vmul.f32 1.442695, %v278_v21  ;;  %v285_v28 = vmul.f32 1.442695, %v276_v22  ;;  %v270_v29 = vmul.f32 %v497_v18, %v240_v23  ;;  %v268_v30 = vmul.f32 %v493_v19, %v230_v24 }
  0x93   : > { %561 = vpow2.f32 %v289_v27  ;;  %v279_v32 = vsub.f32 0.0, %v270_v29  ;;  %v277_v33 = vsub.f32 0.0, %v268_v30 }
  0x94   : > { %563 = vpow2.f32 %v285_v28  ;;  %v250_v34 = vpop.permute.xlu1 %249  ;;  %v245_v35 = vpop.permute.xlu0 %244 }
  0x95   : > { %v291_v38 = vmul.f32 1.442695, %v279_v32  ;;  %v287_v39 = vmul.f32 1.442695, %v277_v33  ;;  %v272_v40 = vmul.f32 %v501_v25, %v250_v34  ;;  %v271_v41 = vmul.f32 %v500_v26, %v245_v35 }
  0x97   : > { %565 = vpow2.f32 %v291_v38  ;;  %v281_v43 = vsub.f32 0.0, %v272_v40  ;;  %v280_v44 = vsub.f32 0.0, %v271_v41 }
  0x98   : > { %567 = vpow2.f32 %v287_v39  ;;  %v260_v45 = vpop.permute.xlu1 %259  ;;  %v255_v46 = vpop.permute.xlu0 %254 }
  0x99   : > { %v295_v48 = vmul.f32 1.442695, %v281_v43  ;;  %v293_v49 = vmul.f32 1.442695, %v280_v44  ;;  %v274_v50 = vmul.f32 %v505_v36, %v260_v45  ;;  %v273_v51 = vmul.f32 %v504_v37, %v255_v46 }
  0x9b   : > { %569 = vpow2.f32 %v295_v48  ;;  %v283_v52 = vsub.f32 0.0, %v274_v50  ;;  %v282_v53 = vsub.f32 0.0, %v273_v51 }
  0x9c   : > { %571 = vpow2.f32 %v293_v49  ;;  %v265_v54 = vpop.permute.xlu0 %264 }
  0x9d   : > { %v299_v55 = vmul.f32 1.442695, %v283_v52  ;;  %v297_v56 = vmul.f32 1.442695, %v282_v53  ;;  %v275_v57 = vmul.f32 %v265_v54, %v212_v47 }
  0x9f   : > { %573 = vpow2.f32 %v299_v55  ;;  %v284_v58 = vsub.f32 0.0, %v275_v57 }
  0xa0   : > { %v562_v59 = vpop.eup %561  ;;  %575 = vpow2.f32 %v297_v56 }
  0xa1   : > { %v564_v60 = vpop.eup %563  ;;  %v305_v61 = vadd.f32 1.0, %v562_v59  ;;  %v301_v62 = vmul.f32 1.442695, %v284_v58 }
  0xa2   : > { %v303_v63 = vadd.f32 1.0, %v564_v60 }
  0xa3   : > { %577 = vrcp.f32 %v305_v61 }
  0xa4   : > { %v566_v0 = vpop.eup %565  ;;  %579 = vpow2.f32 %v301_v62 }
  0xa5   : > { %v568_v1 = vpop.eup %567  ;;  %v306_v2 = vadd.f32 1.0, %v566_v0  ;;  %581 = vrcp.f32 %v303_v63 }
  0xa6   : > { %v304_v3 = vadd.f32 1.0, %v568_v1 }
  0xa7   : > { %583 = vrcp.f32 %v306_v2 }
  0xa8   : > { %v570_v4 = vpop.eup %569  ;;  %585 = vrcp.f32 %v304_v3 }
  0xa9   : > { %v572_v5 = vpop.eup %571  ;;  %v308_v6 = vadd.f32 1.0, %v570_v4 }
  0xaa   : > { %v307_v7 = vadd.f32 1.0, %v572_v5 }
  0xab   : > { %587 = vrcp.f32 %v308_v6 }
  0xac   : > { %v574_v8 = vpop.eup %573  ;;  %589 = vrcp.f32 %v307_v7 }
  0xad   : > { %v576_v9 = vpop.eup %575  ;;  %v310_v10 = vadd.f32 1.0, %v574_v8 }
  0xae   : > { %v309_v11 = vadd.f32 1.0, %v576_v9 }
  0xaf   : > { %591 = vrcp.f32 %v310_v10 }
  0xb0   : > { %593 = vrcp.f32 %v309_v11  ;;  %v578_v12 = vpop.eup %577 }
  0xb1   : > { %v580_v13 = vpop.eup %579 }
  0xb2   : > { %v582_v14 = vpop.eup %581  ;;  %v311_v15 = vadd.f32 1.0, %v580_v13 }
  0xb4   : > { %v584_v16 = vpop.eup %583  ;;  %595 = vrcp.f32 %v311_v15 }
  0xb5   : > { %v586_v17 = vpop.eup %585  ;;  %v514_v18 = vpack.c.bf16 %v584_v16, %v578_v12 }
  0xb6   : > { %v509_v19 = vpack.c.bf16 %v586_v17, %v582_v14 }
  0xb7   : > { %529 = vst [vmem:[%s194_s23 + $0x8] sm:$0xff] %v514_v18  }
  0xb8   : > { %v588_v20 = vpop.eup %587  ;;  %510 = vst [vmem:[%s194_s23] sm:$0xff] %v509_v19  }
  0xb9   : > { %v590_v21 = vpop.eup %589 }
  0xba   : > { %v519_v22 = vpack.c.bf16 %v588_v20, %v590_v21 }
  0xbc   : > { %v592_v23 = vpop.eup %591  ;;  %530 = vst [vmem:[%s194_s23 + $0x10] sm:$0xff] %v519_v22  }
  0xbd   : > { %v594_v24 = vpop.eup %593 }
  0xbe   : > { %v524_v25 = vpack.c.bf16 %v592_v23, %v594_v24 }
  0xc0   : > { %531 = vst [vmem:[%s194_s23 + $0x18] sm:$0xff] %v524_v25  }
  0xc1   : > { %v596_v26 = vpop.eup %595 }
  0xc2   : > { %v489_v27 = vpack.c.bf16 %v596_v26, %v596_v26 }
  0xc4   : > { %366 = vst [vmem:[%s194_s23 + $0x20] sm:$0xf] %v489_v27 }
  0xc5 PF: > { %s12_s11 = sadd.s32 1, %s619_s11   ;;  %s691_s9 = smov %s615_s10 }
  0xc6   : > { %p9_p5 = scmp.ge.s32.totalorder %s12_s11, 4   ;;  %s692_s10 = smov %s694_s12 }
  0xc8   :  { %11 = sbr.rel (!%p9_p5) target bundleno = 2 (0x2), region = 61 }

// kernel: _lambda_.22
= control target key start
LH: loop header
LB: loop body
LE: loop exit
PB: predicated region body
PF: predicated region fallthrough
CT: control target
= control target key end

     0   :  { %v1392_v1 = vmov 0   ;;  %vm734_vm0 = vcmask 1043456   ;;  %vm718_vm1 = vcmask 64512   ;;  %s1849_s0 = inlined_call_operand.vmem [shape: bf16[648,256], index: 0, kind: input, shape index: {}]   ;;  %s1850_s1 = inlined_call_operand.vmem [shape: bf16[72,648], index: 1, kind: input, shape index: {}]   ;;  %s1851_s2 = inlined_call_operand.vmem [shape: f32[72,1], index: 2, kind: input, shape index: {}]   ;;  %s1852_s3 = inlined_call_operand.vmem [shape: bf16[72,256], index: 3, kind: output, shape index: {}]  }
   0x1   :  { %v1228_v0 = vld [vmem:[%s1849_s0 + $0x74] ss:$8 sps:$4 sm:$0xff]   ;;  %1226 = vset.pattern.permute.xlu0 %v1392_v1  ;;  %1227 = vset.pattern.permute.xlu1 %v1392_v1  ;;  %v1232_v3 = vld [vmem:[%s1849_s0 + $0x70] ss:$8 sps:$4 sm:$0xff]   ;;  %v1234_v5 = vld [vmem:[%s1849_s0 + $0x64] ss:$8 sps:$4 sm:$0xff]  }
   0x2   :  { %v1230_v2 = vld [vmem:[%s1849_s0 + $0x174] ss:$8 sps:$4 sm:$0xff]   ;;  %741 = vmatprep.subr.bf16.mxu0 %v1228_v0  ;;  %v1233_v4 = vld [vmem:[%s1849_s0 + $0x170] ss:$8 sps:$4 sm:$0xff]   ;;  %v1236_v6 = vld [vmem:[%s1849_s0 + $0x164] ss:$8 sps:$4 sm:$0xff]  }
   0x3   :  { %822 = vmatprep.subr.bf16.mxu1 %v1230_v2  ;;  %742 = vmatpush1.bf16.msra.mxu0 %v1232_v3  ;;  %v1238_v7 = vld [vmem:[%s1849_s0 + $0x60] ss:$8 sps:$4 sm:$0xff]   ;;  %v1240_v9 = vld [vmem:[%s1849_s0 + $0x54] ss:$8 sps:$4 sm:$0xff]   ;;  %v1244_v11 = vld [vmem:[%s1849_s0 + $0x50] ss:$8 sps:$4 sm:$0xff]  }
   0x4   :  { %823 = vmatpush1.bf16.msra.mxu1 %v1233_v4  ;;  %743 = vmatprep.subr.bf16.mxu0 %v1234_v5  ;;  %v1239_v8 = vld [vmem:[%s1849_s0 + $0x160] ss:$8 sps:$4 sm:$0xff]   ;;  %v1242_v10 = vld [vmem:[%s1849_s0 + $0x154] ss:$8 sps:$4 sm:$0xff]   ;;  %v1245_v12 = vld [vmem:[%s1849_s0 + $0x150] ss:$8 sps:$4 sm:$0xff]  }
   0x5   :  { %824 = vmatprep.subr.bf16.mxu1 %v1236_v6  ;;  %v1246_v13 = vld [vmem:[%s1849_s0 + $0x44] ss:$8 sps:$4 sm:$0xff]   ;;  %v1250_v15 = vld [vmem:[%s1849_s0 + $0x40] ss:$8 sps:$4 sm:$0xff]   ;;  %v1252_v17 = vld [vmem:[%s1849_s0 + $0x34] ss:$8 sps:$4 sm:$0xff]  }
   0x6   :  { %v1248_v14 = vld [vmem:[%s1849_s0 + $0x144] ss:$8 sps:$4 sm:$0xff]   ;;  %v1251_v16 = vld [vmem:[%s1849_s0 + $0x140] ss:$8 sps:$4 sm:$0xff]   ;;  %v1254_v18 = vld [vmem:[%s1849_s0 + $0x134] ss:$8 sps:$4 sm:$0xff]  }
   0x7   :  { %744 = vmatpush1.bf16.msra.mxu0 %v1238_v7  ;;  %v1256_v19 = vld [vmem:[%s1849_s0 + $0x30] ss:$8 sps:$4 sm:$0xff]   ;;  %v1258_v21 = vld [vmem:[%s1849_s0 + $0x24] ss:$8 sps:$4 sm:$0xff]   ;;  %v1262_v23 = vld [vmem:[%s1849_s0 + $0x20] ss:$8 sps:$4 sm:$0xff]  }
   0x8   :  { %825 = vmatpush1.bf16.msra.mxu1 %v1239_v8  ;;  %745 = vmatprep.subr.bf16.mxu0 %v1240_v9  ;;  %v1257_v20 = vld [vmem:[%s1849_s0 + $0x130] ss:$8 sps:$4 sm:$0xff]   ;;  %v1260_v22 = vld [vmem:[%s1849_s0 + $0x124] ss:$8 sps:$4 sm:$0xff]   ;;  %v1263_v24 = vld [vmem:[%s1849_s0 + $0x120] ss:$8 sps:$4 sm:$0xff]  }
   0x9   :  { %826 = vmatprep.subr.bf16.mxu1 %v1242_v10  ;;  %v1264_v25 = vld [vmem:[%s1849_s0 + $0x14] ss:$8 sps:$4 sm:$0xff]   ;;  %v1268_v27 = vld [vmem:[%s1849_s0 + $0x10] ss:$8 sps:$4 sm:$0xff]   ;;  %v1270_v29 = vld [vmem:[%s1849_s0 + $0x4] ss:$8 sps:$4 sm:$0xff]  }
   0xa   :  { %v1266_v26 = vld [vmem:[%s1849_s0 + $0x114] ss:$8 sps:$4 sm:$0xff]   ;;  %v1269_v28 = vld [vmem:[%s1849_s0 + $0x110] ss:$8 sps:$4 sm:$0xff]   ;;  %v1272_v30 = vld [vmem:[%s1849_s0 + $0x104] ss:$8 sps:$4 sm:$0xff]  }
   0xb   :  { %746 = vmatpush1.bf16.msra.mxu0 %v1244_v11  ;;  %v1274_v31 = vld [vmem:[%s1849_s0] ss:$8 sps:$4 sm:$0xff]   ;;  %v1276_v33 = vld [vmem:[%s1849_s0 + $0xf4] ss:$8 sps:$4 sm:$0xff]   ;;  %v1280_v35 = vld [vmem:[%s1849_s0 + $0xf0] ss:$8 sps:$4 sm:$0xff]  }
   0xc   :  { %827 = vmatpush1.bf16.msra.mxu1 %v1245_v12  ;;  %747 = vmatprep.subr.bf16.mxu0 %v1246_v13  ;;  %v1275_v32 = vld [vmem:[%s1849_s0 + $0x100] ss:$8 sps:$4 sm:$0xff]   ;;  %v1278_v34 = vld [vmem:[%s1849_s0 + $0x1f4] ss:$8 sps:$4 sm:$0xff]   ;;  %v1281_v36 = vld [vmem:[%s1849_s0 + $0x1f0] ss:$8 sps:$4 sm:$0xff]  }
   0xd   :  { %828 = vmatprep.subr.bf16.mxu1 %v1248_v14  ;;  %v1282_v37 = vld [vmem:[%s1849_s0 + $0xe4] ss:$8 sps:$4 sm:$0xff]   ;;  %v1286_v39 = vld [vmem:[%s1849_s0 + $0xe0] ss:$8 sps:$4 sm:$0xff]   ;;  %v1288_v41 = vld [vmem:[%s1849_s0 + $0xd4] ss:$8 sps:$4 sm:$0xff]  }
   0xe   :  { %v1284_v38 = vld [vmem:[%s1849_s0 + $0x1e4] ss:$8 sps:$4 sm:$0xff]   ;;  %v1287_v40 = vld [vmem:[%s1849_s0 + $0x1e0] ss:$8 sps:$4 sm:$0xff]   ;;  %v1290_v42 = vld [vmem:[%s1849_s0 + $0x1d4] ss:$8 sps:$4 sm:$0xff]  }
   0xf   :  { %748 = vmatpush1.bf16.msra.mxu0 %v1250_v15  ;;  %v1292_v43 = vld [vmem:[%s1849_s0 + $0xd0] ss:$8 sps:$4 sm:$0xff]   ;;  %v1294_v45 = vld [vmem:[%s1849_s0 + $0xc4] ss:$8 sps:$4 sm:$0xff]   ;;  %v1298_v47 = vld [vmem:[%s1849_s0 + $0xc0] ss:$8 sps:$4 sm:$0xff]  }
  0x10   :  { %829 = vmatpush1.bf16.msra.mxu1 %v1251_v16  ;;  %749 = vmatprep.subr.bf16.mxu0 %v1252_v17  ;;  %v1293_v44 = vld [vmem:[%s1849_s0 + $0x1d0] ss:$8 sps:$4 sm:$0xff]   ;;  %v1296_v46 = vld [vmem:[%s1849_s0 + $0x1c4] ss:$8 sps:$4 sm:$0xff]   ;;  %v1299_v48 = vld [vmem:[%s1849_s0 + $0x1c0] ss:$8 sps:$4 sm:$0xff]  }
  0x11   :  { %830 = vmatprep.subr.bf16.mxu1 %v1254_v18  ;;  %v1300_v49 = vld [vmem:[%s1849_s0 + $0xb4] ss:$8 sps:$4 sm:$0xff]   ;;  %v1329_v52 = vld [vmem:[%s1850_s1 + $0xc] ss:$24 sps:$4 sm:$0xff]   ;;  %v1304_v53 = vld [vmem:[%s1849_s0 + $0xb0] ss:$8 sps:$4 sm:$0xff]  }
  0x12   :  { %v1326_v50 = vld [vmem:[%s1850_s1 + $0x4] ss:$24 sps:$4 sm:$0xff]   ;;  %v1305_v54 = vld [vmem:[%s1849_s0 + $0x1b0] ss:$8 sps:$4 sm:$0xff]   ;;  %854 = vmatprep.mubr.bf16.mxu1 %v1329_v52  ;;  %v1310_v57 = vld [vmem:[%s1849_s0 + $0xa0] ss:$8 sps:$4 sm:$0xff]  }
  0x13   :  { %750 = vmatpush1.bf16.msra.mxu0 %v1256_v19  ;;  %v1302_v51 = vld [vmem:[%s1849_s0 + $0x1b4] ss:$8 sps:$4 sm:$0xff]   ;;  %773 = vmatprep.mubr.bf16.mxu0 %v1326_v50  ;;  %v1306_v55 = vld [vmem:[%s1849_s0 + $0xa4] ss:$8 sps:$4 sm:$0xff]   ;;  %v1311_v58 = vld [vmem:[%s1849_s0 + $0x1a0] ss:$8 sps:$4 sm:$0xff]  }
  0x14   :  { %831 = vmatpush1.bf16.msra.mxu1 %v1257_v20  ;;  %751 = vmatprep.subr.bf16.mxu0 %v1258_v21  ;;  %v1308_v56 = vld [vmem:[%s1849_s0 + $0x1a4] ss:$8 sps:$4 sm:$0xff]   ;;  %v1312_v59 = vld [vmem:[%s1849_s0 + $0x94] ss:$8 sps:$4 sm:$0xff]   ;;  %v1316_v61 = vld [vmem:[%s1849_s0 + $0x90] ss:$8 sps:$4 sm:$0xff]  }
  0x15   :  { %832 = vmatprep.subr.bf16.mxu1 %v1260_v22  ;;  %v1314_v60 = vld [vmem:[%s1849_s0 + $0x194] ss:$8 sps:$4 sm:$0xff]   ;;  %v1317_v62 = vld [vmem:[%s1849_s0 + $0x190] ss:$8 sps:$4 sm:$0xff]   ;;  %v1318_v63 = vld [vmem:[%s1849_s0 + $0x84] ss:$8 sps:$4 sm:$0xff]  }
  0x16   :  { %v1320_v0 = vld [vmem:[%s1849_s0 + $0x184] ss:$8 sps:$4 sm:$0xff]   ;;  %v1322_v1 = vld [vmem:[%s1849_s0 + $0x80] ss:$8 sps:$4 sm:$0xff]   ;;  %v1332_v3 = vld [vmem:[%s1849_s0 + $0x274] ss:$8 sps:$4 sm:$0xff]  }
  0x17   :  { %752 = vmatpush1.bf16.msra.mxu0 %v1262_v23  ;;  %v1323_v2 = vld [vmem:[%s1849_s0 + $0x180] ss:$8 sps:$4 sm:$0xff]   ;;  %v1330_v6 = vld [vmem:[%s1849_s0 + $0x270] ss:$8 sps:$4 sm:$0xff]   ;;  %v1335_v7 = vld [vmem:[%s1849_s0 + $0x264] ss:$8 sps:$4 sm:$0xff]  }
  0x18   :  { %833 = vmatpush1.bf16.msra.mxu1 %v1263_v24  ;;  %753 = vmatprep.subr.bf16.mxu0 %v1264_v25  ;;  %v1324_v4 = vld [vmem:[%s1850_s1] ss:$24 sps:$4 sm:$0xff]   ;;  %v1336_v8 = vld [vmem:[%s1850_s1 + $0x34] ss:$24 sps:$4 sm:$0xff]   ;;  %v1340_v13 = vld [vmem:[%s1850_s1 + $0x30] ss:$24 sps:$4 sm:$0xff]  }
  0x19   :  { %834 = vmatprep.subr.bf16.mxu1 %v1266_v26  ;;  %v1327_v5 = vld [vmem:[%s1850_s1 + $0x8] ss:$24 sps:$4 sm:$0xff]   ;;  %v1338_v9 = vld [vmem:[%s1850_s1 + $0x3c] ss:$24 sps:$4 sm:$0xff]   ;;  %v1341_v14 = vld [vmem:[%s1850_s1 + $0x38] ss:$24 sps:$4 sm:$0xff]  }
  0x1a   :  { %v1333_v10 = vld [vmem:[%s1849_s0 + $0x260] ss:$8 sps:$4 sm:$0xff]   ;;  %v1344_v11 = vld [vmem:[%s1849_s0 + $0x254] ss:$8 sps:$4 sm:$0xff]   ;;  %v1342_v16 = vld [vmem:[%s1849_s0 + $0x250] ss:$8 sps:$4 sm:$0xff]  }
  0x1b   :  { %754 = vmatpush1.bf16.msra.mxu0 %v1268_v27  ;;  %v123_v12 = vld [vmem:[%s1851_s2] sm:$0xff]  ;;  %v125_v15 = vld [vmem:[%s1851_s2 + $0x10] sm:$0xff]  ;;  %v124_v21 = vld [vmem:[%s1851_s2 + $0x8] sm:$0xff] }
  0x1c   :  { %835 = vmatpush1.bf16.msra.mxu1 %v1269_v28  ;;  %755 = vmatprep.subr.bf16.mxu0 %v1270_v29  ;;  %v1347_v17 = vld [vmem:[%s1849_s0 + $0x244] ss:$8 sps:$4 sm:$0xff]   ;;  %v1345_v20 = vld [vmem:[%s1849_s0 + $0x240] ss:$8 sps:$4 sm:$0xff]   ;;  %v126_v22 = vld [vmem:[%s1851_s2 + $0x18] sm:$0xff] }
  0x1d   :  { %836 = vmatprep.subr.bf16.mxu1 %v1272_v30  ;;  %134 = vperm.xlu0 %1226, %v123_v12   ;;  %v1348_v18 = vld [vmem:[%s1850_s1 + $0x64] ss:$24 sps:$4 sm:$0xff]   ;;  %v1352_v24 = vld [vmem:[%s1850_s1 + $0x60] ss:$24 sps:$4 sm:$0xff]   ;;  %v1357_v27 = vld [vmem:[%s1850_s1 + $0x94] ss:$24 sps:$4 sm:$0xff]  }
  0x1e   :  { %v1350_v19 = vld [vmem:[%s1850_s1 + $0x6c] ss:$24 sps:$4 sm:$0xff]   ;;  %144 = vperm.xlu1 %1227, %v125_v15   ;;  %v1356_v23 = vld [vmem:[%s1849_s0 + $0x234] ss:$8 sps:$4 sm:$0xff]   ;;  %v1353_v25 = vld [vmem:[%s1850_s1 + $0x68] ss:$24 sps:$4 sm:$0xff]  }
  0x1f   :  { %756 = vmatpush1.bf16.msra.mxu0 %v1274_v31  ;;  %v1354_v26 = vld [vmem:[%s1849_s0 + $0x230] ss:$8 sps:$4 sm:$0xff]   ;;  %v1359_v28 = vld [vmem:[%s1850_s1 + $0x9c] ss:$24 sps:$4 sm:$0xff]   ;;  %v1363_v29 = vld [vmem:[%s1849_s0 + $0x224] ss:$8 sps:$4 sm:$0xff]  }
  0x20   :  { %837 = vmatpush1.bf16.msra.mxu1 %v1275_v32  ;;  %757 = vmatprep.subr.bf16.mxu0 %v1276_v33  ;;  %v1361_v30 = vld [vmem:[%s1849_s0 + $0x220] ss:$8 sps:$4 sm:$0xff]   ;;  %v1368_v33 = vld [vmem:[%s1849_s0 + $0x214] ss:$8 sps:$4 sm:$0xff]  }
  0x21   :  { %838 = vmatprep.subr.bf16.mxu1 %v1278_v34  ;;  %139 = vperm.xlu0 %1226, %v124_v21   ;;  %v127_v31 = vld [vmem:[%s1851_s2 + $0x20] sm:$0xff]  ;;  %v128_v32 = vld [vmem:[%s1851_s2 + $0x28] sm:$0xff] }
  0x22   :  { %149 = vperm.xlu1 %1227, %v126_v22   ;;  %v39_v34 = vld [vmem:[%s1850_s1 + $0xc0] sm:$0xff] }
  0x23   :  { %758 = vmatpush2.bf16.msra.mxu0 %v1280_v35  ;;  %v40_v35 = vld [vmem:[%s1850_s1 + $0xc8] sm:$0xff]  ;;  %v1383_v52 = vld [vmem:[%s1850_s1 + $0xa4] ss:$24 sps:$4 sm:$0xff]  }
  0x24   :  { %839 = vmatpush2.bf16.msra.mxu1 %v1281_v36  ;;  %759 = vmatprep.subr.bf16.mxu0 %v1282_v37  ;;  %v1364_v36 = vld [vmem:[%s1850_s1 + $0x90] ss:$24 sps:$4 sm:$0xff]  }
  0x25   :  { %840 = vmatprep.subr.bf16.mxu1 %v1284_v38  ;;  %v1365_v37 = vld [vmem:[%s1850_s1 + $0x98] ss:$24 sps:$4 sm:$0xff]   ;;  %154 = vperm.xlu0 %1226, %v127_v31  }
  0x26   :  { %159 = vperm.xlu1 %1227, %v128_v32   ;;  %v1366_v38 = vld [vmem:[%s1849_s0 + $0x210] ss:$8 sps:$4 sm:$0xff]  }
  0x27   :  { %760 = vmatpush2.bf16.msra.mxu0 %v1286_v39  ;;  %v1096_v39 = vcombine.high %v39_v34, %v39_v34 }
  0x28   :  { %841 = vmatpush2.bf16.msra.mxu1 %v1287_v40  ;;  %761 = vmatprep.subr.bf16.mxu0 %v1288_v41  ;;  %v1098_v40 = vcombine.high %v40_v35, %v40_v35  ;;  %v1375_v41 = vld [vmem:[%s1849_s0 + $0x204] ss:$8 sps:$4 sm:$0xff]  }
  0x29   :  { %842 = vmatprep.subr.bf16.mxu1 %v1290_v42  ;;  %v122_v42 = vld [vmem:[%s1849_s0 + $0x280] sm:$0xff] }
  0x2b   :  { %762 = vmatpush2.bf16.msra.mxu0 %v1292_v43  ;;  %v1373_v43 = vld [vmem:[%s1849_s0 + $0x200] ss:$8 sps:$4 sm:$0xff]  }
  0x2c   :  { %843 = vmatpush2.bf16.msra.mxu1 %v1293_v44  ;;  %763 = vmatprep.subr.bf16.mxu0 %v1294_v45  ;;  %v129_v44 = vld [vmem:[%s1851_s2 + $0x30] sm:$0xff]  ;;  %v130_v45 = vld [vmem:[%s1851_s2 + $0x38] sm:$0xff] }
  0x2d   :  { %844 = vmatprep.subr.bf16.mxu1 %v1296_v46  ;;  %v1182_v46 = vcombine.high %v122_v42, %v122_v42  ;;  %164 = vperm.xlu0 %1226, %v129_v44  }
  0x2e   :  { %169 = vperm.xlu1 %1227, %v130_v45  }
  0x2f   :  { %764 = vmatpush2.bf16.msra.mxu0 %v1298_v47  ;;  %v1181_v47 = vcombine.low %v122_v42, %v122_v42 }
  0x30   :  { %845 = vmatpush2.bf16.msra.mxu1 %v1299_v48  ;;  %765 = vmatprep.subr.bf16.mxu0 %v1300_v49  ;;  %v1095_v48 = vcombine.low %v39_v34, %v39_v34  ;;  %v1097_v49 = vcombine.low %v40_v35, %v40_v35 }
  0x31   :  { %846 = vmatprep.subr.bf16.mxu1 %v1302_v51  ;;  %v736_v50 = vsel %vm734_vm0, %v1181_v47, 0  ;;  %v1380_v51 = vld [vmem:[%s1850_s1 + $0x14] ss:$24 sps:$4 sm:$0xff]  }
  0x33   :  { %766 = vmatpush2.bf16.msra.mxu0 %v1304_v53  ;;  %v131_v53 = vld [vmem:[%s1851_s2 + $0x40] sm:$0xff] }
  0x34   :  { %847 = vmatpush2.bf16.msra.mxu1 %v1305_v54  ;;  %767 = vmatprep.subr.bf16.mxu0 %v1306_v55  ;;  %v41_v54 = vld [vmem:[%s1850_s1 + $0xd0] sm:$0xff] }
  0x35   :  { %848 = vmatprep.subr.bf16.mxu1 %v1308_v56  ;;  %174 = vperm.xlu0 %1226, %v131_v53   ;;  %v1378_v55 = vld [vmem:[%s1850_s1 + $0x10] ss:$24 sps:$4 sm:$0xff]   ;;  %v1381_v56 = vld [vmem:[%s1850_s1 + $0xa0] ss:$24 sps:$4 sm:$0xff]  }
  0x37   :  { %768 = vmatpush2.bf16.msra.mxu0 %v1310_v57  ;;  %v1384_v57 = vld [vmem:[%s1850_s1 + $0x44] ss:$24 sps:$4 sm:$0xff]  }
  0x38   :  { %849 = vmatpush2.bf16.msra.mxu1 %v1311_v58  ;;  %769 = vmatprep.subr.bf16.mxu0 %v1312_v59  ;;  %v1100_v58 = vcombine.high %v41_v54, %v41_v54  ;;  %v1387_v59 = vld [vmem:[%s1850_s1 + $0x40] ss:$24 sps:$4 sm:$0xff]  }
  0x39   :  { %850 = vmatprep.subr.bf16.mxu1 %v1314_v60  ;;  %v1099_v60 = vcombine.low %v41_v54, %v41_v54 }
  0x3b   :  { %770 = vmatpush2.bf16.msra.mxu0 %v1316_v61  ;;  %v1389_v61 = vld [vmem:[%s1850_s1 + $0x74] ss:$24 sps:$4 sm:$0xff]  }
  0x3c   :  { %851 = vmatpush2.bf16.msra.mxu1 %v1317_v62  ;;  %771 = vmatprep.subr.bf16.mxu0 %v1318_v63  ;;  %v1391_v62 = vld [vmem:[%s1850_s1 + $0x70] ss:$24 sps:$4 sm:$0xff]  }
  0x3d   :  { %852 = vmatprep.subr.bf16.mxu1 %v1320_v0 }
  0x3f   :  { %772 = vmatpush2.bf16.msra.mxu0 %v1322_v1 }
  0x40   :  { %853 = vmatpush2.bf16.msra.mxu1 %v1323_v2  ;;  %903 = vmatprep.subr.bf16.mxu0 %v1332_v3 }
  0x41   :  { %1207 = vmatprep.subr.bf16.mxu1 %v1332_v3 }
  0x42   :  { %774 = vmatmul.mubr.bf16.vlgmr.msra.gmra.mxu0 %v1324_v4 }
  0x43   :  { %855 = vmatmul.mubr.bf16.vlgmr.msra.gmra.mxu1 %v1327_v5  ;;  %904 = vmatpush1.bf16.msra.mxu0 %v1330_v6 }
  0x44   :  { %1216 = vmatpush1.bf16.msra.mxu1 %v1330_v6  ;;  %905 = vmatprep.subr.bf16.mxu0 %v1335_v7 }
  0x45   :  { %783 = vmatprep.mubr.bf16.mxu0 %v1336_v8  ;;  %864 = vmatprep.mubr.bf16.mxu1 %v1338_v9 }
  0x46   :  { %1208 = vmatprep.subr.bf16.mxu1 %v1335_v7 }
  0x47   :  { %906 = vmatpush1.bf16.msra.mxu0 %v1333_v10 }
  0x48   :  { %1217 = vmatpush1.bf16.msra.mxu1 %v1333_v10  ;;  %907 = vmatprep.subr.bf16.mxu0 %v1344_v11 }
  0x49   :  { %1209 = vmatprep.subr.bf16.mxu1 %v1344_v11 }
  0x4a   :  { %784 = vmatmul.mubr.bf16.gmra.mxu0 %v1340_v13 }
  0x4b   :  { %865 = vmatmul.mubr.bf16.gmra.mxu1 %v1341_v14  ;;  %908 = vmatpush1.bf16.msra.mxu0 %v1342_v16 }
  0x4c   :  { %1218 = vmatpush1.bf16.msra.mxu1 %v1342_v16  ;;  %909 = vmatprep.subr.bf16.mxu0 %v1347_v17 }
  0x4d   :  { %793 = vmatprep.mubr.bf16.mxu0 %v1348_v18  ;;  %874 = vmatprep.mubr.bf16.mxu1 %v1350_v19 }
  0x4e   :  { %1210 = vmatprep.subr.bf16.mxu1 %v1347_v17 }
  0x4f   :  { %910 = vmatpush1.bf16.msra.mxu0 %v1345_v20 }
  0x50   :  { %1219 = vmatpush1.bf16.msra.mxu1 %v1345_v20  ;;  %911 = vmatprep.subr.bf16.mxu0 %v1356_v23 }
  0x51   :  { %1211 = vmatprep.subr.bf16.mxu1 %v1356_v23 }
  0x52   :  { %794 = vmatmul.mubr.bf16.gmra.mxu0 %v1352_v24 }
  0x53   :  { %875 = vmatmul.mubr.bf16.gmra.mxu1 %v1353_v25  ;;  %912 = vmatpush1.bf16.msra.mxu0 %v1354_v26 }
  0x54   :  { %1220 = vmatpush1.bf16.msra.mxu1 %v1354_v26  ;;  %803 = vmatprep.mubr.bf16.mxu0 %v1357_v27 }
  0x55   :  { %884 = vmatprep.mubr.bf16.mxu1 %v1359_v28  ;;  %913 = vmatprep.subr.bf16.mxu0 %v1363_v29 }
  0x56   :  { %1212 = vmatprep.subr.bf16.mxu1 %v1363_v29 }
  0x57   :  { %914 = vmatpush1.bf16.msra.mxu0 %v1361_v30 }
  0x58   :  { %1221 = vmatpush1.bf16.msra.mxu1 %v1361_v30  ;;  %915 = vmatprep.subr.bf16.mxu0 %v1368_v33 }
  0x59   :  { %1213 = vmatprep.subr.bf16.mxu1 %v1368_v33 }
  0x5a   :  { %804 = vmatmul.mubr.bf16.gmra.mxu0 %v1364_v36 }
  0x5b   :  { %885 = vmatmul.mubr.bf16.gmra.mxu1 %v1365_v37  ;;  %916 = vmatpush1.bf16.msra.mxu0 %v1366_v38 }
  0x5c   :  { %1222 = vmatpush1.bf16.msra.mxu1 %v1366_v38  ;;  %813 = vmatprep.mubr.bf16.mxu0 %v1096_v39 }
  0x5d   :  { %894 = vmatprep.mubr.bf16.mxu1 %v1098_v40  ;;  %917 = vmatprep.subr.bf16.mxu0 %v1375_v41 }
  0x5e   :  { %1214 = vmatprep.subr.bf16.mxu1 %v1375_v41 }
  0x5f   :  { %918 = vmatpush1.bf16.msra.mxu0 %v1373_v43 }
  0x60   :  { %1223 = vmatpush1.bf16.msra.mxu1 %v1373_v43  ;;  %1183 = vmatprep.subr.msk.bf16.mxu0 %vm734_vm0, %v1182_v46 }
  0x61   :  { %1215 = vmatprep.subr.msk.bf16.mxu1 %vm734_vm0, %v1182_v46 }
  0x62   :  { %814 = vmatmul.mubr.bf16.gmra.mxu0 %v1095_v48 }
  0x63   :  { %895 = vmatmul.mubr.bf16.gmra.mxu1 %v1097_v49  ;;  %934 = vmatpush2.bf16.msra.mxu0 %v736_v50 }
  0x64   :  { %1224 = vmatpush2.bf16.msra.mxu1 %v736_v50  ;;  %1184 = vmatprep.mubr.msk.bf16.mxu0 %vm718_vm1, %v1380_v51 }
  0x65   :  { %1187 = vmatprep.mubr.msk.bf16.mxu1 %vm718_vm1, %v1383_v52 }
  0x6a   :  { %936 = vmatmul.mubr.bf16.vlgmr.msra.gmra.mxu0 %v1378_v55 }
  0x6b   :  { %966 = vmatmul.mubr.bf16.vlgmr.msra.gmra.mxu1 %v1381_v56  ;;  %1185 = vmatprep.mubr.msk.bf16.mxu0 %vm718_vm1, %v1384_v57 }
  0x6c   :  { %1188 = vmatprep.mubr.msk.bf16.mxu1 %vm718_vm1, %v1100_v58 }
  0x72   :  { %946 = vmatmul.mubr.bf16.gmra.mxu0 %v1387_v59 }
  0x73   :  { %976 = vmatmul.mubr.bf16.gmra.mxu1 %v1099_v60  ;;  %1186 = vmatprep.mubr.msk.bf16.mxu0 %vm718_vm1, %v1389_v61 }
  0x7a   :  { %956 = vmatmul.mubr.bf16.gmra.mxu0 %v1391_v62 }
  0x98   :  { %v135_v17 = vpop.permute.xlu0 %134 }
  0x99   :  { %v145_v25 = vpop.permute.xlu1 %144 }
  0x9c   :  { %v140_v24 = vpop.permute.xlu0 %139 }
  0x9d   :  { %v150_v33 = vpop.permute.xlu1 %149 }
  0xa0   :  { %v1799_v30 = vpop.permute.xlu0 %154 }
  0xa1   :  { %v1801_v39 = vpop.permute.xlu1 %159 }
  0xa8   :  { %v165_v36 = vpop.permute.xlu0 %164 }
  0xa9   :  { %v170_v48 = vpop.permute.xlu1 %169 }
  0xb0   :  { %v175_v54 = vpop.permute.xlu0 %174 }
 0x102   :  { %v775_v63 = vpop.f32.mrf.mxu0 }
 0x103   :  { %v856_v0 = vpop.f32.mrf.mxu1  ;;  %v776_v42 = vadd.f32 %v775_v63, %v135_v17 }
 0x104   :  { %v777_v1 = vpop.f32.mrf.mxu0 }
 0x105   :  { %v858_v2 = vpop.f32.mrf.mxu1  ;;  %v778_v46 = vadd.f32 %v777_v1, %v135_v17  ;;  %v857_v52 = vadd.f32 %v856_v0, %v776_v42 }
 0x106   :  { %v779_v3 = vpop.f32.mrf.mxu0 }
 0x107   :  { %v860_v4 = vpop.f32.mrf.mxu1  ;;  %v780_v49 = vadd.f32 %v779_v3, %v140_v24  ;;  %v859_v60 = vadd.f32 %v858_v2, %v778_v46 }
 0x108   :  { %v781_v5 = vpop.f32.mrf.mxu0 }
 0x109   :  { %v862_v6 = vpop.f32.mrf.mxu1  ;;  %v782_v53 = vadd.f32 %v781_v5, %v140_v24 }
 0x10a   :  { %v785_v7 = vpop.f32.mrf.mxu0 }
 0x10b   :  { %v1769_v8 = vpop.f32.mrf.mxu1  ;;  %v786_v56 = vadd.f32 %v785_v7, %v145_v25 }
 0x10c   :  { %v1771_v9 = vpop.f32.mrf.mxu0 }
 0x10d   :  { %v1773_v10 = vpop.f32.mrf.mxu1  ;;  %v867_v0 = vadd.f32 %v1769_v8, %v786_v56  ;;  %v788_v5 = vadd.f32 %v1771_v9, %v145_v25 }
 0x10e   :  { %v1775_v11 = vpop.f32.mrf.mxu0 }
 0x10f   :  { %v1777_v12 = vpop.f32.mrf.mxu1  ;;  %v869_v25 = vadd.f32 %v1773_v10, %v788_v5 }
 0x110   :  { %v1779_v13 = vpop.f32.mrf.mxu0 }
 0x111   :  { %v1781_v14 = vpop.f32.mrf.mxu1 }
 0x112   :  { %v1783_v15 = vpop.f32.mrf.mxu0 }
 0x113   :  { %v1785_v16 = vpop.f32.mrf.mxu1 }
 0x114   :  { %v1787_v18 = vpop.f32.mrf.mxu0 }
 0x115   :  { %v1789_v19 = vpop.f32.mrf.mxu1 }
 0x116   :  { %v1791_v20 = vpop.f32.mrf.mxu0 }
 0x117   :  { %v1793_v21 = vpop.f32.mrf.mxu1 }
 0x118   :  { %v1795_v22 = vpop.f32.mrf.mxu0 }
 0x119   :  { %v1797_v23 = vpop.f32.mrf.mxu1  ;;  %v802_v5 = vadd.f32 %v1795_v22, %v1801_v39 }
 0x11a   :  { %v805_v26 = vpop.f32.mrf.mxu0 }
 0x11b   :  { %v886_v27 = vpop.f32.mrf.mxu1  ;;  %v806_v43 = vadd.f32 %v805_v26, %v165_v36  ;;  %v861_v26 = vadd.f32 %v860_v4, %v780_v49  ;;  %v790_v4 = vadd.f32 %v1775_v11, %v150_v33 }
 0x11c   :  { %v807_v28 = vpop.f32.mrf.mxu0 }
 0x11d   :  { %v888_v29 = vpop.f32.mrf.mxu1  ;;  %v808_v47 = vadd.f32 %v807_v28, %v165_v36  ;;  %v887_v55 = vadd.f32 %v886_v27, %v806_v43  ;;  %v863_v28 = vadd.f32 %v862_v6, %v782_v53  ;;  %v871_v56 = vadd.f32 %v1777_v12, %v790_v4 }
 0x11e   :  { %v809_v31 = vpop.f32.mrf.mxu0 }
 0x11f   :  { %v890_v32 = vpop.f32.mrf.mxu1  ;;  %v810_v57 = vadd.f32 %v809_v31, %v170_v48  ;;  %v889_v61 = vadd.f32 %v888_v29, %v808_v47 }
 0x120   :  { %v811_v34 = vpop.f32.mrf.mxu0 }
 0x121   :  { %v892_v35 = vpop.f32.mrf.mxu1  ;;  %v891_v7 = vadd.f32 %v890_v32, %v810_v57 }
 0x122   :  { %v815_v37 = vpop.f32.mrf.mxu0 }
 0x123   :  { %v896_v38 = vpop.f32.mrf.mxu1  ;;  %v816_v3 = vadd.f32 %v815_v37, %v175_v54 }
 0x124   :  { %v817_v40 = vpop.f32.mrf.mxu0 }
 0x125   :  { %v898_v41 = vpop.f32.mrf.mxu1  ;;  %v818_v24 = vadd.f32 %v817_v40, %v175_v54  ;;  %v897_v9 = vadd.f32 %v896_v38, %v816_v3 }
 0x126   :  { %v819_v44 = vpop.f32.mrf.mxu0 }
 0x127   :  { %v900_v45 = vpop.f32.mrf.mxu1  ;;  %v812_v44 = vadd.f32 %v811_v34, %v170_v48  ;;  %v792_v48 = vadd.f32 %v1779_v13, %v150_v33  ;;  %v899_v11 = vadd.f32 %v898_v41, %v818_v24 }
 0x128   :  { %v820_v50 = vpop.f32.mrf.mxu0 }
 0x129   :  { %v901_v51 = vpop.f32.mrf.mxu1  ;;  %v893_v34 = vadd.f32 %v892_v35, %v812_v44 }
 0x12a   :  { %v937_v58 = vpop.f32.mrf.mxu0 }
 0x12b   :  { %v967_v59 = vpop.f32.mrf.mxu1  ;;  %v938_v62 = vadd.f32 %v937_v58, %v857_v52  ;;  %v796_v52 = vadd.f32 %v1783_v15, %v1799_v30  ;;  %v873_v15 = vadd.f32 %v1781_v14, %v792_v48  ;;  %v798_v58 = vadd.f32 %v1787_v18, %v1799_v30 }
 0x12c   :  { %v968_v63 = vadd.f32 %v967_v59, %v887_v55  ;;  %v939_v1 = vpop.f32.mrf.mxu0  ;;  %v800_v30 = vadd.f32 %v1791_v20, %v1801_v39 }
 0x12d   :  { %v969_v17 = vpop.f32.mrf.mxu1  ;;  %v940_v36 = vadd.f32 %v939_v1, %v859_v60  ;;  %v984_v2 = vmax.f32 %v938_v62, 0.0  ;;  %v877_v14 = vadd.f32 %v1785_v16, %v796_v52 }
 0x12e   :  { %v970_v45 = vadd.f32 %v969_v17, %v889_v61  ;;  %v941_v27 = vpop.f32.mrf.mxu0  ;;  %v996_v29 = vmax.f32 %v968_v63, 0.0 }
 0x12f   :  { %v971_v31 = vpop.f32.mrf.mxu1  ;;  %v985_v42 = vmax.f32 %v940_v36, 0.0  ;;  %v942_v46 = vadd.f32 %v941_v27, %v861_v26  ;;  %v881_v27 = vadd.f32 %v1793_v21, %v800_v30 }
 0x130   :  { %v997_v43 = vmax.f32 %v970_v45, 0.0  ;;  %v972_v6 = vadd.f32 %v971_v31, %v891_v7  ;;  %v943_v37 = vpop.f32.mrf.mxu0  ;;  %v879_v45 = vadd.f32 %v1789_v19, %v798_v58 }
 0x131   :  { %v973_v47 = vpop.f32.mrf.mxu1  ;;  %v1198_v8 = vpack.c.bf16 %v985_v42, %v984_v2  ;;  %v944_v32 = vadd.f32 %v943_v37, %v863_v28  ;;  %v986_v35 = vmax.f32 %v942_v46, 0.0 }
 0x132   :  { %v1204_v49 = vpack.c.bf16 %v997_v43, %v996_v29  ;;  %v974_v40 = vadd.f32 %v973_v47, %v893_v34  ;;  %v947_v50 = vpop.f32.mrf.mxu0  ;;  %v998_v10 = vmax.f32 %v972_v6, 0.0  ;;  %v883_v29 = vadd.f32 %v1797_v23, %v802_v5 }
 0x133   :  { %v977_v51 = vpop.f32.mrf.mxu1  ;;  %1058 = vst [vmem:[%s1852_s3] sm:$0xff] %v1198_v8  ;;  %v948_v13 = vadd.f32 %v947_v50, %v867_v0  ;;  %v987_v38 = vmax.f32 %v944_v32, 0.0 }
 0x134   :  { %1064 = vst [vmem:[%s1852_s3 + $0x30] sm:$0xff] %v1204_v49  ;;  %v978_v33 = vadd.f32 %v977_v51, %v897_v9  ;;  %v999_v53 = vmax.f32 %v974_v40, 0.0  ;;  %v949_v54 = vpop.f32.mrf.mxu0 }
 0x135   :  { %v979_v55 = vpop.f32.mrf.mxu1  ;;  %v950_v41 = vadd.f32 %v949_v54, %v869_v25  ;;  %v1199_v59 = vpack.c.bf16 %v987_v38, %v986_v35  ;;  %v988_v61 = vmax.f32 %v948_v13, 0.0 }
 0x136   :  { %v980_v57 = vadd.f32 %v979_v55, %v899_v11  ;;  %v1205_v60 = vpack.c.bf16 %v999_v53, %v998_v10  ;;  %v951_v62 = vpop.f32.mrf.mxu0  ;;  %v1000_v26 = vmax.f32 %v978_v33, 0.0 }
 0x137   :  { %v981_v63 = vpop.f32.mrf.mxu1  ;;  %v989_v44 = vmax.f32 %v950_v41, 0.0  ;;  %v952_v17 = vadd.f32 %v951_v62, %v871_v56  ;;  %1059 = vst [vmem:[%s1852_s3 + $0x8] sm:$0xff] %v1199_v59 }
 0x138   :  { %v1001_v1 = vmax.f32 %v980_v57, 0.0  ;;  %1065 = vst [vmem:[%s1852_s3 + $0x38] sm:$0xff] %v1205_v60  ;;  %v953_v12 = vpop.f32.mrf.mxu0 }
 0x139   :  { %v982_v18 = vpop.f32.mrf.mxu1  ;;  %v1200_v28 = vpack.c.bf16 %v989_v44, %v988_v61  ;;  %v954_v36 = vadd.f32 %v953_v12, %v873_v15  ;;  %v990_v16 = vmax.f32 %v952_v17, 0.0 }
 0x13a   :  { %v1206_v3 = vpack.c.bf16 %v1001_v1, %v1000_v26  ;;  %v957_v0 = vpop.f32.mrf.mxu0 }
 0x13b   :  { %1060 = vst [vmem:[%s1852_s3 + $0x10] sm:$0xff] %v1200_v28  ;;  %v991_v7 = vmax.f32 %v954_v36, 0.0  ;;  %v958_v20 = vadd.f32 %v957_v0, %v877_v14 }
 0x13c   :  { %1066 = vst [vmem:[%s1852_s3 + $0x40] sm:$0xff] %v1206_v3  ;;  %v959_v24 = vpop.f32.mrf.mxu0 }
 0x13d   :  { %v1201_v31 = vpack.c.bf16 %v991_v7, %v990_v16  ;;  %v960_v19 = vadd.f32 %v959_v24, %v879_v45  ;;  %v992_v22 = vmax.f32 %v958_v20, 0.0 }
 0x13e   :  { %v961_v2 = vpop.f32.mrf.mxu0 }
 0x13f   :  { %1061 = vst [vmem:[%s1852_s3 + $0x18] sm:$0xff] %v1201_v31  ;;  %v993_v39 = vmax.f32 %v960_v19, 0.0  ;;  %v962_v42 = vadd.f32 %v961_v2, %v881_v27 }
 0x140   :  { %v963_v43 = vpop.f32.mrf.mxu0 }
 0x141   :  { %v1202_v4 = vpack.c.bf16 %v993_v39, %v992_v22  ;;  %v964_v34 = vadd.f32 %v963_v43, %v883_v29  ;;  %v994_v21 = vmax.f32 %v962_v42, 0.0 }
 0x143   :  { %1062 = vst [vmem:[%s1852_s3 + $0x20] sm:$0xff] %v1202_v4  ;;  %v995_v46 = vmax.f32 %v964_v34, 0.0 }
 0x145   :  { %v1203_v6 = vpack.c.bf16 %v995_v46, %v994_v21 }
 0x147   :  { %1063 = vst [vmem:[%s1852_s3 + $0x28] sm:$0xff] %v1203_v6 }

// kernel: _lambda_.24
= control target key start
LH: loop header
LB: loop body
LE: loop exit
PB: predicated region body
PF: predicated region fallthrough
CT: control target
= control target key end

     0   :  { %s515_s9 = smov 0   ;;  %s517_s10 = smov 0   ;;  %s559_s0 = inlined_call_operand.vmem [shape: bf16[2,40,128], index: 0, kind: input, shape index: {}]   ;;  %s560_s1 = inlined_call_operand.vmem [shape: f32[2,40,1], index: 1, kind: input, shape index: {}]   ;;  %s561_s2 = inlined_call_operand.vmem [shape: bf16[2,40,128], index: 2, kind: output, shape index: {}]  }
   0x1   :  { %s519_s11 = smov 0  }
   0x2 LB: > { %s24_s12 = sadd.s32 1, %s493_s10  ;;  %p390_p0 = scmp.ge.s32.totalorder %s497_s11, 1  ;;  %s497_s11 = sphi %s519_s11, %s12_s11   ;;  %s493_s10 = sphi %s517_s10, %s563_s10   ;;  %s489_s9 = sphi %s515_s9, %s562_s9  }
   0x3   : > { %p26_p1 = scmp.ge.s32.totalorder %s24_s12, 2  ;;  %p141_p2 = scmp.lt.s32.totalorder %s497_s11, 3 }
   0x5   : > { %s565_s12 = smov (%p26_p1, %s24_s12), 0  ;;  %p142_p3 = pnand %p390_p0, %p141_p2 }
   0x6   : > { %p174_p4 = scmp.lt.s32.totalorder (!%p142_p3), %s489_s9, 1 }
   0x7   : > { %145 = sbr.rel (%p142_p3) target bundleno = 188 (0xbc), region = 28 }
   0xc   : > { %v499_v0 = vmov 0   ;;  %s567_s9 = smov (!%p174_p4, %s489_s9), 1 }
   0xd   : > { %454 = vset.pattern.permute.xlu1 %v499_v0  ;;  %453 = vset.pattern.permute.xlu0 %v499_v0  ;;  %s427_s13 = smul.u32 40, %s567_s9 }
   0xe   : > { %s426_s17 = smul.u32 20, %s567_s9 }
   0xf   : > { %s186_s16 = scalar_lea.vmem %s560_s1, %s427_s13 }
  0x10   : > { %v207_v1 = vld [vmem:[%s186_s16 + $0x10] sm:$0xff]  ;;  %v205_v2 = vld [vmem:[%s186_s16] sm:$0xff]  ;;  %v208_v3 = vld [vmem:[%s186_s16 + $0x18] sm:$0xff]  ;;  %s181_s20 = scalar_lea.vmem %s559_s0, %s426_s17  ;;  %s194_s23 = scalar_lea.vmem %s561_s2, %s426_s17 }
  0x11   : > { %222 = vperm.xlu1 %454, %v207_v1   ;;  %212 = vperm.xlu0 %453, %v205_v2   ;;  %v206_v4 = vld [vmem:[%s186_s16 + $0x8] sm:$0xff]  ;;  %v209_v5 = vld [vmem:[%s186_s16 + $0x20] sm:$0xff]  ;;  %v199_v16 = vld [vmem:[%s181_s20 + $0x10] sm:$0xf] }
  0x12   : > { %v424_v6 = vld [vmem:[%s181_s20 + $0x8] sm:$0xff]   ;;  %v407_v7 = vld [vmem:[%s181_s20] sm:$0xff]   ;;  %v204_v21 = vunpack.c.l.bf16 %v199_v16 }
  0x13   : > { %v412_v8 = vunpack.c.l.bf16 %v424_v6  ;;  %v408_v9 = vunpack.c.l.bf16 %v407_v7  ;;  %v413_v14 = vunpack.c.h.bf16 %v424_v6  ;;  %v409_v15 = vunpack.c.h.bf16 %v407_v7 }
  0x15   : > { %227 = vperm.xlu1 %454, %v208_v3   ;;  %217 = vperm.xlu0 %453, %v206_v4  }
  0x19   : > { %232 = vperm.xlu0 %453, %v209_v5  }
  0x8c   : > { %v223_v10 = vpop.permute.xlu1 %222  ;;  %v213_v11 = vpop.permute.xlu0 %212 }
  0x8d   : > { %v237_v12 = vmul.f32 %v412_v8, %v223_v10  ;;  %v235_v13 = vmul.f32 %v408_v9, %v213_v11 }
  0x8f   : > { %v242_v17 = vsub.f32 0.0, %v237_v12  ;;  %v240_v18 = vsub.f32 0.0, %v235_v13 }
  0x90   : > { %v228_v19 = vpop.permute.xlu1 %227  ;;  %v218_v20 = vpop.permute.xlu0 %217 }
  0x91   : > { %v249_v22 = vmul.f32 1.442695, %v242_v17  ;;  %v245_v23 = vmul.f32 1.442695, %v240_v18  ;;  %v238_v24 = vmul.f32 %v413_v14, %v228_v19  ;;  %v236_v25 = vmul.f32 %v409_v15, %v218_v20 }
  0x93   : > { %455 = vpow2.f32 %v249_v22  ;;  %v243_v26 = vsub.f32 0.0, %v238_v24  ;;  %v241_v27 = vsub.f32 0.0, %v236_v25 }
  0x94   : > { %457 = vpow2.f32 %v245_v23  ;;  %v233_v28 = vpop.permute.xlu0 %232 }
  0x95   : > { %v251_v29 = vmul.f32 1.442695, %v243_v26  ;;  %v247_v30 = vmul.f32 1.442695, %v241_v27  ;;  %v239_v31 = vmul.f32 %v233_v28, %v204_v21 }
  0x97   : > { %459 = vpow2.f32 %v251_v29  ;;  %v244_v32 = vsub.f32 0.0, %v239_v31 }
  0x98   : > { %461 = vpow2.f32 %v247_v30 }
  0x99   : > { %v253_v33 = vmul.f32 1.442695, %v244_v32 }
  0x9b   : > { %463 = vpow2.f32 %v253_v33 }
  0xa0   : > { %v456_v34 = vpop.eup %455 }
  0xa1   : > { %v458_v35 = vpop.eup %457  ;;  %v257_v36 = vadd.f32 1.0, %v456_v34 }
  0xa2   : > { %v255_v37 = vadd.f32 1.0, %v458_v35 }
  0xa3   : > { %465 = vrcp.f32 %v257_v36 }
  0xa4   : > { %v460_v38 = vpop.eup %459  ;;  %467 = vrcp.f32 %v255_v37 }
  0xa5   : > { %v462_v39 = vpop.eup %461  ;;  %v258_v40 = vadd.f32 1.0, %v460_v38 }
  0xa6   : > { %v256_v41 = vadd.f32 1.0, %v462_v39 }
  0xa7   : > { %469 = vrcp.f32 %v258_v40 }
  0xa8   : > { %v464_v42 = vpop.eup %463  ;;  %471 = vrcp.f32 %v256_v41 }
  0xa9   : > { %v259_v43 = vadd.f32 1.0, %v464_v42 }
  0xab   : > { %473 = vrcp.f32 %v259_v43 }
  0xb0   : > { %v466_v44 = vpop.eup %465 }
  0xb1   : > { %v468_v45 = vpop.eup %467 }
  0xb4   : > { %v470_v46 = vpop.eup %469 }
  0xb5   : > { %v472_v47 = vpop.eup %471  ;;  %v422_v48 = vpack.c.bf16 %v470_v46, %v466_v44 }
  0xb6   : > { %v417_v49 = vpack.c.bf16 %v472_v47, %v468_v45 }
  0xb7   : > { %425 = vst [vmem:[%s194_s23 + $0x8] sm:$0xff] %v422_v48  }
  0xb8   : > { %v474_v50 = vpop.eup %473  ;;  %418 = vst [vmem:[%s194_s23] sm:$0xff] %v417_v49  }
  0xb9   : > { %v405_v51 = vpack.c.bf16 %v474_v50, %v474_v50 }
  0xbb   : > { %290 = vst [vmem:[%s194_s23 + $0x10] sm:$0xf] %v405_v51 }
  0xbc PF: > { %s12_s11 = sadd.s32 1, %s497_s11   ;;  %s562_s9 = smov %s493_s10 }
  0xbd   : > { %p9_p5 = scmp.ge.s32.totalorder %s12_s11, 4   ;;  %s563_s10 = smov %s565_s12 }
  0xbf   :  { %11 = sbr.rel (!%p9_p5) target bundleno = 2 (0x2), region = 61 }

// kernel: _lambda_.33
= control target key start
LH: loop header
LB: loop body
LE: loop exit
PB: predicated region body
PF: predicated region fallthrough
CT: control target
= control target key end

     0   :  { %v964_v1 = vmov 0   ;;  %vm533_vm0 = vcmask 523264   ;;  %s1259_s0 = inlined_call_operand.vmem [shape: bf16[576,256], index: 0, kind: input, shape index: {}]   ;;  %s1260_s1 = inlined_call_operand.vmem [shape: bf16[32,576], index: 1, kind: input, shape index: {}]   ;;  %s1261_s2 = inlined_call_operand.vmem [shape: f32[32,1], index: 2, kind: input, shape index: {}]   ;;  %s1262_s3 = inlined_call_operand.vmem [shape: bf16[32,256], index: 3, kind: output, shape index: {}]  }
   0x1   :  { %v842_v0 = vld [vmem:[%s1259_s0 + $0x74] ss:$8 sps:$4 sm:$0xff]   ;;  %840 = vset.pattern.permute.xlu0 %v964_v1  ;;  %841 = vset.pattern.permute.xlu1 %v964_v1  ;;  %v846_v3 = vld [vmem:[%s1259_s0 + $0x70] ss:$8 sps:$4 sm:$0xff]   ;;  %v848_v5 = vld [vmem:[%s1259_s0 + $0x64] ss:$8 sps:$4 sm:$0xff]  }
   0x2   :  { %v844_v2 = vld [vmem:[%s1259_s0 + $0x174] ss:$8 sps:$4 sm:$0xff]   ;;  %540 = vmatprep.subr.bf16.mxu0 %v842_v0  ;;  %v847_v4 = vld [vmem:[%s1259_s0 + $0x170] ss:$8 sps:$4 sm:$0xff]   ;;  %v850_v6 = vld [vmem:[%s1259_s0 + $0x164] ss:$8 sps:$4 sm:$0xff]  }
   0x3   :  { %593 = vmatprep.subr.bf16.mxu1 %v844_v2  ;;  %541 = vmatpush1.bf16.msra.mxu0 %v846_v3  ;;  %v852_v7 = vld [vmem:[%s1259_s0 + $0x60] ss:$8 sps:$4 sm:$0xff]   ;;  %v854_v9 = vld [vmem:[%s1259_s0 + $0x54] ss:$8 sps:$4 sm:$0xff]   ;;  %v858_v11 = vld [vmem:[%s1259_s0 + $0x50] ss:$8 sps:$4 sm:$0xff]  }
   0x4   :  { %594 = vmatpush1.bf16.msra.mxu1 %v847_v4  ;;  %542 = vmatprep.subr.bf16.mxu0 %v848_v5  ;;  %v853_v8 = vld [vmem:[%s1259_s0 + $0x160] ss:$8 sps:$4 sm:$0xff]   ;;  %v856_v10 = vld [vmem:[%s1259_s0 + $0x154] ss:$8 sps:$4 sm:$0xff]   ;;  %v859_v12 = vld [vmem:[%s1259_s0 + $0x150] ss:$8 sps:$4 sm:$0xff]  }
   0x5   :  { %595 = vmatprep.subr.bf16.mxu1 %v850_v6  ;;  %v860_v13 = vld [vmem:[%s1259_s0 + $0x44] ss:$8 sps:$4 sm:$0xff]   ;;  %v864_v15 = vld [vmem:[%s1259_s0 + $0x40] ss:$8 sps:$4 sm:$0xff]   ;;  %v866_v17 = vld [vmem:[%s1259_s0 + $0x34] ss:$8 sps:$4 sm:$0xff]  }
   0x6   :  { %v862_v14 = vld [vmem:[%s1259_s0 + $0x144] ss:$8 sps:$4 sm:$0xff]   ;;  %v865_v16 = vld [vmem:[%s1259_s0 + $0x140] ss:$8 sps:$4 sm:$0xff]   ;;  %v868_v18 = vld [vmem:[%s1259_s0 + $0x134] ss:$8 sps:$4 sm:$0xff]  }
   0x7   :  { %543 = vmatpush1.bf16.msra.mxu0 %v852_v7  ;;  %v870_v19 = vld [vmem:[%s1259_s0 + $0x30] ss:$8 sps:$4 sm:$0xff]   ;;  %v872_v21 = vld [vmem:[%s1259_s0 + $0x24] ss:$8 sps:$4 sm:$0xff]   ;;  %v876_v23 = vld [vmem:[%s1259_s0 + $0x20] ss:$8 sps:$4 sm:$0xff]  }
   0x8   :  { %596 = vmatpush1.bf16.msra.mxu1 %v853_v8  ;;  %544 = vmatprep.subr.bf16.mxu0 %v854_v9  ;;  %v871_v20 = vld [vmem:[%s1259_s0 + $0x130] ss:$8 sps:$4 sm:$0xff]   ;;  %v874_v22 = vld [vmem:[%s1259_s0 + $0x124] ss:$8 sps:$4 sm:$0xff]   ;;  %v877_v24 = vld [vmem:[%s1259_s0 + $0x120] ss:$8 sps:$4 sm:$0xff]  }
   0x9   :  { %597 = vmatprep.subr.bf16.mxu1 %v856_v10  ;;  %v878_v25 = vld [vmem:[%s1259_s0 + $0x14] ss:$8 sps:$4 sm:$0xff]   ;;  %v882_v27 = vld [vmem:[%s1259_s0 + $0x10] ss:$8 sps:$4 sm:$0xff]   ;;  %v884_v29 = vld [vmem:[%s1259_s0 + $0x4] ss:$8 sps:$4 sm:$0xff]  }
   0xa   :  { %v880_v26 = vld [vmem:[%s1259_s0 + $0x114] ss:$8 sps:$4 sm:$0xff]   ;;  %v883_v28 = vld [vmem:[%s1259_s0 + $0x110] ss:$8 sps:$4 sm:$0xff]   ;;  %v886_v30 = vld [vmem:[%s1259_s0 + $0x104] ss:$8 sps:$4 sm:$0xff]  }
   0xb   :  { %545 = vmatpush1.bf16.msra.mxu0 %v858_v11  ;;  %v888_v31 = vld [vmem:[%s1259_s0] ss:$8 sps:$4 sm:$0xff]   ;;  %v890_v33 = vld [vmem:[%s1259_s0 + $0xf4] ss:$8 sps:$4 sm:$0xff]   ;;  %v894_v35 = vld [vmem:[%s1259_s0 + $0xf0] ss:$8 sps:$4 sm:$0xff]  }
   0xc   :  { %598 = vmatpush1.bf16.msra.mxu1 %v859_v12  ;;  %546 = vmatprep.subr.bf16.mxu0 %v860_v13  ;;  %v889_v32 = vld [vmem:[%s1259_s0 + $0x100] ss:$8 sps:$4 sm:$0xff]   ;;  %v892_v34 = vld [vmem:[%s1259_s0 + $0x1f4] ss:$8 sps:$4 sm:$0xff]   ;;  %v895_v36 = vld [vmem:[%s1259_s0 + $0x1f0] ss:$8 sps:$4 sm:$0xff]  }
   0xd   :  { %599 = vmatprep.subr.bf16.mxu1 %v862_v14  ;;  %v896_v37 = vld [vmem:[%s1259_s0 + $0xe4] ss:$8 sps:$4 sm:$0xff]   ;;  %v900_v39 = vld [vmem:[%s1259_s0 + $0xe0] ss:$8 sps:$4 sm:$0xff]   ;;  %v902_v41 = vld [vmem:[%s1259_s0 + $0xd4] ss:$8 sps:$4 sm:$0xff]  }
   0xe   :  { %v898_v38 = vld [vmem:[%s1259_s0 + $0x1e4] ss:$8 sps:$4 sm:$0xff]   ;;  %v901_v40 = vld [vmem:[%s1259_s0 + $0x1e0] ss:$8 sps:$4 sm:$0xff]   ;;  %v904_v42 = vld [vmem:[%s1259_s0 + $0x1d4] ss:$8 sps:$4 sm:$0xff]  }
   0xf   :  { %547 = vmatpush1.bf16.msra.mxu0 %v864_v15  ;;  %v906_v43 = vld [vmem:[%s1259_s0 + $0xd0] ss:$8 sps:$4 sm:$0xff]   ;;  %v908_v45 = vld [vmem:[%s1259_s0 + $0xc4] ss:$8 sps:$4 sm:$0xff]   ;;  %v912_v47 = vld [vmem:[%s1259_s0 + $0xc0] ss:$8 sps:$4 sm:$0xff]  }
  0x10   :  { %600 = vmatpush1.bf16.msra.mxu1 %v865_v16  ;;  %548 = vmatprep.subr.bf16.mxu0 %v866_v17  ;;  %v907_v44 = vld [vmem:[%s1259_s0 + $0x1d0] ss:$8 sps:$4 sm:$0xff]   ;;  %v910_v46 = vld [vmem:[%s1259_s0 + $0x1c4] ss:$8 sps:$4 sm:$0xff]   ;;  %v913_v48 = vld [vmem:[%s1259_s0 + $0x1c0] ss:$8 sps:$4 sm:$0xff]  }
  0x11   :  { %601 = vmatprep.subr.bf16.mxu1 %v868_v18  ;;  %v914_v49 = vld [vmem:[%s1259_s0 + $0xb4] ss:$8 sps:$4 sm:$0xff]   ;;  %v940_v50 = vld [vmem:[%s1260_s1 + $0x4] ss:$20 sps:$4 sm:$0xff]   ;;  %v943_v52 = vld [vmem:[%s1260_s1 + $0xc] ss:$20 sps:$4 sm:$0xff]  }
  0x12   :  { %v916_v51 = vld [vmem:[%s1259_s0 + $0x1b4] ss:$8 sps:$4 sm:$0xff]   ;;  %572 = vmatprep.mubr.bf16.mxu0 %v940_v50  ;;  %v918_v53 = vld [vmem:[%s1259_s0 + $0xb0] ss:$8 sps:$4 sm:$0xff]   ;;  %625 = vmatprep.mubr.bf16.mxu1 %v943_v52  ;;  %v920_v55 = vld [vmem:[%s1259_s0 + $0xa4] ss:$8 sps:$4 sm:$0xff]  }
  0x13   :  { %549 = vmatpush1.bf16.msra.mxu0 %v870_v19  ;;  %v919_v54 = vld [vmem:[%s1259_s0 + $0x1b0] ss:$8 sps:$4 sm:$0xff]   ;;  %v922_v56 = vld [vmem:[%s1259_s0 + $0x1a4] ss:$8 sps:$4 sm:$0xff]   ;;  %v924_v57 = vld [vmem:[%s1259_s0 + $0xa0] ss:$8 sps:$4 sm:$0xff]  }
  0x14   :  { %602 = vmatpush1.bf16.msra.mxu1 %v871_v20  ;;  %550 = vmatprep.subr.bf16.mxu0 %v872_v21  ;;  %v925_v58 = vld [vmem:[%s1259_s0 + $0x1a0] ss:$8 sps:$4 sm:$0xff]   ;;  %v926_v59 = vld [vmem:[%s1259_s0 + $0x94] ss:$8 sps:$4 sm:$0xff]   ;;  %v930_v62 = vld [vmem:[%s1259_s0 + $0x90] ss:$8 sps:$4 sm:$0xff]  }
  0x15   :  { %603 = vmatprep.subr.bf16.mxu1 %v874_v22  ;;  %v928_v60 = vld [vmem:[%s1259_s0 + $0x194] ss:$8 sps:$4 sm:$0xff]   ;;  %v99_v61 = vld [vmem:[%s1261_s2] sm:$0xff]  ;;  %v931_v63 = vld [vmem:[%s1259_s0 + $0x190] ss:$8 sps:$4 sm:$0xff]  }
  0x16   :  { %v101_v0 = vld [vmem:[%s1261_s2 + $0x10] sm:$0xff]  ;;  %v932_v2 = vld [vmem:[%s1259_s0 + $0x84] ss:$8 sps:$4 sm:$0xff]   ;;  %105 = vperm.xlu0 %840, %v99_v61   ;;  %v102_v5 = vld [vmem:[%s1261_s2 + $0x18] sm:$0xff] }
  0x17   :  { %551 = vmatpush1.bf16.msra.mxu0 %v876_v23  ;;  %v934_v3 = vld [vmem:[%s1259_s0 + $0x184] ss:$8 sps:$4 sm:$0xff]   ;;  %115 = vperm.xlu1 %841, %v101_v0   ;;  %v936_v6 = vld [vmem:[%s1259_s0 + $0x80] ss:$8 sps:$4 sm:$0xff]   ;;  %v946_v8 = vld [vmem:[%s1259_s0 + $0x234] ss:$8 sps:$4 sm:$0xff]  }
  0x18   :  { %604 = vmatpush1.bf16.msra.mxu1 %v877_v24  ;;  %552 = vmatprep.subr.bf16.mxu0 %v878_v25  ;;  %v100_v4 = vld [vmem:[%s1261_s2 + $0x8] sm:$0xff]  ;;  %v938_v9 = vld [vmem:[%s1260_s1] ss:$20 sps:$4 sm:$0xff]   ;;  %v944_v11 = vld [vmem:[%s1259_s0 + $0x230] ss:$8 sps:$4 sm:$0xff]  }
  0x19   :  { %605 = vmatprep.subr.bf16.mxu1 %v880_v26  ;;  %v937_v7 = vld [vmem:[%s1259_s0 + $0x180] ss:$8 sps:$4 sm:$0xff]   ;;  %v949_v12 = vld [vmem:[%s1259_s0 + $0x224] ss:$8 sps:$4 sm:$0xff]   ;;  %v958_v16 = vld [vmem:[%s1259_s0 + $0x214] ss:$8 sps:$4 sm:$0xff]  }
  0x1a   :  { %110 = vperm.xlu0 %840, %v100_v4   ;;  %v941_v10 = vld [vmem:[%s1260_s1 + $0x8] ss:$20 sps:$4 sm:$0xff]   ;;  %v950_v13 = vld [vmem:[%s1260_s1 + $0x2c] ss:$20 sps:$4 sm:$0xff]   ;;  %v955_v18 = vld [vmem:[%s1260_s1 + $0x30] ss:$20 sps:$4 sm:$0xff]  }
  0x1b   :  { %553 = vmatpush1.bf16.msra.mxu0 %v882_v27  ;;  %120 = vperm.xlu1 %841, %v102_v5   ;;  %v952_v14 = vld [vmem:[%s1260_s1 + $0x34] ss:$20 sps:$4 sm:$0xff]   ;;  %v956_v19 = vld [vmem:[%s1259_s0 + $0x210] ss:$8 sps:$4 sm:$0xff]   ;;  %v961_v20 = vld [vmem:[%s1259_s0 + $0x204] ss:$8 sps:$4 sm:$0xff]  }
  0x1c   :  { %606 = vmatpush1.bf16.msra.mxu1 %v883_v28  ;;  %554 = vmatprep.subr.bf16.mxu0 %v884_v29  ;;  %v947_v15 = vld [vmem:[%s1259_s0 + $0x220] ss:$8 sps:$4 sm:$0xff]   ;;  %v962_v22 = vld [vmem:[%s1260_s1 + $0x10] ss:$20 sps:$4 sm:$0xff]   ;;  %v963_v23 = vld [vmem:[%s1260_s1 + $0x38] ss:$20 sps:$4 sm:$0xff]  }
  0x1d   :  { %607 = vmatprep.subr.bf16.mxu1 %v886_v30  ;;  %v954_v17 = vld [vmem:[%s1260_s1 + $0x28] ss:$20 sps:$4 sm:$0xff]  }
  0x1e   :  { %v959_v21 = vld [vmem:[%s1259_s0 + $0x200] ss:$8 sps:$4 sm:$0xff]  }
  0x1f   :  { %555 = vmatpush1.bf16.msra.mxu0 %v888_v31 }
  0x20   :  { %608 = vmatpush1.bf16.msra.mxu1 %v889_v32  ;;  %556 = vmatprep.subr.bf16.mxu0 %v890_v33 }
  0x21   :  { %609 = vmatprep.subr.bf16.mxu1 %v892_v34 }
  0x23   :  { %557 = vmatpush2.bf16.msra.mxu0 %v894_v35 }
  0x24   :  { %610 = vmatpush2.bf16.msra.mxu1 %v895_v36  ;;  %558 = vmatprep.subr.bf16.mxu0 %v896_v37 }
  0x25   :  { %611 = vmatprep.subr.bf16.mxu1 %v898_v38 }
  0x27   :  { %559 = vmatpush2.bf16.msra.mxu0 %v900_v39 }
  0x28   :  { %612 = vmatpush2.bf16.msra.mxu1 %v901_v40  ;;  %560 = vmatprep.subr.bf16.mxu0 %v902_v41 }
  0x29   :  { %613 = vmatprep.subr.bf16.mxu1 %v904_v42 }
  0x2b   :  { %561 = vmatpush2.bf16.msra.mxu0 %v906_v43 }
  0x2c   :  { %614 = vmatpush2.bf16.msra.mxu1 %v907_v44  ;;  %562 = vmatprep.subr.bf16.mxu0 %v908_v45 }
  0x2d   :  { %615 = vmatprep.subr.bf16.mxu1 %v910_v46 }
  0x2f   :  { %563 = vmatpush2.bf16.msra.mxu0 %v912_v47 }
  0x30   :  { %616 = vmatpush2.bf16.msra.mxu1 %v913_v48  ;;  %564 = vmatprep.subr.bf16.mxu0 %v914_v49 }
  0x31   :  { %617 = vmatprep.subr.bf16.mxu1 %v916_v51 }
  0x33   :  { %565 = vmatpush2.bf16.msra.mxu0 %v918_v53 }
  0x34   :  { %618 = vmatpush2.bf16.msra.mxu1 %v919_v54  ;;  %566 = vmatprep.subr.bf16.mxu0 %v920_v55 }
  0x35   :  { %619 = vmatprep.subr.bf16.mxu1 %v922_v56 }
  0x37   :  { %567 = vmatpush2.bf16.msra.mxu0 %v924_v57 }
  0x38   :  { %620 = vmatpush2.bf16.msra.mxu1 %v925_v58  ;;  %568 = vmatprep.subr.bf16.mxu0 %v926_v59 }
  0x39   :  { %621 = vmatprep.subr.bf16.mxu1 %v928_v60 }
  0x3b   :  { %569 = vmatpush2.bf16.msra.mxu0 %v930_v62 }
  0x3c   :  { %622 = vmatpush2.bf16.msra.mxu1 %v931_v63  ;;  %570 = vmatprep.subr.bf16.mxu0 %v932_v2 }
  0x3d   :  { %623 = vmatprep.subr.bf16.mxu1 %v934_v3 }
  0x3f   :  { %571 = vmatpush2.bf16.msra.mxu0 %v936_v6 }
  0x40   :  { %624 = vmatpush2.bf16.msra.mxu1 %v937_v7  ;;  %654 = vmatprep.subr.bf16.mxu0 %v946_v8 }
  0x41   :  { %831 = vmatprep.subr.bf16.mxu1 %v946_v8 }
  0x42   :  { %573 = vmatmul.mubr.bf16.vlgmr.msra.gmra.mxu0 %v938_v9 }
  0x43   :  { %626 = vmatmul.mubr.bf16.vlgmr.msra.gmra.mxu1 %v941_v10  ;;  %655 = vmatpush1.bf16.msra.mxu0 %v944_v11 }
  0x44   :  { %835 = vmatpush1.bf16.msra.mxu1 %v944_v11  ;;  %656 = vmatprep.subr.bf16.mxu0 %v949_v12 }
  0x45   :  { %832 = vmatprep.subr.bf16.mxu1 %v949_v12  ;;  %582 = vmatprep.mubr.bf16.mxu0 %v950_v13 }
  0x46   :  { %635 = vmatprep.mubr.bf16.mxu1 %v952_v14 }
  0x47   :  { %657 = vmatpush1.bf16.msra.mxu0 %v947_v15 }
  0x48   :  { %836 = vmatpush1.bf16.msra.mxu1 %v947_v15  ;;  %658 = vmatprep.subr.bf16.mxu0 %v958_v16 }
  0x49   :  { %833 = vmatprep.subr.bf16.mxu1 %v958_v16 }
  0x4a   :  { %583 = vmatmul.mubr.bf16.gmra.mxu0 %v954_v17 }
  0x4b   :  { %636 = vmatmul.mubr.bf16.gmra.mxu1 %v955_v18  ;;  %659 = vmatpush1.bf16.msra.mxu0 %v956_v19 }
  0x4c   :  { %837 = vmatpush1.bf16.msra.mxu1 %v956_v19  ;;  %660 = vmatprep.subr.bf16.mxu0 %v961_v20 }
  0x4d   :  { %834 = vmatprep.subr.bf16.mxu1 %v961_v20  ;;  %678 = vmatprep.mubr.bf16.mxu0 %v964_v1 }
  0x4e   :  { %688 = vmatprep.mubr.bf16.mxu1 %v964_v1 }
  0x4f   :  { %661 = vmatpush1.bf16.msra.mxu0 %v959_v21 }
  0x50   :  { %838 = vmatpush1.bf16.msra.mxu1 %v959_v21 }
  0x52   :  { %821 = vmatmul.mubr.msk.bf16.vlgmr.msra.gmra.mxu0 %vm533_vm0, %v962_v22 }
  0x53   :  { %822 = vmatmul.mubr.msk.bf16.vlgmr.msra.gmra.mxu1 %vm533_vm0, %v963_v23 }
  0x91   :  { %v106_v31 = vpop.permute.xlu0 %105 }
  0x92   :  { %v116_v32 = vpop.permute.xlu1 %115 }
  0x95   :  { %v111_v42 = vpop.permute.xlu0 %110 }
  0x96   :  { %v121_v44 = vpop.permute.xlu1 %120 }
 0x102   :  { %v574_v24 = vpop.f32.mrf.mxu0 }
 0x103   :  { %v627_v25 = vpop.f32.mrf.mxu1  ;;  %v575_v37 = vadd.f32 %v574_v24, %v106_v31 }
 0x104   :  { %v576_v26 = vpop.f32.mrf.mxu0 }
 0x105   :  { %v629_v27 = vpop.f32.mrf.mxu1  ;;  %v577_v41 = vadd.f32 %v576_v26, %v106_v31  ;;  %v628_v47 = vadd.f32 %v627_v25, %v575_v37 }
 0x106   :  { %v578_v28 = vpop.f32.mrf.mxu0 }
 0x107   :  { %v631_v29 = vpop.f32.mrf.mxu1  ;;  %v579_v49 = vadd.f32 %v578_v28, %v111_v42  ;;  %v630_v53 = vadd.f32 %v629_v27, %v577_v41 }
 0x108   :  { %v580_v1 = vpop.f32.mrf.mxu0 }
 0x109   :  { %v633_v30 = vpop.f32.mrf.mxu1  ;;  %v581_v57 = vadd.f32 %v580_v1, %v111_v42  ;;  %v632_v63 = vadd.f32 %v631_v29, %v579_v49 }
 0x10a   :  { %v584_v33 = vpop.f32.mrf.mxu0 }
 0x10b   :  { %v637_v34 = vpop.f32.mrf.mxu1  ;;  %v585_v38 = vadd.f32 %v584_v33, %v116_v32  ;;  %v634_v8 = vadd.f32 %v633_v30, %v581_v57 }
 0x10c   :  { %v586_v35 = vpop.f32.mrf.mxu0 }
 0x10d   :  { %v639_v36 = vpop.f32.mrf.mxu1  ;;  %v587_v43 = vadd.f32 %v586_v35, %v116_v32  ;;  %v638_v48 = vadd.f32 %v637_v34, %v585_v38 }
 0x10e   :  { %v588_v39 = vpop.f32.mrf.mxu0 }
 0x10f   :  { %v641_v40 = vpop.f32.mrf.mxu1  ;;  %v589_v50 = vadd.f32 %v588_v39, %v121_v44  ;;  %v640_v54 = vadd.f32 %v639_v36, %v587_v43 }
 0x110   :  { %v590_v45 = vpop.f32.mrf.mxu0 }
 0x111   :  { %v643_v46 = vpop.f32.mrf.mxu1  ;;  %v591_v58 = vadd.f32 %v590_v45, %v121_v44  ;;  %v642_v0 = vadd.f32 %v641_v40, %v589_v50 }
 0x112   :  { %v680_v51 = vpop.f32.mrf.mxu0 }
 0x113   :  { %v690_v52 = vpop.f32.mrf.mxu1  ;;  %v681_v55 = vadd.f32 %v680_v51, %v628_v47  ;;  %v644_v9 = vadd.f32 %v643_v46, %v591_v58 }
 0x114   :  { %v691_v56 = vadd.f32 %v690_v52, %v638_v48  ;;  %v682_v59 = vpop.f32.mrf.mxu0 }
 0x115   :  { %v692_v60 = vpop.f32.mrf.mxu1  ;;  %v683_v61 = vadd.f32 %v682_v59, %v630_v53  ;;  %v699_v4 = vmax.f32 %v681_v55, 0.0 }
 0x116   :  { %v693_v62 = vadd.f32 %v692_v60, %v640_v54  ;;  %v684_v2 = vpop.f32.mrf.mxu0  ;;  %v703_v5 = vmax.f32 %v691_v56, 0.0 }
 0x117   :  { %v694_v3 = vpop.f32.mrf.mxu1  ;;  %v700_v6 = vmax.f32 %v683_v61, 0.0  ;;  %v685_v10 = vadd.f32 %v684_v2, %v632_v63 }
 0x118   :  { %v704_v7 = vmax.f32 %v693_v62, 0.0  ;;  %v695_v11 = vadd.f32 %v694_v3, %v642_v0  ;;  %v686_v12 = vpop.f32.mrf.mxu0 }
 0x119   :  { %v696_v13 = vpop.f32.mrf.mxu1  ;;  %v827_v14 = vpack.c.bf16 %v700_v6, %v699_v4  ;;  %v687_v16 = vadd.f32 %v686_v12, %v634_v8  ;;  %v701_v18 = vmax.f32 %v685_v10, 0.0 }
 0x11a   :  { %v829_v15 = vpack.c.bf16 %v704_v7, %v703_v5  ;;  %v697_v17 = vadd.f32 %v696_v13, %v644_v9  ;;  %v705_v19 = vmax.f32 %v695_v11, 0.0 }
 0x11b   :  { %731 = vst [vmem:[%s1262_s3] sm:$0xff] %v827_v14  ;;  %v702_v20 = vmax.f32 %v687_v16, 0.0 }
 0x11c   :  { %733 = vst [vmem:[%s1262_s3 + $0x10] sm:$0xff] %v829_v15  ;;  %v706_v21 = vmax.f32 %v697_v17, 0.0 }
 0x11d   :  { %v828_v22 = vpack.c.bf16 %v702_v20, %v701_v18 }
 0x11e   :  { %v830_v23 = vpack.c.bf16 %v706_v21, %v705_v19 }
 0x11f   :  { %732 = vst [vmem:[%s1262_s3 + $0x8] sm:$0xff] %v828_v22 }
 0x120   :  { %734 = vst [vmem:[%s1262_s3 + $0x18] sm:$0xff] %v830_v23 }

// kernel: _lambda_.23
= control target key start
LH: loop header
LB: loop body
LE: loop exit
PB: predicated region body
PF: predicated region fallthrough
CT: control target
= control target key end

     0   :  { %v1186_v1 = vmov 0   ;;  %vm619_vm0 = vcmask 523264   ;;  %s1558_s0 = inlined_call_operand.vmem [shape: bf16[576,256], index: 0, kind: input, shape index: {}]   ;;  %s1559_s1 = inlined_call_operand.vmem [shape: bf16[64,576], index: 1, kind: input, shape index: {}]   ;;  %s1560_s2 = inlined_call_operand.vmem [shape: f32[64,1], index: 2, kind: input, shape index: {}]   ;;  %s1561_s3 = inlined_call_operand.vmem [shape: bf16[64,256], index: 3, kind: output, shape index: {}]  }
   0x1   :  { %v1050_v0 = vld [vmem:[%s1558_s0 + $0x74] ss:$8 sps:$4 sm:$0xff]   ;;  %1048 = vset.pattern.permute.xlu0 %v1186_v1  ;;  %1049 = vset.pattern.permute.xlu1 %v1186_v1  ;;  %v1054_v3 = vld [vmem:[%s1558_s0 + $0x70] ss:$8 sps:$4 sm:$0xff]   ;;  %v1056_v5 = vld [vmem:[%s1558_s0 + $0x64] ss:$8 sps:$4 sm:$0xff]  }
   0x2   :  { %v1052_v2 = vld [vmem:[%s1558_s0 + $0x174] ss:$8 sps:$4 sm:$0xff]   ;;  %632 = vmatprep.subr.bf16.mxu0 %v1050_v0  ;;  %v1055_v4 = vld [vmem:[%s1558_s0 + $0x170] ss:$8 sps:$4 sm:$0xff]   ;;  %v1058_v6 = vld [vmem:[%s1558_s0 + $0x164] ss:$8 sps:$4 sm:$0xff]  }
   0x3   :  { %705 = vmatprep.subr.bf16.mxu1 %v1052_v2  ;;  %633 = vmatpush1.bf16.msra.mxu0 %v1054_v3  ;;  %v1060_v7 = vld [vmem:[%s1558_s0 + $0x60] ss:$8 sps:$4 sm:$0xff]   ;;  %v1062_v9 = vld [vmem:[%s1558_s0 + $0x54] ss:$8 sps:$4 sm:$0xff]   ;;  %v1066_v11 = vld [vmem:[%s1558_s0 + $0x50] ss:$8 sps:$4 sm:$0xff]  }
   0x4   :  { %706 = vmatpush1.bf16.msra.mxu1 %v1055_v4  ;;  %634 = vmatprep.subr.bf16.mxu0 %v1056_v5  ;;  %v1061_v8 = vld [vmem:[%s1558_s0 + $0x160] ss:$8 sps:$4 sm:$0xff]   ;;  %v1064_v10 = vld [vmem:[%s1558_s0 + $0x154] ss:$8 sps:$4 sm:$0xff]   ;;  %v1067_v12 = vld [vmem:[%s1558_s0 + $0x150] ss:$8 sps:$4 sm:$0xff]  }
   0x5   :  { %707 = vmatprep.subr.bf16.mxu1 %v1058_v6  ;;  %v1068_v13 = vld [vmem:[%s1558_s0 + $0x44] ss:$8 sps:$4 sm:$0xff]   ;;  %v1072_v15 = vld [vmem:[%s1558_s0 + $0x40] ss:$8 sps:$4 sm:$0xff]   ;;  %v1074_v17 = vld [vmem:[%s1558_s0 + $0x34] ss:$8 sps:$4 sm:$0xff]  }
   0x6   :  { %v1070_v14 = vld [vmem:[%s1558_s0 + $0x144] ss:$8 sps:$4 sm:$0xff]   ;;  %v1073_v16 = vld [vmem:[%s1558_s0 + $0x140] ss:$8 sps:$4 sm:$0xff]   ;;  %v1076_v18 = vld [vmem:[%s1558_s0 + $0x134] ss:$8 sps:$4 sm:$0xff]  }
   0x7   :  { %635 = vmatpush1.bf16.msra.mxu0 %v1060_v7  ;;  %v1078_v19 = vld [vmem:[%s1558_s0 + $0x30] ss:$8 sps:$4 sm:$0xff]   ;;  %v1080_v21 = vld [vmem:[%s1558_s0 + $0x24] ss:$8 sps:$4 sm:$0xff]   ;;  %v1084_v23 = vld [vmem:[%s1558_s0 + $0x20] ss:$8 sps:$4 sm:$0xff]  }
   0x8   :  { %708 = vmatpush1.bf16.msra.mxu1 %v1061_v8  ;;  %636 = vmatprep.subr.bf16.mxu0 %v1062_v9  ;;  %v1079_v20 = vld [vmem:[%s1558_s0 + $0x130] ss:$8 sps:$4 sm:$0xff]   ;;  %v1082_v22 = vld [vmem:[%s1558_s0 + $0x124] ss:$8 sps:$4 sm:$0xff]   ;;  %v1085_v24 = vld [vmem:[%s1558_s0 + $0x120] ss:$8 sps:$4 sm:$0xff]  }
   0x9   :  { %709 = vmatprep.subr.bf16.mxu1 %v1064_v10  ;;  %v1086_v25 = vld [vmem:[%s1558_s0 + $0x14] ss:$8 sps:$4 sm:$0xff]   ;;  %v1090_v27 = vld [vmem:[%s1558_s0 + $0x10] ss:$8 sps:$4 sm:$0xff]   ;;  %v1092_v29 = vld [vmem:[%s1558_s0 + $0x4] ss:$8 sps:$4 sm:$0xff]  }
   0xa   :  { %v1088_v26 = vld [vmem:[%s1558_s0 + $0x114] ss:$8 sps:$4 sm:$0xff]   ;;  %v1091_v28 = vld [vmem:[%s1558_s0 + $0x110] ss:$8 sps:$4 sm:$0xff]   ;;  %v1094_v30 = vld [vmem:[%s1558_s0 + $0x104] ss:$8 sps:$4 sm:$0xff]  }
   0xb   :  { %637 = vmatpush1.bf16.msra.mxu0 %v1066_v11  ;;  %v1096_v31 = vld [vmem:[%s1558_s0] ss:$8 sps:$4 sm:$0xff]   ;;  %v1098_v33 = vld [vmem:[%s1558_s0 + $0xf4] ss:$8 sps:$4 sm:$0xff]   ;;  %v1102_v35 = vld [vmem:[%s1558_s0 + $0xf0] ss:$8 sps:$4 sm:$0xff]  }
   0xc   :  { %710 = vmatpush1.bf16.msra.mxu1 %v1067_v12  ;;  %638 = vmatprep.subr.bf16.mxu0 %v1068_v13  ;;  %v1097_v32 = vld [vmem:[%s1558_s0 + $0x100] ss:$8 sps:$4 sm:$0xff]   ;;  %v1100_v34 = vld [vmem:[%s1558_s0 + $0x1f4] ss:$8 sps:$4 sm:$0xff]   ;;  %v1103_v36 = vld [vmem:[%s1558_s0 + $0x1f0] ss:$8 sps:$4 sm:$0xff]  }
   0xd   :  { %711 = vmatprep.subr.bf16.mxu1 %v1070_v14  ;;  %v1104_v37 = vld [vmem:[%s1558_s0 + $0xe4] ss:$8 sps:$4 sm:$0xff]   ;;  %v1108_v39 = vld [vmem:[%s1558_s0 + $0xe0] ss:$8 sps:$4 sm:$0xff]   ;;  %v1110_v41 = vld [vmem:[%s1558_s0 + $0xd4] ss:$8 sps:$4 sm:$0xff]  }
   0xe   :  { %v1106_v38 = vld [vmem:[%s1558_s0 + $0x1e4] ss:$8 sps:$4 sm:$0xff]   ;;  %v1109_v40 = vld [vmem:[%s1558_s0 + $0x1e0] ss:$8 sps:$4 sm:$0xff]   ;;  %v1112_v42 = vld [vmem:[%s1558_s0 + $0x1d4] ss:$8 sps:$4 sm:$0xff]  }
   0xf   :  { %639 = vmatpush1.bf16.msra.mxu0 %v1072_v15  ;;  %v1114_v43 = vld [vmem:[%s1558_s0 + $0xd0] ss:$8 sps:$4 sm:$0xff]   ;;  %v1116_v45 = vld [vmem:[%s1558_s0 + $0xc4] ss:$8 sps:$4 sm:$0xff]   ;;  %v1120_v47 = vld [vmem:[%s1558_s0 + $0xc0] ss:$8 sps:$4 sm:$0xff]  }
  0x10   :  { %712 = vmatpush1.bf16.msra.mxu1 %v1073_v16  ;;  %640 = vmatprep.subr.bf16.mxu0 %v1074_v17  ;;  %v1115_v44 = vld [vmem:[%s1558_s0 + $0x1d0] ss:$8 sps:$4 sm:$0xff]   ;;  %v1118_v46 = vld [vmem:[%s1558_s0 + $0x1c4] ss:$8 sps:$4 sm:$0xff]   ;;  %v1121_v48 = vld [vmem:[%s1558_s0 + $0x1c0] ss:$8 sps:$4 sm:$0xff]  }
  0x11   :  { %713 = vmatprep.subr.bf16.mxu1 %v1076_v18  ;;  %v1122_v49 = vld [vmem:[%s1558_s0 + $0xb4] ss:$8 sps:$4 sm:$0xff]   ;;  %v1148_v50 = vld [vmem:[%s1559_s1 + $0x4] ss:$20 sps:$4 sm:$0xff]   ;;  %v1151_v52 = vld [vmem:[%s1559_s1 + $0xc] ss:$20 sps:$4 sm:$0xff]  }
  0x12   :  { %v1124_v51 = vld [vmem:[%s1558_s0 + $0x1b4] ss:$8 sps:$4 sm:$0xff]   ;;  %664 = vmatprep.mubr.bf16.mxu0 %v1148_v50  ;;  %v1126_v53 = vld [vmem:[%s1558_s0 + $0xb0] ss:$8 sps:$4 sm:$0xff]   ;;  %737 = vmatprep.mubr.bf16.mxu1 %v1151_v52  ;;  %v1128_v55 = vld [vmem:[%s1558_s0 + $0xa4] ss:$8 sps:$4 sm:$0xff]  }
  0x13   :  { %641 = vmatpush1.bf16.msra.mxu0 %v1078_v19  ;;  %v1127_v54 = vld [vmem:[%s1558_s0 + $0x1b0] ss:$8 sps:$4 sm:$0xff]   ;;  %v1130_v56 = vld [vmem:[%s1558_s0 + $0x1a4] ss:$8 sps:$4 sm:$0xff]   ;;  %v1132_v57 = vld [vmem:[%s1558_s0 + $0xa0] ss:$8 sps:$4 sm:$0xff]  }
  0x14   :  { %714 = vmatpush1.bf16.msra.mxu1 %v1079_v20  ;;  %642 = vmatprep.subr.bf16.mxu0 %v1080_v21  ;;  %v1133_v58 = vld [vmem:[%s1558_s0 + $0x1a0] ss:$8 sps:$4 sm:$0xff]   ;;  %v1134_v59 = vld [vmem:[%s1558_s0 + $0x94] ss:$8 sps:$4 sm:$0xff]   ;;  %v1138_v61 = vld [vmem:[%s1558_s0 + $0x90] ss:$8 sps:$4 sm:$0xff]  }
  0x15   :  { %715 = vmatprep.subr.bf16.mxu1 %v1082_v22  ;;  %v1136_v60 = vld [vmem:[%s1558_s0 + $0x194] ss:$8 sps:$4 sm:$0xff]   ;;  %v1139_v62 = vld [vmem:[%s1558_s0 + $0x190] ss:$8 sps:$4 sm:$0xff]   ;;  %v1140_v63 = vld [vmem:[%s1558_s0 + $0x84] ss:$8 sps:$4 sm:$0xff]  }
  0x16   :  { %v1142_v0 = vld [vmem:[%s1558_s0 + $0x184] ss:$8 sps:$4 sm:$0xff]   ;;  %v1144_v2 = vld [vmem:[%s1558_s0 + $0x80] ss:$8 sps:$4 sm:$0xff]   ;;  %v1154_v4 = vld [vmem:[%s1558_s0 + $0x234] ss:$8 sps:$4 sm:$0xff]  }
  0x17   :  { %643 = vmatpush1.bf16.msra.mxu0 %v1084_v23  ;;  %v1145_v3 = vld [vmem:[%s1558_s0 + $0x180] ss:$8 sps:$4 sm:$0xff]   ;;  %v113_v8 = vld [vmem:[%s1560_s2 + $0x10] sm:$0xff]  ;;  %v1163_v12 = vld [vmem:[%s1558_s0 + $0x224] ss:$8 sps:$4 sm:$0xff]  }
  0x18   :  { %716 = vmatpush1.bf16.msra.mxu1 %v1085_v24  ;;  %644 = vmatprep.subr.bf16.mxu0 %v1086_v25  ;;  %v111_v5 = vld [vmem:[%s1560_s2] sm:$0xff]  ;;  %v1149_v7 = vld [vmem:[%s1559_s1 + $0x8] ss:$20 sps:$4 sm:$0xff]   ;;  %v1152_v9 = vld [vmem:[%s1558_s0 + $0x230] ss:$8 sps:$4 sm:$0xff]  }
  0x19   :  { %717 = vmatprep.subr.bf16.mxu1 %v1088_v26  ;;  %v1146_v6 = vld [vmem:[%s1559_s1] ss:$20 sps:$4 sm:$0xff]   ;;  %121 = vperm.xlu0 %1048, %v111_v5   ;;  %v112_v14 = vld [vmem:[%s1560_s2 + $0x8] sm:$0xff]  ;;  %v114_v15 = vld [vmem:[%s1560_s2 + $0x18] sm:$0xff] }
  0x1a   :  { %v1155_v10 = vld [vmem:[%s1559_s1 + $0x2c] ss:$20 sps:$4 sm:$0xff]   ;;  %v1157_v11 = vld [vmem:[%s1559_s1 + $0x34] ss:$20 sps:$4 sm:$0xff]   ;;  %131 = vperm.xlu1 %1049, %v113_v8   ;;  %v1160_v18 = vld [vmem:[%s1559_s1 + $0x30] ss:$20 sps:$4 sm:$0xff]  }
  0x1b   :  { %645 = vmatpush1.bf16.msra.mxu0 %v1090_v27  ;;  %v1161_v13 = vld [vmem:[%s1558_s0 + $0x220] ss:$8 sps:$4 sm:$0xff]   ;;  %v1172_v16 = vld [vmem:[%s1558_s0 + $0x214] ss:$8 sps:$4 sm:$0xff]   ;;  %v1170_v21 = vld [vmem:[%s1558_s0 + $0x210] ss:$8 sps:$4 sm:$0xff]  }
  0x1c   :  { %718 = vmatpush1.bf16.msra.mxu1 %v1091_v28  ;;  %646 = vmatprep.subr.bf16.mxu0 %v1092_v29  ;;  %v1159_v17 = vld [vmem:[%s1559_s1 + $0x28] ss:$20 sps:$4 sm:$0xff]   ;;  %v1181_v22 = vld [vmem:[%s1558_s0 + $0x204] ss:$8 sps:$4 sm:$0xff]  }
  0x1d   :  { %719 = vmatprep.subr.bf16.mxu1 %v1094_v30  ;;  %126 = vperm.xlu0 %1048, %v112_v14   ;;  %v1164_v19 = vld [vmem:[%s1559_s1 + $0x54] ss:$20 sps:$4 sm:$0xff]   ;;  %v1166_v20 = vld [vmem:[%s1559_s1 + $0x5c] ss:$20 sps:$4 sm:$0xff]   ;;  %v115_v23 = vld [vmem:[%s1560_s2 + $0x20] sm:$0xff] }
  0x1e   :  { %136 = vperm.xlu1 %1049, %v114_v15   ;;  %v116_v24 = vld [vmem:[%s1560_s2 + $0x28] sm:$0xff]  ;;  %v1168_v26 = vld [vmem:[%s1559_s1 + $0x50] ss:$20 sps:$4 sm:$0xff]  }
  0x1f   :  { %647 = vmatpush1.bf16.msra.mxu0 %v1096_v31  ;;  %v1179_v25 = vld [vmem:[%s1558_s0 + $0x200] ss:$8 sps:$4 sm:$0xff]   ;;  %v1169_v27 = vld [vmem:[%s1559_s1 + $0x58] ss:$20 sps:$4 sm:$0xff]   ;;  %v1173_v28 = vld [vmem:[%s1559_s1 + $0x7c] ss:$20 sps:$4 sm:$0xff]  }
  0x20   :  { %720 = vmatpush1.bf16.msra.mxu1 %v1097_v32  ;;  %648 = vmatprep.subr.bf16.mxu0 %v1098_v33  ;;  %v1175_v29 = vld [vmem:[%s1559_s1 + $0x84] ss:$20 sps:$4 sm:$0xff]   ;;  %v117_v30 = vld [vmem:[%s1560_s2 + $0x30] sm:$0xff] }
  0x21   :  { %721 = vmatprep.subr.bf16.mxu1 %v1100_v34  ;;  %141 = vperm.xlu0 %1048, %v115_v23   ;;  %v118_v31 = vld [vmem:[%s1560_s2 + $0x38] sm:$0xff]  ;;  %v1178_v33 = vld [vmem:[%s1559_s1 + $0x80] ss:$20 sps:$4 sm:$0xff]   ;;  %v1182_v34 = vld [vmem:[%s1559_s1 + $0x10] ss:$20 sps:$4 sm:$0xff]  }
  0x22   :  { %146 = vperm.xlu1 %1049, %v116_v24   ;;  %v1177_v32 = vld [vmem:[%s1559_s1 + $0x78] ss:$20 sps:$4 sm:$0xff]  }
  0x23   :  { %649 = vmatpush2.bf16.msra.mxu0 %v1102_v35  ;;  %v1183_v35 = vld [vmem:[%s1559_s1 + $0x60] ss:$20 sps:$4 sm:$0xff]  }
  0x24   :  { %722 = vmatpush2.bf16.msra.mxu1 %v1103_v36  ;;  %650 = vmatprep.subr.bf16.mxu0 %v1104_v37  ;;  %v1184_v36 = vld [vmem:[%s1559_s1 + $0x38] ss:$20 sps:$4 sm:$0xff]   ;;  %v1185_v37 = vld [vmem:[%s1559_s1 + $0x88] ss:$20 sps:$4 sm:$0xff]  }
  0x25   :  { %723 = vmatprep.subr.bf16.mxu1 %v1106_v38  ;;  %151 = vperm.xlu0 %1048, %v117_v30  }
  0x26   :  { %156 = vperm.xlu1 %1049, %v118_v31  }
  0x27   :  { %651 = vmatpush2.bf16.msra.mxu0 %v1108_v39 }
  0x28   :  { %724 = vmatpush2.bf16.msra.mxu1 %v1109_v40  ;;  %652 = vmatprep.subr.bf16.mxu0 %v1110_v41 }
  0x29   :  { %725 = vmatprep.subr.bf16.mxu1 %v1112_v42 }
  0x2b   :  { %653 = vmatpush2.bf16.msra.mxu0 %v1114_v43 }
  0x2c   :  { %726 = vmatpush2.bf16.msra.mxu1 %v1115_v44  ;;  %654 = vmatprep.subr.bf16.mxu0 %v1116_v45 }
  0x2d   :  { %727 = vmatprep.subr.bf16.mxu1 %v1118_v46 }
  0x2f   :  { %655 = vmatpush2.bf16.msra.mxu0 %v1120_v47 }
  0x30   :  { %728 = vmatpush2.bf16.msra.mxu1 %v1121_v48  ;;  %656 = vmatprep.subr.bf16.mxu0 %v1122_v49 }
  0x31   :  { %729 = vmatprep.subr.bf16.mxu1 %v1124_v51 }
  0x33   :  { %657 = vmatpush2.bf16.msra.mxu0 %v1126_v53 }
  0x34   :  { %730 = vmatpush2.bf16.msra.mxu1 %v1127_v54  ;;  %658 = vmatprep.subr.bf16.mxu0 %v1128_v55 }
  0x35   :  { %731 = vmatprep.subr.bf16.mxu1 %v1130_v56 }
  0x37   :  { %659 = vmatpush2.bf16.msra.mxu0 %v1132_v57 }
  0x38   :  { %732 = vmatpush2.bf16.msra.mxu1 %v1133_v58  ;;  %660 = vmatprep.subr.bf16.mxu0 %v1134_v59 }
  0x39   :  { %733 = vmatprep.subr.bf16.mxu1 %v1136_v60 }
  0x3b   :  { %661 = vmatpush2.bf16.msra.mxu0 %v1138_v61 }
  0x3c   :  { %734 = vmatpush2.bf16.msra.mxu1 %v1139_v62  ;;  %662 = vmatprep.subr.bf16.mxu0 %v1140_v63 }
  0x3d   :  { %735 = vmatprep.subr.bf16.mxu1 %v1142_v0 }
  0x3f   :  { %663 = vmatpush2.bf16.msra.mxu0 %v1144_v2 }
  0x40   :  { %736 = vmatpush2.bf16.msra.mxu1 %v1145_v3  ;;  %786 = vmatprep.subr.bf16.mxu0 %v1154_v4 }
  0x41   :  { %1039 = vmatprep.subr.bf16.mxu1 %v1154_v4 }
  0x42   :  { %665 = vmatmul.mubr.bf16.vlgmr.msra.gmra.mxu0 %v1146_v6 }
  0x43   :  { %738 = vmatmul.mubr.bf16.vlgmr.msra.gmra.mxu1 %v1149_v7  ;;  %787 = vmatpush1.bf16.msra.mxu0 %v1152_v9 }
  0x44   :  { %1043 = vmatpush1.bf16.msra.mxu1 %v1152_v9  ;;  %674 = vmatprep.mubr.bf16.mxu0 %v1155_v10 }
  0x45   :  { %747 = vmatprep.mubr.bf16.mxu1 %v1157_v11  ;;  %788 = vmatprep.subr.bf16.mxu0 %v1163_v12 }
  0x46   :  { %1040 = vmatprep.subr.bf16.mxu1 %v1163_v12 }
  0x47   :  { %789 = vmatpush1.bf16.msra.mxu0 %v1161_v13 }
  0x48   :  { %1044 = vmatpush1.bf16.msra.mxu1 %v1161_v13  ;;  %790 = vmatprep.subr.bf16.mxu0 %v1172_v16 }
  0x49   :  { %1041 = vmatprep.subr.bf16.mxu1 %v1172_v16 }
  0x4a   :  { %675 = vmatmul.mubr.bf16.gmra.mxu0 %v1159_v17 }
  0x4b   :  { %748 = vmatmul.mubr.bf16.gmra.mxu1 %v1160_v18  ;;  %684 = vmatprep.mubr.bf16.mxu0 %v1164_v19 }
  0x4c   :  { %757 = vmatprep.mubr.bf16.mxu1 %v1166_v20  ;;  %791 = vmatpush1.bf16.msra.mxu0 %v1170_v21 }
  0x4d   :  { %1045 = vmatpush1.bf16.msra.mxu1 %v1170_v21  ;;  %792 = vmatprep.subr.bf16.mxu0 %v1181_v22 }
  0x4e   :  { %1042 = vmatprep.subr.bf16.mxu1 %v1181_v22 }
  0x50   :  { %793 = vmatpush1.bf16.msra.mxu0 %v1179_v25 }
  0x51   :  { %1046 = vmatpush1.bf16.msra.mxu1 %v1179_v25 }
  0x52   :  { %685 = vmatmul.mubr.bf16.gmra.mxu0 %v1168_v26 }
  0x53   :  { %758 = vmatmul.mubr.bf16.gmra.mxu1 %v1169_v27  ;;  %694 = vmatprep.mubr.bf16.mxu0 %v1173_v28 }
  0x54   :  { %767 = vmatprep.mubr.bf16.mxu1 %v1175_v29 }
  0x5a   :  { %695 = vmatmul.mubr.bf16.gmra.mxu0 %v1177_v32 }
  0x5b   :  { %768 = vmatmul.mubr.bf16.gmra.mxu1 %v1178_v33  ;;  %810 = vmatprep.mubr.bf16.mxu0 %v1186_v1 }
  0x5c   :  { %830 = vmatprep.mubr.bf16.mxu1 %v1186_v1 }
  0x62   :  { %1019 = vmatmul.mubr.msk.bf16.vlgmr.msra.gmra.mxu0 %vm619_vm0, %v1182_v34 }
  0x63   :  { %1021 = vmatmul.mubr.msk.bf16.vlgmr.msra.gmra.mxu1 %vm619_vm0, %v1183_v35  ;;  %820 = vmatprep.mubr.bf16.mxu0 %v1186_v1 }
  0x64   :  { %840 = vmatprep.mubr.bf16.mxu1 %v1186_v1 }
  0x6a   :  { %1020 = vmatmul.mubr.msk.bf16.gmra.mxu0 %vm619_vm0, %v1184_v36 }
  0x6b   :  { %1022 = vmatmul.mubr.msk.bf16.gmra.mxu1 %vm619_vm0, %v1185_v37 }
  0x94   :  { %v122_v51 = vpop.permute.xlu0 %121 }
  0x95   :  { %v132_v59 = vpop.permute.xlu1 %131 }
  0x98   :  { %v127_v58 = vpop.permute.xlu0 %126 }
  0x99   :  { %v137_v4 = vpop.permute.xlu1 %136 }
  0x9c   :  { %v142_v0 = vpop.permute.xlu0 %141 }
  0x9d   :  { %v147_v13 = vpop.permute.xlu1 %146 }
  0xa0   :  { %v152_v19 = vpop.permute.xlu0 %151 }
 0x102   :  { %v666_v38 = vpop.f32.mrf.mxu0 }
 0x103   :  { %v739_v39 = vpop.f32.mrf.mxu1  ;;  %v667_v7 = vadd.f32 %v666_v38, %v122_v51 }
 0x104   :  { %v668_v40 = vpop.f32.mrf.mxu0 }
 0x105   :  { %v741_v41 = vpop.f32.mrf.mxu1  ;;  %v669_v11 = vadd.f32 %v668_v40, %v122_v51  ;;  %v740_v16 = vadd.f32 %v739_v39, %v667_v7 }
 0x106   :  { %v670_v42 = vpop.f32.mrf.mxu0 }
 0x107   :  { %v743_v43 = vpop.f32.mrf.mxu1  ;;  %v671_v17 = vadd.f32 %v670_v42, %v127_v58  ;;  %v742_v25 = vadd.f32 %v741_v41, %v669_v11 }
 0x108   :  { %v672_v44 = vpop.f32.mrf.mxu0 }
 0x109   :  { %v745_v45 = vpop.f32.mrf.mxu1  ;;  %v673_v20 = vadd.f32 %v672_v44, %v127_v58  ;;  %v744_v33 = vadd.f32 %v743_v43, %v671_v17 }
 0x10a   :  { %v676_v46 = vpop.f32.mrf.mxu0 }
 0x10b   :  { %v749_v1 = vpop.f32.mrf.mxu1  ;;  %v677_v21 = vadd.f32 %v676_v46, %v132_v59  ;;  %v746_v37 = vadd.f32 %v745_v45, %v673_v20  ;;  %v157_v46 = vpop.permute.xlu1 %156 }
 0x10c   :  { %v678_v47 = vpop.f32.mrf.mxu0 }
 0x10d   :  { %v1513_v48 = vpop.f32.mrf.mxu1  ;;  %v679_v29 = vadd.f32 %v678_v47, %v132_v59  ;;  %v750_v38 = vadd.f32 %v749_v1, %v677_v21 }
 0x10e   :  { %v1515_v49 = vpop.f32.mrf.mxu0 }
 0x10f   :  { %v1517_v50 = vpop.f32.mrf.mxu1  ;;  %v752_v47 = vadd.f32 %v1513_v48, %v679_v29 }
 0x110   :  { %v1519_v52 = vpop.f32.mrf.mxu0 }
 0x111   :  { %v1521_v53 = vpop.f32.mrf.mxu1 }
 0x112   :  { %v686_v54 = vpop.f32.mrf.mxu0 }
 0x113   :  { %v759_v55 = vpop.f32.mrf.mxu1  ;;  %v687_v8 = vadd.f32 %v686_v54, %v142_v0 }
 0x114   :  { %v688_v56 = vpop.f32.mrf.mxu0 }
 0x115   :  { %v761_v57 = vpop.f32.mrf.mxu1  ;;  %v689_v12 = vadd.f32 %v688_v56, %v142_v0  ;;  %v760_v18 = vadd.f32 %v759_v55, %v687_v8 }
 0x116   :  { %v690_v60 = vpop.f32.mrf.mxu0 }
 0x117   :  { %v763_v61 = vpop.f32.mrf.mxu1  ;;  %v691_v22 = vadd.f32 %v690_v60, %v147_v13  ;;  %v762_v26 = vadd.f32 %v761_v57, %v689_v12  ;;  %v681_v60 = vadd.f32 %v1515_v49, %v137_v4 }
 0x118   :  { %v692_v62 = vpop.f32.mrf.mxu0 }
 0x119   :  { %v765_v63 = vpop.f32.mrf.mxu1  ;;  %v693_v30 = vadd.f32 %v692_v62, %v147_v13  ;;  %v764_v39 = vadd.f32 %v763_v61, %v691_v22  ;;  %v683_v62 = vadd.f32 %v1519_v52, %v137_v4 }
 0x11a   :  { %v696_v2 = vpop.f32.mrf.mxu0 }
 0x11b   :  { %v769_v3 = vpop.f32.mrf.mxu1  ;;  %v697_v34 = vadd.f32 %v696_v2, %v152_v19  ;;  %v766_v56 = vadd.f32 %v765_v63, %v693_v30 }
 0x11c   :  { %v698_v5 = vpop.f32.mrf.mxu0 }
 0x11d   :  { %v771_v6 = vpop.f32.mrf.mxu1  ;;  %v699_v40 = vadd.f32 %v698_v5, %v152_v19  ;;  %v770_v45 = vadd.f32 %v769_v3, %v697_v34 }
 0x11e   :  { %v700_v9 = vpop.f32.mrf.mxu0 }
 0x11f   :  { %v1523_v10 = vpop.f32.mrf.mxu1  ;;  %v701_v0 = vadd.f32 %v700_v9, %v157_v46  ;;  %v772_v11 = vadd.f32 %v771_v6, %v699_v40  ;;  %v754_v6 = vadd.f32 %v1517_v50, %v681_v60 }
 0x120   :  { %v702_v14 = vpop.f32.mrf.mxu0 }
 0x121   :  { %v1525_v15 = vpop.f32.mrf.mxu1  ;;  %v703_v12 = vadd.f32 %v702_v14, %v157_v46  ;;  %v774_v14 = vadd.f32 %v1523_v10, %v701_v0 }
 0x122   :  { %v812_v23 = vpop.f32.mrf.mxu0 }
 0x123   :  { %v832_v24 = vpop.f32.mrf.mxu1  ;;  %v813_v27 = vadd.f32 %v812_v23, %v740_v16 }
 0x124   :  { %v833_v28 = vadd.f32 %v832_v24, %v760_v18  ;;  %v814_v31 = vpop.f32.mrf.mxu0 }
 0x125   :  { %v834_v32 = vpop.f32.mrf.mxu1  ;;  %v815_v35 = vadd.f32 %v814_v31, %v742_v25  ;;  %v851_v51 = vmax.f32 %v813_v27, 0.0  ;;  %v776_v27 = vadd.f32 %v1525_v15, %v703_v12 }
 0x126   :  { %v835_v36 = vadd.f32 %v834_v32, %v762_v26  ;;  %v816_v42 = vpop.f32.mrf.mxu0  ;;  %v859_v41 = vmax.f32 %v833_v28, 0.0  ;;  %v756_v26 = vadd.f32 %v1521_v53, %v683_v62 }
 0x127   :  { %v836_v44 = vpop.f32.mrf.mxu1  ;;  %v852_v54 = vmax.f32 %v815_v35, 0.0  ;;  %v817_v57 = vadd.f32 %v816_v42, %v744_v33 }
 0x128   :  { %v860_v55 = vmax.f32 %v835_v36, 0.0  ;;  %v837_v58 = vadd.f32 %v836_v44, %v764_v39  ;;  %v818_v43 = vpop.f32.mrf.mxu0 }
 0x129   :  { %v838_v59 = vpop.f32.mrf.mxu1  ;;  %v1031_v1 = vpack.c.bf16 %v852_v54, %v851_v51  ;;  %v819_v2 = vadd.f32 %v818_v43, %v746_v37  ;;  %v853_v63 = vmax.f32 %v817_v57, 0.0 }
 0x12a   :  { %v1035_v61 = vpack.c.bf16 %v860_v55, %v859_v41  ;;  %v839_v5 = vadd.f32 %v838_v59, %v766_v56  ;;  %v822_v7 = vpop.f32.mrf.mxu0  ;;  %v861_v3 = vmax.f32 %v837_v58, 0.0 }
 0x12b   :  { %v842_v8 = vpop.f32.mrf.mxu1  ;;  %915 = vst [vmem:[%s1561_s3] sm:$0xff] %v1031_v1  ;;  %v823_v48 = vadd.f32 %v822_v7, %v750_v38  ;;  %v854_v52 = vmax.f32 %v819_v2, 0.0 }
 0x12c   :  { %919 = vst [vmem:[%s1561_s3 + $0x20] sm:$0xff] %v1035_v61  ;;  %v843_v49 = vadd.f32 %v842_v8, %v770_v45  ;;  %v862_v4 = vmax.f32 %v839_v5, 0.0  ;;  %v824_v9 = vpop.f32.mrf.mxu0 }
 0x12d   :  { %v844_v13 = vpop.f32.mrf.mxu1  ;;  %v825_v16 = vadd.f32 %v824_v9, %v752_v47  ;;  %v1032_v18 = vpack.c.bf16 %v854_v52, %v853_v63  ;;  %v855_v22 = vmax.f32 %v823_v48, 0.0 }
 0x12e   :  { %v845_v17 = vadd.f32 %v844_v13, %v772_v11  ;;  %v1036_v19 = vpack.c.bf16 %v862_v4, %v861_v3  ;;  %v826_v20 = vpop.f32.mrf.mxu0  ;;  %v863_v23 = vmax.f32 %v843_v49, 0.0 }
 0x12f   :  { %v846_v21 = vpop.f32.mrf.mxu1  ;;  %v856_v24 = vmax.f32 %v825_v16, 0.0  ;;  %916 = vst [vmem:[%s1561_s3 + $0x8] sm:$0xff] %v1032_v18  ;;  %v827_v50 = vadd.f32 %v826_v20, %v754_v6 }
 0x130   :  { %v864_v25 = vmax.f32 %v845_v17, 0.0  ;;  %920 = vst [vmem:[%s1561_s3 + $0x28] sm:$0xff] %v1036_v19  ;;  %v847_v10 = vadd.f32 %v846_v21, %v774_v14  ;;  %v828_v28 = vpop.f32.mrf.mxu0 }
 0x131   :  { %v848_v29 = vpop.f32.mrf.mxu1  ;;  %v1033_v30 = vpack.c.bf16 %v856_v24, %v855_v22  ;;  %v829_v32 = vadd.f32 %v828_v28, %v756_v26  ;;  %v857_v53 = vmax.f32 %v827_v50, 0.0 }
 0x132   :  { %v1037_v31 = vpack.c.bf16 %v864_v25, %v863_v23  ;;  %v849_v33 = vadd.f32 %v848_v29, %v776_v27  ;;  %v865_v15 = vmax.f32 %v847_v10, 0.0 }
 0x133   :  { %917 = vst [vmem:[%s1561_s3 + $0x10] sm:$0xff] %v1033_v30  ;;  %v858_v34 = vmax.f32 %v829_v32, 0.0 }
 0x134   :  { %921 = vst [vmem:[%s1561_s3 + $0x30] sm:$0xff] %v1037_v31  ;;  %v866_v35 = vmax.f32 %v849_v33, 0.0 }
 0x135   :  { %v1034_v36 = vpack.c.bf16 %v858_v34, %v857_v53 }
 0x136   :  { %v1038_v37 = vpack.c.bf16 %v866_v35, %v865_v15 }
 0x137   :  { %918 = vst [vmem:[%s1561_s3 + $0x18] sm:$0xff] %v1034_v36 }
 0x138   :  { %922 = vst [vmem:[%s1561_s3 + $0x38] sm:$0xff] %v1038_v37 }

// kernel: _lambda_.25
= control target key start
LH: loop header
LB: loop body
LE: loop exit
PB: predicated region body
PF: predicated region fallthrough
CT: control target
= control target key end

     0   :  { %v706_v1 = vmov 0   ;;  %vm375_vm0 = vcmask 1043456   ;;  %vm365_vm1 = vcmask 850944   ;;  %s924_s0 = inlined_call_operand.vmem [shape: bf16[360,256], index: 0, kind: input, shape index: {}]   ;;  %s925_s1 = inlined_call_operand.vmem [shape: bf16[40,360], index: 1, kind: input, shape index: {}]   ;;  %s926_s2 = inlined_call_operand.vmem [shape: f32[40,1], index: 2, kind: input, shape index: {}]   ;;  %s927_s3 = inlined_call_operand.vmem [shape: bf16[40,256], index: 3, kind: output, shape index: {}]  }
   0x1   :  { %v627_v0 = vld [vmem:[%s924_s0 + $0x74] ss:$8 sps:$4 sm:$0xff]   ;;  %475 = vmatprep.mubr.bf16.mxu1 %v706_v1  ;;  %625 = vset.pattern.permute.xlu0 %v706_v1  ;;  %v629_v2 = vld [vmem:[%s924_s0 + $0x70] ss:$8 sps:$4 sm:$0xff]   ;;  %v630_v3 = vld [vmem:[%s924_s0 + $0x64] ss:$8 sps:$4 sm:$0xff]  }
   0x2   :  { %626 = vset.pattern.permute.xlu1 %v706_v1  ;;  %382 = vmatprep.subr.bf16.mxu0 %v627_v0  ;;  %v632_v4 = vld [vmem:[%s924_s0 + $0x60] ss:$8 sps:$4 sm:$0xff]   ;;  %v633_v5 = vld [vmem:[%s924_s0 + $0x54] ss:$8 sps:$4 sm:$0xff]   ;;  %v635_v6 = vld [vmem:[%s924_s0 + $0x50] ss:$8 sps:$4 sm:$0xff]  }
   0x3   :  { %383 = vmatpush1.bf16.msra.mxu0 %v629_v2  ;;  %v636_v7 = vld [vmem:[%s924_s0 + $0x44] ss:$8 sps:$4 sm:$0xff]   ;;  %v638_v8 = vld [vmem:[%s924_s0 + $0x40] ss:$8 sps:$4 sm:$0xff]   ;;  %v639_v10 = vld [vmem:[%s924_s0 + $0x34] ss:$8 sps:$4 sm:$0xff]  }
   0x4   :  { %384 = vmatprep.subr.bf16.mxu0 %v630_v3  ;;  %v69_v9 = vld [vmem:[%s924_s0 + $0x160] sm:$0xff]  ;;  %v641_v13 = vld [vmem:[%s924_s0 + $0x30] ss:$8 sps:$4 sm:$0xff]   ;;  %v658_v15 = vld [vmem:[%s924_s0 + $0x154] ss:$8 sps:$4 sm:$0xff]  }
   0x5   :  { %v609_v11 = vcombine.high %v69_v9, %v69_v9  ;;  %v608_v12 = vcombine.low %v69_v9, %v69_v9  ;;  %v642_v16 = vld [vmem:[%s924_s0 + $0x24] ss:$8 sps:$4 sm:$0xff]   ;;  %v661_v17 = vld [vmem:[%s924_s0 + $0x150] ss:$8 sps:$4 sm:$0xff]   ;;  %v644_v19 = vld [vmem:[%s924_s0 + $0x20] ss:$8 sps:$4 sm:$0xff]  }
   0x6   :  { %v664_v18 = vld [vmem:[%s924_s0 + $0x144] ss:$8 sps:$4 sm:$0xff]   ;;  %v645_v20 = vld [vmem:[%s924_s0 + $0x14] ss:$8 sps:$4 sm:$0xff]   ;;  %v667_v21 = vld [vmem:[%s924_s0 + $0x140] ss:$8 sps:$4 sm:$0xff]  }
   0x7   :  { %385 = vmatpush1.bf16.msra.mxu0 %v632_v4  ;;  %610 = vmatprep.subr.msk.bf16.mxu1 %vm375_vm0, %v609_v11  ;;  %v377_v14 = vsel %vm375_vm0, %v608_v12, 0  ;;  %v670_v22 = vld [vmem:[%s924_s0 + $0x134] ss:$8 sps:$4 sm:$0xff]   ;;  %v647_v23 = vld [vmem:[%s924_s0 + $0x10] ss:$8 sps:$4 sm:$0xff]   ;;  %v70_v38 = vld [vmem:[%s926_s2] sm:$0xff] }
   0x8   :  { %386 = vmatprep.subr.bf16.mxu0 %v633_v5  ;;  %446 = vmatpush1.bf16.msra.mxu1 %v377_v14  ;;  %v648_v24 = vld [vmem:[%s924_s0 + $0x4] ss:$8 sps:$4 sm:$0xff]   ;;  %v673_v25 = vld [vmem:[%s924_s0 + $0x130] ss:$8 sps:$4 sm:$0xff]   ;;  %v650_v27 = vld [vmem:[%s924_s0] ss:$8 sps:$4 sm:$0xff]  }
   0x9   :  { %447 = vmatprep.subr.bf16.mxu1 %v658_v15  ;;  %v676_v26 = vld [vmem:[%s924_s0 + $0x124] ss:$8 sps:$4 sm:$0xff]   ;;  %v651_v28 = vld [vmem:[%s924_s0 + $0xf4] ss:$8 sps:$4 sm:$0xff]   ;;  %v679_v29 = vld [vmem:[%s924_s0 + $0x120] ss:$8 sps:$4 sm:$0xff]   ;;  %77 = vperm.xlu0 %625, %v70_v38  }
   0xa   :  { %v682_v30 = vld [vmem:[%s924_s0 + $0x114] ss:$8 sps:$4 sm:$0xff]   ;;  %v654_v31 = vld [vmem:[%s924_s0 + $0xf0] ss:$8 sps:$4 sm:$0xff]   ;;  %v656_v32 = vld [vmem:[%s924_s0 + $0xe4] ss:$8 sps:$4 sm:$0xff]  }
   0xb   :  { %387 = vmatpush1.bf16.msra.mxu0 %v635_v6  ;;  %v685_v33 = vld [vmem:[%s924_s0 + $0x110] ss:$8 sps:$4 sm:$0xff]   ;;  %v688_v35 = vld [vmem:[%s924_s0 + $0x104] ss:$8 sps:$4 sm:$0xff]   ;;  %v660_v36 = vld [vmem:[%s924_s0 + $0xe0] ss:$8 sps:$4 sm:$0xff]  }
   0xc   :  { %388 = vmatprep.subr.bf16.mxu0 %v636_v7  ;;  %448 = vmatpush1.bf16.msra.mxu1 %v661_v17  ;;  %v698_v34 = vld [vmem:[%s925_s1 + $0x4] ss:$12 sps:$4 sm:$0xff]   ;;  %v691_v37 = vld [vmem:[%s924_s0 + $0x100] ss:$8 sps:$4 sm:$0xff]   ;;  %v662_v39 = vld [vmem:[%s924_s0 + $0xd4] ss:$8 sps:$4 sm:$0xff]  }
   0xd   :  { %449 = vmatprep.subr.bf16.mxu1 %v664_v18  ;;  %414 = vmatprep.mubr.bf16.mxu0 %v698_v34  ;;  %v72_v40 = vld [vmem:[%s926_s2 + $0x10] sm:$0xff]  ;;  %v71_v42 = vld [vmem:[%s926_s2 + $0x8] sm:$0xff]  ;;  %v73_v43 = vld [vmem:[%s926_s2 + $0x18] sm:$0xff] }
   0xe   :  { %87 = vperm.xlu1 %626, %v72_v40   ;;  %v694_v41 = vld [vmem:[%s925_s1 + $0x8] ss:$12 sps:$4 sm:$0xff]   ;;  %v666_v44 = vld [vmem:[%s924_s0 + $0xd0] ss:$8 sps:$4 sm:$0xff]   ;;  %v668_v45 = vld [vmem:[%s924_s0 + $0xc4] ss:$8 sps:$4 sm:$0xff]   ;;  %82 = vperm.xlu0 %625, %v71_v42  }
   0xf   :  { %389 = vmatpush1.bf16.msra.mxu0 %v638_v8  ;;  %v74_v46 = vld [vmem:[%s926_s2 + $0x20] sm:$0xff]  ;;  %v674_v48 = vld [vmem:[%s924_s0 + $0xb4] ss:$8 sps:$4 sm:$0xff]   ;;  %v678_v50 = vld [vmem:[%s924_s0 + $0xb0] ss:$8 sps:$4 sm:$0xff]  }
  0x10   :  { %390 = vmatprep.subr.bf16.mxu0 %v639_v10  ;;  %450 = vmatpush1.bf16.msra.mxu1 %v667_v21  ;;  %v672_v47 = vld [vmem:[%s924_s0 + $0xc0] ss:$8 sps:$4 sm:$0xff]   ;;  %v680_v51 = vld [vmem:[%s924_s0 + $0xa4] ss:$8 sps:$4 sm:$0xff]   ;;  %v686_v53 = vld [vmem:[%s924_s0 + $0x94] ss:$8 sps:$4 sm:$0xff]  }
  0x11   :  { %451 = vmatprep.subr.bf16.mxu1 %v670_v22  ;;  %v699_v49 = vld [vmem:[%s925_s1 + $0x20] ss:$12 sps:$4 sm:$0xff]   ;;  %v703_v54 = vld [vmem:[%s925_s1 + $0x38] ss:$0 sps:$4 sm:$0xff]   ;;  %v700_v59 = vld [vmem:[%s925_s1 + $0x1c] ss:$12 sps:$4 sm:$0xff]  }
  0x12   :  { %92 = vperm.xlu1 %626, %v73_v43   ;;  %97 = vperm.xlu0 %625, %v74_v46   ;;  %v684_v52 = vld [vmem:[%s924_s0 + $0xa0] ss:$8 sps:$4 sm:$0xff]   ;;  %v690_v55 = vld [vmem:[%s924_s0 + $0x90] ss:$8 sps:$4 sm:$0xff]   ;;  %v692_v56 = vld [vmem:[%s924_s0 + $0x84] ss:$8 sps:$4 sm:$0xff]  }
  0x13   :  { %391 = vmatpush1.bf16.msra.mxu0 %v641_v13  ;;  %v695_v57 = vld [vmem:[%s924_s0 + $0x80] ss:$8 sps:$4 sm:$0xff]   ;;  %v23_v60 = vld [vmem:[%s925_s1 + $0x30] sm:$0xff]  ;;  %v702_v61 = vld [vmem:[%s925_s1 + $0x18] ss:$12 sps:$4 sm:$0xff]  }
  0x14   :  { %392 = vmatprep.subr.bf16.mxu0 %v642_v16  ;;  %452 = vmatpush1.bf16.msra.mxu1 %v673_v25  ;;  %v696_v58 = vld [vmem:[%s925_s1] ss:$12 sps:$4 sm:$0xff]   ;;  %v562_v62 = vcombine.high %v23_v60, %v23_v60  ;;  %v561_v63 = vcombine.low %v23_v60, %v23_v60 }
  0x15   :  { %453 = vmatprep.subr.bf16.mxu1 %v676_v26 }
  0x17   :  { %393 = vmatpush1.bf16.msra.mxu0 %v644_v19 }
  0x18   :  { %394 = vmatprep.subr.bf16.mxu0 %v645_v20  ;;  %454 = vmatpush1.bf16.msra.mxu1 %v679_v29 }
  0x19   :  { %455 = vmatprep.subr.bf16.mxu1 %v682_v30 }
  0x1b   :  { %395 = vmatpush1.bf16.msra.mxu0 %v647_v23 }
  0x1c   :  { %396 = vmatprep.subr.bf16.mxu0 %v648_v24  ;;  %456 = vmatpush1.bf16.msra.mxu1 %v685_v33 }
  0x1d   :  { %457 = vmatprep.subr.bf16.mxu1 %v688_v35 }
  0x1f   :  { %397 = vmatpush1.bf16.msra.mxu0 %v650_v27 }
  0x20   :  { %398 = vmatprep.subr.bf16.mxu0 %v651_v28  ;;  %458 = vmatpush1.bf16.msra.mxu1 %v691_v37 }
  0x23   :  { %399 = vmatpush2.bf16.msra.mxu0 %v654_v31  ;;  %611 = vmatmul.mubr.msk.bf16.vlgmr.msra.gmra.mxu1 %vm365_vm1, %v694_v41 }
  0x24   :  { %400 = vmatprep.subr.bf16.mxu0 %v656_v32  ;;  %485 = vmatprep.mubr.bf16.mxu1 %v706_v1 }
  0x27   :  { %401 = vmatpush2.bf16.msra.mxu0 %v660_v36 }
  0x28   :  { %402 = vmatprep.subr.bf16.mxu0 %v662_v39 }
  0x2b   :  { %403 = vmatpush2.bf16.msra.mxu0 %v666_v44  ;;  %612 = vmatmul.mubr.msk.bf16.gmra.mxu1 %vm365_vm1, %v699_v49 }
  0x2c   :  { %404 = vmatprep.subr.bf16.mxu0 %v668_v45  ;;  %495 = vmatprep.mubr.bf16.mxu1 %v706_v1 }
  0x2f   :  { %405 = vmatpush2.bf16.msra.mxu0 %v672_v47 }
  0x30   :  { %406 = vmatprep.subr.bf16.mxu0 %v674_v48 }
  0x33   :  { %407 = vmatpush2.bf16.msra.mxu0 %v678_v50  ;;  %613 = vmatmul.mubr.msk.bf16.gmra.mxu1 %vm365_vm1, %v703_v54 }
  0x34   :  { %408 = vmatprep.subr.bf16.mxu0 %v680_v51 }
  0x37   :  { %409 = vmatpush2.bf16.msra.mxu0 %v684_v52 }
  0x38   :  { %410 = vmatprep.subr.bf16.mxu0 %v686_v53 }
  0x3b   :  { %411 = vmatpush2.bf16.msra.mxu0 %v690_v55 }
  0x3c   :  { %412 = vmatprep.subr.bf16.mxu0 %v692_v56 }
  0x3f   :  { %413 = vmatpush2.bf16.msra.mxu0 %v695_v57 }
  0x42   :  { %415 = vmatmul.mubr.bf16.vlgmr.msra.gmra.mxu0 %v696_v58 }
  0x43   :  { %424 = vmatprep.mubr.bf16.mxu0 %v700_v59 }
  0x4a   :  { %425 = vmatmul.mubr.bf16.gmra.mxu0 %v702_v61 }
  0x4b   :  { %434 = vmatprep.mubr.bf16.mxu0 %v562_v62 }
  0x52   :  { %435 = vmatmul.mubr.bf16.gmra.mxu0 %v561_v63 }
  0x84   :  { %v78_v10 = vpop.permute.xlu0 %77 }
  0x89   :  { %v83_v16 = vpop.permute.xlu0 %82  ;;  %v88_v20 = vpop.permute.xlu1 %87 }
  0x8d   :  { %v93_v33 = vpop.permute.xlu1 %92  ;;  %v98_v47 = vpop.permute.xlu0 %97 }
  0xe3   :  { %v477_v0 = vpop.f32.mrf.mxu1 }
  0xe5   :  { %v479_v1 = vpop.f32.mrf.mxu1 }
  0xe7   :  { %v481_v2 = vpop.f32.mrf.mxu1 }
  0xe9   :  { %v483_v3 = vpop.f32.mrf.mxu1 }
  0xeb   :  { %v487_v4 = vpop.f32.mrf.mxu1 }
  0xed   :  { %v489_v5 = vpop.f32.mrf.mxu1 }
  0xef   :  { %v491_v6 = vpop.f32.mrf.mxu1 }
  0xf1   :  { %v493_v7 = vpop.f32.mrf.mxu1 }
  0xf3   :  { %v497_v8 = vpop.f32.mrf.mxu1 }
  0xf5   :  { %v499_v9 = vpop.f32.mrf.mxu1 }
  0xf7   :  { %v501_v11 = vpop.f32.mrf.mxu1 }
  0xf9   :  { %v502_v12 = vpop.f32.mrf.mxu1 }
 0x102   :  { %v416_v13 = vpop.f32.mrf.mxu0 }
 0x103   :  { %v417_v14 = vadd.f32 %v416_v13, %v78_v10 }
 0x104   :  { %v418_v15 = vpop.f32.mrf.mxu0 }
 0x105   :  { %v478_v17 = vadd.f32 %v477_v0, %v417_v14  ;;  %v419_v18 = vadd.f32 %v418_v15, %v78_v10 }
 0x106   :  { %v420_v19 = vpop.f32.mrf.mxu0 }
 0x107   :  { %v480_v21 = vadd.f32 %v479_v1, %v419_v18  ;;  %v421_v22 = vadd.f32 %v420_v19, %v83_v16  ;;  %v504_v24 = vmax.f32 %v478_v17, 0.0 }
 0x108   :  { %v422_v23 = vpop.f32.mrf.mxu0 }
 0x109   :  { %v505_v25 = vmax.f32 %v480_v21, 0.0  ;;  %v482_v26 = vadd.f32 %v481_v2, %v421_v22  ;;  %v423_v27 = vadd.f32 %v422_v23, %v83_v16 }
 0x10a   :  { %v426_v28 = vpop.f32.mrf.mxu0 }
 0x10b   :  { %v619_v29 = vpack.c.bf16 %v505_v25, %v504_v24  ;;  %v484_v30 = vadd.f32 %v483_v3, %v423_v27  ;;  %v427_v31 = vadd.f32 %v426_v28, %v88_v20  ;;  %v506_v34 = vmax.f32 %v482_v26, 0.0 }
 0x10c   :  { %v428_v32 = vpop.f32.mrf.mxu0 }
 0x10d   :  { %546 = vst [vmem:[%s927_s3] sm:$0xff] %v619_v29  ;;  %v507_v35 = vmax.f32 %v484_v30, 0.0  ;;  %v488_v36 = vadd.f32 %v487_v4, %v427_v31  ;;  %v429_v37 = vadd.f32 %v428_v32, %v88_v20 }
 0x10e   :  { %v430_v38 = vpop.f32.mrf.mxu0 }
 0x10f   :  { %v620_v39 = vpack.c.bf16 %v507_v35, %v506_v34  ;;  %v490_v40 = vadd.f32 %v489_v5, %v429_v37  ;;  %v431_v41 = vadd.f32 %v430_v38, %v93_v33  ;;  %v508_v43 = vmax.f32 %v488_v36, 0.0 }
 0x110   :  { %v432_v42 = vpop.f32.mrf.mxu0 }
 0x111   :  { %547 = vst [vmem:[%s927_s3 + $0x8] sm:$0xff] %v620_v39  ;;  %v509_v44 = vmax.f32 %v490_v40, 0.0  ;;  %v492_v45 = vadd.f32 %v491_v6, %v431_v41  ;;  %v433_v46 = vadd.f32 %v432_v42, %v93_v33 }
 0x112   :  { %v436_v48 = vpop.f32.mrf.mxu0 }
 0x113   :  { %v621_v49 = vpack.c.bf16 %v509_v44, %v508_v43  ;;  %v494_v50 = vadd.f32 %v493_v7, %v433_v46  ;;  %v437_v51 = vadd.f32 %v436_v48, %v98_v47  ;;  %v510_v53 = vmax.f32 %v492_v45, 0.0 }
 0x114   :  { %v438_v52 = vpop.f32.mrf.mxu0 }
 0x115   :  { %548 = vst [vmem:[%s927_s3 + $0x10] sm:$0xff] %v621_v49  ;;  %v511_v54 = vmax.f32 %v494_v50, 0.0  ;;  %v498_v55 = vadd.f32 %v497_v8, %v437_v51  ;;  %v439_v56 = vadd.f32 %v438_v52, %v98_v47 }
 0x116   :  { %v440_v57 = vpop.f32.mrf.mxu0 }
 0x117   :  { %v622_v58 = vpack.c.bf16 %v511_v54, %v510_v53  ;;  %v500_v59 = vadd.f32 %v499_v9, %v439_v56  ;;  %v512_v61 = vmax.f32 %v498_v55, 0.0 }
 0x118   :  { %v441_v60 = vpop.f32.mrf.mxu0 }
 0x119   :  { %549 = vst [vmem:[%s927_s3 + $0x18] sm:$0xff] %v622_v58  ;;  %v513_v62 = vmax.f32 %v500_v59, 0.0 }
 0x11b   :  { %v623_v63 = vpack.c.bf16 %v513_v62, %v512_v61 }
 0x11d   :  { %550 = vst [vmem:[%s927_s3 + $0x20] sm:$0xff] %v623_v63 }

// kernel: _lambda_.26
= control target key start
LH: loop header
LB: loop body
LE: loop exit
PB: predicated region body
PF: predicated region fallthrough
CT: control target
= control target key end

     0   :  { %v563_v1 = vmov 0   ;;  %vm293_vm0 = vcmask 261120   ;;  %s736_s0 = inlined_call_operand.vmem [shape: bf16[288,256], index: 0, kind: input, shape index: {}]   ;;  %s737_s1 = inlined_call_operand.vmem [shape: bf16[32,288], index: 1, kind: input, shape index: {}]   ;;  %s738_s2 = inlined_call_operand.vmem [shape: f32[32,1], index: 2, kind: input, shape index: {}]   ;;  %s739_s3 = inlined_call_operand.vmem [shape: bf16[32,256], index: 3, kind: output, shape index: {}]  }
   0x1   :  { %v501_v0 = vld [vmem:[%s736_s0 + $0x74] ss:$8 sps:$4 sm:$0xff]   ;;  %385 = vmatprep.mubr.bf16.mxu1 %v563_v1  ;;  %499 = vset.pattern.permute.xlu0 %v563_v1  ;;  %v503_v2 = vld [vmem:[%s736_s0 + $0x70] ss:$8 sps:$4 sm:$0xff]   ;;  %v504_v3 = vld [vmem:[%s736_s0 + $0x64] ss:$8 sps:$4 sm:$0xff]  }
   0x2   :  { %500 = vset.pattern.permute.xlu1 %v563_v1  ;;  %300 = vmatprep.subr.bf16.mxu0 %v501_v0  ;;  %v506_v4 = vld [vmem:[%s736_s0 + $0x60] ss:$8 sps:$4 sm:$0xff]   ;;  %v507_v5 = vld [vmem:[%s736_s0 + $0x54] ss:$8 sps:$4 sm:$0xff]   ;;  %v509_v6 = vld [vmem:[%s736_s0 + $0x50] ss:$8 sps:$4 sm:$0xff]  }
   0x3   :  { %301 = vmatpush1.bf16.msra.mxu0 %v503_v2  ;;  %v510_v7 = vld [vmem:[%s736_s0 + $0x44] ss:$8 sps:$4 sm:$0xff]   ;;  %v512_v8 = vld [vmem:[%s736_s0 + $0x40] ss:$8 sps:$4 sm:$0xff]   ;;  %v513_v9 = vld [vmem:[%s736_s0 + $0x34] ss:$8 sps:$4 sm:$0xff]  }
   0x4   :  { %302 = vmatprep.subr.bf16.mxu0 %v504_v3  ;;  %v515_v10 = vld [vmem:[%s736_s0 + $0x30] ss:$8 sps:$4 sm:$0xff]   ;;  %v516_v11 = vld [vmem:[%s736_s0 + $0x24] ss:$8 sps:$4 sm:$0xff]   ;;  %v518_v12 = vld [vmem:[%s736_s0 + $0x20] ss:$8 sps:$4 sm:$0xff]  }
   0x5   :  { %v542_v13 = vld [vmem:[%s736_s0 + $0x114] ss:$8 sps:$4 sm:$0xff]   ;;  %v545_v14 = vld [vmem:[%s736_s0 + $0x110] ss:$8 sps:$4 sm:$0xff]   ;;  %v548_v16 = vld [vmem:[%s736_s0 + $0x104] ss:$8 sps:$4 sm:$0xff]  }
   0x6   :  { %v519_v15 = vld [vmem:[%s736_s0 + $0x14] ss:$8 sps:$4 sm:$0xff]   ;;  %365 = vmatprep.subr.bf16.mxu1 %v542_v13  ;;  %v551_v17 = vld [vmem:[%s736_s0 + $0x100] ss:$8 sps:$4 sm:$0xff]   ;;  %v521_v18 = vld [vmem:[%s736_s0 + $0x10] ss:$8 sps:$4 sm:$0xff]  }
   0x7   :  { %303 = vmatpush1.bf16.msra.mxu0 %v506_v4  ;;  %366 = vmatpush1.bf16.msra.mxu1 %v545_v14  ;;  %v522_v19 = vld [vmem:[%s736_s0 + $0x4] ss:$8 sps:$4 sm:$0xff]   ;;  %v554_v20 = vld [vmem:[%s737_s1 + $0x8] ss:$12 sps:$4 sm:$0xff]   ;;  %v527_v27 = vld [vmem:[%s736_s0 + $0xf0] ss:$8 sps:$4 sm:$0xff]  }
   0x8   :  { %304 = vmatprep.subr.bf16.mxu0 %v507_v5  ;;  %367 = vmatprep.subr.bf16.mxu1 %v548_v16  ;;  %v558_v21 = vld [vmem:[%s737_s1 + $0x4] ss:$12 sps:$4 sm:$0xff]   ;;  %v524_v22 = vld [vmem:[%s736_s0] ss:$8 sps:$4 sm:$0xff]   ;;  %v525_v23 = vld [vmem:[%s736_s0 + $0xf4] ss:$8 sps:$4 sm:$0xff]  }
   0x9   :  { %332 = vmatprep.mubr.bf16.mxu0 %v558_v21  ;;  %v59_v24 = vld [vmem:[%s738_s2] sm:$0xff]  ;;  %v61_v25 = vld [vmem:[%s738_s2 + $0x10] sm:$0xff]  ;;  %v60_v26 = vld [vmem:[%s738_s2 + $0x8] sm:$0xff] }
   0xa   :  { %65 = vperm.xlu0 %499, %v59_v24   ;;  %75 = vperm.xlu1 %500, %v61_v25   ;;  %v62_v28 = vld [vmem:[%s738_s2 + $0x18] sm:$0xff]  ;;  %v528_v29 = vld [vmem:[%s736_s0 + $0xe4] ss:$8 sps:$4 sm:$0xff]   ;;  %v530_v31 = vld [vmem:[%s736_s0 + $0xe0] ss:$8 sps:$4 sm:$0xff]  }
   0xb   :  { %305 = vmatpush1.bf16.msra.mxu0 %v509_v6  ;;  %368 = vmatpush1.bf16.msra.mxu1 %v551_v17  ;;  %v559_v30 = vld [vmem:[%s737_s1 + $0x20] ss:$12 sps:$4 sm:$0xff]   ;;  %v531_v32 = vld [vmem:[%s736_s0 + $0xd4] ss:$8 sps:$4 sm:$0xff]   ;;  %v533_v33 = vld [vmem:[%s736_s0 + $0xd0] ss:$8 sps:$4 sm:$0xff]  }
   0xc   :  { %306 = vmatprep.subr.bf16.mxu0 %v510_v7  ;;  %v534_v34 = vld [vmem:[%s736_s0 + $0xc4] ss:$8 sps:$4 sm:$0xff]   ;;  %v536_v35 = vld [vmem:[%s736_s0 + $0xc0] ss:$8 sps:$4 sm:$0xff]   ;;  %v537_v36 = vld [vmem:[%s736_s0 + $0xb4] ss:$8 sps:$4 sm:$0xff]  }
   0xd   :  { %v539_v37 = vld [vmem:[%s736_s0 + $0xb0] ss:$8 sps:$4 sm:$0xff]   ;;  %v540_v38 = vld [vmem:[%s736_s0 + $0xa4] ss:$8 sps:$4 sm:$0xff]   ;;  %v544_v39 = vld [vmem:[%s736_s0 + $0xa0] ss:$8 sps:$4 sm:$0xff]  }
   0xe   :  { %488 = vmatmul.mubr.msk.bf16.vlgmr.msra.gmra.mxu1 %vm293_vm0, %v554_v20  ;;  %70 = vperm.xlu0 %499, %v60_v26   ;;  %v546_v40 = vld [vmem:[%s736_s0 + $0x94] ss:$8 sps:$4 sm:$0xff]   ;;  %v550_v41 = vld [vmem:[%s736_s0 + $0x90] ss:$8 sps:$4 sm:$0xff]   ;;  %v552_v42 = vld [vmem:[%s736_s0 + $0x84] ss:$8 sps:$4 sm:$0xff]  }
   0xf   :  { %307 = vmatpush1.bf16.msra.mxu0 %v512_v8  ;;  %395 = vmatprep.mubr.bf16.mxu1 %v563_v1  ;;  %v555_v43 = vld [vmem:[%s736_s0 + $0x80] ss:$8 sps:$4 sm:$0xff]   ;;  %v562_v46 = vld [vmem:[%s737_s1 + $0x18] ss:$12 sps:$4 sm:$0xff]  }
  0x10   :  { %308 = vmatprep.subr.bf16.mxu0 %v513_v9  ;;  %80 = vperm.xlu1 %500, %v62_v28   ;;  %v556_v44 = vld [vmem:[%s737_s1] ss:$12 sps:$4 sm:$0xff]   ;;  %v560_v45 = vld [vmem:[%s737_s1 + $0x1c] ss:$12 sps:$4 sm:$0xff]  }
  0x13   :  { %309 = vmatpush1.bf16.msra.mxu0 %v515_v10 }
  0x14   :  { %310 = vmatprep.subr.bf16.mxu0 %v516_v11 }
  0x16   :  { %489 = vmatmul.mubr.msk.bf16.gmra.mxu1 %vm293_vm0, %v559_v30 }
  0x17   :  { %311 = vmatpush1.bf16.msra.mxu0 %v518_v12 }
  0x18   :  { %312 = vmatprep.subr.bf16.mxu0 %v519_v15 }
  0x1b   :  { %313 = vmatpush1.bf16.msra.mxu0 %v521_v18 }
  0x1c   :  { %314 = vmatprep.subr.bf16.mxu0 %v522_v19 }
  0x1f   :  { %315 = vmatpush1.bf16.msra.mxu0 %v524_v22 }
  0x20   :  { %316 = vmatprep.subr.bf16.mxu0 %v525_v23 }
  0x23   :  { %317 = vmatpush2.bf16.msra.mxu0 %v527_v27 }
  0x24   :  { %318 = vmatprep.subr.bf16.mxu0 %v528_v29 }
  0x27   :  { %319 = vmatpush2.bf16.msra.mxu0 %v530_v31 }
  0x28   :  { %320 = vmatprep.subr.bf16.mxu0 %v531_v32 }
  0x2b   :  { %321 = vmatpush2.bf16.msra.mxu0 %v533_v33 }
  0x2c   :  { %322 = vmatprep.subr.bf16.mxu0 %v534_v34 }
  0x2f   :  { %323 = vmatpush2.bf16.msra.mxu0 %v536_v35 }
  0x30   :  { %324 = vmatprep.subr.bf16.mxu0 %v537_v36 }
  0x33   :  { %325 = vmatpush2.bf16.msra.mxu0 %v539_v37 }
  0x34   :  { %326 = vmatprep.subr.bf16.mxu0 %v540_v38 }
  0x37   :  { %327 = vmatpush2.bf16.msra.mxu0 %v544_v39 }
  0x38   :  { %328 = vmatprep.subr.bf16.mxu0 %v546_v40 }
  0x3b   :  { %329 = vmatpush2.bf16.msra.mxu0 %v550_v41 }
  0x3c   :  { %330 = vmatprep.subr.bf16.mxu0 %v552_v42 }
  0x3f   :  { %331 = vmatpush2.bf16.msra.mxu0 %v555_v43 }
  0x42   :  { %333 = vmatmul.mubr.bf16.vlgmr.msra.gmra.mxu0 %v556_v44 }
  0x43   :  { %342 = vmatprep.mubr.bf16.mxu0 %v560_v45 }
  0x4a   :  { %343 = vmatmul.mubr.bf16.gmra.mxu0 %v562_v46 }
  0x85   :  { %v66_v49 = vpop.permute.xlu0 %65  ;;  %v76_v62 = vpop.permute.xlu1 %75 }
  0x89   :  { %v71_v55 = vpop.permute.xlu0 %70 }
  0x8b   :  { %v81_v13 = vpop.permute.xlu1 %80 }
  0xce   :  { %v387_v47 = vpop.f32.mrf.mxu1 }
  0xd0   :  { %v389_v48 = vpop.f32.mrf.mxu1 }
  0xd2   :  { %v391_v50 = vpop.f32.mrf.mxu1 }
  0xd4   :  { %v393_v52 = vpop.f32.mrf.mxu1 }
  0xd6   :  { %v397_v59 = vpop.f32.mrf.mxu1 }
  0xd8   :  { %v399_v4 = vpop.f32.mrf.mxu1 }
  0xda   :  { %v401_v15 = vpop.f32.mrf.mxu1 }
  0xdc   :  { %v403_v25 = vpop.f32.mrf.mxu1 }
 0x102   :  { %v334_v51 = vpop.f32.mrf.mxu0 }
 0x103   :  { %v335_v53 = vadd.f32 %v334_v51, %v66_v49 }
 0x104   :  { %v336_v54 = vpop.f32.mrf.mxu0 }
 0x105   :  { %v388_v56 = vadd.f32 %v387_v47, %v335_v53  ;;  %v337_v57 = vadd.f32 %v336_v54, %v66_v49 }
 0x106   :  { %v338_v58 = vpop.f32.mrf.mxu0 }
 0x107   :  { %v390_v60 = vadd.f32 %v389_v48, %v337_v57  ;;  %v339_v61 = vadd.f32 %v338_v58, %v71_v55  ;;  %v406_v0 = vmax.f32 %v388_v56, 0.0 }
 0x108   :  { %v340_v63 = vpop.f32.mrf.mxu0 }
 0x109   :  { %v407_v1 = vmax.f32 %v390_v60, 0.0  ;;  %v392_v2 = vadd.f32 %v391_v50, %v339_v61  ;;  %v341_v3 = vadd.f32 %v340_v63, %v71_v55 }
 0x10a   :  { %v344_v5 = vpop.f32.mrf.mxu0 }
 0x10b   :  { %v494_v6 = vpack.c.bf16 %v407_v1, %v406_v0  ;;  %v394_v7 = vadd.f32 %v393_v52, %v341_v3  ;;  %v345_v8 = vadd.f32 %v344_v5, %v76_v62  ;;  %v408_v10 = vmax.f32 %v392_v2, 0.0 }
 0x10c   :  { %v346_v9 = vpop.f32.mrf.mxu0 }
 0x10d   :  { %438 = vst [vmem:[%s739_s3] sm:$0xff] %v494_v6  ;;  %v409_v11 = vmax.f32 %v394_v7, 0.0  ;;  %v398_v12 = vadd.f32 %v397_v59, %v345_v8  ;;  %v347_v14 = vadd.f32 %v346_v9, %v76_v62 }
 0x10e   :  { %v348_v16 = vpop.f32.mrf.mxu0 }
 0x10f   :  { %v495_v17 = vpack.c.bf16 %v409_v11, %v408_v10  ;;  %v400_v18 = vadd.f32 %v399_v4, %v347_v14  ;;  %v349_v19 = vadd.f32 %v348_v16, %v81_v13  ;;  %v410_v21 = vmax.f32 %v398_v12, 0.0 }
 0x110   :  { %v350_v20 = vpop.f32.mrf.mxu0 }
 0x111   :  { %439 = vst [vmem:[%s739_s3 + $0x8] sm:$0xff] %v495_v17  ;;  %v411_v22 = vmax.f32 %v400_v18, 0.0  ;;  %v402_v23 = vadd.f32 %v401_v15, %v349_v19  ;;  %v351_v24 = vadd.f32 %v350_v20, %v81_v13 }
 0x113   :  { %v496_v26 = vpack.c.bf16 %v411_v22, %v410_v21  ;;  %v404_v27 = vadd.f32 %v403_v25, %v351_v24  ;;  %v412_v28 = vmax.f32 %v402_v23, 0.0 }
 0x115   :  { %440 = vst [vmem:[%s739_s3 + $0x10] sm:$0xff] %v496_v26  ;;  %v413_v29 = vmax.f32 %v404_v27, 0.0 }
 0x117   :  { %v497_v30 = vpack.c.bf16 %v413_v29, %v412_v28 }
 0x119   :  { %441 = vst [vmem:[%s739_s3 + $0x18] sm:$0xff] %v497_v30 }

// kernel: _lambda_.35
= control target key start
LH: loop header
LB: loop body
LE: loop exit
PB: predicated region body
PF: predicated region fallthrough
CT: control target
= control target key end

     0   :  { %v478_v1 = vmov 0   ;;  %vm262_vm0 = vcmask 261120   ;;  %s628_s0 = inlined_call_operand.vmem [shape: bf16[288,256], index: 0, kind: input, shape index: {}]   ;;  %s629_s1 = inlined_call_operand.vmem [shape: bf16[16,288], index: 1, kind: input, shape index: {}]   ;;  %s630_s2 = inlined_call_operand.vmem [shape: f32[16,1], index: 2, kind: input, shape index: {}]   ;;  %s631_s3 = inlined_call_operand.vmem [shape: bf16[16,256], index: 3, kind: output, shape index: {}]  }
   0x1   :  { %v420_v0 = vld [vmem:[%s628_s0 + $0x74] ss:$8 sps:$4 sm:$0xff]   ;;  %341 = vmatprep.mubr.bf16.mxu1 %v478_v1  ;;  %419 = vset.pattern.permute.xlu0 %v478_v1  ;;  %v422_v2 = vld [vmem:[%s628_s0 + $0x70] ss:$8 sps:$4 sm:$0xff]   ;;  %v423_v3 = vld [vmem:[%s628_s0 + $0x64] ss:$8 sps:$4 sm:$0xff]  }
   0x2   :  { %266 = vmatprep.subr.bf16.mxu0 %v420_v0  ;;  %v425_v4 = vld [vmem:[%s628_s0 + $0x60] ss:$8 sps:$4 sm:$0xff]   ;;  %v426_v5 = vld [vmem:[%s628_s0 + $0x54] ss:$8 sps:$4 sm:$0xff]   ;;  %v428_v6 = vld [vmem:[%s628_s0 + $0x50] ss:$8 sps:$4 sm:$0xff]  }
   0x3   :  { %267 = vmatpush1.bf16.msra.mxu0 %v422_v2  ;;  %v429_v7 = vld [vmem:[%s628_s0 + $0x44] ss:$8 sps:$4 sm:$0xff]   ;;  %v431_v8 = vld [vmem:[%s628_s0 + $0x40] ss:$8 sps:$4 sm:$0xff]   ;;  %v432_v9 = vld [vmem:[%s628_s0 + $0x34] ss:$8 sps:$4 sm:$0xff]  }
   0x4   :  { %268 = vmatprep.subr.bf16.mxu0 %v423_v3  ;;  %v434_v10 = vld [vmem:[%s628_s0 + $0x30] ss:$8 sps:$4 sm:$0xff]   ;;  %v435_v11 = vld [vmem:[%s628_s0 + $0x24] ss:$8 sps:$4 sm:$0xff]   ;;  %v437_v12 = vld [vmem:[%s628_s0 + $0x20] ss:$8 sps:$4 sm:$0xff]  }
   0x5   :  { %v461_v13 = vld [vmem:[%s628_s0 + $0x114] ss:$8 sps:$4 sm:$0xff]   ;;  %v464_v14 = vld [vmem:[%s628_s0 + $0x110] ss:$8 sps:$4 sm:$0xff]   ;;  %v467_v16 = vld [vmem:[%s628_s0 + $0x104] ss:$8 sps:$4 sm:$0xff]  }
   0x6   :  { %v438_v15 = vld [vmem:[%s628_s0 + $0x14] ss:$8 sps:$4 sm:$0xff]   ;;  %321 = vmatprep.subr.bf16.mxu1 %v461_v13  ;;  %v470_v17 = vld [vmem:[%s628_s0 + $0x100] ss:$8 sps:$4 sm:$0xff]   ;;  %v440_v18 = vld [vmem:[%s628_s0 + $0x10] ss:$8 sps:$4 sm:$0xff]  }
   0x7   :  { %269 = vmatpush1.bf16.msra.mxu0 %v425_v4  ;;  %322 = vmatpush1.bf16.msra.mxu1 %v464_v14  ;;  %v441_v19 = vld [vmem:[%s628_s0 + $0x4] ss:$8 sps:$4 sm:$0xff]   ;;  %v473_v20 = vld [vmem:[%s629_s1 + $0x8] ss:$12 sps:$4 sm:$0xff]   ;;  %v446_v26 = vld [vmem:[%s628_s0 + $0xf0] ss:$8 sps:$4 sm:$0xff]  }
   0x8   :  { %270 = vmatprep.subr.bf16.mxu0 %v426_v5  ;;  %323 = vmatprep.subr.bf16.mxu1 %v467_v16  ;;  %v477_v21 = vld [vmem:[%s629_s1 + $0x4] ss:$12 sps:$4 sm:$0xff]   ;;  %v443_v23 = vld [vmem:[%s628_s0] ss:$8 sps:$4 sm:$0xff]   ;;  %v444_v24 = vld [vmem:[%s628_s0 + $0xf4] ss:$8 sps:$4 sm:$0xff]  }
   0x9   :  { %v55_v22 = vld [vmem:[%s630_s2] sm:$0xff]  ;;  %298 = vmatprep.mubr.bf16.mxu0 %v477_v21  ;;  %v56_v25 = vld [vmem:[%s630_s2 + $0x8] sm:$0xff]  ;;  %v450_v29 = vld [vmem:[%s628_s0 + $0xd4] ss:$8 sps:$4 sm:$0xff]  }
   0xa   :  { %59 = vperm.xlu0 %419, %v55_v22   ;;  %v447_v27 = vld [vmem:[%s628_s0 + $0xe4] ss:$8 sps:$4 sm:$0xff]   ;;  %v449_v28 = vld [vmem:[%s628_s0 + $0xe0] ss:$8 sps:$4 sm:$0xff]   ;;  %v452_v30 = vld [vmem:[%s628_s0 + $0xd0] ss:$8 sps:$4 sm:$0xff]  }
   0xb   :  { %271 = vmatpush1.bf16.msra.mxu0 %v428_v6  ;;  %324 = vmatpush1.bf16.msra.mxu1 %v470_v17  ;;  %v453_v31 = vld [vmem:[%s628_s0 + $0xc4] ss:$8 sps:$4 sm:$0xff]   ;;  %v455_v32 = vld [vmem:[%s628_s0 + $0xc0] ss:$8 sps:$4 sm:$0xff]   ;;  %v456_v33 = vld [vmem:[%s628_s0 + $0xb4] ss:$8 sps:$4 sm:$0xff]  }
   0xc   :  { %272 = vmatprep.subr.bf16.mxu0 %v429_v7  ;;  %v458_v34 = vld [vmem:[%s628_s0 + $0xb0] ss:$8 sps:$4 sm:$0xff]   ;;  %v459_v35 = vld [vmem:[%s628_s0 + $0xa4] ss:$8 sps:$4 sm:$0xff]   ;;  %v463_v36 = vld [vmem:[%s628_s0 + $0xa0] ss:$8 sps:$4 sm:$0xff]  }
   0xd   :  { %v465_v37 = vld [vmem:[%s628_s0 + $0x94] ss:$8 sps:$4 sm:$0xff]   ;;  %v469_v38 = vld [vmem:[%s628_s0 + $0x90] ss:$8 sps:$4 sm:$0xff]   ;;  %v471_v39 = vld [vmem:[%s628_s0 + $0x84] ss:$8 sps:$4 sm:$0xff]  }
   0xe   :  { %413 = vmatmul.mubr.msk.bf16.vlgmr.msra.gmra.mxu1 %vm262_vm0, %v473_v20  ;;  %64 = vperm.xlu0 %419, %v56_v25   ;;  %v474_v40 = vld [vmem:[%s628_s0 + $0x80] ss:$8 sps:$4 sm:$0xff]  }
   0xf   :  { %273 = vmatpush1.bf16.msra.mxu0 %v431_v8  ;;  %v475_v41 = vld [vmem:[%s629_s1] ss:$12 sps:$4 sm:$0xff]  }
  0x10   :  { %274 = vmatprep.subr.bf16.mxu0 %v432_v9 }
  0x13   :  { %275 = vmatpush1.bf16.msra.mxu0 %v434_v10 }
  0x14   :  { %276 = vmatprep.subr.bf16.mxu0 %v435_v11 }
  0x17   :  { %277 = vmatpush1.bf16.msra.mxu0 %v437_v12 }
  0x18   :  { %278 = vmatprep.subr.bf16.mxu0 %v438_v15 }
  0x1b   :  { %279 = vmatpush1.bf16.msra.mxu0 %v440_v18 }
  0x1c   :  { %280 = vmatprep.subr.bf16.mxu0 %v441_v19 }
  0x1f   :  { %281 = vmatpush1.bf16.msra.mxu0 %v443_v23 }
  0x20   :  { %282 = vmatprep.subr.bf16.mxu0 %v444_v24 }
  0x23   :  { %283 = vmatpush2.bf16.msra.mxu0 %v446_v26 }
  0x24   :  { %284 = vmatprep.subr.bf16.mxu0 %v447_v27 }
  0x27   :  { %285 = vmatpush2.bf16.msra.mxu0 %v449_v28 }
  0x28   :  { %286 = vmatprep.subr.bf16.mxu0 %v450_v29 }
  0x2b   :  { %287 = vmatpush2.bf16.msra.mxu0 %v452_v30 }
  0x2c   :  { %288 = vmatprep.subr.bf16.mxu0 %v453_v31 }
  0x2f   :  { %289 = vmatpush2.bf16.msra.mxu0 %v455_v32 }
  0x30   :  { %290 = vmatprep.subr.bf16.mxu0 %v456_v33 }
  0x33   :  { %291 = vmatpush2.bf16.msra.mxu0 %v458_v34 }
  0x34   :  { %292 = vmatprep.subr.bf16.mxu0 %v459_v35 }
  0x37   :  { %293 = vmatpush2.bf16.msra.mxu0 %v463_v36 }
  0x38   :  { %294 = vmatprep.subr.bf16.mxu0 %v465_v37 }
  0x3b   :  { %295 = vmatpush2.bf16.msra.mxu0 %v469_v38 }
  0x3c   :  { %296 = vmatprep.subr.bf16.mxu0 %v471_v39 }
  0x3f   :  { %297 = vmatpush2.bf16.msra.mxu0 %v474_v40 }
  0x42   :  { %299 = vmatmul.mubr.bf16.vlgmr.msra.gmra.mxu0 %v475_v41 }
  0x85   :  { %v60_v43 = vpop.permute.xlu0 %59 }
  0x89   :  { %v65_v49 = vpop.permute.xlu0 %64 }
  0xce   :  { %v343_v42 = vpop.f32.mrf.mxu1 }
  0xd0   :  { %v345_v44 = vpop.f32.mrf.mxu1 }
  0xd2   :  { %v347_v51 = vpop.f32.mrf.mxu1 }
  0xd4   :  { %v349_v60 = vpop.f32.mrf.mxu1 }
 0x102   :  { %v300_v45 = vpop.f32.mrf.mxu0 }
 0x103   :  { %v301_v46 = vadd.f32 %v300_v45, %v60_v43 }
 0x104   :  { %v302_v47 = vpop.f32.mrf.mxu0 }
 0x105   :  { %v344_v48 = vadd.f32 %v343_v42, %v301_v46  ;;  %v303_v50 = vadd.f32 %v302_v47, %v60_v43 }
 0x106   :  { %v304_v52 = vpop.f32.mrf.mxu0 }
 0x107   :  { %v346_v53 = vadd.f32 %v345_v44, %v303_v50  ;;  %v305_v54 = vadd.f32 %v304_v52, %v65_v49  ;;  %v352_v56 = vmax.f32 %v344_v48, 0.0 }
 0x108   :  { %v306_v55 = vpop.f32.mrf.mxu0 }
 0x109   :  { %v353_v57 = vmax.f32 %v346_v53, 0.0  ;;  %v348_v58 = vadd.f32 %v347_v51, %v305_v54  ;;  %v307_v59 = vadd.f32 %v306_v55, %v65_v49 }
 0x10b   :  { %v416_v61 = vpack.c.bf16 %v353_v57, %v352_v56  ;;  %v350_v62 = vadd.f32 %v349_v60, %v307_v59  ;;  %v354_v63 = vmax.f32 %v348_v58, 0.0 }
 0x10d   :  { %368 = vst [vmem:[%s631_s3] sm:$0xff] %v416_v61  ;;  %v355_v0 = vmax.f32 %v350_v62, 0.0 }
 0x10f   :  { %v417_v1 = vpack.c.bf16 %v355_v0, %v354_v63 }
 0x111   :  { %369 = vst [vmem:[%s631_s3 + $0x8] sm:$0xff] %v417_v1 }

// kernel: _lambda_.27
= control target key start
LH: loop header
LB: loop body
LE: loop exit
PB: predicated region body
PF: predicated region fallthrough
CT: control target
= control target key end

     0   :  { %s959_s12 = smov 0   ;;  %s961_s13 = smov 0   ;;  %s1148_s0 = inlined_call_operand.vmem [shape: bf16[72,2048], index: 0, kind: input, shape index: {}]   ;;  %s1149_s1 = inlined_call_operand.vmem [shape: bf16[4,72], index: 1, kind: input, shape index: {}]   ;;  %s1150_s2 = inlined_call_operand.vmem [shape: f32[4,1], index: 2, kind: input, shape index: {}]   ;;  %s1151_s3 = inlined_call_operand.vmem [shape: bf16[4,2048], index: 3, kind: output, shape index: {}]  }
   0x1   :  { %s963_s14 = smov 0  }
   0x2 LB: > { %s812_s15 = sadd.s32 4294967295, %s935_s14   ;;  %s976_s16 = sadd.s32 1, %s935_s14   ;;  %s935_s14 = sphi %s963_s14, %s1154_s14   ;;  %s931_s13 = sphi %s961_s13, %s1153_s13   ;;  %s927_s12 = sphi %s959_s12, %s1152_s12  }
   0x3   : > { %s17_s17 = ssub.s32 %s935_s14, %s976_s16  ;;  %s20_s18 = sadd.s32 1, %s931_s13 }
   0x4   : > { %p18_p0 = scmp.eq.s32.totalorder %s17_s17, 0  ;;  %p27_p1 = scmp.ne.s32.totalorder %s931_s13, %s927_s12 }
   0x5   : > { %p28_p2 = scmp.eq.s32.totalorder %s935_s14, 0  ;;  %p815_p4 = scmp.ge.s32.totalorder %s935_s14, 2 }
   0x6   : > { %s985_s19 = scalar_select %p18_p0, %s931_s13, %s20_s18  }
   0x7   : > { %p29_p3 = por %p28_p2, %p27_p1  ;;  %127 = sbr.rel (%p815_p4) target bundleno = 35 (0x23), region = 24 }
   0xc   : > { %130 = sbr.rel (!%p29_p3) target bundleno = 35 (0x23), region = 28  ;;  %s132_s20 = sand.u32 (%p29_p3), 1, %s931_s13  }
   0xd   : > { %s875_s21 = sshll.u32 (%p29_p3), %s935_s14, 5  ;;  %s876_s22 = smul.u32 (%p29_p3), 288, %s132_s20 }
   0xe   : > { %s993_s25 = scalar_lea.vmem (%p29_p3), %s1148_s0, %s875_s21 }
   0xf   : > { %v150_v0 = vld [vmem:[%s993_s25] sm:$0xff] (%p29_p3)  ;;  %v152_v1 = vld [vmem:[%s993_s25 + $0x8] sm:$0xff] (%p29_p3)  ;;  %v154_v2 = vld [vmem:[%s993_s25 + $0x10] sm:$0xff] (%p29_p3)  ;;  %s1001_s26 = scalar_lea.vmem (%p29_p3), [#allocation2], %s876_s22 }
  0x10   : > { %v156_v3 = vld [vmem:[%s993_s25 + $0x18] sm:$0xff] (%p29_p3)  ;;  %v158_v4 = vld [vmem:[%s993_s25 + $0x40] sm:$0xff] (%p29_p3)  ;;  %v160_v5 = vld [vmem:[%s993_s25 + $0x48] sm:$0xff] (%p29_p3)  ;;  %151 = vst [vmem:[%s1001_s26] sm:$0xff] (%p29_p3), %v150_v0 }
  0x11   : > { %153 = vst [vmem:[%s1001_s26 + $0x8] sm:$0xff] %v152_v1  ;;  %155 = vst [vmem:[%s1001_s26 + $0x10] sm:$0xff] %v154_v2  ;;  %v162_v6 = vld [vmem:[%s993_s25 + $0x50] sm:$0xff]  ;;  %v164_v7 = vld [vmem:[%s993_s25 + $0x58] sm:$0xff] }
  0x12   : > { %157 = vst [vmem:[%s1001_s26 + $0x18] sm:$0xff] %v156_v3  ;;  %159 = vst [vmem:[%s1001_s26 + $0x20] sm:$0xff] %v158_v4  ;;  %v166_v8 = vld [vmem:[%s993_s25 + $0x80] sm:$0xff]  ;;  %v168_v9 = vld [vmem:[%s993_s25 + $0x88] sm:$0xff] }
  0x13   : > { %161 = vst [vmem:[%s1001_s26 + $0x28] sm:$0xff] %v160_v5  ;;  %163 = vst [vmem:[%s1001_s26 + $0x30] sm:$0xff] %v162_v6  ;;  %v170_v10 = vld [vmem:[%s993_s25 + $0x90] sm:$0xff]  ;;  %v172_v11 = vld [vmem:[%s993_s25 + $0x98] sm:$0xff] }
  0x14   : > { %165 = vst [vmem:[%s1001_s26 + $0x38] sm:$0xff] %v164_v7  ;;  %167 = vst [vmem:[%s1001_s26 + $0x40] sm:$0xff] %v166_v8  ;;  %v174_v12 = vld [vmem:[%s993_s25 + $0xc0] sm:$0xff]  ;;  %v176_v13 = vld [vmem:[%s993_s25 + $0xc8] sm:$0xff] }
  0x15   : > { %169 = vst [vmem:[%s1001_s26 + $0x48] sm:$0xff] %v168_v9  ;;  %171 = vst [vmem:[%s1001_s26 + $0x50] sm:$0xff] %v170_v10  ;;  %v178_v14 = vld [vmem:[%s993_s25 + $0xd0] sm:$0xff]  ;;  %v180_v15 = vld [vmem:[%s993_s25 + $0xd8] sm:$0xff] }
  0x16   : > { %173 = vst [vmem:[%s1001_s26 + $0x58] sm:$0xff] %v172_v11  ;;  %175 = vst [vmem:[%s1001_s26 + $0x60] sm:$0xff] %v174_v12  ;;  %v182_v16 = vld [vmem:[%s993_s25 + $0x100] sm:$0xff]  ;;  %v184_v17 = vld [vmem:[%s993_s25 + $0x108] sm:$0xff] }
  0x17   : > { %177 = vst [vmem:[%s1001_s26 + $0x68] sm:$0xff] %v176_v13  ;;  %179 = vst [vmem:[%s1001_s26 + $0x70] sm:$0xff] %v178_v14  ;;  %v186_v18 = vld [vmem:[%s993_s25 + $0x110] sm:$0xff]  ;;  %v188_v19 = vld [vmem:[%s993_s25 + $0x118] sm:$0xff] }
  0x18   : > { %181 = vst [vmem:[%s1001_s26 + $0x78] sm:$0xff] %v180_v15  ;;  %183 = vst [vmem:[%s1001_s26 + $0x80] sm:$0xff] %v182_v16  ;;  %v190_v20 = vld [vmem:[%s993_s25 + $0x140] sm:$0xff]  ;;  %v192_v21 = vld [vmem:[%s993_s25 + $0x148] sm:$0xff] }
  0x19   : > { %185 = vst [vmem:[%s1001_s26 + $0x88] sm:$0xff] %v184_v17  ;;  %187 = vst [vmem:[%s1001_s26 + $0x90] sm:$0xff] %v186_v18  ;;  %v194_v22 = vld [vmem:[%s993_s25 + $0x150] sm:$0xff]  ;;  %v196_v23 = vld [vmem:[%s993_s25 + $0x158] sm:$0xff] }
  0x1a   : > { %189 = vst [vmem:[%s1001_s26 + $0x98] sm:$0xff] %v188_v19  ;;  %191 = vst [vmem:[%s1001_s26 + $0xa0] sm:$0xff] %v190_v20  ;;  %v198_v24 = vld [vmem:[%s993_s25 + $0x180] sm:$0xff]  ;;  %v200_v25 = vld [vmem:[%s993_s25 + $0x188] sm:$0xff] }
  0x1b   : > { %193 = vst [vmem:[%s1001_s26 + $0xa8] sm:$0xff] %v192_v21  ;;  %195 = vst [vmem:[%s1001_s26 + $0xb0] sm:$0xff] %v194_v22  ;;  %v202_v26 = vld [vmem:[%s993_s25 + $0x190] sm:$0xff]  ;;  %v204_v27 = vld [vmem:[%s993_s25 + $0x198] sm:$0xff] }
  0x1c   : > { %197 = vst [vmem:[%s1001_s26 + $0xb8] sm:$0xff] %v196_v23  ;;  %199 = vst [vmem:[%s1001_s26 + $0xc0] sm:$0xff] %v198_v24  ;;  %v206_v28 = vld [vmem:[%s993_s25 + $0x1c0] sm:$0xff]  ;;  %v208_v29 = vld [vmem:[%s993_s25 + $0x1c8] sm:$0xff] }
  0x1d   : > { %201 = vst [vmem:[%s1001_s26 + $0xc8] sm:$0xff] %v200_v25  ;;  %203 = vst [vmem:[%s1001_s26 + $0xd0] sm:$0xff] %v202_v26  ;;  %v210_v30 = vld [vmem:[%s993_s25 + $0x1d0] sm:$0xff]  ;;  %v212_v31 = vld [vmem:[%s993_s25 + $0x1d8] sm:$0xff] }
  0x1e   : > { %205 = vst [vmem:[%s1001_s26 + $0xd8] sm:$0xff] %v204_v27  ;;  %207 = vst [vmem:[%s1001_s26 + $0xe0] sm:$0xff] %v206_v28  ;;  %v214_v32 = vld [vmem:[%s993_s25 + $0x200] sm:$0xff]  ;;  %v216_v33 = vld [vmem:[%s993_s25 + $0x208] sm:$0xff] }
  0x1f   : > { %209 = vst [vmem:[%s1001_s26 + $0xe8] sm:$0xff] %v208_v29  ;;  %211 = vst [vmem:[%s1001_s26 + $0xf0] sm:$0xff] %v210_v30  ;;  %v218_v34 = vld [vmem:[%s993_s25 + $0x210] sm:$0xff]  ;;  %v220_v35 = vld [vmem:[%s993_s25 + $0x218] sm:$0xff] }
  0x20   : > { %213 = vst [vmem:[%s1001_s26 + $0xf8] sm:$0xff] %v212_v31  ;;  %215 = vst [vmem:[%s1001_s26 + $0x100] sm:$0xff] %v214_v32 }
  0x21   : > { %217 = vst [vmem:[%s1001_s26 + $0x108] sm:$0xff] %v216_v33  ;;  %219 = vst [vmem:[%s1001_s26 + $0x110] sm:$0xff] %v218_v34 }
  0x22   : > { %221 = vst [vmem:[%s1001_s26 + $0x118] sm:$0xff] %v220_v35 }
  0x23 PF: > { %p818_p5 = scmp.ge.s32.totalorder %s935_s14, 1  ;;  %p226_p6 = scmp.lt.s32.totalorder %s935_s14, 3 }
  0x25   : > { %p227_p7 = pnand %p818_p5, %p226_p6 }
  0x26   : > { %s233_s27 = sand.u32 (!%p227_p7), 1, %s927_s12   ;;  %s819_s7 = sshll.u32 (!%p227_p7), %s812_s15, 3 }
  0x27   : > { %230 = sbr.rel (%p227_p7) target bundleno = 296 (0x128), region = 51  ;;  %p258_p8 = scmp.lt.s32.totalorder (!%p227_p7), %s819_s7, 15 }
  0x28   : > { %s877_s28 = smul.u32 (!%p227_p7), 288, %s233_s27 }
  0x2a   : > { %s1078_s4 = scalar_lea.vmem (!%p227_p7), [#allocation2], %s877_s28 }
  0x2c   : > { %v937_v36 = vmov 0   ;;  %v301_v37 = vld [vmem:[%s1150_s2] sm:$0xf]  ;;  %vm491_vm0 = vcmask 1043456   ;;  %v298_v39 = vld [vmem:[%s1078_s4 + $0x108] sm:$0xff]  ;;  %v299_v12 = vld [vmem:[%s1078_s4 + $0x110] sm:$0xff] }
  0x2d   : > { %548 = vmatprep.mubr.bf16.mxu0 %v937_v36  ;;  %589 = vmatprep.mubr.bf16.mxu1 %v937_v36  ;;  %v297_v38 = vld [vmem:[%s1078_s4 + $0x100] sm:$0xff]  ;;  %v856_v42 = vcombine.high %v298_v39, %v298_v39  ;;  %v855_v44 = vcombine.low %v298_v39, %v298_v39  ;;  %v290_v46 = vld [vmem:[%s1078_s4 + $0xc8] sm:$0xff]  ;;  %v300_v13 = vld [vmem:[%s1078_s4 + $0x118] sm:$0xff]  ;;  %v858_v16 = vcombine.high %v299_v12, %v299_v12  ;;  %vm487_vm1 = vcmask 588800   ;;  %s1156_s7 = smov (!%p258_p8, %s819_s7), 15 }
  0x2e   : > { %904 = vset.pattern.permute.xlu0 %v937_v36  ;;  %v289_v40 = vld [vmem:[%s1078_s4 + $0xc0] sm:$0xff]  ;;  %v854_v41 = vcombine.high %v297_v38, %v297_v38  ;;  %v853_v43 = vcombine.low %v297_v38, %v297_v38  ;;  %v294_v47 = vld [vmem:[%s1078_s4 + $0xe8] sm:$0xff]  ;;  %v860_v17 = vcombine.high %v300_v13, %v300_v13  ;;  %v857_v18 = vcombine.low %v299_v12, %v299_v12  ;;  %v291_v20 = vld [vmem:[%s1078_s4 + $0xd0] sm:$0xff]  ;;  %s820_s8 = sshll.u32 %s1156_s7, 1 }
  0x2f   : > { %304 = vperm.xlu0 %904, %v301_v37   ;;  %v293_v45 = vld [vmem:[%s1078_s4 + $0xe0] sm:$0xff]  ;;  %v848_v49 = vcombine.high %v290_v46, %v294_v47  ;;  %v282_v52 = vld [vmem:[%s1078_s4 + $0x88] sm:$0xff]  ;;  %863 = vmatprep.subr.msk.bf16.mxu1 %vm491_vm0, %v856_v42  ;;  %v499_v54 = vsel %vm491_vm0, %v855_v44, 0  ;;  %v847_v57 = vcombine.low %v290_v46, %v294_v47  ;;  %v859_v19 = vcombine.low %v300_v13, %v300_v13  ;;  %v295_v21 = vld [vmem:[%s1078_s4 + $0xf0] sm:$0xff]  ;;  %s261_s11 = scalar_lea.vmem %s1151_s3, %s820_s8 }
  0x30   : > { %v846_v48 = vcombine.high %v289_v40, %v293_v45  ;;  %v281_v50 = vld [vmem:[%s1078_s4 + $0x80] sm:$0xff]  ;;  %861 = vmatprep.subr.msk.bf16.mxu0 %vm491_vm0, %v854_v41  ;;  %v493_v53 = vsel %vm491_vm0, %v853_v43, 0  ;;  %v286_v55 = vld [vmem:[%s1078_s4 + $0xa8] sm:$0xff]  ;;  %564 = vmatpush1.bf16.msra.mxu1 %v499_v54  ;;  %v845_v56 = vcombine.low %v289_v40, %v293_v45  ;;  %v292_v22 = vld [vmem:[%s1078_s4 + $0xd8] sm:$0xff]  ;;  %v505_v25 = vsel %vm491_vm0, %v857_v18, 0 }
  0x31   : > { %v285_v51 = vld [vmem:[%s1078_s4 + $0xa0] sm:$0xff]  ;;  %523 = vmatpush1.bf16.msra.mxu0 %v493_v53  ;;  %565 = vmatprep.subr.bf16.mxu1 %v848_v49  ;;  %v840_v59 = vcombine.high %v282_v52, %v286_v55  ;;  %v274_v62 = vld [vmem:[%s1078_s4 + $0x48] sm:$0xff]  ;;  %v839_v1 = vcombine.low %v282_v52, %v286_v55  ;;  %v296_v23 = vld [vmem:[%s1078_s4 + $0xf8] sm:$0xff]  ;;  %v511_v26 = vsel %vm491_vm0, %v859_v19, 0  ;;  %v850_v27 = vcombine.high %v291_v20, %v295_v21 }
  0x32   : > { %524 = vmatprep.subr.bf16.mxu0 %v846_v48  ;;  %v838_v58 = vcombine.high %v281_v50, %v285_v51  ;;  %v273_v60 = vld [vmem:[%s1078_s4 + $0x40] sm:$0xff]  ;;  %v278_v63 = vld [vmem:[%s1078_s4 + $0x68] sm:$0xff]  ;;  %v837_v0 = vcombine.low %v281_v50, %v285_v51  ;;  %v852_v28 = vcombine.high %v292_v22, %v296_v23  ;;  %v283_v29 = vld [vmem:[%s1078_s4 + $0x90] sm:$0xff]  ;;  %v849_v33 = vcombine.low %v291_v20, %v295_v21 }
  0x33   : > { %v277_v61 = vld [vmem:[%s1078_s4 + $0x60] sm:$0xff]  ;;  %v832_v3 = vcombine.high %v274_v62, %v278_v63  ;;  %v266_v6 = vld [vmem:[%s1078_s4 + $0x8] sm:$0xff]  ;;  %v831_v9 = vcombine.low %v274_v62, %v278_v63  ;;  %v287_v30 = vld [vmem:[%s1078_s4 + $0xb0] sm:$0xff]  ;;  %v851_v34 = vcombine.low %v292_v22, %v296_v23 }
  0x34   : > { %566 = vmatpush1.bf16.msra.mxu1 %v847_v57  ;;  %v830_v2 = vcombine.high %v273_v60, %v277_v61  ;;  %v265_v4 = vld [vmem:[%s1078_s4] sm:$0xff]  ;;  %v270_v7 = vld [vmem:[%s1078_s4 + $0x28] sm:$0xff]  ;;  %v829_v8 = vcombine.low %v273_v60, %v277_v61  ;;  %v284_v31 = vld [vmem:[%s1078_s4 + $0x98] sm:$0xff]  ;;  %v842_v35 = vcombine.high %v283_v29, %v287_v30  ;;  %v841_v42 = vcombine.low %v283_v29, %v287_v30 }
  0x35   : > { %525 = vmatpush1.bf16.msra.mxu0 %v845_v56  ;;  %567 = vmatprep.subr.bf16.mxu1 %v840_v59  ;;  %v269_v5 = vld [vmem:[%s1078_s4 + $0x20] sm:$0xff]  ;;  %v824_v11 = vcombine.high %v266_v6, %v270_v7  ;;  %v823_v15 = vcombine.low %v266_v6, %v270_v7  ;;  %v288_v32 = vld [vmem:[%s1078_s4 + $0xb8] sm:$0xff]  ;;  %v275_v38 = vld [vmem:[%s1078_s4 + $0x50] sm:$0xff]  ;;  %v938_v56 = vmov 1983009808  }
  0x36   : > { %526 = vmatprep.subr.bf16.mxu0 %v838_v58  ;;  %v822_v10 = vcombine.high %v265_v4, %v269_v5  ;;  %v821_v14 = vcombine.low %v265_v4, %v269_v5  ;;  %v264_v24 = vld [vmem:[%s1149_s1] sm:$0x3]  ;;  %v844_v37 = vcombine.high %v284_v31, %v288_v32  ;;  %v279_v39 = vld [vmem:[%s1078_s4 + $0x70] sm:$0xff]  ;;  %v276_v40 = vld [vmem:[%s1078_s4 + $0x58] sm:$0xff]  ;;  %v843_v43 = vcombine.low %v284_v31, %v288_v32 }
  0x37   : > { %v280_v41 = vld [vmem:[%s1078_s4 + $0x78] sm:$0xff]  ;;  %v834_v44 = vcombine.high %v275_v38, %v279_v39  ;;  %v267_v46 = vld [vmem:[%s1078_s4 + $0x10] sm:$0xff]  ;;  %v833_v50 = vcombine.low %v275_v38, %v279_v39  ;;  %v715_v57 = vunpack.c.l.s4 %v938_v56  ;;  %v717_v58 = vlaneseq }
  0x38   : > { %568 = vmatpush1.bf16.msra.mxu1 %v839_v1  ;;  %v836_v45 = vcombine.high %v276_v40, %v280_v41  ;;  %v271_v47 = vld [vmem:[%s1078_s4 + $0x30] sm:$0xff]  ;;  %v268_v48 = vld [vmem:[%s1078_s4 + $0x18] sm:$0xff]  ;;  %v835_v51 = vcombine.low %v276_v40, %v280_v41 }
  0x39   : > { %527 = vmatpush1.bf16.msra.mxu0 %v837_v0  ;;  %569 = vmatprep.subr.bf16.mxu1 %v832_v3  ;;  %v272_v49 = vld [vmem:[%s1078_s4 + $0x38] sm:$0xff]  ;;  %v826_v52 = vcombine.high %v267_v46, %v271_v47  ;;  %v825_v53 = vcombine.low %v267_v46, %v271_v47  ;;  %v716_v0 = vunpack.c.0.s8 %v715_v57  ;;  %v718_v1 = vshrl.u32 %v717_v58, 7 }
  0x3a   : > { %528 = vmatprep.subr.bf16.mxu0 %v830_v2  ;;  %v827_v54 = vcombine.low %v268_v48, %v272_v49 }
  0x3c   : > { %570 = vmatpush1.bf16.msra.mxu1 %v831_v9 }
  0x3d   : > { %529 = vmatpush1.bf16.msra.mxu0 %v829_v8  ;;  %571 = vmatprep.subr.bf16.mxu1 %v824_v11  ;;  %v719_v11 = vsub.s32 %v716_v0, %v718_v1 }
  0x3e   : > { %530 = vmatprep.subr.bf16.mxu0 %v822_v10 }
  0x40   : > { %572 = vmatpush1.bf16.msra.mxu1 %v823_v15 }
  0x41   : > { %531 = vmatpush1.bf16.msra.mxu0 %v821_v14  ;;  %867 = vmatprep.subr.msk.bf16.mxu1 %vm491_vm0, %v860_v17 }
  0x42   : > { %865 = vmatprep.subr.msk.bf16.mxu0 %vm491_vm0, %v858_v16 }
  0x43   : > { %864 = vmatmul.mubr.msk.bf16.vlgmr.msra.gmra.mxu1 %vm487_vm1, %v264_v24 }
  0x44   : > { %862 = vmatmul.mubr.msk.bf16.vlgmr.msra.gmra.mxu0 %vm487_vm1, %v264_v24  ;;  %646 = vmatpush1.bf16.msra.mxu1 %v511_v26 }
  0x45   : > { %605 = vmatpush1.bf16.msra.mxu0 %v505_v25  ;;  %647 = vmatprep.subr.bf16.mxu1 %v852_v28 }
  0x46   : > { %606 = vmatprep.subr.bf16.mxu0 %v850_v27  ;;  %630 = vmatprep.mubr.bf16.mxu0 %v937_v36 }
  0x47   : > { %671 = vmatprep.mubr.bf16.mxu1 %v937_v36  ;;  %v828_v36 = vcombine.high %v268_v48, %v272_v49 }
  0x48   : > { %648 = vmatpush1.bf16.msra.mxu1 %v851_v34 }
  0x49   : > { %607 = vmatpush1.bf16.msra.mxu0 %v849_v33  ;;  %649 = vmatprep.subr.bf16.mxu1 %v844_v37 }
  0x4a   : > { %608 = vmatprep.subr.bf16.mxu0 %v842_v35 }
  0x4c   : > { %650 = vmatpush1.bf16.msra.mxu1 %v843_v43 }
  0x4d   : > { %609 = vmatpush1.bf16.msra.mxu0 %v841_v42  ;;  %651 = vmatprep.subr.bf16.mxu1 %v836_v45 }
  0x4e   : > { %610 = vmatprep.subr.bf16.mxu0 %v834_v44 }
  0x50   : > { %652 = vmatpush1.bf16.msra.mxu1 %v835_v51 }
  0x51   : > { %611 = vmatpush1.bf16.msra.mxu0 %v833_v50  ;;  %653 = vmatprep.subr.bf16.mxu1 %v828_v36 }
  0x52   : > { %612 = vmatprep.subr.bf16.mxu0 %v826_v52 }
  0x54   : > { %654 = vmatpush1.bf16.msra.mxu1 %v827_v54 }
  0x55   : > { %613 = vmatpush1.bf16.msra.mxu0 %v825_v53 }
  0x57   : > { %868 = vmatmul.mubr.msk.bf16.vlgmr.msra.gmra.mxu1 %vm487_vm1, %v264_v24 }
  0x58   : > { %866 = vmatmul.mubr.msk.bf16.vlgmr.msra.gmra.mxu0 %vm487_vm1, %v264_v24 }
  0xaa   : > { %v305_v55 = vpop.permute.xlu0 %304 }
 0x103   : > { %v591_v60 = vpop.f32.mrf.mxu1 }
 0x104   : > { %v550_v59 = vpop.f32.mrf.mxu0  ;;  %v592_v62 = vadd.f32 %v591_v60, %v305_v55 }
 0x105   : > { %v551_v61 = vadd.f32 %v550_v59, %v305_v55  ;;  %v593_v2 = vpop.f32.mrf.mxu1 }
 0x106   : > { %v552_v63 = vpop.f32.mrf.mxu0  ;;  %v682_v4 = vmul.f32 0.1, %v592_v62  ;;  %v594_v6 = vadd.f32 %v593_v2, %v305_v55 }
 0x107   : > { %v680_v3 = vmul.f32 0.1, %v551_v61  ;;  %v553_v5 = vadd.f32 %v552_v63, %v305_v55  ;;  %v595_v8 = vpop.f32.mrf.mxu1 }
 0x108   : > { %v554_v7 = vpop.f32.mrf.mxu0  ;;  %v683_v10 = vmul.f32 0.1, %v594_v6  ;;  %v690_v15 = vmax.f32 %v592_v62, %v682_v4 }
 0x109   : > { %v681_v9 = vmul.f32 0.1, %v553_v5  ;;  %v596_v13 = vpop.f32.mrf.mxu1  ;;  %v688_v14 = vmax.f32 %v551_v61, %v680_v3 }
 0x10a   : > { %v555_v12 = vpop.f32.mrf.mxu0  ;;  %v691_v17 = vmax.f32 %v594_v6, %v683_v10 }
 0x10b   : > { %v689_v16 = vmax.f32 %v553_v5, %v681_v9 }
 0x10c   : > { %v870_v19 = vpack.c.bf16 %v691_v17, %v690_v15 }
 0x10d   : > { %v869_v18 = vpack.c.bf16 %v689_v16, %v688_v14 }
 0x10e   : > { %v727_v21 = vrot.slane %v870_v19, %v719_v11 }
 0x10f   : > { %v720_v20 = vrot.slane %v869_v18, %v719_v11 }
 0x111   : > { %v728_v22 = vcombine.low %v720_v20, %v727_v21 }
 0x113   : > { %748 = vst [vmem:[%s261_s11] sm:$0xff] %v728_v22 }
 0x117   : > { %v673_v24 = vpop.f32.mrf.mxu1 }
 0x118   : > { %v632_v23 = vpop.f32.mrf.mxu0  ;;  %v674_v26 = vadd.f32 %v673_v24, %v305_v55 }
 0x119   : > { %v633_v25 = vadd.f32 %v632_v23, %v305_v55  ;;  %v675_v28 = vpop.f32.mrf.mxu1 }
 0x11a   : > { %v634_v27 = vpop.f32.mrf.mxu0  ;;  %v686_v30 = vmul.f32 0.1, %v674_v26  ;;  %v676_v32 = vadd.f32 %v675_v28, %v305_v55 }
 0x11b   : > { %v684_v29 = vmul.f32 0.1, %v633_v25  ;;  %v635_v31 = vadd.f32 %v634_v27, %v305_v55  ;;  %v677_v34 = vpop.f32.mrf.mxu1 }
 0x11c   : > { %v636_v33 = vpop.f32.mrf.mxu0  ;;  %v687_v37 = vmul.f32 0.1, %v676_v32  ;;  %v694_v41 = vmax.f32 %v674_v26, %v686_v30 }
 0x11d   : > { %v685_v35 = vmul.f32 0.1, %v635_v31  ;;  %v678_v39 = vpop.f32.mrf.mxu1  ;;  %v692_v40 = vmax.f32 %v633_v25, %v684_v29 }
 0x11e   : > { %v637_v38 = vpop.f32.mrf.mxu0  ;;  %v695_v43 = vmax.f32 %v676_v32, %v687_v37 }
 0x11f   : > { %v693_v42 = vmax.f32 %v635_v31, %v685_v35 }
 0x120   : > { %v872_v45 = vpack.c.bf16 %v695_v43, %v694_v41 }
 0x121   : > { %v871_v44 = vpack.c.bf16 %v693_v42, %v692_v40 }
 0x122   : > { %v744_v47 = vrot.slane %v872_v45, %v719_v11 }
 0x123   : > { %v737_v46 = vrot.slane %v871_v44, %v719_v11 }
 0x125   : > { %v745_v48 = vcombine.low %v737_v46, %v744_v47 }
 0x127   : > { %749 = vst [vmem:[%s261_s11 + $0x8] sm:$0xff] %v745_v48 }
 0x128 PF: > { %p10_p9 = scmp.ge.s32.totalorder %s976_s16, 4   ;;  %s1152_s12 = smov %s931_s13 }
 0x129   : > { %s1153_s13 = smov %s985_s19  ;;  %s1154_s14 = smov %s976_s16 }
 0x12a   :  { %12 = sbr.rel (!%p10_p9) target bundleno = 2 (0x2), region = 90 }

// kernel: _lambda_.28
= control target key start
LH: loop header
LB: loop body
LE: loop exit
PB: predicated region body
PF: predicated region fallthrough
CT: control target
= control target key end

     0   :  { %s807_s12 = smov 0   ;;  %s809_s13 = smov 0   ;;  %s948_s0 = inlined_call_operand.vmem [shape: bf16[36,2048], index: 0, kind: input, shape index: {}]   ;;  %s949_s1 = inlined_call_operand.vmem [shape: bf16[4,36], index: 1, kind: input, shape index: {}]   ;;  %s950_s2 = inlined_call_operand.vmem [shape: f32[4,1], index: 2, kind: input, shape index: {}]   ;;  %s951_s3 = inlined_call_operand.vmem [shape: bf16[4,2048], index: 3, kind: output, shape index: {}]  }
   0x1   :  { %s811_s14 = smov 0  }
   0x2 LB: > { %s676_s15 = sadd.s32 4294967295, %s783_s14   ;;  %s824_s16 = sadd.s32 1, %s783_s14   ;;  %s783_s14 = sphi %s811_s14, %s954_s14   ;;  %s779_s13 = sphi %s809_s13, %s953_s13   ;;  %s775_s12 = sphi %s807_s12, %s952_s12  }
   0x3   : > { %s17_s17 = ssub.s32 %s783_s14, %s824_s16  ;;  %s20_s18 = sadd.s32 1, %s779_s13 }
   0x4   : > { %p18_p0 = scmp.eq.s32.totalorder %s17_s17, 0  ;;  %p27_p1 = scmp.ne.s32.totalorder %s779_s13, %s775_s12 }
   0x5   : > { %p28_p2 = scmp.eq.s32.totalorder %s783_s14, 0  ;;  %p679_p4 = scmp.ge.s32.totalorder %s783_s14, 2 }
   0x6   : > { %s833_s19 = scalar_select %p18_p0, %s779_s13, %s20_s18  }
   0x7   : > { %p29_p3 = por %p28_p2, %p27_p1  ;;  %127 = sbr.rel (%p679_p4) target bundleno = 27 (0x1b), region = 24 }
   0xc   : > { %130 = sbr.rel (!%p29_p3) target bundleno = 27 (0x1b), region = 28  ;;  %s132_s20 = sand.u32 (%p29_p3), 1, %s779_s13  }
   0xd   : > { %s723_s21 = sshll.u32 (%p29_p3), %s783_s14, 5  ;;  %s724_s22 = smul.u32 (%p29_p3), 160, %s132_s20 }
   0xe   : > { %s841_s25 = scalar_lea.vmem (%p29_p3), %s948_s0, %s723_s21 }
   0xf   : > { %v150_v0 = vld [vmem:[%s841_s25] sm:$0xff] (%p29_p3)  ;;  %v152_v1 = vld [vmem:[%s841_s25 + $0x8] sm:$0xff] (%p29_p3)  ;;  %v154_v2 = vld [vmem:[%s841_s25 + $0x10] sm:$0xff] (%p29_p3)  ;;  %s849_s26 = scalar_lea.vmem (%p29_p3), [#allocation2], %s724_s22 }
  0x10   : > { %v156_v3 = vld [vmem:[%s841_s25 + $0x18] sm:$0xff] (%p29_p3)  ;;  %v158_v4 = vld [vmem:[%s841_s25 + $0x40] sm:$0xff] (%p29_p3)  ;;  %v160_v5 = vld [vmem:[%s841_s25 + $0x48] sm:$0xff] (%p29_p3)  ;;  %151 = vst [vmem:[%s849_s26] sm:$0xff] (%p29_p3), %v150_v0 }
  0x11   : > { %153 = vst [vmem:[%s849_s26 + $0x8] sm:$0xff] %v152_v1  ;;  %155 = vst [vmem:[%s849_s26 + $0x10] sm:$0xff] %v154_v2  ;;  %v162_v6 = vld [vmem:[%s841_s25 + $0x50] sm:$0xff]  ;;  %v164_v7 = vld [vmem:[%s841_s25 + $0x58] sm:$0xff] }
  0x12   : > { %157 = vst [vmem:[%s849_s26 + $0x18] sm:$0xff] %v156_v3  ;;  %159 = vst [vmem:[%s849_s26 + $0x20] sm:$0xff] %v158_v4  ;;  %v166_v8 = vld [vmem:[%s841_s25 + $0x80] sm:$0xff]  ;;  %v168_v9 = vld [vmem:[%s841_s25 + $0x88] sm:$0xff] }
  0x13   : > { %161 = vst [vmem:[%s849_s26 + $0x28] sm:$0xff] %v160_v5  ;;  %163 = vst [vmem:[%s849_s26 + $0x30] sm:$0xff] %v162_v6  ;;  %v170_v10 = vld [vmem:[%s841_s25 + $0x90] sm:$0xff]  ;;  %v172_v11 = vld [vmem:[%s841_s25 + $0x98] sm:$0xff] }
  0x14   : > { %165 = vst [vmem:[%s849_s26 + $0x38] sm:$0xff] %v164_v7  ;;  %167 = vst [vmem:[%s849_s26 + $0x40] sm:$0xff] %v166_v8  ;;  %v174_v12 = vld [vmem:[%s841_s25 + $0xc0] sm:$0xff]  ;;  %v176_v13 = vld [vmem:[%s841_s25 + $0xc8] sm:$0xff] }
  0x15   : > { %169 = vst [vmem:[%s849_s26 + $0x48] sm:$0xff] %v168_v9  ;;  %171 = vst [vmem:[%s849_s26 + $0x50] sm:$0xff] %v170_v10  ;;  %v178_v14 = vld [vmem:[%s841_s25 + $0xd0] sm:$0xff]  ;;  %v180_v15 = vld [vmem:[%s841_s25 + $0xd8] sm:$0xff] }
  0x16   : > { %173 = vst [vmem:[%s849_s26 + $0x58] sm:$0xff] %v172_v11  ;;  %175 = vst [vmem:[%s849_s26 + $0x60] sm:$0xff] %v174_v12  ;;  %v182_v16 = vld [vmem:[%s841_s25 + $0x100] sm:$0xff]  ;;  %v184_v17 = vld [vmem:[%s841_s25 + $0x108] sm:$0xff] }
  0x17   : > { %177 = vst [vmem:[%s849_s26 + $0x68] sm:$0xff] %v176_v13  ;;  %179 = vst [vmem:[%s849_s26 + $0x70] sm:$0xff] %v178_v14  ;;  %v186_v18 = vld [vmem:[%s841_s25 + $0x110] sm:$0xff]  ;;  %v188_v19 = vld [vmem:[%s841_s25 + $0x118] sm:$0xff] }
  0x18   : > { %181 = vst [vmem:[%s849_s26 + $0x78] sm:$0xff] %v180_v15  ;;  %183 = vst [vmem:[%s849_s26 + $0x80] sm:$0xff] %v182_v16 }
  0x19   : > { %185 = vst [vmem:[%s849_s26 + $0x88] sm:$0xff] %v184_v17  ;;  %187 = vst [vmem:[%s849_s26 + $0x90] sm:$0xff] %v186_v18 }
  0x1a   : > { %189 = vst [vmem:[%s849_s26 + $0x98] sm:$0xff] %v188_v19 }
  0x1b PF: > { %p682_p5 = scmp.ge.s32.totalorder %s783_s14, 1  ;;  %p194_p6 = scmp.lt.s32.totalorder %s783_s14, 3 }
  0x1d   : > { %p195_p7 = pnand %p682_p5, %p194_p6 }
  0x1e   : > { %s201_s27 = sand.u32 (!%p195_p7), 1, %s775_s12   ;;  %s683_s7 = sshll.u32 (!%p195_p7), %s676_s15, 3 }
  0x1f   : > { %198 = sbr.rel (%p195_p7) target bundleno = 270 (0x10e), region = 51  ;;  %p226_p8 = scmp.lt.s32.totalorder (!%p195_p7), %s683_s7, 15 }
  0x20   : > { %s725_s28 = smul.u32 (!%p195_p7), 160, %s201_s27 }
  0x22   : > { %s894_s4 = scalar_lea.vmem (!%p195_p7), [#allocation2], %s725_s28 }
  0x24   : > { %v785_v20 = vmov 0   ;;  %v253_v21 = vld [vmem:[%s950_s2] sm:$0xf]  ;;  %vm363_vm0 = vcmask 1041408   ;;  %v250_v23 = vld [vmem:[%s894_s4 + $0x88] sm:$0x33]  ;;  %v581_v9 = vlaneseq }
  0x25   : > { %420 = vmatprep.mubr.bf16.mxu0 %v785_v20  ;;  %461 = vmatprep.mubr.bf16.mxu1 %v785_v20  ;;  %v249_v22 = vld [vmem:[%s894_s4 + $0x80] sm:$0x33]  ;;  %v704_v26 = vcombine.high %v250_v23, %v250_v23  ;;  %v703_v28 = vcombine.low %v250_v23, %v250_v23  ;;  %v242_v30 = vld [vmem:[%s894_s4 + $0x48] sm:$0xff]  ;;  %v251_v44 = vld [vmem:[%s894_s4 + $0x90] sm:$0x33]  ;;  %vm359_vm1 = vcmask 293888  }
  0x26   : > { %752 = vset.pattern.permute.xlu0 %v785_v20  ;;  %v241_v24 = vld [vmem:[%s894_s4 + $0x40] sm:$0xff]  ;;  %v702_v25 = vcombine.high %v249_v22, %v249_v22  ;;  %v701_v27 = vcombine.low %v249_v22, %v249_v22  ;;  %v246_v31 = vld [vmem:[%s894_s4 + $0x68] sm:$0xff]  ;;  %v252_v45 = vld [vmem:[%s894_s4 + $0x98] sm:$0x33]  ;;  %v706_v48 = vcombine.high %v251_v44, %v251_v44  ;;  %v705_v50 = vcombine.low %v251_v44, %v251_v44  ;;  %s956_s7 = smov (!%p226_p8, %s683_s7), 15 }
  0x27   : > { %256 = vperm.xlu0 %752, %v253_v21   ;;  %v245_v29 = vld [vmem:[%s894_s4 + $0x60] sm:$0xff]  ;;  %v696_v33 = vcombine.high %v242_v30, %v246_v31  ;;  %v234_v36 = vld [vmem:[%s894_s4 + $0x8] sm:$0xff]  ;;  %711 = vmatprep.subr.msk.bf16.mxu1 %vm363_vm0, %v704_v26  ;;  %v371_v38 = vsel %vm363_vm0, %v703_v28, 0  ;;  %v695_v41 = vcombine.low %v242_v30, %v246_v31  ;;  %v708_v49 = vcombine.high %v252_v45, %v252_v45  ;;  %v243_v52 = vld [vmem:[%s894_s4 + $0x50] sm:$0xff]  ;;  %s684_s8 = sshll.u32 %s956_s7, 1 }
  0x28   : > { %v694_v32 = vcombine.high %v241_v24, %v245_v29  ;;  %v233_v34 = vld [vmem:[%s894_s4] sm:$0xff]  ;;  %709 = vmatprep.subr.msk.bf16.mxu0 %vm363_vm0, %v702_v25  ;;  %v365_v37 = vsel %vm363_vm0, %v701_v27, 0  ;;  %v238_v39 = vld [vmem:[%s894_s4 + $0x28] sm:$0xff]  ;;  %440 = vmatpush1.bf16.msra.mxu1 %v371_v38  ;;  %v693_v40 = vcombine.low %v241_v24, %v245_v29  ;;  %v707_v51 = vcombine.low %v252_v45, %v252_v45  ;;  %v247_v53 = vld [vmem:[%s894_s4 + $0x70] sm:$0xff]  ;;  %s229_s11 = scalar_lea.vmem %s951_s3, %s684_s8 }
  0x29   : > { %v237_v35 = vld [vmem:[%s894_s4 + $0x20] sm:$0xff]  ;;  %399 = vmatpush1.bf16.msra.mxu0 %v365_v37  ;;  %441 = vmatprep.subr.bf16.mxu1 %v696_v33  ;;  %v688_v43 = vcombine.high %v234_v36, %v238_v39  ;;  %v687_v47 = vcombine.low %v234_v36, %v238_v39  ;;  %v244_v54 = vld [vmem:[%s894_s4 + $0x58] sm:$0xff]  ;;  %v377_v57 = vsel %vm363_vm0, %v705_v50, 0  ;;  %v698_v59 = vcombine.high %v243_v52, %v247_v53  ;;  %v235_v61 = vld [vmem:[%s894_s4 + $0x10] sm:$0xff] }
  0x2a   : > { %400 = vmatprep.subr.bf16.mxu0 %v694_v32  ;;  %v686_v42 = vcombine.high %v233_v34, %v237_v35  ;;  %v685_v46 = vcombine.low %v233_v34, %v237_v35  ;;  %v248_v55 = vld [vmem:[%s894_s4 + $0x78] sm:$0xff]  ;;  %v232_v56 = vld [vmem:[%s949_s1] sm:$0x3]  ;;  %v383_v58 = vsel %vm363_vm0, %v707_v51, 0  ;;  %v239_v62 = vld [vmem:[%s894_s4 + $0x30] sm:$0xff]  ;;  %v697_v1 = vcombine.low %v243_v52, %v247_v53 }
  0x2b   : > { %v700_v60 = vcombine.high %v244_v54, %v248_v55  ;;  %v236_v63 = vld [vmem:[%s894_s4 + $0x18] sm:$0xff]  ;;  %v699_v2 = vcombine.low %v244_v54, %v248_v55  ;;  %v690_v3 = vcombine.high %v235_v61, %v239_v62  ;;  %v689_v5 = vcombine.low %v235_v61, %v239_v62 }
  0x2c   : > { %442 = vmatpush1.bf16.msra.mxu1 %v695_v41  ;;  %v240_v0 = vld [vmem:[%s894_s4 + $0x38] sm:$0xff]  ;;  %v786_v7 = vmov 1983009808   ;;  %v582_v15 = vshrl.u32 %v581_v9, 7 }
  0x2d   : > { %401 = vmatpush1.bf16.msra.mxu0 %v693_v40  ;;  %443 = vmatprep.subr.bf16.mxu1 %v688_v43  ;;  %v692_v4 = vcombine.high %v236_v63, %v240_v0  ;;  %v691_v6 = vcombine.low %v236_v63, %v240_v0  ;;  %v579_v8 = vunpack.c.l.s4 %v786_v7 }
  0x2e   : > { %402 = vmatprep.subr.bf16.mxu0 %v686_v42 }
  0x2f   : > { %v580_v14 = vunpack.c.0.s8 %v579_v8 }
  0x30   : > { %444 = vmatpush1.bf16.msra.mxu1 %v687_v47 }
  0x31   : > { %403 = vmatpush1.bf16.msra.mxu0 %v685_v46  ;;  %715 = vmatprep.subr.msk.bf16.mxu1 %vm363_vm0, %v708_v49  ;;  %v583_v26 = vsub.s32 %v580_v14, %v582_v15 }
  0x32   : > { %713 = vmatprep.subr.msk.bf16.mxu0 %vm363_vm0, %v706_v48 }
  0x33   : > { %712 = vmatmul.mubr.msk.bf16.vlgmr.msra.gmra.mxu1 %vm359_vm1, %v232_v56 }
  0x34   : > { %710 = vmatmul.mubr.msk.bf16.vlgmr.msra.gmra.mxu0 %vm359_vm1, %v232_v56  ;;  %522 = vmatpush1.bf16.msra.mxu1 %v383_v58 }
  0x35   : > { %481 = vmatpush1.bf16.msra.mxu0 %v377_v57  ;;  %523 = vmatprep.subr.bf16.mxu1 %v700_v60 }
  0x36   : > { %482 = vmatprep.subr.bf16.mxu0 %v698_v59  ;;  %502 = vmatprep.mubr.bf16.mxu0 %v785_v20 }
  0x37   : > { %543 = vmatprep.mubr.bf16.mxu1 %v785_v20 }
  0x38   : > { %524 = vmatpush1.bf16.msra.mxu1 %v699_v2 }
  0x39   : > { %483 = vmatpush1.bf16.msra.mxu0 %v697_v1  ;;  %525 = vmatprep.subr.bf16.mxu1 %v692_v4 }
  0x3a   : > { %484 = vmatprep.subr.bf16.mxu0 %v690_v3 }
  0x3c   : > { %526 = vmatpush1.bf16.msra.mxu1 %v691_v6 }
  0x3d   : > { %485 = vmatpush1.bf16.msra.mxu0 %v689_v5 }
  0x3f   : > { %716 = vmatmul.mubr.msk.bf16.vlgmr.msra.gmra.mxu1 %vm359_vm1, %v232_v56 }
  0x40   : > { %714 = vmatmul.mubr.msk.bf16.vlgmr.msra.gmra.mxu0 %vm359_vm1, %v232_v56 }
  0xa2   : > { %v257_v10 = vpop.permute.xlu0 %256 }
  0xf3   : > { %v463_v12 = vpop.f32.mrf.mxu1 }
  0xf4   : > { %v422_v11 = vpop.f32.mrf.mxu0  ;;  %v464_v16 = vadd.f32 %v463_v12, %v257_v10 }
  0xf5   : > { %v423_v13 = vadd.f32 %v422_v11, %v257_v10  ;;  %v465_v18 = vpop.f32.mrf.mxu1 }
  0xf6   : > { %v424_v17 = vpop.f32.mrf.mxu0  ;;  %v466_v21 = vadd.f32 %v465_v18, %v257_v10  ;;  %v554_v22 = vmax.f32 %v464_v16, 0.0 }
  0xf7   : > { %v425_v19 = vadd.f32 %v424_v17, %v257_v10  ;;  %v552_v20 = vmax.f32 %v423_v13, 0.0  ;;  %v467_v24 = vpop.f32.mrf.mxu1 }
  0xf8   : > { %v426_v23 = vpop.f32.mrf.mxu0  ;;  %v555_v27 = vmax.f32 %v466_v21, 0.0 }
  0xf9   : > { %v553_v25 = vmax.f32 %v425_v19, 0.0  ;;  %v468_v29 = vpop.f32.mrf.mxu1 }
  0xfa   : > { %v427_v28 = vpop.f32.mrf.mxu0  ;;  %v718_v31 = vpack.c.bf16 %v555_v27, %v554_v22 }
  0xfb   : > { %v717_v30 = vpack.c.bf16 %v553_v25, %v552_v20 }
  0xfc   : > { %v591_v33 = vrot.slane %v718_v31, %v583_v26 }
  0xfd   : > { %v584_v32 = vrot.slane %v717_v30, %v583_v26 }
  0xff   : > { %v592_v34 = vcombine.low %v584_v32, %v591_v33  ;;  %v545_v36 = vpop.f32.mrf.mxu1 }
 0x100   : > { %v504_v35 = vpop.f32.mrf.mxu0  ;;  %v546_v38 = vadd.f32 %v545_v36, %v257_v10 }
 0x101   : > { %612 = vst [vmem:[%s229_s11] sm:$0xff] %v592_v34  ;;  %v505_v37 = vadd.f32 %v504_v35, %v257_v10  ;;  %v547_v40 = vpop.f32.mrf.mxu1 }
 0x102   : > { %v506_v39 = vpop.f32.mrf.mxu0  ;;  %v548_v42 = vadd.f32 %v547_v40, %v257_v10  ;;  %v558_v46 = vmax.f32 %v546_v38, 0.0 }
 0x103   : > { %v507_v41 = vadd.f32 %v506_v39, %v257_v10  ;;  %v549_v44 = vpop.f32.mrf.mxu1  ;;  %v556_v45 = vmax.f32 %v505_v37, 0.0 }
 0x104   : > { %v508_v43 = vpop.f32.mrf.mxu0  ;;  %v559_v48 = vmax.f32 %v548_v42, 0.0 }
 0x105   : > { %v557_v47 = vmax.f32 %v507_v41, 0.0  ;;  %v550_v50 = vpop.f32.mrf.mxu1 }
 0x106   : > { %v509_v49 = vpop.f32.mrf.mxu0  ;;  %v720_v52 = vpack.c.bf16 %v559_v48, %v558_v46 }
 0x107   : > { %v719_v51 = vpack.c.bf16 %v557_v47, %v556_v45 }
 0x108   : > { %v608_v54 = vrot.slane %v720_v52, %v583_v26 }
 0x109   : > { %v601_v53 = vrot.slane %v719_v51, %v583_v26 }
 0x10b   : > { %v609_v55 = vcombine.low %v601_v53, %v608_v54 }
 0x10d   : > { %613 = vst [vmem:[%s229_s11 + $0x8] sm:$0xff] %v609_v55 }
 0x10e PF: > { %p10_p9 = scmp.ge.s32.totalorder %s824_s16, 4   ;;  %s952_s12 = smov %s779_s13 }
 0x10f   : > { %s953_s13 = smov %s833_s19  ;;  %s954_s14 = smov %s824_s16 }
 0x110   :  { %12 = sbr.rel (!%p10_p9) target bundleno = 2 (0x2), region = 90 }

// kernel: _lambda_.31
= control target key start
LH: loop header
LB: loop body
LE: loop exit
PB: predicated region body
PF: predicated region fallthrough
CT: control target
= control target key end

     0   :  { %s799_s12 = smov 0   ;;  %s801_s13 = smov 0   ;;  %s940_s0 = inlined_call_operand.vmem [shape: bf16[36,2048], index: 0, kind: input, shape index: {}]   ;;  %s941_s1 = inlined_call_operand.vmem [shape: bf16[8,36], index: 1, kind: input, shape index: {}]   ;;  %s942_s2 = inlined_call_operand.vmem [shape: f32[8,1], index: 2, kind: input, shape index: {}]   ;;  %s943_s3 = inlined_call_operand.vmem [shape: bf16[8,2048], index: 3, kind: output, shape index: {}]  }
   0x1   :  { %s803_s14 = smov 0  }
   0x2 LB: > { %s666_s15 = sadd.s32 4294967295, %s776_s14   ;;  %s816_s16 = sadd.s32 1, %s776_s14   ;;  %s776_s14 = sphi %s803_s14, %s946_s14   ;;  %s772_s13 = sphi %s801_s13, %s945_s13   ;;  %s768_s12 = sphi %s799_s12, %s944_s12  }
   0x3   : > { %s17_s17 = ssub.s32 %s776_s14, %s816_s16  ;;  %s20_s18 = sadd.s32 1, %s772_s13 }
   0x4   : > { %p18_p0 = scmp.eq.s32.totalorder %s17_s17, 0  ;;  %p27_p1 = scmp.ne.s32.totalorder %s772_s13, %s768_s12 }
   0x5   : > { %p28_p2 = scmp.eq.s32.totalorder %s776_s14, 0  ;;  %p669_p4 = scmp.ge.s32.totalorder %s776_s14, 2 }
   0x6   : > { %s825_s19 = scalar_select %p18_p0, %s772_s13, %s20_s18  }
   0x7   : > { %p29_p3 = por %p28_p2, %p27_p1  ;;  %127 = sbr.rel (%p669_p4) target bundleno = 27 (0x1b), region = 24 }
   0xc   : > { %130 = sbr.rel (!%p29_p3) target bundleno = 27 (0x1b), region = 28  ;;  %s132_s20 = sand.u32 (%p29_p3), 1, %s772_s13  }
   0xd   : > { %s713_s21 = sshll.u32 (%p29_p3), %s776_s14, 5  ;;  %s718_s22 = smul.u32 (%p29_p3), 160, %s132_s20 }
   0xe   : > { %s833_s25 = scalar_lea.vmem (%p29_p3), %s940_s0, %s713_s21 }
   0xf   : > { %v150_v0 = vld [vmem:[%s833_s25] sm:$0xff] (%p29_p3)  ;;  %v152_v1 = vld [vmem:[%s833_s25 + $0x8] sm:$0xff] (%p29_p3)  ;;  %v154_v2 = vld [vmem:[%s833_s25 + $0x10] sm:$0xff] (%p29_p3)  ;;  %s841_s26 = scalar_lea.vmem (%p29_p3), [#allocation2], %s718_s22 }
  0x10   : > { %v156_v3 = vld [vmem:[%s833_s25 + $0x18] sm:$0xff] (%p29_p3)  ;;  %v158_v4 = vld [vmem:[%s833_s25 + $0x40] sm:$0xff] (%p29_p3)  ;;  %v160_v5 = vld [vmem:[%s833_s25 + $0x48] sm:$0xff] (%p29_p3)  ;;  %151 = vst [vmem:[%s841_s26] sm:$0xff] (%p29_p3), %v150_v0 }
  0x11   : > { %153 = vst [vmem:[%s841_s26 + $0x8] sm:$0xff] %v152_v1  ;;  %155 = vst [vmem:[%s841_s26 + $0x10] sm:$0xff] %v154_v2  ;;  %v162_v6 = vld [vmem:[%s833_s25 + $0x50] sm:$0xff]  ;;  %v164_v7 = vld [vmem:[%s833_s25 + $0x58] sm:$0xff] }
  0x12   : > { %157 = vst [vmem:[%s841_s26 + $0x18] sm:$0xff] %v156_v3  ;;  %159 = vst [vmem:[%s841_s26 + $0x20] sm:$0xff] %v158_v4  ;;  %v166_v8 = vld [vmem:[%s833_s25 + $0x80] sm:$0xff]  ;;  %v168_v9 = vld [vmem:[%s833_s25 + $0x88] sm:$0xff] }
  0x13   : > { %161 = vst [vmem:[%s841_s26 + $0x28] sm:$0xff] %v160_v5  ;;  %163 = vst [vmem:[%s841_s26 + $0x30] sm:$0xff] %v162_v6  ;;  %v170_v10 = vld [vmem:[%s833_s25 + $0x90] sm:$0xff]  ;;  %v172_v11 = vld [vmem:[%s833_s25 + $0x98] sm:$0xff] }
  0x14   : > { %165 = vst [vmem:[%s841_s26 + $0x38] sm:$0xff] %v164_v7  ;;  %167 = vst [vmem:[%s841_s26 + $0x40] sm:$0xff] %v166_v8  ;;  %v174_v12 = vld [vmem:[%s833_s25 + $0xc0] sm:$0xff]  ;;  %v176_v13 = vld [vmem:[%s833_s25 + $0xc8] sm:$0xff] }
  0x15   : > { %169 = vst [vmem:[%s841_s26 + $0x48] sm:$0xff] %v168_v9  ;;  %171 = vst [vmem:[%s841_s26 + $0x50] sm:$0xff] %v170_v10  ;;  %v178_v14 = vld [vmem:[%s833_s25 + $0xd0] sm:$0xff]  ;;  %v180_v15 = vld [vmem:[%s833_s25 + $0xd8] sm:$0xff] }
  0x16   : > { %173 = vst [vmem:[%s841_s26 + $0x58] sm:$0xff] %v172_v11  ;;  %175 = vst [vmem:[%s841_s26 + $0x60] sm:$0xff] %v174_v12  ;;  %v182_v16 = vld [vmem:[%s833_s25 + $0x100] sm:$0xff]  ;;  %v184_v17 = vld [vmem:[%s833_s25 + $0x108] sm:$0xff] }
  0x17   : > { %177 = vst [vmem:[%s841_s26 + $0x68] sm:$0xff] %v176_v13  ;;  %179 = vst [vmem:[%s841_s26 + $0x70] sm:$0xff] %v178_v14  ;;  %v186_v18 = vld [vmem:[%s833_s25 + $0x110] sm:$0xff]  ;;  %v188_v19 = vld [vmem:[%s833_s25 + $0x118] sm:$0xff] }
  0x18   : > { %181 = vst [vmem:[%s841_s26 + $0x78] sm:$0xff] %v180_v15  ;;  %183 = vst [vmem:[%s841_s26 + $0x80] sm:$0xff] %v182_v16 }
  0x19   : > { %185 = vst [vmem:[%s841_s26 + $0x88] sm:$0xff] %v184_v17  ;;  %187 = vst [vmem:[%s841_s26 + $0x90] sm:$0xff] %v186_v18 }
  0x1a   : > { %189 = vst [vmem:[%s841_s26 + $0x98] sm:$0xff] %v188_v19 }
  0x1b PF: > { %p672_p5 = scmp.ge.s32.totalorder %s776_s14, 1  ;;  %p194_p6 = scmp.lt.s32.totalorder %s776_s14, 3 }
  0x1d   : > { %p195_p7 = pnand %p672_p5, %p194_p6 }
  0x1e   : > { %s201_s27 = sand.u32 (!%p195_p7), 1, %s768_s12   ;;  %s673_s7 = sshll.u32 (!%p195_p7), %s666_s15, 3 }
  0x1f   : > { %198 = sbr.rel (%p195_p7) target bundleno = 268 (0x10c), region = 51  ;;  %p226_p8 = scmp.lt.s32.totalorder (!%p195_p7), %s673_s7, 15 }
  0x20   : > { %s719_s28 = smul.u32 (!%p195_p7), 160, %s201_s27 }
  0x22   : > { %s886_s4 = scalar_lea.vmem (!%p195_p7), [#allocation2], %s719_s28 }
  0x24   : > { %v778_v20 = vmov 0   ;;  %v253_v21 = vld [vmem:[%s942_s2] sm:$0xff]  ;;  %vm363_vm0 = vcmask 1041408   ;;  %v250_v23 = vld [vmem:[%s886_s4 + $0x88] sm:$0x33]  ;;  %v243_v52 = vld [vmem:[%s886_s4 + $0x50] sm:$0xff] }
  0x25   : > { %420 = vmatprep.mubr.bf16.mxu0 %v778_v20  ;;  %461 = vmatprep.mubr.bf16.mxu1 %v778_v20  ;;  %v249_v22 = vld [vmem:[%s886_s4 + $0x80] sm:$0x33]  ;;  %v694_v26 = vcombine.high %v250_v23, %v250_v23  ;;  %v693_v28 = vcombine.low %v250_v23, %v250_v23  ;;  %v242_v30 = vld [vmem:[%s886_s4 + $0x48] sm:$0xff]  ;;  %v251_v44 = vld [vmem:[%s886_s4 + $0x90] sm:$0x33]  ;;  %vm359_vm1 = vcmask 293888  }
  0x26   : > { %745 = vset.pattern.permute.xlu0 %v778_v20  ;;  %v241_v24 = vld [vmem:[%s886_s4 + $0x40] sm:$0xff]  ;;  %v692_v25 = vcombine.high %v249_v22, %v249_v22  ;;  %v691_v27 = vcombine.low %v249_v22, %v249_v22  ;;  %v246_v31 = vld [vmem:[%s886_s4 + $0x68] sm:$0xff]  ;;  %v252_v45 = vld [vmem:[%s886_s4 + $0x98] sm:$0x33]  ;;  %v696_v48 = vcombine.high %v251_v44, %v251_v44  ;;  %v695_v50 = vcombine.low %v251_v44, %v251_v44  ;;  %s948_s7 = smov (!%p226_p8, %s673_s7), 15 }
  0x27   : > { %256 = vperm.xlu0 %745, %v253_v21   ;;  %v245_v29 = vld [vmem:[%s886_s4 + $0x60] sm:$0xff]  ;;  %v686_v33 = vcombine.high %v242_v30, %v246_v31  ;;  %v234_v36 = vld [vmem:[%s886_s4 + $0x8] sm:$0xff]  ;;  %701 = vmatprep.subr.msk.bf16.mxu1 %vm363_vm0, %v694_v26  ;;  %v371_v38 = vsel %vm363_vm0, %v693_v28, 0  ;;  %v685_v41 = vcombine.low %v242_v30, %v246_v31  ;;  %v698_v49 = vcombine.high %v252_v45, %v252_v45  ;;  %v247_v53 = vld [vmem:[%s886_s4 + $0x70] sm:$0xff]  ;;  %s674_s8 = sshll.u32 %s948_s7, 2 }
  0x28   : > { %v684_v32 = vcombine.high %v241_v24, %v245_v29  ;;  %v233_v34 = vld [vmem:[%s886_s4] sm:$0xff]  ;;  %699 = vmatprep.subr.msk.bf16.mxu0 %vm363_vm0, %v692_v25  ;;  %v365_v37 = vsel %vm363_vm0, %v691_v27, 0  ;;  %v238_v39 = vld [vmem:[%s886_s4 + $0x28] sm:$0xff]  ;;  %440 = vmatpush1.bf16.msra.mxu1 %v371_v38  ;;  %v683_v40 = vcombine.low %v241_v24, %v245_v29  ;;  %v697_v51 = vcombine.low %v252_v45, %v252_v45  ;;  %v244_v54 = vld [vmem:[%s886_s4 + $0x58] sm:$0xff]  ;;  %s229_s11 = scalar_lea.vmem %s943_s3, %s674_s8 }
  0x29   : > { %v237_v35 = vld [vmem:[%s886_s4 + $0x20] sm:$0xff]  ;;  %399 = vmatpush1.bf16.msra.mxu0 %v365_v37  ;;  %441 = vmatprep.subr.bf16.mxu1 %v686_v33  ;;  %v678_v43 = vcombine.high %v234_v36, %v238_v39  ;;  %v677_v47 = vcombine.low %v234_v36, %v238_v39  ;;  %v248_v55 = vld [vmem:[%s886_s4 + $0x78] sm:$0xff]  ;;  %v377_v57 = vsel %vm363_vm0, %v695_v50, 0  ;;  %v688_v59 = vcombine.high %v243_v52, %v247_v53  ;;  %v235_v61 = vld [vmem:[%s886_s4 + $0x10] sm:$0xff] }
  0x2a   : > { %400 = vmatprep.subr.bf16.mxu0 %v684_v32  ;;  %v676_v42 = vcombine.high %v233_v34, %v237_v35  ;;  %v675_v46 = vcombine.low %v233_v34, %v237_v35  ;;  %v232_v56 = vld [vmem:[%s941_s1] sm:$0xf]  ;;  %v383_v58 = vsel %vm363_vm0, %v697_v51, 0  ;;  %v690_v60 = vcombine.high %v244_v54, %v248_v55  ;;  %v239_v62 = vld [vmem:[%s886_s4 + $0x30] sm:$0xff]  ;;  %v236_v63 = vld [vmem:[%s886_s4 + $0x18] sm:$0xff] }
  0x2b   : > { %v240_v0 = vld [vmem:[%s886_s4 + $0x38] sm:$0xff]  ;;  %v687_v1 = vcombine.low %v243_v52, %v247_v53  ;;  %v689_v2 = vcombine.low %v244_v54, %v248_v55  ;;  %v680_v3 = vcombine.high %v235_v61, %v239_v62  ;;  %v679_v5 = vcombine.low %v235_v61, %v239_v62 }
  0x2c   : > { %442 = vmatpush1.bf16.msra.mxu1 %v685_v41  ;;  %v682_v4 = vcombine.high %v236_v63, %v240_v0  ;;  %v681_v6 = vcombine.low %v236_v63, %v240_v0 }
  0x2d   : > { %401 = vmatpush1.bf16.msra.mxu0 %v683_v40  ;;  %443 = vmatprep.subr.bf16.mxu1 %v678_v43 }
  0x2e   : > { %402 = vmatprep.subr.bf16.mxu0 %v676_v42 }
  0x30   : > { %444 = vmatpush1.bf16.msra.mxu1 %v677_v47 }
  0x31   : > { %403 = vmatpush1.bf16.msra.mxu0 %v675_v46  ;;  %705 = vmatprep.subr.msk.bf16.mxu1 %vm363_vm0, %v698_v49 }
  0x32   : > { %703 = vmatprep.subr.msk.bf16.mxu0 %vm363_vm0, %v696_v48 }
  0x33   : > { %702 = vmatmul.mubr.msk.bf16.vlgmr.msra.gmra.mxu1 %vm359_vm1, %v232_v56 }
  0x34   : > { %700 = vmatmul.mubr.msk.bf16.vlgmr.msra.gmra.mxu0 %vm359_vm1, %v232_v56  ;;  %522 = vmatpush1.bf16.msra.mxu1 %v383_v58 }
  0x35   : > { %481 = vmatpush1.bf16.msra.mxu0 %v377_v57  ;;  %523 = vmatprep.subr.bf16.mxu1 %v690_v60 }
  0x36   : > { %482 = vmatprep.subr.bf16.mxu0 %v688_v59  ;;  %502 = vmatprep.mubr.bf16.mxu0 %v778_v20 }
  0x37   : > { %543 = vmatprep.mubr.bf16.mxu1 %v778_v20 }
  0x38   : > { %524 = vmatpush1.bf16.msra.mxu1 %v689_v2 }
  0x39   : > { %483 = vmatpush1.bf16.msra.mxu0 %v687_v1  ;;  %525 = vmatprep.subr.bf16.mxu1 %v682_v4 }
  0x3a   : > { %484 = vmatprep.subr.bf16.mxu0 %v680_v3 }
  0x3c   : > { %526 = vmatpush1.bf16.msra.mxu1 %v681_v6 }
  0x3d   : > { %485 = vmatpush1.bf16.msra.mxu0 %v679_v5 }
  0x3f   : > { %706 = vmatmul.mubr.msk.bf16.vlgmr.msra.gmra.mxu1 %vm359_vm1, %v232_v56 }
  0x40   : > { %704 = vmatmul.mubr.msk.bf16.vlgmr.msra.gmra.mxu0 %vm359_vm1, %v232_v56 }
  0xa2   : > { %v257_v7 = vpop.permute.xlu0 %256 }
  0xf3   : > { %v463_v9 = vpop.f32.mrf.mxu1 }
  0xf4   : > { %v422_v8 = vpop.f32.mrf.mxu0  ;;  %v464_v11 = vadd.f32 %v463_v9, %v257_v7 }
  0xf5   : > { %v423_v10 = vadd.f32 %v422_v8, %v257_v7  ;;  %v465_v13 = vpop.f32.mrf.mxu1 }
  0xf6   : > { %v424_v12 = vpop.f32.mrf.mxu0  ;;  %v554_v15 = vmul.f32 0.1, %v464_v11  ;;  %v466_v17 = vadd.f32 %v465_v13, %v257_v7 }
  0xf7   : > { %v552_v14 = vmul.f32 0.1, %v423_v10  ;;  %v425_v16 = vadd.f32 %v424_v12, %v257_v7  ;;  %v467_v19 = vpop.f32.mrf.mxu1 }
  0xf8   : > { %v426_v18 = vpop.f32.mrf.mxu0  ;;  %v555_v21 = vmul.f32 0.1, %v466_v17  ;;  %v562_v25 = vmax.f32 %v464_v11, %v554_v15 }
  0xf9   : > { %v553_v20 = vmul.f32 0.1, %v425_v16  ;;  %v468_v23 = vpop.f32.mrf.mxu1  ;;  %v560_v24 = vmax.f32 %v423_v10, %v552_v14 }
  0xfa   : > { %v427_v22 = vpop.f32.mrf.mxu0  ;;  %v563_v27 = vmax.f32 %v466_v17, %v555_v21 }
  0xfb   : > { %v561_v26 = vmax.f32 %v425_v16, %v553_v20 }
  0xfc   : > { %v715_v29 = vpack.c.bf16 %v563_v27, %v562_v25 }
  0xfd   : > { %v714_v28 = vpack.c.bf16 %v561_v26, %v560_v24 }
  0xfe   : > { %601 = vst [vmem:[%s229_s11 + $0x8] sm:$0xff] %v715_v29 }
  0xff   : > { %600 = vst [vmem:[%s229_s11] sm:$0xff] %v714_v28  ;;  %v545_v31 = vpop.f32.mrf.mxu1 }
 0x100   : > { %v504_v30 = vpop.f32.mrf.mxu0  ;;  %v546_v33 = vadd.f32 %v545_v31, %v257_v7 }
 0x101   : > { %v505_v32 = vadd.f32 %v504_v30, %v257_v7  ;;  %v547_v35 = vpop.f32.mrf.mxu1 }
 0x102   : > { %v506_v34 = vpop.f32.mrf.mxu0  ;;  %v558_v37 = vmul.f32 0.1, %v546_v33  ;;  %v548_v39 = vadd.f32 %v547_v35, %v257_v7 }
 0x103   : > { %v556_v36 = vmul.f32 0.1, %v505_v32  ;;  %v507_v38 = vadd.f32 %v506_v34, %v257_v7  ;;  %v549_v41 = vpop.f32.mrf.mxu1 }
 0x104   : > { %v508_v40 = vpop.f32.mrf.mxu0  ;;  %v559_v43 = vmul.f32 0.1, %v548_v39  ;;  %v566_v47 = vmax.f32 %v546_v33, %v558_v37 }
 0x105   : > { %v557_v42 = vmul.f32 0.1, %v507_v38  ;;  %v550_v45 = vpop.f32.mrf.mxu1  ;;  %v564_v46 = vmax.f32 %v505_v32, %v556_v36 }
 0x106   : > { %v509_v44 = vpop.f32.mrf.mxu0  ;;  %v567_v49 = vmax.f32 %v548_v39, %v559_v43 }
 0x107   : > { %v565_v48 = vmax.f32 %v507_v38, %v557_v42 }
 0x108   : > { %v717_v51 = vpack.c.bf16 %v567_v49, %v566_v47 }
 0x109   : > { %v716_v50 = vpack.c.bf16 %v565_v48, %v564_v46 }
 0x10a   : > { %603 = vst [vmem:[%s229_s11 + $0x18] sm:$0xff] %v717_v51 }
 0x10b   : > { %602 = vst [vmem:[%s229_s11 + $0x10] sm:$0xff] %v716_v50 }
 0x10c PF: > { %p10_p9 = scmp.ge.s32.totalorder %s816_s16, 4   ;;  %s944_s12 = smov %s772_s13 }
 0x10d   : > { %s945_s13 = smov %s825_s19  ;;  %s946_s14 = smov %s816_s16 }
 0x10e   :  { %12 = sbr.rel (!%p10_p9) target bundleno = 2 (0x2), region = 90 }

// kernel: _lambda_.32
= control target key start
LH: loop header
LB: loop body
LE: loop exit
PB: predicated region body
PF: predicated region fallthrough
CT: control target
= control target key end

     0   :  { %vm146_vm0 = vcmask 1043456   ;;  %v349_v2 = vmov 0   ;;  %vm142_vm1 = vcmask 588800   ;;  %s445_s0 = inlined_call_operand.vmem [shape: bf16[72,512], index: 0, kind: input, shape index: {}]   ;;  %s446_s2 = inlined_call_operand.vmem [shape: f32[16,1], index: 2, kind: input, shape index: {}]   ;;  %s447_s1 = inlined_call_operand.vmem [shape: bf16[16,72], index: 1, kind: input, shape index: {}]   ;;  %s448_s3 = inlined_call_operand.vmem [shape: bf16[16,512], index: 3, kind: output, shape index: {}]  }
   0x1   :  { %v33_v0 = vld [vmem:[%s445_s0 + $0x80] sm:$0xff]  ;;  %v34_v1 = vld [vmem:[%s445_s0 + $0x88] sm:$0xff]  ;;  %191 = vmatprep.mubr.bf16.mxu0 %v349_v2  ;;  %234 = vmatprep.mubr.bf16.mxu1 %v349_v2 }
   0x2   :  { %v303_v3 = vcombine.high %v33_v0, %v33_v0  ;;  %v305_v4 = vcombine.high %v34_v1, %v34_v1  ;;  %v302_v5 = vcombine.low %v33_v0, %v33_v0  ;;  %v304_v6 = vcombine.low %v34_v1, %v34_v1  ;;  %v324_v7 = vld [vmem:[%s445_s0 + $0x64] ss:$16 sps:$4 sm:$0xff]   ;;  %319 = vset.pattern.permute.xlu0 %v349_v2  ;;  %v326_v8 = vld [vmem:[%s445_s0 + $0x6c] ss:$16 sps:$4 sm:$0xff]   ;;  %v328_v11 = vld [vmem:[%s445_s0 + $0x60] ss:$16 sps:$4 sm:$0xff]  }
   0x3   :  { %v329_v12 = vld [vmem:[%s445_s0 + $0x68] ss:$16 sps:$4 sm:$0xff]   ;;  %v330_v13 = vld [vmem:[%s445_s0 + $0x44] ss:$16 sps:$4 sm:$0xff]   ;;  %v332_v14 = vld [vmem:[%s445_s0 + $0x4c] ss:$16 sps:$4 sm:$0xff]  }
   0x4   :  { %306 = vmatprep.subr.msk.bf16.mxu0 %vm146_vm0, %v303_v3  ;;  %308 = vmatprep.subr.msk.bf16.mxu1 %vm146_vm0, %v305_v4  ;;  %v148_v9 = vsel %vm146_vm0, %v302_v5, 0  ;;  %v154_v10 = vsel %vm146_vm0, %v304_v6, 0  ;;  %v334_v15 = vld [vmem:[%s445_s0 + $0x40] ss:$16 sps:$4 sm:$0xff]   ;;  %v335_v16 = vld [vmem:[%s445_s0 + $0x48] ss:$16 sps:$4 sm:$0xff]  }
   0x5   :  { %166 = vmatpush1.bf16.msra.mxu0 %v148_v9  ;;  %209 = vmatpush1.bf16.msra.mxu1 %v154_v10  ;;  %v336_v17 = vld [vmem:[%s445_s0 + $0x24] ss:$16 sps:$4 sm:$0xff]   ;;  %v338_v18 = vld [vmem:[%s445_s0 + $0x2c] ss:$16 sps:$4 sm:$0xff]   ;;  %v340_v19 = vld [vmem:[%s445_s0 + $0x20] ss:$16 sps:$4 sm:$0xff]  }
   0x6   :  { %167 = vmatprep.subr.bf16.mxu0 %v324_v7  ;;  %210 = vmatprep.subr.bf16.mxu1 %v326_v8  ;;  %v341_v20 = vld [vmem:[%s445_s0 + $0x28] ss:$16 sps:$4 sm:$0xff]   ;;  %v35_v21 = vld [vmem:[%s446_s2] sm:$0xff]  ;;  %v344_v23 = vld [vmem:[%s445_s0 + $0xc] ss:$16 sps:$4 sm:$0xff]  }
   0x7   :  { %v342_v22 = vld [vmem:[%s445_s0 + $0x4] ss:$16 sps:$4 sm:$0xff]   ;;  %39 = vperm.xlu0 %319, %v35_v21   ;;  %v36_v24 = vld [vmem:[%s446_s2 + $0x8] sm:$0xff]  ;;  %v346_v25 = vld [vmem:[%s445_s0] ss:$16 sps:$4 sm:$0xff]  }
   0x8   :  { %v347_v26 = vld [vmem:[%s445_s0 + $0x8] ss:$16 sps:$4 sm:$0xff]   ;;  %v348_v27 = vld [vmem:[%s447_s1] sm:$0xff]  }
   0x9   :  { %168 = vmatpush1.bf16.msra.mxu0 %v328_v11  ;;  %211 = vmatpush1.bf16.msra.mxu1 %v329_v12 }
   0xa   :  { %169 = vmatprep.subr.bf16.mxu0 %v330_v13  ;;  %212 = vmatprep.subr.bf16.mxu1 %v332_v14 }
   0xb   :  { %44 = vperm.xlu0 %319, %v36_v24  }
   0xd   :  { %170 = vmatpush1.bf16.msra.mxu0 %v334_v15  ;;  %213 = vmatpush1.bf16.msra.mxu1 %v335_v16 }
   0xe   :  { %171 = vmatprep.subr.bf16.mxu0 %v336_v17  ;;  %214 = vmatprep.subr.bf16.mxu1 %v338_v18 }
  0x11   :  { %172 = vmatpush1.bf16.msra.mxu0 %v340_v19  ;;  %215 = vmatpush1.bf16.msra.mxu1 %v341_v20 }
  0x12   :  { %173 = vmatprep.subr.bf16.mxu0 %v342_v22  ;;  %216 = vmatprep.subr.bf16.mxu1 %v344_v23 }
  0x15   :  { %174 = vmatpush1.bf16.msra.mxu0 %v346_v25  ;;  %217 = vmatpush1.bf16.msra.mxu1 %v347_v26 }
  0x18   :  { %307 = vmatmul.mubr.msk.bf16.vlgmr.msra.gmra.mxu0 %vm142_vm1, %v348_v27  ;;  %309 = vmatmul.mubr.msk.bf16.vlgmr.msra.gmra.mxu1 %vm142_vm1, %v348_v27 }
  0x82   :  { %v40_v28 = vpop.permute.xlu0 %39 }
  0x86   :  { %v45_v41 = vpop.permute.xlu0 %44 }
  0xd8   :  { %v193_v29 = vpop.f32.mrf.mxu0  ;;  %v236_v30 = vpop.f32.mrf.mxu1 }
  0xd9   :  { %v194_v31 = vadd.f32 %v193_v29, %v40_v28  ;;  %v237_v32 = vadd.f32 %v236_v30, %v40_v28 }
  0xda   :  { %v195_v33 = vpop.f32.mrf.mxu0  ;;  %v238_v34 = vpop.f32.mrf.mxu1 }
  0xdb   :  { %v196_v35 = vadd.f32 %v195_v33, %v40_v28  ;;  %v239_v36 = vadd.f32 %v238_v34, %v40_v28  ;;  %v245_v39 = vmax.f32 %v194_v31, 0.0  ;;  %v247_v40 = vmax.f32 %v237_v32, 0.0 }
  0xdc   :  { %v197_v37 = vpop.f32.mrf.mxu0  ;;  %v240_v38 = vpop.f32.mrf.mxu1 }
  0xdd   :  { %v246_v42 = vmax.f32 %v196_v35, 0.0  ;;  %v248_v43 = vmax.f32 %v239_v36, 0.0  ;;  %v198_v44 = vadd.f32 %v197_v37, %v45_v41  ;;  %v241_v45 = vadd.f32 %v240_v38, %v45_v41 }
  0xde   :  { %v199_v46 = vpop.f32.mrf.mxu0  ;;  %v242_v47 = vpop.f32.mrf.mxu1 }
  0xdf   :  { %v314_v48 = vpack.c.bf16 %v246_v42, %v245_v39  ;;  %v315_v49 = vpack.c.bf16 %v248_v43, %v247_v40  ;;  %v200_v50 = vadd.f32 %v199_v46, %v45_v41  ;;  %v243_v51 = vadd.f32 %v242_v47, %v45_v41 }
  0xe0   :  { %v249_v52 = vmax.f32 %v198_v44, 0.0  ;;  %v251_v53 = vmax.f32 %v241_v45, 0.0 }
  0xe1   :  { %277 = vst [vmem:[%s448_s3] sm:$0xff] %v314_v48  ;;  %278 = vst [vmem:[%s448_s3 + $0x8] sm:$0xff] %v315_v49  ;;  %v250_v54 = vmax.f32 %v200_v50, 0.0  ;;  %v252_v55 = vmax.f32 %v243_v51, 0.0 }
  0xe3   :  { %v316_v56 = vpack.c.bf16 %v250_v54, %v249_v52  ;;  %v317_v57 = vpack.c.bf16 %v252_v55, %v251_v53 }
  0xe5   :  { %279 = vst [vmem:[%s448_s3 + $0x10] sm:$0xff] %v316_v56  ;;  %280 = vst [vmem:[%s448_s3 + $0x18] sm:$0xff] %v317_v57 }

// kernel: _lambda_.36
= control target key start
LH: loop header
LB: loop body
LE: loop exit
PB: predicated region body
PF: predicated region fallthrough
CT: control target
= control target key end

     0   :  { %v893_v1 = vmov 0   ;;  %vm478_vm0 = vcmask 261120   ;;  %s1166_s0 = inlined_call_operand.vmem [shape: bf16[288,512], index: 0, kind: input, shape index: {}]   ;;  %s1167_s1 = inlined_call_operand.vmem [shape: bf16[16,288], index: 1, kind: input, shape index: {}]   ;;  %s1168_s2 = inlined_call_operand.vmem [shape: f32[16,1], index: 2, kind: input, shape index: {}]   ;;  %s1169_s3 = inlined_call_operand.vmem [shape: bf16[16,512], index: 3, kind: output, shape index: {}]  }
   0x1   :  { %v781_v0 = vld [vmem:[%s1166_s0 + $0xe4] ss:$16 sps:$4 sm:$0xff]   ;;  %557 = vmatprep.mubr.bf16.mxu1 %v893_v1  ;;  %780 = vset.pattern.permute.xlu0 %v893_v1  ;;  %v785_v3 = vld [vmem:[%s1166_s0 + $0xe0] ss:$16 sps:$4 sm:$0xff]   ;;  %v796_v11 = vld [vmem:[%s1166_s0 + $0xe8] ss:$16 sps:$4 sm:$0xff]  }
   0x2   :  { %v783_v2 = vld [vmem:[%s1166_s0 + $0x224] ss:$16 sps:$4 sm:$0xff]   ;;  %482 = vmatprep.subr.bf16.mxu0 %v781_v0  ;;  %v786_v4 = vld [vmem:[%s1166_s0 + $0x220] ss:$16 sps:$4 sm:$0xff]   ;;  %v798_v12 = vld [vmem:[%s1166_s0 + $0xec] ss:$16 sps:$4 sm:$0xff]  }
   0x3   :  { %537 = vmatprep.subr.bf16.mxu1 %v783_v2  ;;  %v787_v5 = vld [vmem:[%s1166_s0 + $0xc4] ss:$16 sps:$4 sm:$0xff]   ;;  %483 = vmatpush1.bf16.msra.mxu0 %v785_v3  ;;  %v791_v7 = vld [vmem:[%s1166_s0 + $0xc0] ss:$16 sps:$4 sm:$0xff]   ;;  %v802_v15 = vld [vmem:[%s1166_s0 + $0xc8] ss:$16 sps:$4 sm:$0xff]  }
   0x4   :  { %538 = vmatpush1.bf16.msra.mxu1 %v786_v4  ;;  %v789_v6 = vld [vmem:[%s1166_s0 + $0x204] ss:$16 sps:$4 sm:$0xff]   ;;  %484 = vmatprep.subr.bf16.mxu0 %v787_v5  ;;  %v792_v8 = vld [vmem:[%s1166_s0 + $0x200] ss:$16 sps:$4 sm:$0xff]   ;;  %v804_v16 = vld [vmem:[%s1166_s0 + $0xcc] ss:$16 sps:$4 sm:$0xff]  }
   0x5   :  { %539 = vmatprep.subr.bf16.mxu1 %v789_v6  ;;  %v793_v9 = vld [vmem:[%s1166_s0 + $0xa4] ss:$16 sps:$4 sm:$0xff]   ;;  %v799_v13 = vld [vmem:[%s1166_s0 + $0xa0] ss:$16 sps:$4 sm:$0xff]   ;;  %v810_v19 = vld [vmem:[%s1166_s0 + $0xac] ss:$16 sps:$4 sm:$0xff]  }
   0x6   :  { %v946_v10 = vld [vmem:[%s1167_s1 + $0x8] ss:$12 sps:$4 sm:$0xff]   ;;  %v805_v17 = vld [vmem:[%s1166_s0 + $0x80] ss:$16 sps:$4 sm:$0xff]   ;;  %v816_v23 = vld [vmem:[%s1166_s0 + $0x8c] ss:$16 sps:$4 sm:$0xff]  }
   0x7   :  { %485 = vmatpush1.bf16.msra.mxu0 %v791_v7  ;;  %v800_v14 = vld [vmem:[%s1166_s0 + $0x84] ss:$16 sps:$4 sm:$0xff]   ;;  %v808_v20 = vld [vmem:[%s1166_s0 + $0xa8] ss:$16 sps:$4 sm:$0xff]   ;;  %v811_v21 = vld [vmem:[%s1166_s0 + $0x60] ss:$16 sps:$4 sm:$0xff]  }
   0x8   :  { %540 = vmatpush1.bf16.msra.mxu1 %v792_v8  ;;  %486 = vmatprep.subr.bf16.mxu0 %v793_v9  ;;  %v806_v18 = vld [vmem:[%s1166_s0 + $0x64] ss:$16 sps:$4 sm:$0xff]   ;;  %v814_v24 = vld [vmem:[%s1166_s0 + $0x88] ss:$16 sps:$4 sm:$0xff]   ;;  %v817_v25 = vld [vmem:[%s1166_s0 + $0x40] ss:$16 sps:$4 sm:$0xff]  }
   0x9   :  { %568 = vmatprep.subr.bf16.mxu1 %v798_v12  ;;  %v812_v22 = vld [vmem:[%s1166_s0 + $0x44] ss:$16 sps:$4 sm:$0xff]   ;;  %v822_v27 = vld [vmem:[%s1166_s0 + $0x6c] ss:$16 sps:$4 sm:$0xff]   ;;  %v820_v28 = vld [vmem:[%s1166_s0 + $0x68] ss:$16 sps:$4 sm:$0xff]  }
   0xa   :  { %v818_v26 = vld [vmem:[%s1166_s0 + $0x24] ss:$16 sps:$4 sm:$0xff]   ;;  %v823_v29 = vld [vmem:[%s1166_s0 + $0x20] ss:$16 sps:$4 sm:$0xff]   ;;  %v828_v31 = vld [vmem:[%s1166_s0 + $0x4c] ss:$16 sps:$4 sm:$0xff]  }
   0xb   :  { %769 = vmatmul.mubr.msk.bf16.vlgmr.msra.gmra.mxu1 %vm478_vm0, %v946_v10  ;;  %487 = vmatpush1.bf16.msra.mxu0 %v799_v13  ;;  %v824_v30 = vld [vmem:[%s1166_s0 + $0x4] ss:$16 sps:$4 sm:$0xff]   ;;  %v826_v32 = vld [vmem:[%s1166_s0 + $0x48] ss:$16 sps:$4 sm:$0xff]   ;;  %v829_v33 = vld [vmem:[%s1166_s0] ss:$16 sps:$4 sm:$0xff]  }
   0xc   :  { %569 = vmatpush1.bf16.msra.mxu1 %v796_v11  ;;  %488 = vmatprep.subr.bf16.mxu0 %v800_v14  ;;  %v830_v34 = vld [vmem:[%s1166_s0 + $0x1e4] ss:$16 sps:$4 sm:$0xff]   ;;  %v834_v35 = vld [vmem:[%s1166_s0 + $0x2c] ss:$16 sps:$4 sm:$0xff]   ;;  %v832_v36 = vld [vmem:[%s1166_s0 + $0x28] ss:$16 sps:$4 sm:$0xff]  }
   0xd   :  { %570 = vmatprep.subr.bf16.mxu1 %v804_v16  ;;  %v835_v37 = vld [vmem:[%s1166_s0 + $0x1e0] ss:$16 sps:$4 sm:$0xff]   ;;  %v836_v38 = vld [vmem:[%s1166_s0 + $0x1c4] ss:$16 sps:$4 sm:$0xff]   ;;  %v840_v39 = vld [vmem:[%s1166_s0 + $0xc] ss:$16 sps:$4 sm:$0xff]  }
   0xe   :  { %v838_v40 = vld [vmem:[%s1166_s0 + $0x8] ss:$16 sps:$4 sm:$0xff]   ;;  %v841_v41 = vld [vmem:[%s1166_s0 + $0x1c0] ss:$16 sps:$4 sm:$0xff]   ;;  %v842_v42 = vld [vmem:[%s1166_s0 + $0x1a4] ss:$16 sps:$4 sm:$0xff]  }
   0xf   :  { %489 = vmatpush1.bf16.msra.mxu0 %v805_v17  ;;  %v846_v43 = vld [vmem:[%s1166_s0 + $0x1ec] ss:$16 sps:$4 sm:$0xff]   ;;  %v844_v44 = vld [vmem:[%s1166_s0 + $0x1e8] ss:$16 sps:$4 sm:$0xff]   ;;  %v847_v45 = vld [vmem:[%s1166_s0 + $0x1a0] ss:$16 sps:$4 sm:$0xff]  }
  0x10   :  { %571 = vmatpush1.bf16.msra.mxu1 %v802_v15  ;;  %490 = vmatprep.subr.bf16.mxu0 %v806_v18  ;;  %v848_v46 = vld [vmem:[%s1166_s0 + $0x184] ss:$16 sps:$4 sm:$0xff]   ;;  %v852_v47 = vld [vmem:[%s1166_s0 + $0x1cc] ss:$16 sps:$4 sm:$0xff]   ;;  %v850_v48 = vld [vmem:[%s1166_s0 + $0x1c8] ss:$16 sps:$4 sm:$0xff]  }
  0x11   :  { %572 = vmatprep.subr.bf16.mxu1 %v810_v19  ;;  %v853_v49 = vld [vmem:[%s1166_s0 + $0x180] ss:$16 sps:$4 sm:$0xff]   ;;  %v854_v50 = vld [vmem:[%s1166_s0 + $0x164] ss:$16 sps:$4 sm:$0xff]   ;;  %v858_v52 = vld [vmem:[%s1166_s0 + $0x1ac] ss:$16 sps:$4 sm:$0xff]  }
  0x12   :  { %v880_v51 = vld [vmem:[%s1167_s1 + $0x4] ss:$12 sps:$4 sm:$0xff]   ;;  %v856_v53 = vld [vmem:[%s1166_s0 + $0x1a8] ss:$16 sps:$4 sm:$0xff]   ;;  %v864_v56 = vld [vmem:[%s1166_s0 + $0x18c] ss:$16 sps:$4 sm:$0xff]  }
  0x13   :  { %491 = vmatpush1.bf16.msra.mxu0 %v811_v21  ;;  %514 = vmatprep.mubr.bf16.mxu0 %v880_v51  ;;  %v859_v54 = vld [vmem:[%s1166_s0 + $0x160] ss:$16 sps:$4 sm:$0xff]   ;;  %v860_v55 = vld [vmem:[%s1166_s0 + $0x144] ss:$16 sps:$4 sm:$0xff]   ;;  %v862_v58 = vld [vmem:[%s1166_s0 + $0x188] ss:$16 sps:$4 sm:$0xff]  }
  0x14   :  { %573 = vmatpush1.bf16.msra.mxu1 %v808_v20  ;;  %492 = vmatprep.subr.bf16.mxu0 %v812_v22  ;;  %v91_v57 = vld [vmem:[%s1168_s2] sm:$0xff]  ;;  %v92_v60 = vld [vmem:[%s1168_s2 + $0x8] sm:$0xff] }
  0x15   :  { %574 = vmatprep.subr.bf16.mxu1 %v816_v23  ;;  %600 = vmatprep.mubr.bf16.mxu1 %v880_v51  ;;  %v865_v59 = vld [vmem:[%s1166_s0 + $0x140] ss:$16 sps:$4 sm:$0xff]   ;;  %v866_v61 = vld [vmem:[%s1166_s0 + $0x124] ss:$16 sps:$4 sm:$0xff]   ;;  %v870_v62 = vld [vmem:[%s1166_s0 + $0x16c] ss:$16 sps:$4 sm:$0xff]  }
  0x16   :  { %95 = vperm.xlu0 %780, %v91_v57   ;;  %v868_v63 = vld [vmem:[%s1166_s0 + $0x168] ss:$16 sps:$4 sm:$0xff]   ;;  %v871_v0 = vld [vmem:[%s1166_s0 + $0x120] ss:$16 sps:$4 sm:$0xff]   ;;  %v872_v2 = vld [vmem:[%s1166_s0 + $0x104] ss:$16 sps:$4 sm:$0xff]  }
  0x17   :  { %493 = vmatpush1.bf16.msra.mxu0 %v817_v25  ;;  %v876_v3 = vld [vmem:[%s1166_s0 + $0x14c] ss:$16 sps:$4 sm:$0xff]   ;;  %v874_v4 = vld [vmem:[%s1166_s0 + $0x148] ss:$16 sps:$4 sm:$0xff]   ;;  %v877_v5 = vld [vmem:[%s1166_s0 + $0x100] ss:$16 sps:$4 sm:$0xff]  }
  0x18   :  { %575 = vmatpush1.bf16.msra.mxu1 %v814_v24  ;;  %494 = vmatprep.subr.bf16.mxu0 %v818_v26  ;;  %v883_v6 = vld [vmem:[%s1166_s0 + $0x12c] ss:$16 sps:$4 sm:$0xff]   ;;  %v881_v9 = vld [vmem:[%s1166_s0 + $0x128] ss:$16 sps:$4 sm:$0xff]  }
  0x19   :  { %576 = vmatprep.subr.bf16.mxu1 %v822_v27  ;;  %v886_v7 = vld [vmem:[%s1166_s0 + $0x22c] ss:$16 sps:$4 sm:$0xff]   ;;  %v884_v11 = vld [vmem:[%s1166_s0 + $0x228] ss:$16 sps:$4 sm:$0xff]  }
  0x1a   :  { %100 = vperm.xlu0 %780, %v92_v60   ;;  %v878_v8 = vld [vmem:[%s1167_s1] ss:$12 sps:$4 sm:$0xff]   ;;  %v887_v14 = vld [vmem:[%s1166_s0 + $0x108] ss:$16 sps:$4 sm:$0xff]  }
  0x1b   :  { %495 = vmatpush1.bf16.msra.mxu0 %v823_v29  ;;  %v889_v12 = vld [vmem:[%s1166_s0 + $0x10c] ss:$16 sps:$4 sm:$0xff]   ;;  %v890_v15 = vld [vmem:[%s1166_s0 + $0x208] ss:$16 sps:$4 sm:$0xff]  }
  0x1c   :  { %577 = vmatpush1.bf16.msra.mxu1 %v820_v28  ;;  %496 = vmatprep.subr.bf16.mxu0 %v824_v30  ;;  %v892_v13 = vld [vmem:[%s1166_s0 + $0x20c] ss:$16 sps:$4 sm:$0xff]  }
  0x1d   :  { %578 = vmatprep.subr.bf16.mxu1 %v828_v31 }
  0x1f   :  { %497 = vmatpush1.bf16.msra.mxu0 %v829_v33 }
  0x20   :  { %579 = vmatpush1.bf16.msra.mxu1 %v826_v32  ;;  %498 = vmatprep.subr.bf16.mxu0 %v830_v34 }
  0x21   :  { %580 = vmatprep.subr.bf16.mxu1 %v834_v35 }
  0x23   :  { %499 = vmatpush2.bf16.msra.mxu0 %v835_v37 }
  0x24   :  { %581 = vmatpush1.bf16.msra.mxu1 %v832_v36  ;;  %500 = vmatprep.subr.bf16.mxu0 %v836_v38 }
  0x25   :  { %582 = vmatprep.subr.bf16.mxu1 %v840_v39 }
  0x27   :  { %501 = vmatpush2.bf16.msra.mxu0 %v841_v41 }
  0x28   :  { %583 = vmatpush1.bf16.msra.mxu1 %v838_v40  ;;  %502 = vmatprep.subr.bf16.mxu0 %v842_v42 }
  0x29   :  { %584 = vmatprep.subr.bf16.mxu1 %v846_v43 }
  0x2b   :  { %503 = vmatpush2.bf16.msra.mxu0 %v847_v45 }
  0x2c   :  { %585 = vmatpush2.bf16.msra.mxu1 %v844_v44  ;;  %504 = vmatprep.subr.bf16.mxu0 %v848_v46 }
  0x2d   :  { %586 = vmatprep.subr.bf16.mxu1 %v852_v47 }
  0x2f   :  { %505 = vmatpush2.bf16.msra.mxu0 %v853_v49 }
  0x30   :  { %587 = vmatpush2.bf16.msra.mxu1 %v850_v48  ;;  %506 = vmatprep.subr.bf16.mxu0 %v854_v50 }
  0x31   :  { %588 = vmatprep.subr.bf16.mxu1 %v858_v52 }
  0x33   :  { %507 = vmatpush2.bf16.msra.mxu0 %v859_v54 }
  0x34   :  { %589 = vmatpush2.bf16.msra.mxu1 %v856_v53  ;;  %508 = vmatprep.subr.bf16.mxu0 %v860_v55 }
  0x35   :  { %590 = vmatprep.subr.bf16.mxu1 %v864_v56 }
  0x37   :  { %509 = vmatpush2.bf16.msra.mxu0 %v865_v59 }
  0x38   :  { %591 = vmatpush2.bf16.msra.mxu1 %v862_v58  ;;  %510 = vmatprep.subr.bf16.mxu0 %v866_v61 }
  0x39   :  { %592 = vmatprep.subr.bf16.mxu1 %v870_v62 }
  0x3b   :  { %511 = vmatpush2.bf16.msra.mxu0 %v871_v0 }
  0x3c   :  { %593 = vmatpush2.bf16.msra.mxu1 %v868_v63  ;;  %512 = vmatprep.subr.bf16.mxu0 %v872_v2 }
  0x3d   :  { %594 = vmatprep.subr.bf16.mxu1 %v876_v3 }
  0x3f   :  { %513 = vmatpush2.bf16.msra.mxu0 %v877_v5 }
  0x40   :  { %595 = vmatpush2.bf16.msra.mxu1 %v874_v4  ;;  %623 = vmatprep.subr.bf16.mxu0 %v886_v7 }
  0x41   :  { %596 = vmatprep.subr.bf16.mxu1 %v883_v6 }
  0x42   :  { %515 = vmatmul.mubr.bf16.vlgmr.msra.gmra.mxu0 %v878_v8 }
  0x43   :  { %624 = vmatpush1.bf16.msra.mxu0 %v884_v11  ;;  %643 = vmatprep.mubr.bf16.mxu0 %v893_v1 }
  0x44   :  { %597 = vmatpush2.bf16.msra.mxu1 %v881_v9  ;;  %625 = vmatprep.subr.bf16.mxu0 %v892_v13 }
  0x45   :  { %598 = vmatprep.subr.bf16.mxu1 %v889_v12 }
  0x47   :  { %626 = vmatpush1.bf16.msra.mxu0 %v890_v15 }
  0x48   :  { %599 = vmatpush2.bf16.msra.mxu1 %v887_v14 }
  0x4a   :  { %770 = vmatmul.mubr.msk.bf16.vlgmr.msra.gmra.mxu0 %vm478_vm0, %v946_v10 }
  0x4b   :  { %601 = vmatmul.mubr.bf16.vlgmr.msra.gmra.mxu1 %v878_v8 }
  0x91   :  { %v96_v17 = vpop.permute.xlu0 %95 }
  0x95   :  { %v101_v21 = vpop.permute.xlu0 %100 }
  0xcb   :  { %v559_v16 = vpop.f32.mrf.mxu1 }
  0xcd   :  { %v561_v18 = vpop.f32.mrf.mxu1 }
  0xcf   :  { %v563_v22 = vpop.f32.mrf.mxu1 }
  0xd1   :  { %v565_v1 = vpop.f32.mrf.mxu1 }
 0x102   :  { %v516_v19 = vpop.f32.mrf.mxu0 }
 0x103   :  { %v517_v20 = vadd.f32 %v516_v19, %v96_v17 }
 0x104   :  { %v518_v23 = vpop.f32.mrf.mxu0 }
 0x105   :  { %v560_v24 = vadd.f32 %v559_v16, %v517_v20  ;;  %v519_v25 = vadd.f32 %v518_v23, %v96_v17 }
 0x106   :  { %v520_v26 = vpop.f32.mrf.mxu0 }
 0x107   :  { %v562_v27 = vadd.f32 %v561_v18, %v519_v25  ;;  %v521_v28 = vadd.f32 %v520_v26, %v101_v21  ;;  %v654_v30 = vmax.f32 %v560_v24, 0.0 }
 0x108   :  { %v522_v29 = vpop.f32.mrf.mxu0 }
 0x109   :  { %v655_v31 = vmax.f32 %v562_v27, 0.0  ;;  %v564_v32 = vadd.f32 %v563_v22, %v521_v28  ;;  %v523_v33 = vadd.f32 %v522_v29, %v101_v21 }
 0x10a   :  { %v645_v34 = vpop.f32.mrf.mxu0 }
 0x10b   :  { %v602_v10 = vpop.f32.mrf.mxu1  ;;  %v775_v35 = vpack.c.bf16 %v655_v31, %v654_v30  ;;  %v566_v36 = vadd.f32 %v565_v1, %v523_v33  ;;  %v658_v40 = vmax.f32 %v564_v32, 0.0 }
 0x10c   :  { %v603_v37 = vadd.f32 %v602_v10, %v96_v17  ;;  %v647_v39 = vpop.f32.mrf.mxu0 }
 0x10d   :  { %v604_v38 = vpop.f32.mrf.mxu1  ;;  %686 = vst [vmem:[%s1169_s3] sm:$0xff] %v775_v35  ;;  %v659_v41 = vmax.f32 %v566_v36, 0.0 }
 0x10e   :  { %v646_v42 = vadd.f32 %v645_v34, %v603_v37  ;;  %v605_v43 = vadd.f32 %v604_v38, %v96_v17  ;;  %v649_v45 = vpop.f32.mrf.mxu0 }
 0x10f   :  { %v606_v44 = vpop.f32.mrf.mxu1  ;;  %v777_v46 = vpack.c.bf16 %v659_v41, %v658_v40 }
 0x110   :  { %v648_v47 = vadd.f32 %v647_v39, %v605_v43  ;;  %v607_v48 = vadd.f32 %v606_v44, %v101_v21  ;;  %v656_v50 = vmax.f32 %v646_v42, 0.0  ;;  %v651_v54 = vpop.f32.mrf.mxu0 }
 0x111   :  { %v608_v49 = vpop.f32.mrf.mxu1  ;;  %688 = vst [vmem:[%s1169_s3 + $0x10] sm:$0xff] %v777_v46 }
 0x112   :  { %v657_v51 = vmax.f32 %v648_v47, 0.0  ;;  %v650_v52 = vadd.f32 %v649_v45, %v607_v48  ;;  %v609_v53 = vadd.f32 %v608_v49, %v101_v21 }
 0x114   :  { %v776_v55 = vpack.c.bf16 %v657_v51, %v656_v50  ;;  %v652_v56 = vadd.f32 %v651_v54, %v609_v53  ;;  %v660_v57 = vmax.f32 %v650_v52, 0.0 }
 0x116   :  { %687 = vst [vmem:[%s1169_s3 + $0x8] sm:$0xff] %v776_v55  ;;  %v661_v58 = vmax.f32 %v652_v56, 0.0 }
 0x118   :  { %v778_v59 = vpack.c.bf16 %v661_v58, %v660_v57 }
 0x11a   :  { %689 = vst [vmem:[%s1169_s3 + $0x18] sm:$0xff] %v778_v59 }

// kernel: _lambda_.37
= control target key start
LH: loop header
LB: loop body
LE: loop exit
PB: predicated region body
PF: predicated region fallthrough
CT: control target
= control target key end

     0   :  { %v1206_v1 = vmov 0   ;;  %vm698_vm0 = vcmask 392192   ;;  %s1595_s0 = inlined_call_operand.vmem [shape: bf16[432,512], index: 0, kind: input, shape index: {}]   ;;  %s1596_s1 = inlined_call_operand.vmem [shape: bf16[16,432], index: 1, kind: input, shape index: {}]   ;;  %s1597_s2 = inlined_call_operand.vmem [shape: f32[16,1], index: 2, kind: input, shape index: {}]   ;;  %s1598_s3 = inlined_call_operand.vmem [shape: bf16[16,512], index: 3, kind: output, shape index: {}]  }
   0x1   :  { %v1038_v0 = vld [vmem:[%s1595_s0 + $0xe4] ss:$16 sps:$4 sm:$0xff]   ;;  %1037 = vset.pattern.permute.xlu0 %v1206_v1  ;;  %v1042_v3 = vld [vmem:[%s1595_s0 + $0xe0] ss:$16 sps:$4 sm:$0xff]   ;;  %v1332_v35 = vld [vmem:[%s1596_s1 + $0xc] ss:$16 sps:$4 sm:$0xff]  }
   0x2   :  { %v1040_v2 = vld [vmem:[%s1595_s0 + $0x2e4] ss:$16 sps:$4 sm:$0xff]   ;;  %702 = vmatprep.subr.bf16.mxu0 %v1038_v0  ;;  %v1043_v4 = vld [vmem:[%s1595_s0 + $0x2e0] ss:$16 sps:$4 sm:$0xff]   ;;  %1026 = vmatprep.mubr.msk.bf16.mxu1 %vm698_vm0, %v1332_v35  ;;  %v1111_v47 = vld [vmem:[%s1595_s0 + $0xec] ss:$16 sps:$4 sm:$0xff]  }
   0x3   :  { %745 = vmatprep.subr.bf16.mxu1 %v1040_v2  ;;  %v1044_v5 = vld [vmem:[%s1595_s0 + $0xc4] ss:$16 sps:$4 sm:$0xff]   ;;  %703 = vmatpush1.bf16.msra.mxu0 %v1042_v3  ;;  %v1048_v7 = vld [vmem:[%s1595_s0 + $0xc0] ss:$16 sps:$4 sm:$0xff]   ;;  %v1375_v48 = vld [vmem:[%s1596_s1 + $0x8] ss:$16 sps:$4 sm:$0xff]  }
   0x4   :  { %746 = vmatpush1.bf16.msra.mxu1 %v1043_v4  ;;  %v1046_v6 = vld [vmem:[%s1595_s0 + $0x2c4] ss:$16 sps:$4 sm:$0xff]   ;;  %704 = vmatprep.subr.bf16.mxu0 %v1044_v5  ;;  %v1049_v8 = vld [vmem:[%s1595_s0 + $0x2c0] ss:$16 sps:$4 sm:$0xff]   ;;  %v1109_v49 = vld [vmem:[%s1595_s0 + $0xe8] ss:$16 sps:$4 sm:$0xff]  }
   0x5   :  { %747 = vmatprep.subr.bf16.mxu1 %v1046_v6  ;;  %v1050_v9 = vld [vmem:[%s1595_s0 + $0xa4] ss:$16 sps:$4 sm:$0xff]   ;;  %v1054_v11 = vld [vmem:[%s1595_s0 + $0xa0] ss:$16 sps:$4 sm:$0xff]   ;;  %v1117_v52 = vld [vmem:[%s1595_s0 + $0xcc] ss:$16 sps:$4 sm:$0xff]  }
   0x6   :  { %v1052_v10 = vld [vmem:[%s1595_s0 + $0x2a4] ss:$16 sps:$4 sm:$0xff]   ;;  %v1055_v12 = vld [vmem:[%s1595_s0 + $0x2a0] ss:$16 sps:$4 sm:$0xff]   ;;  %v1115_v54 = vld [vmem:[%s1595_s0 + $0xc8] ss:$16 sps:$4 sm:$0xff]  }
   0x7   :  { %705 = vmatpush1.bf16.msra.mxu0 %v1048_v7  ;;  %v1056_v13 = vld [vmem:[%s1595_s0 + $0x84] ss:$16 sps:$4 sm:$0xff]   ;;  %v1060_v15 = vld [vmem:[%s1595_s0 + $0x80] ss:$16 sps:$4 sm:$0xff]   ;;  %v1123_v57 = vld [vmem:[%s1595_s0 + $0xac] ss:$16 sps:$4 sm:$0xff]  }
   0x8   :  { %748 = vmatpush1.bf16.msra.mxu1 %v1049_v8  ;;  %706 = vmatprep.subr.bf16.mxu0 %v1050_v9  ;;  %v1058_v14 = vld [vmem:[%s1595_s0 + $0x284] ss:$16 sps:$4 sm:$0xff]   ;;  %v1061_v16 = vld [vmem:[%s1595_s0 + $0x280] ss:$16 sps:$4 sm:$0xff]   ;;  %v1121_v58 = vld [vmem:[%s1595_s0 + $0xa8] ss:$16 sps:$4 sm:$0xff]  }
   0x9   :  { %749 = vmatprep.subr.bf16.mxu1 %v1052_v10  ;;  %v1062_v17 = vld [vmem:[%s1595_s0 + $0x64] ss:$16 sps:$4 sm:$0xff]   ;;  %v1066_v19 = vld [vmem:[%s1595_s0 + $0x60] ss:$16 sps:$4 sm:$0xff]   ;;  %v1129_v61 = vld [vmem:[%s1595_s0 + $0x8c] ss:$16 sps:$4 sm:$0xff]  }
   0xa   :  { %v1064_v18 = vld [vmem:[%s1595_s0 + $0x264] ss:$16 sps:$4 sm:$0xff]   ;;  %v1067_v20 = vld [vmem:[%s1595_s0 + $0x260] ss:$16 sps:$4 sm:$0xff]   ;;  %v1127_v62 = vld [vmem:[%s1595_s0 + $0x88] ss:$16 sps:$4 sm:$0xff]  }
   0xb   :  { %707 = vmatpush1.bf16.msra.mxu0 %v1054_v11  ;;  %v1068_v21 = vld [vmem:[%s1595_s0 + $0x44] ss:$16 sps:$4 sm:$0xff]   ;;  %v1072_v23 = vld [vmem:[%s1595_s0 + $0x40] ss:$16 sps:$4 sm:$0xff]   ;;  %v1135_v1 = vld [vmem:[%s1595_s0 + $0x6c] ss:$16 sps:$4 sm:$0xff]  }
   0xc   :  { %750 = vmatpush1.bf16.msra.mxu1 %v1055_v12  ;;  %708 = vmatprep.subr.bf16.mxu0 %v1056_v13  ;;  %v1070_v22 = vld [vmem:[%s1595_s0 + $0x244] ss:$16 sps:$4 sm:$0xff]   ;;  %v1073_v24 = vld [vmem:[%s1595_s0 + $0x240] ss:$16 sps:$4 sm:$0xff]   ;;  %v1133_v2 = vld [vmem:[%s1595_s0 + $0x68] ss:$16 sps:$4 sm:$0xff]  }
   0xd   :  { %751 = vmatprep.subr.bf16.mxu1 %v1058_v14  ;;  %v1074_v25 = vld [vmem:[%s1595_s0 + $0x24] ss:$16 sps:$4 sm:$0xff]   ;;  %v1078_v27 = vld [vmem:[%s1595_s0 + $0x20] ss:$16 sps:$4 sm:$0xff]   ;;  %v1142_v4 = vld [vmem:[%s1595_s0 + $0x4c] ss:$16 sps:$4 sm:$0xff]  }
   0xe   :  { %v1076_v26 = vld [vmem:[%s1595_s0 + $0x224] ss:$16 sps:$4 sm:$0xff]   ;;  %v1079_v28 = vld [vmem:[%s1595_s0 + $0x220] ss:$16 sps:$4 sm:$0xff]   ;;  %v1145_v5 = vld [vmem:[%s1595_s0 + $0x2ec] ss:$16 sps:$4 sm:$0xff]  }
   0xf   :  { %709 = vmatpush1.bf16.msra.mxu0 %v1060_v15  ;;  %v1080_v29 = vld [vmem:[%s1595_s0 + $0x4] ss:$16 sps:$4 sm:$0xff]   ;;  %v1084_v31 = vld [vmem:[%s1595_s0] ss:$16 sps:$4 sm:$0xff]   ;;  %v1140_v7 = vld [vmem:[%s1595_s0 + $0x48] ss:$16 sps:$4 sm:$0xff]  }
  0x10   :  { %752 = vmatpush1.bf16.msra.mxu1 %v1061_v16  ;;  %710 = vmatprep.subr.bf16.mxu0 %v1062_v17  ;;  %v1082_v30 = vld [vmem:[%s1595_s0 + $0x204] ss:$16 sps:$4 sm:$0xff]   ;;  %v1085_v32 = vld [vmem:[%s1595_s0 + $0x200] ss:$16 sps:$4 sm:$0xff]   ;;  %v1143_v8 = vld [vmem:[%s1595_s0 + $0x2e8] ss:$16 sps:$4 sm:$0xff]  }
  0x11   :  { %753 = vmatprep.subr.bf16.mxu1 %v1064_v18  ;;  %v1086_v33 = vld [vmem:[%s1595_s0 + $0x1e4] ss:$16 sps:$4 sm:$0xff]   ;;  %v1090_v36 = vld [vmem:[%s1595_s0 + $0x1e0] ss:$16 sps:$4 sm:$0xff]   ;;  %v1148_v9 = vld [vmem:[%s1595_s0 + $0x2c] ss:$16 sps:$4 sm:$0xff]  }
  0x12   :  { %v1088_v34 = vld [vmem:[%s1595_s0 + $0x344] ss:$16 sps:$4 sm:$0xff]   ;;  %v1091_v37 = vld [vmem:[%s1595_s0 + $0x340] ss:$16 sps:$4 sm:$0xff]   ;;  %v1151_v10 = vld [vmem:[%s1595_s0 + $0x2cc] ss:$16 sps:$4 sm:$0xff]  }
  0x13   :  { %711 = vmatpush1.bf16.msra.mxu0 %v1066_v19  ;;  %v1092_v38 = vld [vmem:[%s1595_s0 + $0x1c4] ss:$16 sps:$4 sm:$0xff]   ;;  %v1096_v40 = vld [vmem:[%s1595_s0 + $0x1c0] ss:$16 sps:$4 sm:$0xff]   ;;  %v1146_v11 = vld [vmem:[%s1595_s0 + $0x28] ss:$16 sps:$4 sm:$0xff]  }
  0x14   :  { %754 = vmatpush1.bf16.msra.mxu1 %v1067_v20  ;;  %712 = vmatprep.subr.bf16.mxu0 %v1068_v21  ;;  %v1094_v39 = vld [vmem:[%s1595_s0 + $0x324] ss:$16 sps:$4 sm:$0xff]   ;;  %v1097_v41 = vld [vmem:[%s1595_s0 + $0x320] ss:$16 sps:$4 sm:$0xff]   ;;  %v1149_v12 = vld [vmem:[%s1595_s0 + $0x2c8] ss:$16 sps:$4 sm:$0xff]  }
  0x15   :  { %755 = vmatprep.subr.bf16.mxu1 %v1070_v22  ;;  %v1098_v42 = vld [vmem:[%s1595_s0 + $0x1a4] ss:$16 sps:$4 sm:$0xff]   ;;  %v1102_v44 = vld [vmem:[%s1595_s0 + $0x1a0] ss:$16 sps:$4 sm:$0xff]   ;;  %v1154_v13 = vld [vmem:[%s1595_s0 + $0xc] ss:$16 sps:$4 sm:$0xff]  }
  0x16   :  { %v1100_v43 = vld [vmem:[%s1595_s0 + $0x304] ss:$16 sps:$4 sm:$0xff]   ;;  %v1103_v45 = vld [vmem:[%s1595_s0 + $0x300] ss:$16 sps:$4 sm:$0xff]   ;;  %v1157_v14 = vld [vmem:[%s1595_s0 + $0x2ac] ss:$16 sps:$4 sm:$0xff]  }
  0x17   :  { %713 = vmatpush1.bf16.msra.mxu0 %v1072_v23  ;;  %v1107_v46 = vld [vmem:[%s1595_s0 + $0x184] ss:$16 sps:$4 sm:$0xff]   ;;  %v1112_v50 = vld [vmem:[%s1595_s0 + $0x180] ss:$16 sps:$4 sm:$0xff]   ;;  %v1152_v15 = vld [vmem:[%s1595_s0 + $0x8] ss:$16 sps:$4 sm:$0xff]  }
  0x18   :  { %756 = vmatpush1.bf16.msra.mxu1 %v1073_v24  ;;  %714 = vmatprep.subr.bf16.mxu0 %v1074_v25  ;;  %v1113_v51 = vld [vmem:[%s1595_s0 + $0x164] ss:$16 sps:$4 sm:$0xff]   ;;  %v1118_v55 = vld [vmem:[%s1595_s0 + $0x160] ss:$16 sps:$4 sm:$0xff]   ;;  %v1155_v16 = vld [vmem:[%s1595_s0 + $0x2a8] ss:$16 sps:$4 sm:$0xff]  }
  0x19   :  { %757 = vmatprep.subr.bf16.mxu1 %v1076_v26  ;;  %v1139_v53 = vld [vmem:[%s1596_s1 + $0x4] ss:$16 sps:$4 sm:$0xff]   ;;  %v1124_v59 = vld [vmem:[%s1595_s0 + $0x140] ss:$16 sps:$4 sm:$0xff]   ;;  %v1160_v17 = vld [vmem:[%s1595_s0 + $0x1ec] ss:$16 sps:$4 sm:$0xff]  }
  0x1a   :  { %734 = vmatprep.mubr.bf16.mxu0 %v1139_v53  ;;  %v1119_v56 = vld [vmem:[%s1595_s0 + $0x144] ss:$16 sps:$4 sm:$0xff]   ;;  %v1130_v63 = vld [vmem:[%s1595_s0 + $0x120] ss:$16 sps:$4 sm:$0xff]   ;;  %v1163_v18 = vld [vmem:[%s1595_s0 + $0x28c] ss:$16 sps:$4 sm:$0xff]  }
  0x1b   :  { %715 = vmatpush1.bf16.msra.mxu0 %v1078_v27  ;;  %v1125_v60 = vld [vmem:[%s1595_s0 + $0x124] ss:$16 sps:$4 sm:$0xff]   ;;  %v1136_v3 = vld [vmem:[%s1595_s0 + $0x100] ss:$16 sps:$4 sm:$0xff]   ;;  %v1158_v20 = vld [vmem:[%s1595_s0 + $0x1e8] ss:$16 sps:$4 sm:$0xff]  }
  0x1c   :  { %758 = vmatpush1.bf16.msra.mxu1 %v1079_v28  ;;  %716 = vmatprep.subr.bf16.mxu0 %v1080_v29  ;;  %v1131_v0 = vld [vmem:[%s1595_s0 + $0x104] ss:$16 sps:$4 sm:$0xff]   ;;  %v1444_v6 = vld [vmem:[%s1596_s1] ss:$16 sps:$4 sm:$0xff]   ;;  %v1161_v21 = vld [vmem:[%s1595_s0 + $0x288] ss:$16 sps:$4 sm:$0xff]  }
  0x1d   :  { %759 = vmatprep.subr.bf16.mxu1 %v1082_v30  ;;  %v127_v19 = vld [vmem:[%s1597_s2] sm:$0xff]  ;;  %v128_v22 = vld [vmem:[%s1597_s2 + $0x8] sm:$0xff] }
  0x1e   :  { %131 = vperm.xlu0 %1037, %v127_v19   ;;  %v1166_v23 = vld [vmem:[%s1595_s0 + $0x1cc] ss:$16 sps:$4 sm:$0xff]   ;;  %v1164_v25 = vld [vmem:[%s1595_s0 + $0x1c8] ss:$16 sps:$4 sm:$0xff]  }
  0x1f   :  { %717 = vmatpush1.bf16.msra.mxu0 %v1084_v31  ;;  %v1169_v24 = vld [vmem:[%s1595_s0 + $0x26c] ss:$16 sps:$4 sm:$0xff]   ;;  %v1167_v26 = vld [vmem:[%s1595_s0 + $0x268] ss:$16 sps:$4 sm:$0xff]  }
  0x20   :  { %760 = vmatpush1.bf16.msra.mxu1 %v1085_v32  ;;  %718 = vmatprep.subr.bf16.mxu0 %v1086_v33  ;;  %v1172_v27 = vld [vmem:[%s1595_s0 + $0x1ac] ss:$16 sps:$4 sm:$0xff]   ;;  %v1170_v29 = vld [vmem:[%s1595_s0 + $0x1a8] ss:$16 sps:$4 sm:$0xff]  }
  0x21   :  { %771 = vmatprep.subr.bf16.mxu1 %v1088_v34  ;;  %v1175_v28 = vld [vmem:[%s1595_s0 + $0x24c] ss:$16 sps:$4 sm:$0xff]   ;;  %v1173_v30 = vld [vmem:[%s1595_s0 + $0x248] ss:$16 sps:$4 sm:$0xff]  }
  0x22   :  { %136 = vperm.xlu0 %1037, %v128_v22   ;;  %v1178_v31 = vld [vmem:[%s1595_s0 + $0x18c] ss:$16 sps:$4 sm:$0xff]   ;;  %v1176_v33 = vld [vmem:[%s1595_s0 + $0x188] ss:$16 sps:$4 sm:$0xff]  }
  0x23   :  { %719 = vmatpush2.bf16.msra.mxu0 %v1090_v36  ;;  %v1181_v32 = vld [vmem:[%s1595_s0 + $0x22c] ss:$16 sps:$4 sm:$0xff]   ;;  %v1179_v34 = vld [vmem:[%s1595_s0 + $0x228] ss:$16 sps:$4 sm:$0xff]  }
  0x24   :  { %772 = vmatpush2.bf16.msra.mxu1 %v1091_v37  ;;  %720 = vmatprep.subr.bf16.mxu0 %v1092_v38  ;;  %v1187_v36 = vld [vmem:[%s1595_s0 + $0x20c] ss:$16 sps:$4 sm:$0xff]   ;;  %v1182_v37 = vld [vmem:[%s1595_s0 + $0x168] ss:$16 sps:$4 sm:$0xff]  }
  0x25   :  { %773 = vmatprep.subr.bf16.mxu1 %v1094_v39  ;;  %v1185_v38 = vld [vmem:[%s1595_s0 + $0x208] ss:$16 sps:$4 sm:$0xff]   ;;  %v1190_v39 = vld [vmem:[%s1595_s0 + $0x14c] ss:$16 sps:$4 sm:$0xff]  }
  0x27   :  { %721 = vmatpush2.bf16.msra.mxu0 %v1096_v40  ;;  %v1193_v40 = vld [vmem:[%s1595_s0 + $0x34c] ss:$16 sps:$4 sm:$0xff]  }
  0x28   :  { %774 = vmatpush2.bf16.msra.mxu1 %v1097_v41  ;;  %722 = vmatprep.subr.bf16.mxu0 %v1098_v42  ;;  %v1188_v41 = vld [vmem:[%s1595_s0 + $0x148] ss:$16 sps:$4 sm:$0xff]  }
  0x29   :  { %775 = vmatprep.subr.bf16.mxu1 %v1100_v43  ;;  %v1191_v42 = vld [vmem:[%s1595_s0 + $0x348] ss:$16 sps:$4 sm:$0xff]   ;;  %v1196_v43 = vld [vmem:[%s1595_s0 + $0x12c] ss:$16 sps:$4 sm:$0xff]  }
  0x2b   :  { %723 = vmatpush2.bf16.msra.mxu0 %v1102_v44  ;;  %v1199_v44 = vld [vmem:[%s1595_s0 + $0x32c] ss:$16 sps:$4 sm:$0xff]  }
  0x2c   :  { %776 = vmatpush2.bf16.msra.mxu1 %v1103_v45  ;;  %724 = vmatprep.subr.bf16.mxu0 %v1107_v46  ;;  %v1194_v45 = vld [vmem:[%s1595_s0 + $0x128] ss:$16 sps:$4 sm:$0xff]  }
  0x2d   :  { %788 = vmatprep.subr.bf16.mxu1 %v1111_v47  ;;  %v1197_v46 = vld [vmem:[%s1595_s0 + $0x328] ss:$16 sps:$4 sm:$0xff]   ;;  %v1202_v47 = vld [vmem:[%s1595_s0 + $0x10c] ss:$16 sps:$4 sm:$0xff]  }
  0x2f   :  { %778 = vmatmul.mubr.bf16.vlgmr.msra.gmra.mxu1 %v1375_v48  ;;  %725 = vmatpush2.bf16.msra.mxu0 %v1112_v50  ;;  %v1200_v50 = vld [vmem:[%s1595_s0 + $0x108] ss:$16 sps:$4 sm:$0xff]  }
  0x30   :  { %789 = vmatpush1.bf16.msra.mxu1 %v1109_v49  ;;  %726 = vmatprep.subr.bf16.mxu0 %v1113_v51  ;;  %v1205_v49 = vld [vmem:[%s1595_s0 + $0x30c] ss:$16 sps:$4 sm:$0xff]   ;;  %v1203_v51 = vld [vmem:[%s1595_s0 + $0x308] ss:$16 sps:$4 sm:$0xff]  }
  0x31   :  { %790 = vmatprep.subr.bf16.mxu1 %v1117_v52  ;;  %820 = vmatprep.mubr.bf16.mxu1 %v1139_v53 }
  0x33   :  { %727 = vmatpush2.bf16.msra.mxu0 %v1118_v55 }
  0x34   :  { %791 = vmatpush1.bf16.msra.mxu1 %v1115_v54  ;;  %728 = vmatprep.subr.bf16.mxu0 %v1119_v56 }
  0x35   :  { %792 = vmatprep.subr.bf16.mxu1 %v1123_v57 }
  0x37   :  { %729 = vmatpush2.bf16.msra.mxu0 %v1124_v59 }
  0x38   :  { %793 = vmatpush1.bf16.msra.mxu1 %v1121_v58  ;;  %730 = vmatprep.subr.bf16.mxu0 %v1125_v60 }
  0x39   :  { %794 = vmatprep.subr.bf16.mxu1 %v1129_v61 }
  0x3b   :  { %731 = vmatpush2.bf16.msra.mxu0 %v1130_v63 }
  0x3c   :  { %795 = vmatpush1.bf16.msra.mxu1 %v1127_v62  ;;  %732 = vmatprep.subr.bf16.mxu0 %v1131_v0 }
  0x3d   :  { %796 = vmatprep.subr.bf16.mxu1 %v1135_v1 }
  0x3f   :  { %733 = vmatpush2.bf16.msra.mxu0 %v1136_v3 }
  0x40   :  { %797 = vmatpush1.bf16.msra.mxu1 %v1133_v2  ;;  %831 = vmatprep.subr.bf16.mxu0 %v1145_v5 }
  0x41   :  { %798 = vmatprep.subr.bf16.mxu1 %v1142_v4 }
  0x42   :  { %735 = vmatmul.mubr.bf16.vlgmr.msra.gmra.mxu0 %v1444_v6 }
  0x43   :  { %832 = vmatpush1.bf16.msra.mxu0 %v1143_v8  ;;  %1027 = vmatprep.mubr.msk.bf16.mxu0 %vm698_vm0, %v1332_v35  ;;  %v1184_v35 = vld [vmem:[%s1595_s0 + $0x16c] ss:$16 sps:$4 sm:$0xff]  }
  0x44   :  { %799 = vmatpush1.bf16.msra.mxu1 %v1140_v7  ;;  %833 = vmatprep.subr.bf16.mxu0 %v1151_v10 }
  0x45   :  { %800 = vmatprep.subr.bf16.mxu1 %v1148_v9 }
  0x47   :  { %834 = vmatpush1.bf16.msra.mxu0 %v1149_v12 }
  0x48   :  { %801 = vmatpush1.bf16.msra.mxu1 %v1146_v11  ;;  %835 = vmatprep.subr.bf16.mxu0 %v1157_v14 }
  0x49   :  { %802 = vmatprep.subr.bf16.mxu1 %v1154_v13 }
  0x4b   :  { %836 = vmatpush1.bf16.msra.mxu0 %v1155_v16 }
  0x4c   :  { %803 = vmatpush1.bf16.msra.mxu1 %v1152_v15  ;;  %837 = vmatprep.subr.bf16.mxu0 %v1163_v18 }
  0x4d   :  { %804 = vmatprep.subr.bf16.mxu1 %v1160_v17 }
  0x4f   :  { %838 = vmatpush1.bf16.msra.mxu0 %v1161_v21 }
  0x50   :  { %805 = vmatpush2.bf16.msra.mxu1 %v1158_v20  ;;  %839 = vmatprep.subr.bf16.mxu0 %v1169_v24 }
  0x51   :  { %806 = vmatprep.subr.bf16.mxu1 %v1166_v23 }
  0x53   :  { %840 = vmatpush1.bf16.msra.mxu0 %v1167_v26 }
  0x54   :  { %807 = vmatpush2.bf16.msra.mxu1 %v1164_v25  ;;  %841 = vmatprep.subr.bf16.mxu0 %v1175_v28 }
  0x55   :  { %808 = vmatprep.subr.bf16.mxu1 %v1172_v27 }
  0x57   :  { %842 = vmatpush1.bf16.msra.mxu0 %v1173_v30 }
  0x58   :  { %809 = vmatpush2.bf16.msra.mxu1 %v1170_v29  ;;  %843 = vmatprep.subr.bf16.mxu0 %v1181_v32 }
  0x59   :  { %810 = vmatprep.subr.bf16.mxu1 %v1178_v31 }
  0x5b   :  { %844 = vmatpush1.bf16.msra.mxu0 %v1179_v34 }
  0x5c   :  { %811 = vmatpush2.bf16.msra.mxu1 %v1176_v33  ;;  %845 = vmatprep.subr.bf16.mxu0 %v1187_v36 }
  0x5d   :  { %812 = vmatprep.subr.bf16.mxu1 %v1184_v35 }
  0x5f   :  { %846 = vmatpush1.bf16.msra.mxu0 %v1185_v38 }
  0x60   :  { %813 = vmatpush2.bf16.msra.mxu1 %v1182_v37  ;;  %857 = vmatprep.subr.bf16.mxu0 %v1193_v40 }
  0x61   :  { %814 = vmatprep.subr.bf16.mxu1 %v1190_v39 }
  0x63   :  { %858 = vmatpush2.bf16.msra.mxu0 %v1191_v42 }
  0x64   :  { %815 = vmatpush2.bf16.msra.mxu1 %v1188_v41  ;;  %859 = vmatprep.subr.bf16.mxu0 %v1199_v44 }
  0x65   :  { %816 = vmatprep.subr.bf16.mxu1 %v1196_v43 }
  0x67   :  { %860 = vmatpush2.bf16.msra.mxu0 %v1197_v46 }
  0x68   :  { %817 = vmatpush2.bf16.msra.mxu1 %v1194_v45  ;;  %861 = vmatprep.subr.bf16.mxu0 %v1205_v49 }
  0x69   :  { %818 = vmatprep.subr.bf16.mxu1 %v1202_v47 }
  0x6b   :  { %862 = vmatpush2.bf16.msra.mxu0 %v1203_v51 }
  0x6c   :  { %819 = vmatpush2.bf16.msra.mxu1 %v1200_v50 }
  0x6e   :  { %864 = vmatmul.mubr.bf16.vlgmr.msra.gmra.mxu0 %v1375_v48 }
  0x6f   :  { %821 = vmatmul.mubr.bf16.vlgmr.msra.gmra.mxu1 %v1444_v6 }
  0x99   :  { %v132_v53 = vpop.permute.xlu0 %131 }
  0x9d   :  { %v137_v58 = vpop.permute.xlu0 %136 }
  0xef   :  { %v779_v52 = vpop.f32.mrf.mxu1 }
  0xf1   :  { %v781_v54 = vpop.f32.mrf.mxu1 }
  0xf3   :  { %v783_v61 = vpop.f32.mrf.mxu1 }
  0xf5   :  { %v785_v6 = vpop.f32.mrf.mxu1 }
 0x102   :  { %v736_v55 = vpop.f32.mrf.mxu0 }
 0x103   :  { %v737_v56 = vadd.f32 %v736_v55, %v132_v53 }
 0x104   :  { %v738_v57 = vpop.f32.mrf.mxu0 }
 0x105   :  { %v780_v59 = vadd.f32 %v779_v52, %v737_v56  ;;  %v739_v60 = vadd.f32 %v738_v57, %v132_v53 }
 0x106   :  { %v740_v62 = vpop.f32.mrf.mxu0 }
 0x107   :  { %v782_v63 = vadd.f32 %v781_v54, %v739_v60  ;;  %v741_v0 = vadd.f32 %v740_v62, %v137_v58  ;;  %v874_v2 = vmax.f32 %v780_v59, 0.0 }
 0x108   :  { %v742_v1 = vpop.f32.mrf.mxu0 }
 0x109   :  { %v875_v3 = vmax.f32 %v782_v63, 0.0  ;;  %v784_v4 = vadd.f32 %v783_v61, %v741_v0  ;;  %v743_v5 = vadd.f32 %v742_v1, %v137_v58 }
 0x10b   :  { %v1032_v48 = vpack.c.bf16 %v875_v3, %v874_v2  ;;  %v786_v7 = vadd.f32 %v785_v6, %v743_v5  ;;  %v878_v8 = vmax.f32 %v784_v4, 0.0 }
 0x10d   :  { %906 = vst [vmem:[%s1598_s3] sm:$0xff] %v1032_v48  ;;  %v879_v9 = vmax.f32 %v786_v7, 0.0 }
 0x10f   :  { %v1034_v10 = vpack.c.bf16 %v879_v9, %v878_v8 }
 0x111   :  { %908 = vst [vmem:[%s1598_s3 + $0x10] sm:$0xff] %v1034_v10 }
 0x12e   :  { %v865_v12 = vpop.f32.mrf.mxu0 }
 0x12f   :  { %v822_v11 = vpop.f32.mrf.mxu1 }
 0x130   :  { %v823_v13 = vadd.f32 %v822_v11, %v132_v53  ;;  %v867_v15 = vpop.f32.mrf.mxu0 }
 0x131   :  { %v824_v14 = vpop.f32.mrf.mxu1 }
 0x132   :  { %v866_v16 = vadd.f32 %v865_v12, %v823_v13  ;;  %v825_v17 = vadd.f32 %v824_v14, %v132_v53  ;;  %v869_v19 = vpop.f32.mrf.mxu0 }
 0x133   :  { %v826_v18 = vpop.f32.mrf.mxu1 }
 0x134   :  { %v868_v20 = vadd.f32 %v867_v15, %v825_v17  ;;  %v827_v21 = vadd.f32 %v826_v18, %v137_v58  ;;  %v876_v23 = vmax.f32 %v866_v16, 0.0  ;;  %v871_v27 = vpop.f32.mrf.mxu0 }
 0x135   :  { %v828_v22 = vpop.f32.mrf.mxu1 }
 0x136   :  { %v877_v24 = vmax.f32 %v868_v20, 0.0  ;;  %v870_v25 = vadd.f32 %v869_v19, %v827_v21  ;;  %v829_v26 = vadd.f32 %v828_v22, %v137_v58 }
 0x138   :  { %v1033_v28 = vpack.c.bf16 %v877_v24, %v876_v23  ;;  %v872_v29 = vadd.f32 %v871_v27, %v829_v26  ;;  %v880_v30 = vmax.f32 %v870_v25, 0.0 }
 0x13a   :  { %907 = vst [vmem:[%s1598_s3 + $0x8] sm:$0xff] %v1033_v28  ;;  %v881_v31 = vmax.f32 %v872_v29, 0.0 }
 0x13c   :  { %v1035_v32 = vpack.c.bf16 %v881_v31, %v880_v30 }
 0x13e   :  { %909 = vst [vmem:[%s1598_s3 + $0x18] sm:$0xff] %v1035_v32 }

// kernel: _lambda_.38
= control target key start
LH: loop header
LB: loop body
LE: loop exit
PB: predicated region body
PF: predicated region fallthrough
CT: control target
= control target key end

     0   :  { %v355_v1 = vmov 0   ;;  %vm169_vm0 = vcmask 130048   ;;  %s466_s0 = inlined_call_operand.vmem [shape: bf16[144,256], index: 0, kind: input, shape index: {}]   ;;  %s467_s1 = inlined_call_operand.vmem [shape: bf16[32,144], index: 1, kind: input, shape index: {}]   ;;  %s468_s2 = inlined_call_operand.vmem [shape: f32[32,1], index: 2, kind: input, shape index: {}]   ;;  %s469_s3 = inlined_call_operand.vmem [shape: bf16[32,256], index: 3, kind: output, shape index: {}]  }
   0x1   :  { %v322_v0 = vld [vmem:[%s466_s0 + $0x74] ss:$8 sps:$4 sm:$0xff]   ;;  %321 = vset.pattern.permute.xlu1 %v355_v1  ;;  %320 = vset.pattern.permute.xlu0 %v355_v1  ;;  %v324_v2 = vld [vmem:[%s466_s0 + $0x70] ss:$8 sps:$4 sm:$0xff]   ;;  %v325_v3 = vld [vmem:[%s466_s0 + $0x64] ss:$8 sps:$4 sm:$0xff]  }
   0x2   :  { %176 = vmatprep.subr.bf16.mxu0 %v322_v0  ;;  %301 = vmatprep.subr.bf16.mxu1 %v322_v0  ;;  %v327_v4 = vld [vmem:[%s466_s0 + $0x60] ss:$8 sps:$4 sm:$0xff]   ;;  %v328_v5 = vld [vmem:[%s466_s0 + $0x54] ss:$8 sps:$4 sm:$0xff]   ;;  %v330_v6 = vld [vmem:[%s466_s0 + $0x50] ss:$8 sps:$4 sm:$0xff]  }
   0x3   :  { %177 = vmatpush1.bf16.msra.mxu0 %v324_v2  ;;  %310 = vmatpush1.bf16.msra.mxu1 %v324_v2  ;;  %v331_v7 = vld [vmem:[%s466_s0 + $0x44] ss:$8 sps:$4 sm:$0xff]   ;;  %v333_v8 = vld [vmem:[%s466_s0 + $0x40] ss:$8 sps:$4 sm:$0xff]   ;;  %v334_v9 = vld [vmem:[%s466_s0 + $0x34] ss:$8 sps:$4 sm:$0xff]  }
   0x4   :  { %178 = vmatprep.subr.bf16.mxu0 %v325_v3  ;;  %302 = vmatprep.subr.bf16.mxu1 %v325_v3  ;;  %v351_v10 = vld [vmem:[%s467_s1 + $0x4] ss:$8 sps:$4 sm:$0xff]   ;;  %v354_v11 = vld [vmem:[%s467_s1 + $0x14] ss:$8 sps:$4 sm:$0xff]   ;;  %v336_v12 = vld [vmem:[%s466_s0 + $0x30] ss:$8 sps:$4 sm:$0xff]  }
   0x5   :  { %v39_v13 = vld [vmem:[%s468_s2 + $0x10] sm:$0xff]  ;;  %v37_v14 = vld [vmem:[%s468_s2] sm:$0xff]  ;;  %291 = vmatprep.mubr.msk.bf16.mxu0 %vm169_vm0, %v351_v10  ;;  %292 = vmatprep.mubr.msk.bf16.mxu1 %vm169_vm0, %v354_v11  ;;  %v40_v17 = vld [vmem:[%s468_s2 + $0x18] sm:$0xff] }
   0x6   :  { %v337_v15 = vld [vmem:[%s466_s0 + $0x24] ss:$8 sps:$4 sm:$0xff]   ;;  %53 = vperm.xlu1 %321, %v39_v13   ;;  %43 = vperm.xlu0 %320, %v37_v14   ;;  %v339_v16 = vld [vmem:[%s466_s0 + $0x20] ss:$8 sps:$4 sm:$0xff]   ;;  %v340_v19 = vld [vmem:[%s466_s0 + $0x14] ss:$8 sps:$4 sm:$0xff]  }
   0x7   :  { %179 = vmatpush1.bf16.msra.mxu0 %v327_v4  ;;  %311 = vmatpush1.bf16.msra.mxu1 %v327_v4  ;;  %v38_v18 = vld [vmem:[%s468_s2 + $0x8] sm:$0xff]  ;;  %v342_v20 = vld [vmem:[%s466_s0 + $0x10] ss:$8 sps:$4 sm:$0xff]  }
   0x8   :  { %180 = vmatprep.subr.bf16.mxu0 %v328_v5  ;;  %303 = vmatprep.subr.bf16.mxu1 %v328_v5  ;;  %v343_v21 = vld [vmem:[%s466_s0 + $0x4] ss:$8 sps:$4 sm:$0xff]   ;;  %v345_v22 = vld [vmem:[%s466_s0] ss:$8 sps:$4 sm:$0xff]   ;;  %v352_v26 = vld [vmem:[%s467_s1 + $0x10] ss:$8 sps:$4 sm:$0xff]  }
   0x9   :  { %v346_v23 = vld [vmem:[%s466_s0 + $0x84] ss:$8 sps:$4 sm:$0xff]   ;;  %v348_v24 = vld [vmem:[%s466_s0 + $0x80] ss:$8 sps:$4 sm:$0xff]  }
   0xa   :  { %58 = vperm.xlu1 %321, %v40_v17   ;;  %48 = vperm.xlu0 %320, %v38_v18   ;;  %v349_v25 = vld [vmem:[%s467_s1] ss:$8 sps:$4 sm:$0xff]  }
   0xb   :  { %181 = vmatpush1.bf16.msra.mxu0 %v330_v6  ;;  %312 = vmatpush1.bf16.msra.mxu1 %v330_v6 }
   0xc   :  { %182 = vmatprep.subr.bf16.mxu0 %v331_v7  ;;  %304 = vmatprep.subr.bf16.mxu1 %v331_v7 }
   0xf   :  { %183 = vmatpush1.bf16.msra.mxu0 %v333_v8  ;;  %313 = vmatpush1.bf16.msra.mxu1 %v333_v8 }
  0x10   :  { %184 = vmatprep.subr.bf16.mxu0 %v334_v9  ;;  %305 = vmatprep.subr.bf16.mxu1 %v334_v9 }
  0x13   :  { %185 = vmatpush1.bf16.msra.mxu0 %v336_v12  ;;  %314 = vmatpush1.bf16.msra.mxu1 %v336_v12 }
  0x14   :  { %186 = vmatprep.subr.bf16.mxu0 %v337_v15  ;;  %306 = vmatprep.subr.bf16.mxu1 %v337_v15 }
  0x17   :  { %187 = vmatpush1.bf16.msra.mxu0 %v339_v16  ;;  %315 = vmatpush1.bf16.msra.mxu1 %v339_v16 }
  0x18   :  { %188 = vmatprep.subr.bf16.mxu0 %v340_v19  ;;  %307 = vmatprep.subr.bf16.mxu1 %v340_v19 }
  0x1b   :  { %189 = vmatpush1.bf16.msra.mxu0 %v342_v20  ;;  %316 = vmatpush1.bf16.msra.mxu1 %v342_v20 }
  0x1c   :  { %190 = vmatprep.subr.bf16.mxu0 %v343_v21  ;;  %308 = vmatprep.subr.bf16.mxu1 %v343_v21 }
  0x1f   :  { %191 = vmatpush1.bf16.msra.mxu0 %v345_v22  ;;  %317 = vmatpush1.bf16.msra.mxu1 %v345_v22 }
  0x20   :  { %206 = vmatprep.subr.bf16.mxu0 %v346_v23  ;;  %309 = vmatprep.subr.bf16.mxu1 %v346_v23 }
  0x23   :  { %207 = vmatpush2.bf16.msra.mxu0 %v348_v24  ;;  %318 = vmatpush2.bf16.msra.mxu1 %v348_v24 }
  0x26   :  { %209 = vmatmul.mubr.bf16.vlgmr.msra.gmra.mxu0 %v349_v25  ;;  %219 = vmatmul.mubr.bf16.vlgmr.msra.gmra.mxu1 %v352_v26 }
  0x81   :  { %v54_v27 = vpop.permute.xlu1 %53  ;;  %v44_v28 = vpop.permute.xlu0 %43 }
  0x85   :  { %v59_v41 = vpop.permute.xlu1 %58  ;;  %v49_v42 = vpop.permute.xlu0 %48 }
  0xe6   :  { %v210_v29 = vpop.f32.mrf.mxu0  ;;  %v220_v30 = vpop.f32.mrf.mxu1 }
  0xe7   :  { %v211_v31 = vadd.f32 %v210_v29, %v44_v28  ;;  %v221_v32 = vadd.f32 %v220_v30, %v54_v27 }
  0xe8   :  { %v212_v33 = vpop.f32.mrf.mxu0  ;;  %v222_v34 = vpop.f32.mrf.mxu1 }
  0xe9   :  { %v213_v35 = vadd.f32 %v212_v33, %v44_v28  ;;  %v223_v36 = vadd.f32 %v222_v34, %v54_v27  ;;  %v229_v39 = vmax.f32 %v211_v31, 0.0  ;;  %v233_v40 = vmax.f32 %v221_v32, 0.0 }
  0xea   :  { %v214_v37 = vpop.f32.mrf.mxu0  ;;  %v224_v38 = vpop.f32.mrf.mxu1 }
  0xeb   :  { %v230_v43 = vmax.f32 %v213_v35, 0.0  ;;  %v234_v44 = vmax.f32 %v223_v36, 0.0  ;;  %v215_v45 = vadd.f32 %v214_v37, %v49_v42  ;;  %v225_v46 = vadd.f32 %v224_v38, %v59_v41 }
  0xec   :  { %v216_v47 = vpop.f32.mrf.mxu0  ;;  %v226_v48 = vpop.f32.mrf.mxu1 }
  0xed   :  { %v297_v49 = vpack.c.bf16 %v230_v43, %v229_v39  ;;  %v299_v50 = vpack.c.bf16 %v234_v44, %v233_v40  ;;  %v217_v51 = vadd.f32 %v216_v47, %v49_v42  ;;  %v227_v52 = vadd.f32 %v226_v48, %v59_v41 }
  0xee   :  { %v231_v53 = vmax.f32 %v215_v45, 0.0  ;;  %v235_v54 = vmax.f32 %v225_v46, 0.0 }
  0xef   :  { %261 = vst [vmem:[%s469_s3] sm:$0xff] %v297_v49  ;;  %263 = vst [vmem:[%s469_s3 + $0x10] sm:$0xff] %v299_v50  ;;  %v232_v55 = vmax.f32 %v217_v51, 0.0  ;;  %v236_v56 = vmax.f32 %v227_v52, 0.0 }
  0xf1   :  { %v298_v57 = vpack.c.bf16 %v232_v55, %v231_v53  ;;  %v300_v58 = vpack.c.bf16 %v236_v56, %v235_v54 }
  0xf3   :  { %262 = vst [vmem:[%s469_s3 + $0x8] sm:$0xff] %v298_v57  ;;  %264 = vst [vmem:[%s469_s3 + $0x18] sm:$0xff] %v300_v58 }

// kernel: _lambda_.39
= control target key start
LH: loop header
LB: loop body
LE: loop exit
PB: predicated region body
PF: predicated region fallthrough
CT: control target
= control target key end

     0   :  { %v1349_v1 = vmov 0   ;;  %vm773_vm0 = vcmask 785408   ;;  %s1766_s0 = inlined_call_operand.vmem [shape: bf16[864,256], index: 0, kind: input, shape index: {}]   ;;  %s1767_s1 = inlined_call_operand.vmem [shape: bf16[32,864], index: 1, kind: input, shape index: {}]   ;;  %s1768_s2 = inlined_call_operand.vmem [shape: f32[32,1], index: 2, kind: input, shape index: {}]   ;;  %s1769_s3 = inlined_call_operand.vmem [shape: bf16[32,256], index: 3, kind: output, shape index: {}]  }
   0x1   :  { %v1167_v0 = vld [vmem:[%s1766_s0 + $0x74] ss:$8 sps:$4 sm:$0xff]   ;;  %1165 = vset.pattern.permute.xlu0 %v1349_v1  ;;  %1166 = vset.pattern.permute.xlu1 %v1349_v1  ;;  %v1169_v2 = vld [vmem:[%s1766_s0 + $0x70] ss:$8 sps:$4 sm:$0xff]   ;;  %v1173_v5 = vld [vmem:[%s1766_s0 + $0x64] ss:$8 sps:$4 sm:$0xff]  }
   0x2   :  { %780 = vmatprep.subr.bf16.mxu0 %v1167_v0  ;;  %v1170_v3 = vld [vmem:[%s1766_s0 + $0x174] ss:$8 sps:$4 sm:$0xff]   ;;  %v1172_v4 = vld [vmem:[%s1766_s0 + $0x170] ss:$8 sps:$4 sm:$0xff]   ;;  %v1175_v6 = vld [vmem:[%s1766_s0 + $0x60] ss:$8 sps:$4 sm:$0xff]  }
   0x3   :  { %781 = vmatpush1.bf16.msra.mxu0 %v1169_v2  ;;  %833 = vmatprep.subr.bf16.mxu1 %v1170_v3  ;;  %v1176_v7 = vld [vmem:[%s1766_s0 + $0x164] ss:$8 sps:$4 sm:$0xff]   ;;  %v1178_v8 = vld [vmem:[%s1766_s0 + $0x160] ss:$8 sps:$4 sm:$0xff]   ;;  %v1179_v9 = vld [vmem:[%s1766_s0 + $0x54] ss:$8 sps:$4 sm:$0xff]  }
   0x4   :  { %834 = vmatpush1.bf16.msra.mxu1 %v1172_v4  ;;  %782 = vmatprep.subr.bf16.mxu0 %v1173_v5  ;;  %v1181_v10 = vld [vmem:[%s1766_s0 + $0x50] ss:$8 sps:$4 sm:$0xff]   ;;  %v1182_v11 = vld [vmem:[%s1766_s0 + $0x154] ss:$8 sps:$4 sm:$0xff]   ;;  %v1185_v12 = vld [vmem:[%s1766_s0 + $0x44] ss:$8 sps:$4 sm:$0xff]  }
   0x5   :  { %835 = vmatprep.subr.bf16.mxu1 %v1176_v7  ;;  %v1184_v13 = vld [vmem:[%s1766_s0 + $0x150] ss:$8 sps:$4 sm:$0xff]   ;;  %v1188_v14 = vld [vmem:[%s1766_s0 + $0x144] ss:$8 sps:$4 sm:$0xff]   ;;  %v1187_v15 = vld [vmem:[%s1766_s0 + $0x40] ss:$8 sps:$4 sm:$0xff]  }
   0x6   :  { %v1191_v16 = vld [vmem:[%s1766_s0 + $0x34] ss:$8 sps:$4 sm:$0xff]   ;;  %v1190_v17 = vld [vmem:[%s1766_s0 + $0x140] ss:$8 sps:$4 sm:$0xff]   ;;  %v1193_v19 = vld [vmem:[%s1766_s0 + $0x30] ss:$8 sps:$4 sm:$0xff]  }
   0x7   :  { %783 = vmatpush1.bf16.msra.mxu0 %v1175_v6  ;;  %v1194_v18 = vld [vmem:[%s1766_s0 + $0x134] ss:$8 sps:$4 sm:$0xff]   ;;  %v1197_v20 = vld [vmem:[%s1766_s0 + $0x24] ss:$8 sps:$4 sm:$0xff]   ;;  %v1196_v21 = vld [vmem:[%s1766_s0 + $0x130] ss:$8 sps:$4 sm:$0xff]  }
   0x8   :  { %784 = vmatprep.subr.bf16.mxu0 %v1179_v9  ;;  %836 = vmatpush1.bf16.msra.mxu1 %v1178_v8  ;;  %v1200_v22 = vld [vmem:[%s1766_s0 + $0x124] ss:$8 sps:$4 sm:$0xff]   ;;  %v1199_v23 = vld [vmem:[%s1766_s0 + $0x20] ss:$8 sps:$4 sm:$0xff]   ;;  %v1203_v24 = vld [vmem:[%s1766_s0 + $0x14] ss:$8 sps:$4 sm:$0xff]  }
   0x9   :  { %837 = vmatprep.subr.bf16.mxu1 %v1182_v11  ;;  %v1202_v25 = vld [vmem:[%s1766_s0 + $0x120] ss:$8 sps:$4 sm:$0xff]   ;;  %v1206_v26 = vld [vmem:[%s1766_s0 + $0x114] ss:$8 sps:$4 sm:$0xff]   ;;  %v1205_v27 = vld [vmem:[%s1766_s0 + $0x10] ss:$8 sps:$4 sm:$0xff]  }
   0xa   :  { %v1209_v28 = vld [vmem:[%s1766_s0 + $0x4] ss:$8 sps:$4 sm:$0xff]   ;;  %v1208_v29 = vld [vmem:[%s1766_s0 + $0x110] ss:$8 sps:$4 sm:$0xff]   ;;  %v1211_v31 = vld [vmem:[%s1766_s0] ss:$8 sps:$4 sm:$0xff]  }
   0xb   :  { %785 = vmatpush1.bf16.msra.mxu0 %v1181_v10  ;;  %v1212_v30 = vld [vmem:[%s1766_s0 + $0x104] ss:$8 sps:$4 sm:$0xff]   ;;  %v1215_v32 = vld [vmem:[%s1766_s0 + $0xf4] ss:$8 sps:$4 sm:$0xff]   ;;  %v1214_v33 = vld [vmem:[%s1766_s0 + $0x100] ss:$8 sps:$4 sm:$0xff]  }
   0xc   :  { %786 = vmatprep.subr.bf16.mxu0 %v1185_v12  ;;  %838 = vmatpush1.bf16.msra.mxu1 %v1184_v13  ;;  %v1218_v34 = vld [vmem:[%s1766_s0 + $0x1f4] ss:$8 sps:$4 sm:$0xff]   ;;  %v1217_v35 = vld [vmem:[%s1766_s0 + $0xf0] ss:$8 sps:$4 sm:$0xff]   ;;  %v1221_v36 = vld [vmem:[%s1766_s0 + $0xe4] ss:$8 sps:$4 sm:$0xff]  }
   0xd   :  { %839 = vmatprep.subr.bf16.mxu1 %v1188_v14  ;;  %v1220_v37 = vld [vmem:[%s1766_s0 + $0x1f0] ss:$8 sps:$4 sm:$0xff]   ;;  %v1224_v38 = vld [vmem:[%s1766_s0 + $0x1e4] ss:$8 sps:$4 sm:$0xff]   ;;  %v1223_v39 = vld [vmem:[%s1766_s0 + $0xe0] ss:$8 sps:$4 sm:$0xff]  }
   0xe   :  { %v1227_v40 = vld [vmem:[%s1766_s0 + $0xd4] ss:$8 sps:$4 sm:$0xff]   ;;  %v1226_v41 = vld [vmem:[%s1766_s0 + $0x1e0] ss:$8 sps:$4 sm:$0xff]   ;;  %v1229_v43 = vld [vmem:[%s1766_s0 + $0xd0] ss:$8 sps:$4 sm:$0xff]  }
   0xf   :  { %787 = vmatpush1.bf16.msra.mxu0 %v1187_v15  ;;  %v1230_v42 = vld [vmem:[%s1766_s0 + $0x1d4] ss:$8 sps:$4 sm:$0xff]   ;;  %v1233_v44 = vld [vmem:[%s1766_s0 + $0xc4] ss:$8 sps:$4 sm:$0xff]   ;;  %v1232_v45 = vld [vmem:[%s1766_s0 + $0x1d0] ss:$8 sps:$4 sm:$0xff]  }
  0x10   :  { %788 = vmatprep.subr.bf16.mxu0 %v1191_v16  ;;  %840 = vmatpush1.bf16.msra.mxu1 %v1190_v17  ;;  %v1236_v46 = vld [vmem:[%s1766_s0 + $0x1c4] ss:$8 sps:$4 sm:$0xff]   ;;  %v1235_v47 = vld [vmem:[%s1766_s0 + $0xc0] ss:$8 sps:$4 sm:$0xff]   ;;  %v1239_v49 = vld [vmem:[%s1766_s0 + $0xb4] ss:$8 sps:$4 sm:$0xff]  }
  0x11   :  { %841 = vmatprep.subr.bf16.mxu1 %v1194_v18  ;;  %v1264_v48 = vld [vmem:[%s1767_s1 + $0x4] ss:$28 sps:$4 sm:$0xff]   ;;  %v1242_v51 = vld [vmem:[%s1766_s0 + $0x1b4] ss:$8 sps:$4 sm:$0xff]   ;;  %v1271_v52 = vld [vmem:[%s1767_s1 + $0xc] ss:$28 sps:$4 sm:$0xff]  }
  0x12   :  { %v1238_v50 = vld [vmem:[%s1766_s0 + $0x1c0] ss:$8 sps:$4 sm:$0xff]   ;;  %812 = vmatprep.mubr.bf16.mxu0 %v1264_v48  ;;  %v1241_v53 = vld [vmem:[%s1766_s0 + $0xb0] ss:$8 sps:$4 sm:$0xff]   ;;  %v1245_v54 = vld [vmem:[%s1766_s0 + $0xa4] ss:$8 sps:$4 sm:$0xff]   ;;  %865 = vmatprep.mubr.bf16.mxu1 %v1271_v52 }
  0x13   :  { %789 = vmatpush1.bf16.msra.mxu0 %v1193_v19  ;;  %v1244_v55 = vld [vmem:[%s1766_s0 + $0x1b0] ss:$8 sps:$4 sm:$0xff]   ;;  %v1248_v56 = vld [vmem:[%s1766_s0 + $0x1a4] ss:$8 sps:$4 sm:$0xff]   ;;  %v1247_v57 = vld [vmem:[%s1766_s0 + $0xa0] ss:$8 sps:$4 sm:$0xff]  }
  0x14   :  { %790 = vmatprep.subr.bf16.mxu0 %v1197_v20  ;;  %842 = vmatpush1.bf16.msra.mxu1 %v1196_v21  ;;  %v1251_v58 = vld [vmem:[%s1766_s0 + $0x94] ss:$8 sps:$4 sm:$0xff]   ;;  %v1250_v59 = vld [vmem:[%s1766_s0 + $0x1a0] ss:$8 sps:$4 sm:$0xff]   ;;  %v1253_v61 = vld [vmem:[%s1766_s0 + $0x90] ss:$8 sps:$4 sm:$0xff]  }
  0x15   :  { %843 = vmatprep.subr.bf16.mxu1 %v1200_v22  ;;  %v1254_v60 = vld [vmem:[%s1766_s0 + $0x194] ss:$8 sps:$4 sm:$0xff]   ;;  %v1257_v62 = vld [vmem:[%s1766_s0 + $0x84] ss:$8 sps:$4 sm:$0xff]   ;;  %v1256_v63 = vld [vmem:[%s1766_s0 + $0x190] ss:$8 sps:$4 sm:$0xff]  }
  0x16   :  { %v1260_v0 = vld [vmem:[%s1766_s0 + $0x184] ss:$8 sps:$4 sm:$0xff]   ;;  %v1259_v2 = vld [vmem:[%s1766_s0 + $0x80] ss:$8 sps:$4 sm:$0xff]   ;;  %v1268_v3 = vld [vmem:[%s1766_s0 + $0x274] ss:$8 sps:$4 sm:$0xff]  }
  0x17   :  { %791 = vmatpush1.bf16.msra.mxu0 %v1199_v23  ;;  %v1265_v4 = vld [vmem:[%s1766_s0 + $0x180] ss:$8 sps:$4 sm:$0xff]   ;;  %v1301_v6 = vld [vmem:[%s1766_s0 + $0x354] ss:$8 sps:$4 sm:$0xff]   ;;  %v1266_v7 = vld [vmem:[%s1766_s0 + $0x270] ss:$8 sps:$4 sm:$0xff]  }
  0x18   :  { %792 = vmatprep.subr.bf16.mxu0 %v1203_v24  ;;  %844 = vmatpush1.bf16.msra.mxu1 %v1202_v25  ;;  %v1262_v5 = vld [vmem:[%s1767_s1] ss:$28 sps:$4 sm:$0xff]   ;;  %v1269_v8 = vld [vmem:[%s1767_s1 + $0x8] ss:$28 sps:$4 sm:$0xff]   ;;  %v1299_v10 = vld [vmem:[%s1766_s0 + $0x350] ss:$8 sps:$4 sm:$0xff]  }
  0x19   :  { %845 = vmatprep.subr.bf16.mxu1 %v1206_v26  ;;  %v1274_v9 = vld [vmem:[%s1766_s0 + $0x264] ss:$8 sps:$4 sm:$0xff]   ;;  %v1272_v11 = vld [vmem:[%s1766_s0 + $0x260] ss:$8 sps:$4 sm:$0xff]   ;;  %v1277_v13 = vld [vmem:[%s1766_s0 + $0x254] ss:$8 sps:$4 sm:$0xff]  }
  0x1a   :  { %v1307_v12 = vld [vmem:[%s1766_s0 + $0x344] ss:$8 sps:$4 sm:$0xff]   ;;  %v1305_v14 = vld [vmem:[%s1766_s0 + $0x340] ss:$8 sps:$4 sm:$0xff]   ;;  %v1320_v15 = vld [vmem:[%s1767_s1 + $0x3c] ss:$28 sps:$4 sm:$0xff]  }
  0x1b   :  { %793 = vmatpush1.bf16.msra.mxu0 %v1205_v27  ;;  %v1313_v16 = vld [vmem:[%s1766_s0 + $0x334] ss:$8 sps:$4 sm:$0xff]   ;;  %v1323_v18 = vld [vmem:[%s1767_s1 + $0x44] ss:$28 sps:$4 sm:$0xff]   ;;  %v1275_v19 = vld [vmem:[%s1766_s0 + $0x250] ss:$8 sps:$4 sm:$0xff]  }
  0x1c   :  { %794 = vmatprep.subr.bf16.mxu0 %v1209_v28  ;;  %846 = vmatpush1.bf16.msra.mxu1 %v1208_v29  ;;  %v1322_v17 = vld [vmem:[%s1767_s1 + $0x38] ss:$28 sps:$4 sm:$0xff]   ;;  %v1280_v20 = vld [vmem:[%s1766_s0 + $0x244] ss:$8 sps:$4 sm:$0xff]   ;;  %v1325_v21 = vld [vmem:[%s1767_s1 + $0x40] ss:$28 sps:$4 sm:$0xff]  }
  0x1d   :  { %847 = vmatprep.subr.bf16.mxu1 %v1212_v30  ;;  %v1311_v22 = vld [vmem:[%s1766_s0 + $0x330] ss:$8 sps:$4 sm:$0xff]   ;;  %v1319_v23 = vld [vmem:[%s1766_s0 + $0x324] ss:$8 sps:$4 sm:$0xff]   ;;  %v1278_v24 = vld [vmem:[%s1766_s0 + $0x240] ss:$8 sps:$4 sm:$0xff]  }
  0x1e   :  { %v1283_v25 = vld [vmem:[%s1766_s0 + $0x234] ss:$8 sps:$4 sm:$0xff]   ;;  %v1317_v26 = vld [vmem:[%s1766_s0 + $0x320] ss:$8 sps:$4 sm:$0xff]   ;;  %v1281_v28 = vld [vmem:[%s1766_s0 + $0x230] ss:$8 sps:$4 sm:$0xff]  }
  0x1f   :  { %795 = vmatpush1.bf16.msra.mxu0 %v1211_v31  ;;  %v1331_v27 = vld [vmem:[%s1766_s0 + $0x314] ss:$8 sps:$4 sm:$0xff]   ;;  %v1286_v30 = vld [vmem:[%s1766_s0 + $0x224] ss:$8 sps:$4 sm:$0xff]   ;;  %v1296_v48 = vld [vmem:[%s1766_s0 + $0x2e0] ss:$8 sps:$4 sm:$0xff]  }
  0x20   :  { %796 = vmatprep.subr.bf16.mxu0 %v1215_v32  ;;  %848 = vmatpush1.bf16.msra.mxu1 %v1214_v33  ;;  %v1344_v29 = vld [vmem:[%s1767_s1 + $0x14] ss:$28 sps:$4 sm:$0xff]   ;;  %v139_v31 = vld [vmem:[%s1768_s2] sm:$0xff] }
  0x21   :  { %849 = vmatprep.subr.bf16.mxu1 %v1218_v34  ;;  %v1329_v32 = vld [vmem:[%s1766_s0 + $0x310] ss:$8 sps:$4 sm:$0xff]   ;;  %v1337_v33 = vld [vmem:[%s1766_s0 + $0x304] ss:$8 sps:$4 sm:$0xff]   ;;  %145 = vperm.xlu0 %1165, %v139_v31   ;;  %v1316_v52 = vld [vmem:[%s1766_s0 + $0x2b4] ss:$8 sps:$4 sm:$0xff]  }
  0x22   :  { %v141_v34 = vld [vmem:[%s1768_s2 + $0x10] sm:$0xff] }
  0x23   :  { %797 = vmatpush2.bf16.msra.mxu0 %v1217_v35  ;;  %v1284_v35 = vld [vmem:[%s1766_s0 + $0x220] ss:$8 sps:$4 sm:$0xff]   ;;  %155 = vperm.xlu1 %1166, %v141_v34  }
  0x24   :  { %798 = vmatprep.subr.bf16.mxu0 %v1221_v36  ;;  %850 = vmatpush2.bf16.msra.mxu1 %v1220_v37  ;;  %v140_v36 = vld [vmem:[%s1768_s2 + $0x8] sm:$0xff]  ;;  %v1289_v37 = vld [vmem:[%s1766_s0 + $0x214] ss:$8 sps:$4 sm:$0xff]  }
  0x25   :  { %851 = vmatprep.subr.bf16.mxu1 %v1224_v38  ;;  %v142_v38 = vld [vmem:[%s1768_s2 + $0x18] sm:$0xff]  ;;  %150 = vperm.xlu0 %1165, %v140_v36  }
  0x27   :  { %799 = vmatpush2.bf16.msra.mxu0 %v1223_v39  ;;  %v1335_v39 = vld [vmem:[%s1766_s0 + $0x300] ss:$8 sps:$4 sm:$0xff]   ;;  %160 = vperm.xlu1 %1166, %v142_v38  }
  0x28   :  { %800 = vmatprep.subr.bf16.mxu0 %v1227_v40  ;;  %852 = vmatpush2.bf16.msra.mxu1 %v1226_v41  ;;  %v1287_v40 = vld [vmem:[%s1766_s0 + $0x210] ss:$8 sps:$4 sm:$0xff]   ;;  %v1292_v41 = vld [vmem:[%s1766_s0 + $0x204] ss:$8 sps:$4 sm:$0xff]  }
  0x29   :  { %853 = vmatprep.subr.bf16.mxu1 %v1230_v42  ;;  %v1341_v42 = vld [vmem:[%s1767_s1 + $0x18] ss:$28 sps:$4 sm:$0xff]  }
  0x2b   :  { %801 = vmatpush2.bf16.msra.mxu0 %v1229_v43  ;;  %v1290_v43 = vld [vmem:[%s1766_s0 + $0x200] ss:$8 sps:$4 sm:$0xff]  }
  0x2c   :  { %802 = vmatprep.subr.bf16.mxu0 %v1233_v44  ;;  %854 = vmatpush2.bf16.msra.mxu1 %v1232_v45  ;;  %v1295_v44 = vld [vmem:[%s1766_s0 + $0x2f4] ss:$8 sps:$4 sm:$0xff]   ;;  %v1293_v45 = vld [vmem:[%s1766_s0 + $0x2f0] ss:$8 sps:$4 sm:$0xff]  }
  0x2d   :  { %855 = vmatprep.subr.bf16.mxu1 %v1236_v46  ;;  %v1298_v46 = vld [vmem:[%s1766_s0 + $0x2e4] ss:$8 sps:$4 sm:$0xff]  }
  0x2f   :  { %803 = vmatpush2.bf16.msra.mxu0 %v1235_v47  ;;  %v1345_v47 = vld [vmem:[%s1767_s1 + $0x50] ss:$28 sps:$4 sm:$0xff]  }
  0x30   :  { %804 = vmatprep.subr.bf16.mxu0 %v1239_v49  ;;  %856 = vmatpush2.bf16.msra.mxu1 %v1238_v50  ;;  %v1302_v49 = vld [vmem:[%s1766_s0 + $0x2d0] ss:$8 sps:$4 sm:$0xff]   ;;  %v1310_v50 = vld [vmem:[%s1766_s0 + $0x2c4] ss:$8 sps:$4 sm:$0xff]  }
  0x31   :  { %857 = vmatprep.subr.bf16.mxu1 %v1242_v51  ;;  %v1308_v51 = vld [vmem:[%s1766_s0 + $0x2c0] ss:$8 sps:$4 sm:$0xff]  }
  0x33   :  { %805 = vmatpush2.bf16.msra.mxu0 %v1241_v53  ;;  %v1314_v53 = vld [vmem:[%s1766_s0 + $0x2b0] ss:$8 sps:$4 sm:$0xff]  }
  0x34   :  { %806 = vmatprep.subr.bf16.mxu0 %v1245_v54  ;;  %858 = vmatpush2.bf16.msra.mxu1 %v1244_v55  ;;  %v1328_v54 = vld [vmem:[%s1766_s0 + $0x2a4] ss:$8 sps:$4 sm:$0xff]   ;;  %v1326_v55 = vld [vmem:[%s1766_s0 + $0x2a0] ss:$8 sps:$4 sm:$0xff]  }
  0x35   :  { %859 = vmatprep.subr.bf16.mxu1 %v1248_v56  ;;  %v1334_v56 = vld [vmem:[%s1766_s0 + $0x294] ss:$8 sps:$4 sm:$0xff]  }
  0x37   :  { %807 = vmatpush2.bf16.msra.mxu0 %v1247_v57  ;;  %v1332_v57 = vld [vmem:[%s1766_s0 + $0x290] ss:$8 sps:$4 sm:$0xff]  }
  0x38   :  { %808 = vmatprep.subr.bf16.mxu0 %v1251_v58  ;;  %860 = vmatpush2.bf16.msra.mxu1 %v1250_v59  ;;  %v1340_v58 = vld [vmem:[%s1766_s0 + $0x284] ss:$8 sps:$4 sm:$0xff]   ;;  %v1338_v59 = vld [vmem:[%s1766_s0 + $0x280] ss:$8 sps:$4 sm:$0xff]  }
  0x39   :  { %861 = vmatprep.subr.bf16.mxu1 %v1254_v60  ;;  %v1342_v60 = vld [vmem:[%s1767_s1 + $0x10] ss:$28 sps:$4 sm:$0xff]  }
  0x3b   :  { %809 = vmatpush2.bf16.msra.mxu0 %v1253_v61  ;;  %v1346_v61 = vld [vmem:[%s1767_s1 + $0x4c] ss:$28 sps:$4 sm:$0xff]  }
  0x3c   :  { %810 = vmatprep.subr.bf16.mxu0 %v1257_v62  ;;  %862 = vmatpush2.bf16.msra.mxu1 %v1256_v63  ;;  %v1348_v62 = vld [vmem:[%s1767_s1 + $0x48] ss:$28 sps:$4 sm:$0xff]  }
  0x3d   :  { %863 = vmatprep.subr.bf16.mxu1 %v1260_v0 }
  0x3f   :  { %811 = vmatpush2.bf16.msra.mxu0 %v1259_v2 }
  0x40   :  { %886 = vmatprep.subr.bf16.mxu0 %v1268_v3  ;;  %864 = vmatpush2.bf16.msra.mxu1 %v1265_v4 }
  0x41   :  { %943 = vmatprep.subr.bf16.mxu1 %v1301_v6 }
  0x42   :  { %813 = vmatmul.mubr.bf16.vlgmr.msra.gmra.mxu0 %v1262_v5 }
  0x43   :  { %887 = vmatpush1.bf16.msra.mxu0 %v1266_v7  ;;  %866 = vmatmul.mubr.bf16.vlgmr.msra.gmra.mxu1 %v1269_v8 }
  0x44   :  { %888 = vmatprep.subr.bf16.mxu0 %v1274_v9  ;;  %944 = vmatpush1.bf16.msra.mxu1 %v1299_v10 }
  0x45   :  { %945 = vmatprep.subr.bf16.mxu1 %v1307_v12  ;;  %822 = vmatprep.mubr.bf16.mxu0 %v1320_v15 }
  0x46   :  { %875 = vmatprep.mubr.bf16.mxu1 %v1323_v18 }
  0x47   :  { %889 = vmatpush1.bf16.msra.mxu0 %v1272_v11 }
  0x48   :  { %890 = vmatprep.subr.bf16.mxu0 %v1277_v13  ;;  %946 = vmatpush1.bf16.msra.mxu1 %v1305_v14 }
  0x49   :  { %947 = vmatprep.subr.bf16.mxu1 %v1313_v16 }
  0x4a   :  { %823 = vmatmul.mubr.bf16.gmra.mxu0 %v1322_v17 }
  0x4b   :  { %891 = vmatpush1.bf16.msra.mxu0 %v1275_v19  ;;  %876 = vmatmul.mubr.bf16.gmra.mxu1 %v1325_v21 }
  0x4c   :  { %892 = vmatprep.subr.bf16.mxu0 %v1280_v20  ;;  %948 = vmatpush1.bf16.msra.mxu1 %v1311_v22 }
  0x4d   :  { %971 = vmatprep.mubr.bf16.mxu1 %v1349_v1  ;;  %949 = vmatprep.subr.bf16.mxu1 %v1319_v23 }
  0x4e   :  { %918 = vmatprep.mubr.bf16.mxu0 %v1344_v29 }
  0x4f   :  { %893 = vmatpush1.bf16.msra.mxu0 %v1278_v24 }
  0x50   :  { %894 = vmatprep.subr.bf16.mxu0 %v1283_v25  ;;  %950 = vmatpush1.bf16.msra.mxu1 %v1317_v26 }
  0x51   :  { %951 = vmatprep.subr.bf16.mxu1 %v1331_v27 }
  0x53   :  { %895 = vmatpush1.bf16.msra.mxu0 %v1281_v28 }
  0x54   :  { %896 = vmatprep.subr.bf16.mxu0 %v1286_v30  ;;  %952 = vmatpush1.bf16.msra.mxu1 %v1329_v32 }
  0x55   :  { %953 = vmatprep.subr.bf16.mxu1 %v1337_v33 }
  0x57   :  { %897 = vmatpush1.bf16.msra.mxu0 %v1284_v35 }
  0x58   :  { %898 = vmatprep.subr.bf16.mxu0 %v1289_v37  ;;  %954 = vmatpush1.bf16.msra.mxu1 %v1335_v39 }
  0x5b   :  { %899 = vmatpush1.bf16.msra.mxu0 %v1287_v40  ;;  %1154 = vmatmul.mubr.msk.bf16.vlgmr.msra.gmra.mxu1 %vm773_vm0, %v1341_v42 }
  0x5c   :  { %900 = vmatprep.subr.bf16.mxu0 %v1292_v41  ;;  %981 = vmatprep.mubr.bf16.mxu1 %v1349_v1  ;;  %v1304_v1 = vld [vmem:[%s1766_s0 + $0x2d4] ss:$8 sps:$4 sm:$0xff]  }
  0x5f   :  { %901 = vmatpush1.bf16.msra.mxu0 %v1290_v43 }
  0x60   :  { %902 = vmatprep.subr.bf16.mxu0 %v1295_v44 }
  0x63   :  { %903 = vmatpush2.bf16.msra.mxu0 %v1293_v45  ;;  %1155 = vmatmul.mubr.msk.bf16.gmra.mxu1 %vm773_vm0, %v1345_v47 }
  0x64   :  { %904 = vmatprep.subr.bf16.mxu0 %v1298_v46 }
  0x67   :  { %905 = vmatpush2.bf16.msra.mxu0 %v1296_v48 }
  0x68   :  { %906 = vmatprep.subr.bf16.mxu0 %v1304_v1 }
  0x6b   :  { %907 = vmatpush2.bf16.msra.mxu0 %v1302_v49 }
  0x6c   :  { %908 = vmatprep.subr.bf16.mxu0 %v1310_v50 }
  0x6f   :  { %909 = vmatpush2.bf16.msra.mxu0 %v1308_v51 }
  0x70   :  { %910 = vmatprep.subr.bf16.mxu0 %v1316_v52 }
  0x73   :  { %911 = vmatpush2.bf16.msra.mxu0 %v1314_v53 }
  0x74   :  { %912 = vmatprep.subr.bf16.mxu0 %v1328_v54 }
  0x77   :  { %913 = vmatpush2.bf16.msra.mxu0 %v1326_v55 }
  0x78   :  { %914 = vmatprep.subr.bf16.mxu0 %v1334_v56 }
  0x7b   :  { %915 = vmatpush2.bf16.msra.mxu0 %v1332_v57 }
  0x7c   :  { %916 = vmatprep.subr.bf16.mxu0 %v1340_v58 }
  0x7f   :  { %917 = vmatpush2.bf16.msra.mxu0 %v1338_v59 }
  0x82   :  { %919 = vmatmul.mubr.bf16.vlgmr.msra.gmra.mxu0 %v1342_v60 }
  0x83   :  { %928 = vmatprep.mubr.bf16.mxu0 %v1346_v61 }
  0x8a   :  { %929 = vmatmul.mubr.bf16.gmra.mxu0 %v1348_v62 }
  0x9c   :  { %v146_v14 = vpop.permute.xlu0 %145 }
  0x9e   :  { %v156_v22 = vpop.permute.xlu1 %155 }
  0xa0   :  { %v151_v19 = vpop.permute.xlu0 %150 }
  0xa2   :  { %v161_v34 = vpop.permute.xlu1 %160 }
 0x102   :  { %v814_v4 = vpop.f32.mrf.mxu0 }
 0x103   :  { %v867_v63 = vpop.f32.mrf.mxu1  ;;  %v815_v18 = vadd.f32 %v814_v4, %v146_v14 }
 0x104   :  { %v816_v6 = vpop.f32.mrf.mxu0 }
 0x105   :  { %v869_v0 = vpop.f32.mrf.mxu1  ;;  %v817_v21 = vadd.f32 %v816_v6, %v146_v14  ;;  %v868_v24 = vadd.f32 %v867_v63, %v815_v18 }
 0x106   :  { %v818_v8 = vpop.f32.mrf.mxu0 }
 0x107   :  { %v871_v2 = vpop.f32.mrf.mxu1  ;;  %v819_v25 = vadd.f32 %v818_v8, %v151_v19  ;;  %v870_v28 = vadd.f32 %v869_v0, %v817_v21 }
 0x108   :  { %v820_v10 = vpop.f32.mrf.mxu0 }
 0x109   :  { %v873_v3 = vpop.f32.mrf.mxu1  ;;  %v821_v29 = vadd.f32 %v820_v10, %v151_v19  ;;  %v872_v33 = vadd.f32 %v871_v2, %v819_v25 }
 0x10a   :  { %v824_v12 = vpop.f32.mrf.mxu0 }
 0x10b   :  { %v877_v5 = vpop.f32.mrf.mxu1  ;;  %v825_v31 = vadd.f32 %v824_v12, %v156_v22  ;;  %v874_v40 = vadd.f32 %v873_v3, %v821_v29 }
 0x10c   :  { %v826_v15 = vpop.f32.mrf.mxu0 }
 0x10d   :  { %v879_v7 = vpop.f32.mrf.mxu1  ;;  %v827_v37 = vadd.f32 %v826_v15, %v156_v22  ;;  %v878_v43 = vadd.f32 %v877_v5, %v825_v31 }
 0x10e   :  { %v828_v17 = vpop.f32.mrf.mxu0 }
 0x10f   :  { %v881_v9 = vpop.f32.mrf.mxu1  ;;  %v829_v44 = vadd.f32 %v828_v17, %v161_v34  ;;  %v880_v49 = vadd.f32 %v879_v7, %v827_v37 }
 0x110   :  { %v830_v23 = vpop.f32.mrf.mxu0 }
 0x111   :  { %v883_v11 = vpop.f32.mrf.mxu1  ;;  %v831_v52 = vadd.f32 %v830_v23, %v161_v34  ;;  %v882_v56 = vadd.f32 %v881_v9, %v829_v44 }
 0x113   :  { %v884_v0 = vadd.f32 %v883_v11, %v831_v52 }
 0x11b   :  { %v973_v13 = vpop.f32.mrf.mxu1 }
 0x11d   :  { %v975_v16 = vpop.f32.mrf.mxu1 }
 0x11f   :  { %v977_v20 = vpop.f32.mrf.mxu1 }
 0x121   :  { %v979_v27 = vpop.f32.mrf.mxu1 }
 0x123   :  { %v983_v39 = vpop.f32.mrf.mxu1 }
 0x125   :  { %v985_v50 = vpop.f32.mrf.mxu1 }
 0x127   :  { %v987_v62 = vpop.f32.mrf.mxu1 }
 0x129   :  { %v989_v10 = vpop.f32.mrf.mxu1 }
 0x142   :  { %v920_v26 = vpop.f32.mrf.mxu0 }
 0x143   :  { %v921_v30 = vadd.f32 %v920_v26, %v868_v24 }
 0x144   :  { %v922_v32 = vpop.f32.mrf.mxu0 }
 0x145   :  { %v974_v35 = vadd.f32 %v973_v13, %v921_v30  ;;  %v923_v36 = vadd.f32 %v922_v32, %v870_v28 }
 0x146   :  { %v924_v38 = vpop.f32.mrf.mxu0 }
 0x147   :  { %v976_v41 = vadd.f32 %v975_v16, %v923_v36  ;;  %v925_v42 = vadd.f32 %v924_v38, %v872_v33  ;;  %v992_v46 = vmax.f32 %v974_v35, 0.0 }
 0x148   :  { %v926_v45 = vpop.f32.mrf.mxu0 }
 0x149   :  { %v993_v47 = vmax.f32 %v976_v41, 0.0  ;;  %v978_v48 = vadd.f32 %v977_v20, %v925_v42  ;;  %v927_v1 = vadd.f32 %v926_v45, %v874_v40 }
 0x14a   :  { %v930_v51 = vpop.f32.mrf.mxu0 }
 0x14b   :  { %v1160_v53 = vpack.c.bf16 %v993_v47, %v992_v46  ;;  %v980_v54 = vadd.f32 %v979_v27, %v927_v1  ;;  %v931_v55 = vadd.f32 %v930_v51, %v878_v43  ;;  %v994_v58 = vmax.f32 %v978_v48, 0.0 }
 0x14c   :  { %v932_v57 = vpop.f32.mrf.mxu0 }
 0x14d   :  { %1024 = vst [vmem:[%s1769_s3] sm:$0xff] %v1160_v53  ;;  %v995_v59 = vmax.f32 %v980_v54, 0.0  ;;  %v984_v60 = vadd.f32 %v983_v39, %v931_v55  ;;  %v933_v61 = vadd.f32 %v932_v57, %v880_v49 }
 0x14e   :  { %v934_v63 = vpop.f32.mrf.mxu0 }
 0x14f   :  { %v1161_v2 = vpack.c.bf16 %v995_v59, %v994_v58  ;;  %v986_v3 = vadd.f32 %v985_v50, %v933_v61  ;;  %v935_v4 = vadd.f32 %v934_v63, %v882_v56  ;;  %v996_v6 = vmax.f32 %v984_v60, 0.0 }
 0x150   :  { %v936_v5 = vpop.f32.mrf.mxu0 }
 0x151   :  { %1025 = vst [vmem:[%s1769_s3 + $0x8] sm:$0xff] %v1161_v2  ;;  %v997_v7 = vmax.f32 %v986_v3, 0.0  ;;  %v988_v8 = vadd.f32 %v987_v62, %v935_v4  ;;  %v937_v9 = vadd.f32 %v936_v5, %v884_v0 }
 0x153   :  { %v1162_v12 = vpack.c.bf16 %v997_v7, %v996_v6  ;;  %v990_v13 = vadd.f32 %v989_v10, %v937_v9  ;;  %v998_v11 = vmax.f32 %v988_v8, 0.0 }
 0x155   :  { %1026 = vst [vmem:[%s1769_s3 + $0x10] sm:$0xff] %v1162_v12  ;;  %v999_v14 = vmax.f32 %v990_v13, 0.0 }
 0x157   :  { %v1163_v15 = vpack.c.bf16 %v999_v14, %v998_v11 }
 0x159   :  { %1027 = vst [vmem:[%s1769_s3 + $0x18] sm:$0xff] %v1163_v15 }

// kernel: _lambda_.40
= control target key start
LH: loop header
LB: loop body
LE: loop exit
PB: predicated region body
PF: predicated region fallthrough
CT: control target
= control target key end

     0   :  { %v731_v1 = vmov 0   ;;  %vm355_vm0 = vcmask 261120   ;;  %s954_s0 = inlined_call_operand.vmem [shape: bf16[288,256], index: 0, kind: input, shape index: {}]   ;;  %s955_s1 = inlined_call_operand.vmem [shape: bf16[64,288], index: 1, kind: input, shape index: {}]   ;;  %s956_s2 = inlined_call_operand.vmem [shape: f32[64,1], index: 2, kind: input, shape index: {}]   ;;  %s957_s3 = inlined_call_operand.vmem [shape: bf16[64,256], index: 3, kind: output, shape index: {}]  }
   0x1   :  { %v661_v0 = vld [vmem:[%s954_s0 + $0x74] ss:$8 sps:$4 sm:$0xff]   ;;  %473 = vmatprep.mubr.bf16.mxu1 %v731_v1  ;;  %659 = vset.pattern.permute.xlu0 %v731_v1  ;;  %v663_v2 = vld [vmem:[%s954_s0 + $0x70] ss:$8 sps:$4 sm:$0xff]   ;;  %v664_v3 = vld [vmem:[%s954_s0 + $0x64] ss:$8 sps:$4 sm:$0xff]  }
   0x2   :  { %660 = vset.pattern.permute.xlu1 %v731_v1  ;;  %368 = vmatprep.subr.bf16.mxu0 %v661_v0  ;;  %v666_v4 = vld [vmem:[%s954_s0 + $0x60] ss:$8 sps:$4 sm:$0xff]   ;;  %v667_v5 = vld [vmem:[%s954_s0 + $0x54] ss:$8 sps:$4 sm:$0xff]   ;;  %v669_v6 = vld [vmem:[%s954_s0 + $0x50] ss:$8 sps:$4 sm:$0xff]  }
   0x3   :  { %369 = vmatpush1.bf16.msra.mxu0 %v663_v2  ;;  %v670_v7 = vld [vmem:[%s954_s0 + $0x44] ss:$8 sps:$4 sm:$0xff]   ;;  %v672_v8 = vld [vmem:[%s954_s0 + $0x40] ss:$8 sps:$4 sm:$0xff]   ;;  %v673_v9 = vld [vmem:[%s954_s0 + $0x34] ss:$8 sps:$4 sm:$0xff]  }
   0x4   :  { %370 = vmatprep.subr.bf16.mxu0 %v664_v3  ;;  %v675_v10 = vld [vmem:[%s954_s0 + $0x30] ss:$8 sps:$4 sm:$0xff]   ;;  %v676_v11 = vld [vmem:[%s954_s0 + $0x24] ss:$8 sps:$4 sm:$0xff]   ;;  %v678_v12 = vld [vmem:[%s954_s0 + $0x20] ss:$8 sps:$4 sm:$0xff]  }
   0x5   :  { %v702_v13 = vld [vmem:[%s954_s0 + $0x114] ss:$8 sps:$4 sm:$0xff]   ;;  %v705_v14 = vld [vmem:[%s954_s0 + $0x110] ss:$8 sps:$4 sm:$0xff]   ;;  %v708_v16 = vld [vmem:[%s954_s0 + $0x104] ss:$8 sps:$4 sm:$0xff]  }
   0x6   :  { %v679_v15 = vld [vmem:[%s954_s0 + $0x14] ss:$8 sps:$4 sm:$0xff]   ;;  %453 = vmatprep.subr.bf16.mxu1 %v702_v13  ;;  %v711_v17 = vld [vmem:[%s954_s0 + $0x100] ss:$8 sps:$4 sm:$0xff]   ;;  %v681_v18 = vld [vmem:[%s954_s0 + $0x10] ss:$8 sps:$4 sm:$0xff]  }
   0x7   :  { %371 = vmatpush1.bf16.msra.mxu0 %v666_v4  ;;  %454 = vmatpush1.bf16.msra.mxu1 %v705_v14  ;;  %v682_v19 = vld [vmem:[%s954_s0 + $0x4] ss:$8 sps:$4 sm:$0xff]   ;;  %v714_v20 = vld [vmem:[%s955_s1 + $0x8] ss:$12 sps:$4 sm:$0xff]   ;;  %v687_v24 = vld [vmem:[%s954_s0 + $0xf0] ss:$8 sps:$4 sm:$0xff]  }
   0x8   :  { %372 = vmatprep.subr.bf16.mxu0 %v667_v5  ;;  %455 = vmatprep.subr.bf16.mxu1 %v708_v16  ;;  %v718_v21 = vld [vmem:[%s955_s1 + $0x4] ss:$12 sps:$4 sm:$0xff]   ;;  %v684_v22 = vld [vmem:[%s954_s0] ss:$8 sps:$4 sm:$0xff]   ;;  %v685_v23 = vld [vmem:[%s954_s0 + $0xf4] ss:$8 sps:$4 sm:$0xff]  }
   0x9   :  { %400 = vmatprep.mubr.bf16.mxu0 %v718_v21  ;;  %v688_v25 = vld [vmem:[%s954_s0 + $0xe4] ss:$8 sps:$4 sm:$0xff]   ;;  %v69_v28 = vld [vmem:[%s956_s2 + $0x10] sm:$0xff]  ;;  %v690_v29 = vld [vmem:[%s954_s0 + $0xe0] ss:$8 sps:$4 sm:$0xff]  }
   0xa   :  { %v719_v26 = vld [vmem:[%s955_s1 + $0x20] ss:$12 sps:$4 sm:$0xff]   ;;  %87 = vperm.xlu1 %660, %v69_v28   ;;  %v691_v31 = vld [vmem:[%s954_s0 + $0xd4] ss:$8 sps:$4 sm:$0xff]   ;;  %v693_v33 = vld [vmem:[%s954_s0 + $0xd0] ss:$8 sps:$4 sm:$0xff]  }
   0xb   :  { %373 = vmatpush1.bf16.msra.mxu0 %v669_v6  ;;  %456 = vmatpush1.bf16.msra.mxu1 %v711_v17  ;;  %v67_v27 = vld [vmem:[%s956_s2] sm:$0xff]  ;;  %v68_v30 = vld [vmem:[%s956_s2 + $0x8] sm:$0xff]  ;;  %v70_v32 = vld [vmem:[%s956_s2 + $0x18] sm:$0xff] }
   0xc   :  { %374 = vmatprep.subr.bf16.mxu0 %v670_v7  ;;  %77 = vperm.xlu0 %659, %v67_v27   ;;  %v71_v34 = vld [vmem:[%s956_s2 + $0x20] sm:$0xff]  ;;  %v72_v36 = vld [vmem:[%s956_s2 + $0x28] sm:$0xff]  ;;  %v73_v39 = vld [vmem:[%s956_s2 + $0x30] sm:$0xff] }
   0xd   :  { %v694_v35 = vld [vmem:[%s954_s0 + $0xc4] ss:$8 sps:$4 sm:$0xff]   ;;  %v696_v38 = vld [vmem:[%s954_s0 + $0xc0] ss:$8 sps:$4 sm:$0xff]   ;;  %v697_v40 = vld [vmem:[%s954_s0 + $0xb4] ss:$8 sps:$4 sm:$0xff]  }
   0xe   :  { %638 = vmatmul.mubr.msk.bf16.vlgmr.msra.gmra.mxu1 %vm355_vm0, %v714_v20  ;;  %92 = vperm.xlu1 %660, %v70_v32   ;;  %v723_v37 = vld [vmem:[%s955_s1 + $0x38] ss:$12 sps:$4 sm:$0xff]   ;;  %v727_v44 = vld [vmem:[%s955_s1 + $0x50] ss:$12 sps:$4 sm:$0xff]   ;;  %v704_v45 = vld [vmem:[%s954_s0 + $0xa0] ss:$8 sps:$4 sm:$0xff]  }
   0xf   :  { %375 = vmatpush1.bf16.msra.mxu0 %v672_v8  ;;  %483 = vmatprep.mubr.bf16.mxu1 %v731_v1  ;;  %v74_v41 = vld [vmem:[%s956_s2 + $0x38] sm:$0xff]  ;;  %v700_v43 = vld [vmem:[%s954_s0 + $0xa4] ss:$8 sps:$4 sm:$0xff]   ;;  %v715_v49 = vld [vmem:[%s954_s0 + $0x80] ss:$8 sps:$4 sm:$0xff]  }
  0x10   :  { %376 = vmatprep.subr.bf16.mxu0 %v673_v9  ;;  %82 = vperm.xlu0 %659, %v68_v30   ;;  %v699_v42 = vld [vmem:[%s954_s0 + $0xb0] ss:$8 sps:$4 sm:$0xff]   ;;  %v706_v46 = vld [vmem:[%s954_s0 + $0x94] ss:$8 sps:$4 sm:$0xff]   ;;  %v712_v48 = vld [vmem:[%s954_s0 + $0x84] ss:$8 sps:$4 sm:$0xff]  }
  0x11   :  { %v710_v47 = vld [vmem:[%s954_s0 + $0x90] ss:$8 sps:$4 sm:$0xff]   ;;  %v716_v50 = vld [vmem:[%s955_s1] ss:$12 sps:$4 sm:$0xff]   ;;  %v720_v51 = vld [vmem:[%s955_s1 + $0x1c] ss:$12 sps:$4 sm:$0xff]  }
  0x12   :  { %102 = vperm.xlu1 %660, %v72_v36   ;;  %v722_v52 = vld [vmem:[%s955_s1 + $0x18] ss:$12 sps:$4 sm:$0xff]   ;;  %v724_v53 = vld [vmem:[%s955_s1 + $0x34] ss:$12 sps:$4 sm:$0xff]   ;;  %v726_v54 = vld [vmem:[%s955_s1 + $0x30] ss:$12 sps:$4 sm:$0xff]  }
  0x13   :  { %377 = vmatpush1.bf16.msra.mxu0 %v675_v10  ;;  %v728_v55 = vld [vmem:[%s955_s1 + $0x4c] ss:$12 sps:$4 sm:$0xff]   ;;  %v730_v56 = vld [vmem:[%s955_s1 + $0x48] ss:$12 sps:$4 sm:$0xff]  }
  0x14   :  { %378 = vmatprep.subr.bf16.mxu0 %v676_v11  ;;  %97 = vperm.xlu0 %659, %v71_v34  }
  0x16   :  { %639 = vmatmul.mubr.msk.bf16.gmra.mxu1 %vm355_vm0, %v719_v26  ;;  %112 = vperm.xlu1 %660, %v74_v41  }
  0x17   :  { %379 = vmatpush1.bf16.msra.mxu0 %v678_v12  ;;  %493 = vmatprep.mubr.bf16.mxu1 %v731_v1 }
  0x18   :  { %380 = vmatprep.subr.bf16.mxu0 %v679_v15  ;;  %107 = vperm.xlu0 %659, %v73_v39  }
  0x1b   :  { %381 = vmatpush1.bf16.msra.mxu0 %v681_v18 }
  0x1c   :  { %382 = vmatprep.subr.bf16.mxu0 %v682_v19 }
  0x1e   :  { %640 = vmatmul.mubr.msk.bf16.gmra.mxu1 %vm355_vm0, %v723_v37 }
  0x1f   :  { %383 = vmatpush1.bf16.msra.mxu0 %v684_v22  ;;  %503 = vmatprep.mubr.bf16.mxu1 %v731_v1 }
  0x20   :  { %384 = vmatprep.subr.bf16.mxu0 %v685_v23 }
  0x23   :  { %385 = vmatpush2.bf16.msra.mxu0 %v687_v24 }
  0x24   :  { %386 = vmatprep.subr.bf16.mxu0 %v688_v25 }
  0x26   :  { %641 = vmatmul.mubr.msk.bf16.gmra.mxu1 %vm355_vm0, %v727_v44 }
  0x27   :  { %387 = vmatpush2.bf16.msra.mxu0 %v690_v29 }
  0x28   :  { %388 = vmatprep.subr.bf16.mxu0 %v691_v31 }
  0x2b   :  { %389 = vmatpush2.bf16.msra.mxu0 %v693_v33 }
  0x2c   :  { %390 = vmatprep.subr.bf16.mxu0 %v694_v35 }
  0x2f   :  { %391 = vmatpush2.bf16.msra.mxu0 %v696_v38 }
  0x30   :  { %392 = vmatprep.subr.bf16.mxu0 %v697_v40 }
  0x33   :  { %393 = vmatpush2.bf16.msra.mxu0 %v699_v42 }
  0x34   :  { %394 = vmatprep.subr.bf16.mxu0 %v700_v43 }
  0x37   :  { %395 = vmatpush2.bf16.msra.mxu0 %v704_v45 }
  0x38   :  { %396 = vmatprep.subr.bf16.mxu0 %v706_v46 }
  0x3b   :  { %397 = vmatpush2.bf16.msra.mxu0 %v710_v47 }
  0x3c   :  { %398 = vmatprep.subr.bf16.mxu0 %v712_v48 }
  0x3f   :  { %399 = vmatpush2.bf16.msra.mxu0 %v715_v49 }
  0x42   :  { %401 = vmatmul.mubr.bf16.vlgmr.msra.gmra.mxu0 %v716_v50 }
  0x43   :  { %410 = vmatprep.mubr.bf16.mxu0 %v720_v51 }
  0x4a   :  { %411 = vmatmul.mubr.bf16.gmra.mxu0 %v722_v52 }
  0x4b   :  { %420 = vmatprep.mubr.bf16.mxu0 %v724_v53 }
  0x52   :  { %421 = vmatmul.mubr.bf16.gmra.mxu0 %v726_v54 }
  0x53   :  { %430 = vmatprep.mubr.bf16.mxu0 %v728_v55 }
  0x5a   :  { %431 = vmatmul.mubr.bf16.gmra.mxu0 %v730_v56 }
  0x85   :  { %v88_v12 = vpop.permute.xlu1 %87 }
  0x87   :  { %v78_v63 = vpop.permute.xlu0 %77 }
  0x89   :  { %v93_v27 = vpop.permute.xlu1 %92 }
  0x8b   :  { %v83_v5 = vpop.permute.xlu0 %82 }
  0x8d   :  { %v103_v47 = vpop.permute.xlu1 %102 }
  0x8f   :  { %v98_v38 = vpop.permute.xlu0 %97 }
  0xce   :  { %v475_v57 = vpop.f32.mrf.mxu1 }
  0xd0   :  { %v477_v58 = vpop.f32.mrf.mxu1 }
  0xd2   :  { %v479_v59 = vpop.f32.mrf.mxu1 }
  0xd4   :  { %v481_v60 = vpop.f32.mrf.mxu1 }
  0xd6   :  { %v485_v61 = vpop.f32.mrf.mxu1 }
  0xd8   :  { %v487_v62 = vpop.f32.mrf.mxu1 }
  0xda   :  { %v489_v0 = vpop.f32.mrf.mxu1 }
  0xdc   :  { %v491_v2 = vpop.f32.mrf.mxu1 }
  0xde   :  { %v495_v9 = vpop.f32.mrf.mxu1 }
  0xe0   :  { %v497_v19 = vpop.f32.mrf.mxu1 }
  0xe2   :  { %v499_v30 = vpop.f32.mrf.mxu1 }
  0xe4   :  { %v501_v41 = vpop.f32.mrf.mxu1 }
  0xe6   :  { %v505_v52 = vpop.f32.mrf.mxu1 }
 0x102   :  { %v402_v1 = vpop.f32.mrf.mxu0 }
 0x103   :  { %v403_v3 = vadd.f32 %v402_v1, %v78_v63 }
 0x104   :  { %v404_v4 = vpop.f32.mrf.mxu0 }
 0x105   :  { %v476_v6 = vadd.f32 %v475_v57, %v403_v3  ;;  %v405_v7 = vadd.f32 %v404_v4, %v78_v63  ;;  %v113_v4 = vpop.permute.xlu1 %112 }
 0x106   :  { %v406_v8 = vpop.f32.mrf.mxu0 }
 0x107   :  { %v478_v10 = vadd.f32 %v477_v58, %v405_v7  ;;  %v407_v11 = vadd.f32 %v406_v8, %v83_v5  ;;  %v514_v14 = vmax.f32 %v476_v6, 0.0  ;;  %v108_v58 = vpop.permute.xlu0 %107 }
 0x108   :  { %v408_v13 = vpop.f32.mrf.mxu0 }
 0x109   :  { %v515_v15 = vmax.f32 %v478_v10, 0.0  ;;  %v480_v16 = vadd.f32 %v479_v59, %v407_v11  ;;  %v409_v17 = vadd.f32 %v408_v13, %v83_v5 }
 0x10a   :  { %v412_v18 = vpop.f32.mrf.mxu0 }
 0x10b   :  { %v650_v20 = vpack.c.bf16 %v515_v15, %v514_v14  ;;  %v482_v21 = vadd.f32 %v481_v60, %v409_v17  ;;  %v413_v22 = vadd.f32 %v412_v18, %v88_v12  ;;  %v516_v24 = vmax.f32 %v480_v16, 0.0 }
 0x10c   :  { %v414_v23 = vpop.f32.mrf.mxu0 }
 0x10d   :  { %578 = vst [vmem:[%s957_s3] sm:$0xff] %v650_v20  ;;  %v517_v25 = vmax.f32 %v482_v21, 0.0  ;;  %v486_v26 = vadd.f32 %v485_v61, %v413_v22  ;;  %v415_v28 = vadd.f32 %v414_v23, %v88_v12 }
 0x10e   :  { %v416_v29 = vpop.f32.mrf.mxu0 }
 0x10f   :  { %v651_v31 = vpack.c.bf16 %v517_v25, %v516_v24  ;;  %v488_v32 = vadd.f32 %v487_v62, %v415_v28  ;;  %v417_v33 = vadd.f32 %v416_v29, %v93_v27  ;;  %v518_v35 = vmax.f32 %v486_v26, 0.0  ;;  %v507_v62 = vpop.f32.mrf.mxu1 }
 0x110   :  { %v418_v34 = vpop.f32.mrf.mxu0 }
 0x111   :  { %579 = vst [vmem:[%s957_s3 + $0x8] sm:$0xff] %v651_v31  ;;  %v519_v36 = vmax.f32 %v488_v32, 0.0  ;;  %v490_v37 = vadd.f32 %v489_v0, %v417_v33  ;;  %v419_v39 = vadd.f32 %v418_v34, %v93_v27 }
 0x112   :  { %v422_v40 = vpop.f32.mrf.mxu0 }
 0x113   :  { %v652_v42 = vpack.c.bf16 %v519_v36, %v518_v35  ;;  %v492_v43 = vadd.f32 %v491_v2, %v419_v39  ;;  %v423_v44 = vadd.f32 %v422_v40, %v98_v38  ;;  %v520_v46 = vmax.f32 %v490_v37, 0.0 }
 0x114   :  { %v424_v45 = vpop.f32.mrf.mxu0 }
 0x115   :  { %580 = vst [vmem:[%s957_s3 + $0x10] sm:$0xff] %v652_v42  ;;  %v521_v48 = vmax.f32 %v492_v43, 0.0  ;;  %v496_v49 = vadd.f32 %v495_v9, %v423_v44  ;;  %v425_v50 = vadd.f32 %v424_v45, %v98_v38  ;;  %v509_v9 = vpop.f32.mrf.mxu1 }
 0x116   :  { %v426_v51 = vpop.f32.mrf.mxu0 }
 0x117   :  { %v653_v53 = vpack.c.bf16 %v521_v48, %v520_v46  ;;  %v498_v54 = vadd.f32 %v497_v19, %v425_v50  ;;  %v427_v55 = vadd.f32 %v426_v51, %v103_v47  ;;  %v522_v57 = vmax.f32 %v496_v49, 0.0  ;;  %v511_v19 = vpop.f32.mrf.mxu1 }
 0x118   :  { %v428_v56 = vpop.f32.mrf.mxu0 }
 0x119   :  { %581 = vst [vmem:[%s957_s3 + $0x18] sm:$0xff] %v653_v53  ;;  %v523_v59 = vmax.f32 %v498_v54, 0.0  ;;  %v500_v60 = vadd.f32 %v499_v30, %v427_v55  ;;  %v429_v61 = vadd.f32 %v428_v56, %v103_v47 }
 0x11a   :  { %v432_v63 = vpop.f32.mrf.mxu0 }
 0x11b   :  { %v654_v0 = vpack.c.bf16 %v523_v59, %v522_v57  ;;  %v502_v1 = vadd.f32 %v501_v41, %v429_v61  ;;  %v433_v2 = vadd.f32 %v432_v63, %v108_v58  ;;  %v524_v5 = vmax.f32 %v500_v60, 0.0 }
 0x11c   :  { %v434_v3 = vpop.f32.mrf.mxu0 }
 0x11d   :  { %582 = vst [vmem:[%s957_s3 + $0x20] sm:$0xff] %v654_v0  ;;  %v525_v6 = vmax.f32 %v502_v1, 0.0  ;;  %v506_v7 = vadd.f32 %v505_v52, %v433_v2  ;;  %v435_v8 = vadd.f32 %v434_v3, %v108_v58 }
 0x11e   :  { %v436_v10 = vpop.f32.mrf.mxu0 }
 0x11f   :  { %v655_v11 = vpack.c.bf16 %v525_v6, %v524_v5  ;;  %v508_v12 = vadd.f32 %v507_v62, %v435_v8  ;;  %v437_v13 = vadd.f32 %v436_v10, %v113_v4  ;;  %v526_v15 = vmax.f32 %v506_v7, 0.0 }
 0x120   :  { %v438_v14 = vpop.f32.mrf.mxu0 }
 0x121   :  { %583 = vst [vmem:[%s957_s3 + $0x28] sm:$0xff] %v655_v11  ;;  %v527_v16 = vmax.f32 %v508_v12, 0.0  ;;  %v510_v17 = vadd.f32 %v509_v9, %v437_v13  ;;  %v439_v18 = vadd.f32 %v438_v14, %v113_v4 }
 0x123   :  { %v656_v20 = vpack.c.bf16 %v527_v16, %v526_v15  ;;  %v512_v21 = vadd.f32 %v511_v19, %v439_v18  ;;  %v528_v22 = vmax.f32 %v510_v17, 0.0 }
 0x125   :  { %584 = vst [vmem:[%s957_s3 + $0x30] sm:$0xff] %v656_v20  ;;  %v529_v23 = vmax.f32 %v512_v21, 0.0 }
 0x127   :  { %v657_v24 = vpack.c.bf16 %v529_v23, %v528_v22 }
 0x129   :  { %585 = vst [vmem:[%s957_s3 + $0x38] sm:$0xff] %v657_v24 }

// kernel: _lambda_.41
= control target key start
LH: loop header
LB: loop body
LE: loop exit
PB: predicated region body
PF: predicated region fallthrough
CT: control target
= control target key end

     0   :  { %v2075_v8 = vmov 0   ;;  %s2804_s0 = inlined_call_operand.vmem [shape: bf16[1152,256], index: 0, kind: input, shape index: {}]   ;;  %s2805_s1 = inlined_call_operand.vmem [shape: bf16[64,1152], index: 1, kind: input, shape index: {}]   ;;  %s2806_s2 = inlined_call_operand.vmem [shape: f32[64,1], index: 2, kind: input, shape index: {}]   ;;  %s2807_s3 = inlined_call_operand.vmem [shape: bf16[64,256], index: 3, kind: output, shape index: {}]  }
   0x1   :  { %v1807_v0 = vld [vmem:[%s2804_s0 + $0x74] ss:$8 sps:$4 sm:$0xff]   ;;  %v1811_v2 = vld [vmem:[%s2804_s0 + $0x70] ss:$8 sps:$4 sm:$0xff]   ;;  %v1813_v4 = vld [vmem:[%s2804_s0 + $0x64] ss:$8 sps:$4 sm:$0xff]   ;;  %1805 = vset.pattern.permute.xlu0 %v2075_v8  ;;  %1806 = vset.pattern.permute.xlu1 %v2075_v8 }
   0x2   :  { %v1809_v1 = vld [vmem:[%s2804_s0 + $0x174] ss:$8 sps:$4 sm:$0xff]   ;;  %1151 = vmatprep.subr.bf16.mxu0 %v1807_v0  ;;  %v1812_v3 = vld [vmem:[%s2804_s0 + $0x170] ss:$8 sps:$4 sm:$0xff]   ;;  %v1815_v5 = vld [vmem:[%s2804_s0 + $0x164] ss:$8 sps:$4 sm:$0xff]  }
   0x3   :  { %1224 = vmatprep.subr.bf16.mxu1 %v1809_v1  ;;  %1152 = vmatpush1.bf16.msra.mxu0 %v1811_v2  ;;  %v1817_v6 = vld [vmem:[%s2804_s0 + $0x60] ss:$8 sps:$4 sm:$0xff]   ;;  %v1819_v9 = vld [vmem:[%s2804_s0 + $0x54] ss:$8 sps:$4 sm:$0xff]   ;;  %v1823_v11 = vld [vmem:[%s2804_s0 + $0x50] ss:$8 sps:$4 sm:$0xff]  }
   0x4   :  { %1225 = vmatpush1.bf16.msra.mxu1 %v1812_v3  ;;  %1153 = vmatprep.subr.bf16.mxu0 %v1813_v4  ;;  %v1818_v7 = vld [vmem:[%s2804_s0 + $0x160] ss:$8 sps:$4 sm:$0xff]   ;;  %v1821_v10 = vld [vmem:[%s2804_s0 + $0x154] ss:$8 sps:$4 sm:$0xff]   ;;  %v1824_v12 = vld [vmem:[%s2804_s0 + $0x150] ss:$8 sps:$4 sm:$0xff]  }
   0x5   :  { %1226 = vmatprep.subr.bf16.mxu1 %v1815_v5  ;;  %v1825_v13 = vld [vmem:[%s2804_s0 + $0x44] ss:$8 sps:$4 sm:$0xff]   ;;  %v1829_v15 = vld [vmem:[%s2804_s0 + $0x40] ss:$8 sps:$4 sm:$0xff]   ;;  %v1831_v17 = vld [vmem:[%s2804_s0 + $0x34] ss:$8 sps:$4 sm:$0xff]  }
   0x6   :  { %v1827_v14 = vld [vmem:[%s2804_s0 + $0x144] ss:$8 sps:$4 sm:$0xff]   ;;  %v1830_v16 = vld [vmem:[%s2804_s0 + $0x140] ss:$8 sps:$4 sm:$0xff]   ;;  %v1833_v18 = vld [vmem:[%s2804_s0 + $0x134] ss:$8 sps:$4 sm:$0xff]  }
   0x7   :  { %1154 = vmatpush1.bf16.msra.mxu0 %v1817_v6  ;;  %v1835_v19 = vld [vmem:[%s2804_s0 + $0x30] ss:$8 sps:$4 sm:$0xff]   ;;  %v1837_v21 = vld [vmem:[%s2804_s0 + $0x24] ss:$8 sps:$4 sm:$0xff]   ;;  %v1841_v23 = vld [vmem:[%s2804_s0 + $0x20] ss:$8 sps:$4 sm:$0xff]  }
   0x8   :  { %1227 = vmatpush1.bf16.msra.mxu1 %v1818_v7  ;;  %1155 = vmatprep.subr.bf16.mxu0 %v1819_v9  ;;  %v1836_v20 = vld [vmem:[%s2804_s0 + $0x130] ss:$8 sps:$4 sm:$0xff]   ;;  %v1839_v22 = vld [vmem:[%s2804_s0 + $0x124] ss:$8 sps:$4 sm:$0xff]   ;;  %v1842_v24 = vld [vmem:[%s2804_s0 + $0x120] ss:$8 sps:$4 sm:$0xff]  }
   0x9   :  { %1228 = vmatprep.subr.bf16.mxu1 %v1821_v10  ;;  %v1843_v25 = vld [vmem:[%s2804_s0 + $0x14] ss:$8 sps:$4 sm:$0xff]   ;;  %v1847_v27 = vld [vmem:[%s2804_s0 + $0x10] ss:$8 sps:$4 sm:$0xff]   ;;  %v1849_v29 = vld [vmem:[%s2804_s0 + $0x4] ss:$8 sps:$4 sm:$0xff]  }
   0xa   :  { %v1845_v26 = vld [vmem:[%s2804_s0 + $0x114] ss:$8 sps:$4 sm:$0xff]   ;;  %v1848_v28 = vld [vmem:[%s2804_s0 + $0x110] ss:$8 sps:$4 sm:$0xff]   ;;  %v1851_v30 = vld [vmem:[%s2804_s0 + $0x104] ss:$8 sps:$4 sm:$0xff]  }
   0xb   :  { %1156 = vmatpush1.bf16.msra.mxu0 %v1823_v11  ;;  %v1853_v31 = vld [vmem:[%s2804_s0] ss:$8 sps:$4 sm:$0xff]   ;;  %v1855_v33 = vld [vmem:[%s2804_s0 + $0xf4] ss:$8 sps:$4 sm:$0xff]   ;;  %v1859_v35 = vld [vmem:[%s2804_s0 + $0xf0] ss:$8 sps:$4 sm:$0xff]  }
   0xc   :  { %1229 = vmatpush1.bf16.msra.mxu1 %v1824_v12  ;;  %1157 = vmatprep.subr.bf16.mxu0 %v1825_v13  ;;  %v1854_v32 = vld [vmem:[%s2804_s0 + $0x100] ss:$8 sps:$4 sm:$0xff]   ;;  %v1857_v34 = vld [vmem:[%s2804_s0 + $0x1f4] ss:$8 sps:$4 sm:$0xff]   ;;  %v1860_v36 = vld [vmem:[%s2804_s0 + $0x1f0] ss:$8 sps:$4 sm:$0xff]  }
   0xd   :  { %1230 = vmatprep.subr.bf16.mxu1 %v1827_v14  ;;  %v1861_v37 = vld [vmem:[%s2804_s0 + $0xe4] ss:$8 sps:$4 sm:$0xff]   ;;  %v1865_v39 = vld [vmem:[%s2804_s0 + $0xe0] ss:$8 sps:$4 sm:$0xff]   ;;  %v1867_v41 = vld [vmem:[%s2804_s0 + $0xd4] ss:$8 sps:$4 sm:$0xff]  }
   0xe   :  { %v1863_v38 = vld [vmem:[%s2804_s0 + $0x1e4] ss:$8 sps:$4 sm:$0xff]   ;;  %v1866_v40 = vld [vmem:[%s2804_s0 + $0x1e0] ss:$8 sps:$4 sm:$0xff]   ;;  %v1869_v42 = vld [vmem:[%s2804_s0 + $0x1d4] ss:$8 sps:$4 sm:$0xff]  }
   0xf   :  { %1158 = vmatpush1.bf16.msra.mxu0 %v1829_v15  ;;  %v1871_v43 = vld [vmem:[%s2804_s0 + $0xd0] ss:$8 sps:$4 sm:$0xff]   ;;  %v1873_v45 = vld [vmem:[%s2804_s0 + $0xc4] ss:$8 sps:$4 sm:$0xff]   ;;  %v1877_v47 = vld [vmem:[%s2804_s0 + $0xc0] ss:$8 sps:$4 sm:$0xff]  }
  0x10   :  { %1231 = vmatpush1.bf16.msra.mxu1 %v1830_v16  ;;  %1159 = vmatprep.subr.bf16.mxu0 %v1831_v17  ;;  %v1872_v44 = vld [vmem:[%s2804_s0 + $0x1d0] ss:$8 sps:$4 sm:$0xff]   ;;  %v1875_v46 = vld [vmem:[%s2804_s0 + $0x1c4] ss:$8 sps:$4 sm:$0xff]   ;;  %v1878_v48 = vld [vmem:[%s2804_s0 + $0x1c0] ss:$8 sps:$4 sm:$0xff]  }
  0x11   :  { %1232 = vmatprep.subr.bf16.mxu1 %v1833_v18  ;;  %v1879_v49 = vld [vmem:[%s2804_s0 + $0xb4] ss:$8 sps:$4 sm:$0xff]   ;;  %v1905_v50 = vld [vmem:[%s2805_s1 + $0x4] ss:$36 sps:$4 sm:$0xff]   ;;  %v1908_v52 = vld [vmem:[%s2805_s1 + $0xc] ss:$36 sps:$4 sm:$0xff]  }
  0x12   :  { %v1881_v51 = vld [vmem:[%s2804_s0 + $0x1b4] ss:$8 sps:$4 sm:$0xff]   ;;  %1183 = vmatprep.mubr.bf16.mxu0 %v1905_v50  ;;  %v1883_v53 = vld [vmem:[%s2804_s0 + $0xb0] ss:$8 sps:$4 sm:$0xff]   ;;  %1256 = vmatprep.mubr.bf16.mxu1 %v1908_v52  ;;  %v1885_v55 = vld [vmem:[%s2804_s0 + $0xa4] ss:$8 sps:$4 sm:$0xff]  }
  0x13   :  { %1160 = vmatpush1.bf16.msra.mxu0 %v1835_v19  ;;  %v1884_v54 = vld [vmem:[%s2804_s0 + $0x1b0] ss:$8 sps:$4 sm:$0xff]   ;;  %v1887_v56 = vld [vmem:[%s2804_s0 + $0x1a4] ss:$8 sps:$4 sm:$0xff]   ;;  %v1889_v57 = vld [vmem:[%s2804_s0 + $0xa0] ss:$8 sps:$4 sm:$0xff]  }
  0x14   :  { %1233 = vmatpush1.bf16.msra.mxu1 %v1836_v20  ;;  %1161 = vmatprep.subr.bf16.mxu0 %v1837_v21  ;;  %v1890_v58 = vld [vmem:[%s2804_s0 + $0x1a0] ss:$8 sps:$4 sm:$0xff]   ;;  %v1891_v59 = vld [vmem:[%s2804_s0 + $0x94] ss:$8 sps:$4 sm:$0xff]   ;;  %v1895_v61 = vld [vmem:[%s2804_s0 + $0x90] ss:$8 sps:$4 sm:$0xff]  }
  0x15   :  { %1234 = vmatprep.subr.bf16.mxu1 %v1839_v22  ;;  %v1893_v60 = vld [vmem:[%s2804_s0 + $0x194] ss:$8 sps:$4 sm:$0xff]   ;;  %v1896_v62 = vld [vmem:[%s2804_s0 + $0x190] ss:$8 sps:$4 sm:$0xff]   ;;  %v1897_v63 = vld [vmem:[%s2804_s0 + $0x84] ss:$8 sps:$4 sm:$0xff]  }
  0x16   :  { %v1899_v0 = vld [vmem:[%s2804_s0 + $0x184] ss:$8 sps:$4 sm:$0xff]   ;;  %v1901_v1 = vld [vmem:[%s2804_s0 + $0x80] ss:$8 sps:$4 sm:$0xff]   ;;  %v1911_v3 = vld [vmem:[%s2804_s0 + $0x274] ss:$8 sps:$4 sm:$0xff]  }
  0x17   :  { %1162 = vmatpush1.bf16.msra.mxu0 %v1841_v23  ;;  %v1902_v2 = vld [vmem:[%s2804_s0 + $0x180] ss:$8 sps:$4 sm:$0xff]   ;;  %v1914_v4 = vld [vmem:[%s2804_s0 + $0x374] ss:$8 sps:$4 sm:$0xff]   ;;  %v1909_v7 = vld [vmem:[%s2804_s0 + $0x270] ss:$8 sps:$4 sm:$0xff]  }
  0x18   :  { %1235 = vmatpush1.bf16.msra.mxu1 %v1842_v24  ;;  %1163 = vmatprep.subr.bf16.mxu0 %v1843_v25  ;;  %v1903_v5 = vld [vmem:[%s2805_s1] ss:$36 sps:$4 sm:$0xff]   ;;  %v1906_v6 = vld [vmem:[%s2805_s1 + $0x8] ss:$36 sps:$4 sm:$0xff]   ;;  %v1912_v9 = vld [vmem:[%s2804_s0 + $0x370] ss:$8 sps:$4 sm:$0xff]  }
  0x19   :  { %1236 = vmatprep.subr.bf16.mxu1 %v1845_v26  ;;  %v1917_v10 = vld [vmem:[%s2804_s0 + $0x264] ss:$8 sps:$4 sm:$0xff]   ;;  %v1915_v12 = vld [vmem:[%s2804_s0 + $0x260] ss:$8 sps:$4 sm:$0xff]   ;;  %v1923_v15 = vld [vmem:[%s2804_s0 + $0x254] ss:$8 sps:$4 sm:$0xff]  }
  0x1a   :  { %v1920_v11 = vld [vmem:[%s2804_s0 + $0x364] ss:$8 sps:$4 sm:$0xff]   ;;  %v1918_v14 = vld [vmem:[%s2804_s0 + $0x360] ss:$8 sps:$4 sm:$0xff]   ;;  %v1926_v16 = vld [vmem:[%s2804_s0 + $0x354] ss:$8 sps:$4 sm:$0xff]  }
  0x1b   :  { %1164 = vmatpush1.bf16.msra.mxu0 %v1847_v27  ;;  %v1957_v13 = vld [vmem:[%s2805_s1 + $0x4c] ss:$36 sps:$4 sm:$0xff]   ;;  %v1966_v20 = vld [vmem:[%s2805_s1 + $0x54] ss:$36 sps:$4 sm:$0xff]   ;;  %v1927_v24 = vld [vmem:[%s2804_s0 + $0x240] ss:$8 sps:$4 sm:$0xff]  }
  0x1c   :  { %1237 = vmatpush1.bf16.msra.mxu1 %v1848_v28  ;;  %1165 = vmatprep.subr.bf16.mxu0 %v1849_v29  ;;  %v1921_v17 = vld [vmem:[%s2804_s0 + $0x250] ss:$8 sps:$4 sm:$0xff]   ;;  %v1965_v19 = vld [vmem:[%s2805_s1 + $0x48] ss:$36 sps:$4 sm:$0xff]   ;;  %v1935_v27 = vld [vmem:[%s2804_s0 + $0x234] ss:$8 sps:$4 sm:$0xff]  }
  0x1d   :  { %1238 = vmatprep.subr.bf16.mxu1 %v1851_v30  ;;  %v1924_v18 = vld [vmem:[%s2804_s0 + $0x350] ss:$8 sps:$4 sm:$0xff]   ;;  %v1929_v22 = vld [vmem:[%s2804_s0 + $0x244] ss:$8 sps:$4 sm:$0xff]   ;;  %v1930_v26 = vld [vmem:[%s2804_s0 + $0x340] ss:$8 sps:$4 sm:$0xff]  }
  0x1e   :  { %v1968_v21 = vld [vmem:[%s2805_s1 + $0x50] ss:$36 sps:$4 sm:$0xff]   ;;  %v1932_v23 = vld [vmem:[%s2804_s0 + $0x344] ss:$8 sps:$4 sm:$0xff]  }
  0x1f   :  { %1166 = vmatpush1.bf16.msra.mxu0 %v1853_v31  ;;  %v1975_v25 = vld [vmem:[%s2805_s1 + $0x94] ss:$36 sps:$4 sm:$0xff]  }
  0x20   :  { %1239 = vmatpush1.bf16.msra.mxu1 %v1854_v32  ;;  %1167 = vmatprep.subr.bf16.mxu0 %v1855_v33  ;;  %v1938_v28 = vld [vmem:[%s2804_s0 + $0x334] ss:$8 sps:$4 sm:$0xff]   ;;  %v1933_v29 = vld [vmem:[%s2804_s0 + $0x230] ss:$8 sps:$4 sm:$0xff]  }
  0x21   :  { %1240 = vmatprep.subr.bf16.mxu1 %v1857_v34  ;;  %v1936_v30 = vld [vmem:[%s2804_s0 + $0x330] ss:$8 sps:$4 sm:$0xff]   ;;  %v1984_v32 = vld [vmem:[%s2805_s1 + $0x9c] ss:$36 sps:$4 sm:$0xff]   ;;  %v1941_v34 = vld [vmem:[%s2804_s0 + $0x224] ss:$8 sps:$4 sm:$0xff]  }
  0x22   :  { %v1983_v31 = vld [vmem:[%s2805_s1 + $0x90] ss:$36 sps:$4 sm:$0xff]   ;;  %v1986_v33 = vld [vmem:[%s2805_s1 + $0x98] ss:$36 sps:$4 sm:$0xff]  }
  0x23   :  { %1168 = vmatpush2.bf16.msra.mxu0 %v1859_v35  ;;  %v1944_v35 = vld [vmem:[%s2804_s0 + $0x324] ss:$8 sps:$4 sm:$0xff]   ;;  %v1961_v50 = vld [vmem:[%s2804_s0 + $0x2f4] ss:$8 sps:$4 sm:$0xff]   ;;  %v1959_v52 = vld [vmem:[%s2804_s0 + $0x2f0] ss:$8 sps:$4 sm:$0xff]  }
  0x24   :  { %1241 = vmatpush2.bf16.msra.mxu1 %v1860_v36  ;;  %1169 = vmatprep.subr.bf16.mxu0 %v1861_v37  ;;  %v1939_v36 = vld [vmem:[%s2804_s0 + $0x220] ss:$8 sps:$4 sm:$0xff]  }
  0x25   :  { %1242 = vmatprep.subr.bf16.mxu1 %v1863_v38  ;;  %v1993_v37 = vld [vmem:[%s2805_s1 + $0xdc] ss:$36 sps:$4 sm:$0xff]  }
  0x26   :  { %v1942_v38 = vld [vmem:[%s2804_s0 + $0x320] ss:$8 sps:$4 sm:$0xff]  }
  0x27   :  { %1170 = vmatpush2.bf16.msra.mxu0 %v1865_v39  ;;  %v1947_v39 = vld [vmem:[%s2804_s0 + $0x214] ss:$8 sps:$4 sm:$0xff]  }
  0x28   :  { %1243 = vmatpush2.bf16.msra.mxu1 %v1866_v40  ;;  %1171 = vmatprep.subr.bf16.mxu0 %v1867_v41  ;;  %v1950_v40 = vld [vmem:[%s2804_s0 + $0x314] ss:$8 sps:$4 sm:$0xff]   ;;  %v1945_v41 = vld [vmem:[%s2804_s0 + $0x210] ss:$8 sps:$4 sm:$0xff]  }
  0x29   :  { %1244 = vmatprep.subr.bf16.mxu1 %v1869_v42  ;;  %v1948_v42 = vld [vmem:[%s2804_s0 + $0x310] ss:$8 sps:$4 sm:$0xff]  }
  0x2b   :  { %1172 = vmatpush2.bf16.msra.mxu0 %v1871_v43  ;;  %v2001_v43 = vld [vmem:[%s2805_s1 + $0xd8] ss:$36 sps:$4 sm:$0xff]  }
  0x2c   :  { %1245 = vmatpush2.bf16.msra.mxu1 %v1872_v44  ;;  %1173 = vmatprep.subr.bf16.mxu0 %v1873_v45  ;;  %v2002_v44 = vld [vmem:[%s2805_s1 + $0xe4] ss:$36 sps:$4 sm:$0xff]  }
  0x2d   :  { %1246 = vmatprep.subr.bf16.mxu1 %v1875_v46  ;;  %v2004_v45 = vld [vmem:[%s2805_s1 + $0xe0] ss:$36 sps:$4 sm:$0xff]  }
  0x2e   :  { %v1953_v46 = vld [vmem:[%s2804_s0 + $0x204] ss:$8 sps:$4 sm:$0xff]  }
  0x2f   :  { %1174 = vmatpush2.bf16.msra.mxu0 %v1877_v47  ;;  %v1956_v47 = vld [vmem:[%s2804_s0 + $0x304] ss:$8 sps:$4 sm:$0xff]  }
  0x30   :  { %1247 = vmatpush2.bf16.msra.mxu1 %v1878_v48  ;;  %1175 = vmatprep.subr.bf16.mxu0 %v1879_v49  ;;  %v1951_v48 = vld [vmem:[%s2804_s0 + $0x200] ss:$8 sps:$4 sm:$0xff]  }
  0x31   :  { %1248 = vmatprep.subr.bf16.mxu1 %v1881_v51  ;;  %v1954_v49 = vld [vmem:[%s2804_s0 + $0x300] ss:$8 sps:$4 sm:$0xff]   ;;  %v1964_v51 = vld [vmem:[%s2804_s0 + $0x3f4] ss:$8 sps:$4 sm:$0xff]  }
  0x33   :  { %1176 = vmatpush2.bf16.msra.mxu0 %v1883_v53  ;;  %v1962_v53 = vld [vmem:[%s2804_s0 + $0x3f0] ss:$8 sps:$4 sm:$0xff]  }
  0x34   :  { %1249 = vmatpush2.bf16.msra.mxu1 %v1884_v54  ;;  %1177 = vmatprep.subr.bf16.mxu0 %v1885_v55  ;;  %v1971_v54 = vld [vmem:[%s2804_s0 + $0x2e4] ss:$8 sps:$4 sm:$0xff]  }
  0x35   :  { %1250 = vmatprep.subr.bf16.mxu1 %v1887_v56  ;;  %v1974_v55 = vld [vmem:[%s2804_s0 + $0x3e4] ss:$8 sps:$4 sm:$0xff]   ;;  %v2025_v56 = vld [vmem:[%s2805_s1 + $0x14] ss:$36 sps:$4 sm:$0xff]  }
  0x37   :  { %1178 = vmatpush2.bf16.msra.mxu0 %v1889_v57  ;;  %v2028_v57 = vld [vmem:[%s2805_s1 + $0x1c] ss:$36 sps:$4 sm:$0xff]  }
  0x38   :  { %1251 = vmatpush2.bf16.msra.mxu1 %v1890_v58  ;;  %1179 = vmatprep.subr.bf16.mxu0 %v1891_v59  ;;  %v1969_v58 = vld [vmem:[%s2804_s0 + $0x2e0] ss:$8 sps:$4 sm:$0xff]  }
  0x39   :  { %1252 = vmatprep.subr.bf16.mxu1 %v1893_v60  ;;  %v1972_v59 = vld [vmem:[%s2804_s0 + $0x3e0] ss:$8 sps:$4 sm:$0xff]   ;;  %v1979_v60 = vld [vmem:[%s2804_s0 + $0x2d4] ss:$8 sps:$4 sm:$0xff]  }
  0x3b   :  { %1180 = vmatpush2.bf16.msra.mxu0 %v1895_v61  ;;  %v1982_v61 = vld [vmem:[%s2804_s0 + $0x3d4] ss:$8 sps:$4 sm:$0xff]  }
  0x3c   :  { %1253 = vmatpush2.bf16.msra.mxu1 %v1896_v62  ;;  %1181 = vmatprep.subr.bf16.mxu0 %v1897_v63  ;;  %v199_v62 = vld [vmem:[%s2806_s2] sm:$0xff]  ;;  %v1977_v63 = vld [vmem:[%s2804_s0 + $0x2d0] ss:$8 sps:$4 sm:$0xff]  }
  0x3d   :  { %1254 = vmatprep.subr.bf16.mxu1 %v1899_v0  ;;  %209 = vperm.xlu0 %1805, %v199_v62   ;;  %v1980_v0 = vld [vmem:[%s2804_s0 + $0x3d0] ss:$8 sps:$4 sm:$0xff]  }
  0x3e   :  { %v2074_v62 = vld [vmem:[%s2805_s1 + $0xf8] ss:$36 sps:$4 sm:$0xff]  }
  0x3f   :  { %1182 = vmatpush2.bf16.msra.mxu0 %v1901_v1  ;;  %v1989_v1 = vld [vmem:[%s2804_s0 + $0x2c4] ss:$8 sps:$4 sm:$0xff]  }
  0x40   :  { %1255 = vmatpush2.bf16.msra.mxu1 %v1902_v2  ;;  %1297 = vmatprep.subr.bf16.mxu0 %v1911_v3  ;;  %v1992_v2 = vld [vmem:[%s2804_s0 + $0x3c4] ss:$8 sps:$4 sm:$0xff]  }
  0x41   :  { %1370 = vmatprep.subr.bf16.mxu1 %v1914_v4  ;;  %v200_v3 = vld [vmem:[%s2806_s2 + $0x8] sm:$0xff] }
  0x42   :  { %1184 = vmatmul.mubr.bf16.vlgmr.msra.gmra.mxu0 %v1903_v5  ;;  %214 = vperm.xlu0 %1805, %v200_v3   ;;  %v1987_v4 = vld [vmem:[%s2804_s0 + $0x2c0] ss:$8 sps:$4 sm:$0xff]  }
  0x43   :  { %1257 = vmatmul.mubr.bf16.vlgmr.msra.gmra.mxu1 %v1906_v6  ;;  %1298 = vmatpush1.bf16.msra.mxu0 %v1909_v7  ;;  %v1990_v5 = vld [vmem:[%s2804_s0 + $0x3c0] ss:$8 sps:$4 sm:$0xff]   ;;  %v1997_v6 = vld [vmem:[%s2804_s0 + $0x2b4] ss:$8 sps:$4 sm:$0xff]  }
  0x44   :  { %1371 = vmatpush1.bf16.msra.mxu1 %v1912_v9  ;;  %1299 = vmatprep.subr.bf16.mxu0 %v1917_v10  ;;  %v2000_v7 = vld [vmem:[%s2804_s0 + $0x3b4] ss:$8 sps:$4 sm:$0xff]   ;;  %v1995_v9 = vld [vmem:[%s2804_s0 + $0x2b0] ss:$8 sps:$4 sm:$0xff]  }
  0x45   :  { %1372 = vmatprep.subr.bf16.mxu1 %v1920_v11  ;;  %1193 = vmatprep.mubr.bf16.mxu0 %v1957_v13  ;;  %v1998_v10 = vld [vmem:[%s2804_s0 + $0x3b0] ss:$8 sps:$4 sm:$0xff]   ;;  %v2007_v11 = vld [vmem:[%s2804_s0 + $0x2a4] ss:$8 sps:$4 sm:$0xff]   ;;  %v2005_v13 = vld [vmem:[%s2804_s0 + $0x2a0] ss:$8 sps:$4 sm:$0xff]  }
  0x46   :  { %1266 = vmatprep.mubr.bf16.mxu1 %v1966_v20  ;;  %v201_v20 = vld [vmem:[%s2806_s2 + $0x10] sm:$0xff] }
  0x47   :  { %1300 = vmatpush1.bf16.msra.mxu0 %v1915_v12  ;;  %v2010_v12 = vld [vmem:[%s2804_s0 + $0x3a4] ss:$8 sps:$4 sm:$0xff]   ;;  %219 = vperm.xlu1 %1806, %v201_v20  }
  0x48   :  { %1373 = vmatpush1.bf16.msra.mxu1 %v1918_v14  ;;  %1301 = vmatprep.subr.bf16.mxu0 %v1923_v15  ;;  %v2008_v14 = vld [vmem:[%s2804_s0 + $0x3a0] ss:$8 sps:$4 sm:$0xff]   ;;  %v2013_v15 = vld [vmem:[%s2804_s0 + $0x294] ss:$8 sps:$4 sm:$0xff]  }
  0x49   :  { %1374 = vmatprep.subr.bf16.mxu1 %v1926_v16  ;;  %v2016_v16 = vld [vmem:[%s2804_s0 + $0x394] ss:$8 sps:$4 sm:$0xff]  }
  0x4a   :  { %1194 = vmatmul.mubr.bf16.gmra.mxu0 %v1965_v19  ;;  %v2019_v19 = vld [vmem:[%s2804_s0 + $0x284] ss:$8 sps:$4 sm:$0xff]  }
  0x4b   :  { %1267 = vmatmul.mubr.bf16.gmra.mxu1 %v1968_v21  ;;  %1302 = vmatpush1.bf16.msra.mxu0 %v1921_v17  ;;  %v2011_v17 = vld [vmem:[%s2804_s0 + $0x290] ss:$8 sps:$4 sm:$0xff]   ;;  %v2022_v21 = vld [vmem:[%s2804_s0 + $0x384] ss:$8 sps:$4 sm:$0xff]  }
  0x4c   :  { %1375 = vmatpush1.bf16.msra.mxu1 %v1924_v18  ;;  %1303 = vmatprep.subr.bf16.mxu0 %v1929_v22  ;;  %v2014_v18 = vld [vmem:[%s2804_s0 + $0x390] ss:$8 sps:$4 sm:$0xff]  }
  0x4d   :  { %1376 = vmatprep.subr.bf16.mxu1 %v1932_v23  ;;  %1203 = vmatprep.mubr.bf16.mxu0 %v1975_v25  ;;  %v202_v22 = vld [vmem:[%s2806_s2 + $0x18] sm:$0xff]  ;;  %v203_v23 = vld [vmem:[%s2806_s2 + $0x20] sm:$0xff] }
  0x4e   :  { %1276 = vmatprep.mubr.bf16.mxu1 %v1984_v32  ;;  %v2020_v25 = vld [vmem:[%s2804_s0 + $0x380] ss:$8 sps:$4 sm:$0xff]   ;;  %224 = vperm.xlu1 %1806, %v202_v22   ;;  %v2034_v32 = vld [vmem:[%s2804_s0 + $0x464] ss:$8 sps:$4 sm:$0xff]  }
  0x4f   :  { %1304 = vmatpush1.bf16.msra.mxu0 %v1927_v24  ;;  %v2017_v24 = vld [vmem:[%s2804_s0 + $0x280] ss:$8 sps:$4 sm:$0xff]   ;;  %229 = vperm.xlu0 %1805, %v203_v23  }
  0x50   :  { %1377 = vmatpush1.bf16.msra.mxu1 %v1930_v26  ;;  %1305 = vmatprep.subr.bf16.mxu0 %v1935_v27  ;;  %v2031_v26 = vld [vmem:[%s2804_s0 + $0x474] ss:$8 sps:$4 sm:$0xff]  }
  0x51   :  { %1378 = vmatprep.subr.bf16.mxu1 %v1938_v28  ;;  %v2023_v27 = vld [vmem:[%s2805_s1 + $0x10] ss:$36 sps:$4 sm:$0xff]   ;;  %v2026_v28 = vld [vmem:[%s2805_s1 + $0x18] ss:$36 sps:$4 sm:$0xff]  }
  0x52   :  { %1204 = vmatmul.mubr.bf16.gmra.mxu0 %v1983_v31  ;;  %v2029_v31 = vld [vmem:[%s2804_s0 + $0x470] ss:$8 sps:$4 sm:$0xff]  }
  0x53   :  { %1277 = vmatmul.mubr.bf16.gmra.mxu1 %v1986_v33  ;;  %1306 = vmatpush1.bf16.msra.mxu0 %v1933_v29  ;;  %v204_v29 = vld [vmem:[%s2806_s2 + $0x28] sm:$0xff]  ;;  %v2035_v33 = vld [vmem:[%s2805_s1 + $0x5c] ss:$36 sps:$4 sm:$0xff]  }
  0x54   :  { %1379 = vmatpush1.bf16.msra.mxu1 %v1936_v30  ;;  %1307 = vmatprep.subr.bf16.mxu0 %v1941_v34  ;;  %v205_v30 = vld [vmem:[%s2806_s2 + $0x30] sm:$0xff]  ;;  %v2037_v34 = vld [vmem:[%s2805_s1 + $0x64] ss:$36 sps:$4 sm:$0xff]  }
  0x55   :  { %1380 = vmatprep.subr.bf16.mxu1 %v1944_v35  ;;  %1213 = vmatprep.mubr.bf16.mxu0 %v1993_v37  ;;  %v2032_v35 = vld [vmem:[%s2804_s0 + $0x460] ss:$8 sps:$4 sm:$0xff]   ;;  %v2043_v37 = vld [vmem:[%s2804_s0 + $0x454] ss:$8 sps:$4 sm:$0xff]  }
  0x56   :  { %1286 = vmatprep.mubr.bf16.mxu1 %v2002_v44  ;;  %234 = vperm.xlu1 %1806, %v204_v29   ;;  %v2044_v44 = vld [vmem:[%s2804_s0 + $0x440] ss:$8 sps:$4 sm:$0xff]  }
  0x57   :  { %1308 = vmatpush1.bf16.msra.mxu0 %v1939_v36  ;;  %239 = vperm.xlu0 %1805, %v205_v30   ;;  %v206_v36 = vld [vmem:[%s2806_s2 + $0x38] sm:$0xff] }
  0x58   :  { %1381 = vmatpush1.bf16.msra.mxu1 %v1942_v38  ;;  %1309 = vmatprep.subr.bf16.mxu0 %v1947_v39  ;;  %v2039_v38 = vld [vmem:[%s2805_s1 + $0x58] ss:$36 sps:$4 sm:$0xff]   ;;  %v2040_v39 = vld [vmem:[%s2805_s1 + $0x60] ss:$36 sps:$4 sm:$0xff]  }
  0x59   :  { %1382 = vmatprep.subr.bf16.mxu1 %v1950_v40  ;;  %v2041_v40 = vld [vmem:[%s2804_s0 + $0x450] ss:$8 sps:$4 sm:$0xff]  }
  0x5a   :  { %1214 = vmatmul.mubr.bf16.gmra.mxu0 %v2001_v43  ;;  %244 = vperm.xlu1 %1806, %v206_v36   ;;  %v2049_v43 = vld [vmem:[%s2805_s1 + $0xac] ss:$36 sps:$4 sm:$0xff]  }
  0x5b   :  { %1287 = vmatmul.mubr.bf16.gmra.mxu1 %v2004_v45  ;;  %1310 = vmatpush1.bf16.msra.mxu0 %v1945_v41  ;;  %v2046_v41 = vld [vmem:[%s2804_s0 + $0x444] ss:$8 sps:$4 sm:$0xff]   ;;  %v2055_v45 = vld [vmem:[%s2804_s0 + $0x434] ss:$8 sps:$4 sm:$0xff]  }
  0x5c   :  { %1383 = vmatpush1.bf16.msra.mxu1 %v1948_v42  ;;  %1311 = vmatprep.subr.bf16.mxu0 %v1953_v46  ;;  %v2047_v42 = vld [vmem:[%s2805_s1 + $0xa4] ss:$36 sps:$4 sm:$0xff]  }
  0x5d   :  { %1384 = vmatprep.subr.bf16.mxu1 %v1956_v47  ;;  %1329 = vmatprep.mubr.bf16.mxu0 %v2025_v56  ;;  %v2051_v46 = vld [vmem:[%s2805_s1 + $0xa0] ss:$36 sps:$4 sm:$0xff]   ;;  %v2052_v47 = vld [vmem:[%s2805_s1 + $0xa8] ss:$36 sps:$4 sm:$0xff]   ;;  %v2065_v56 = vld [vmem:[%s2804_s0 + $0x410] ss:$8 sps:$4 sm:$0xff]  }
  0x5e   :  { %1402 = vmatprep.mubr.bf16.mxu1 %v2028_v57  ;;  %v2070_v57 = vld [vmem:[%s2804_s0 + $0x404] ss:$8 sps:$4 sm:$0xff]  }
  0x5f   :  { %1312 = vmatpush1.bf16.msra.mxu0 %v1951_v48  ;;  %v2053_v48 = vld [vmem:[%s2804_s0 + $0x430] ss:$8 sps:$4 sm:$0xff]  }
  0x60   :  { %1385 = vmatpush1.bf16.msra.mxu1 %v1954_v49  ;;  %1313 = vmatprep.subr.bf16.mxu0 %v1961_v50  ;;  %v2058_v49 = vld [vmem:[%s2804_s0 + $0x424] ss:$8 sps:$4 sm:$0xff]  }
  0x61   :  { %1386 = vmatprep.subr.bf16.mxu1 %v1964_v51  ;;  %v2059_v50 = vld [vmem:[%s2805_s1 + $0xec] ss:$36 sps:$4 sm:$0xff]   ;;  %v2061_v51 = vld [vmem:[%s2805_s1 + $0xf4] ss:$36 sps:$4 sm:$0xff]  }
  0x63   :  { %1314 = vmatpush2.bf16.msra.mxu0 %v1959_v52  ;;  %v2056_v52 = vld [vmem:[%s2804_s0 + $0x420] ss:$8 sps:$4 sm:$0xff]  }
  0x64   :  { %1387 = vmatpush2.bf16.msra.mxu1 %v1962_v53  ;;  %1315 = vmatprep.subr.bf16.mxu0 %v1971_v54  ;;  %v2067_v53 = vld [vmem:[%s2804_s0 + $0x414] ss:$8 sps:$4 sm:$0xff]   ;;  %v2063_v54 = vld [vmem:[%s2805_s1 + $0xe8] ss:$36 sps:$4 sm:$0xff]  }
  0x65   :  { %1388 = vmatprep.subr.bf16.mxu1 %v1974_v55  ;;  %v2064_v55 = vld [vmem:[%s2805_s1 + $0xf0] ss:$36 sps:$4 sm:$0xff]  }
  0x67   :  { %1316 = vmatpush2.bf16.msra.mxu0 %v1969_v58  ;;  %v2068_v58 = vld [vmem:[%s2804_s0 + $0x400] ss:$8 sps:$4 sm:$0xff]  }
  0x68   :  { %1389 = vmatpush2.bf16.msra.mxu1 %v1972_v59  ;;  %1317 = vmatprep.subr.bf16.mxu0 %v1979_v60  ;;  %v2071_v59 = vld [vmem:[%s2805_s1 + $0x20] ss:$36 sps:$4 sm:$0xff]   ;;  %v2072_v60 = vld [vmem:[%s2805_s1 + $0xb0] ss:$36 sps:$4 sm:$0xff]  }
  0x69   :  { %1390 = vmatprep.subr.bf16.mxu1 %v1982_v61  ;;  %v2073_v61 = vld [vmem:[%s2805_s1 + $0x68] ss:$36 sps:$4 sm:$0xff]  }
  0x6b   :  { %1318 = vmatpush2.bf16.msra.mxu0 %v1977_v63 }
  0x6c   :  { %1391 = vmatpush2.bf16.msra.mxu1 %v1980_v0  ;;  %1319 = vmatprep.subr.bf16.mxu0 %v1989_v1 }
  0x6d   :  { %1392 = vmatprep.subr.bf16.mxu1 %v1992_v2 }
  0x6f   :  { %1320 = vmatpush2.bf16.msra.mxu0 %v1987_v4 }
  0x70   :  { %1393 = vmatpush2.bf16.msra.mxu1 %v1990_v5  ;;  %1321 = vmatprep.subr.bf16.mxu0 %v1997_v6 }
  0x71   :  { %1394 = vmatprep.subr.bf16.mxu1 %v2000_v7 }
  0x73   :  { %1322 = vmatpush2.bf16.msra.mxu0 %v1995_v9 }
  0x74   :  { %1395 = vmatpush2.bf16.msra.mxu1 %v1998_v10  ;;  %1323 = vmatprep.subr.bf16.mxu0 %v2007_v11 }
  0x75   :  { %1396 = vmatprep.subr.bf16.mxu1 %v2010_v12 }
  0x77   :  { %1324 = vmatpush2.bf16.msra.mxu0 %v2005_v13 }
  0x78   :  { %1397 = vmatpush2.bf16.msra.mxu1 %v2008_v14  ;;  %1325 = vmatprep.subr.bf16.mxu0 %v2013_v15 }
  0x79   :  { %1398 = vmatprep.subr.bf16.mxu1 %v2016_v16 }
  0x7b   :  { %1326 = vmatpush2.bf16.msra.mxu0 %v2011_v17 }
  0x7c   :  { %1399 = vmatpush2.bf16.msra.mxu1 %v2014_v18  ;;  %1327 = vmatprep.subr.bf16.mxu0 %v2019_v19 }
  0x7d   :  { %1400 = vmatprep.subr.bf16.mxu1 %v2022_v21 }
  0x7f   :  { %1328 = vmatpush2.bf16.msra.mxu0 %v2017_v24 }
  0x80   :  { %1401 = vmatpush2.bf16.msra.mxu1 %v2020_v25  ;;  %1443 = vmatprep.subr.bf16.mxu0 %v2031_v26 }
  0x81   :  { %1788 = vmatprep.subr.bf16.mxu1 %v2031_v26 }
  0x82   :  { %1330 = vmatmul.mubr.bf16.vlgmr.msra.gmra.mxu0 %v2023_v27 }
  0x83   :  { %1403 = vmatmul.mubr.bf16.vlgmr.msra.gmra.mxu1 %v2026_v28  ;;  %1444 = vmatpush1.bf16.msra.mxu0 %v2029_v31 }
  0x84   :  { %1796 = vmatpush1.bf16.msra.mxu1 %v2029_v31  ;;  %1445 = vmatprep.subr.bf16.mxu0 %v2034_v32 }
  0x85   :  { %1789 = vmatprep.subr.bf16.mxu1 %v2034_v32  ;;  %1339 = vmatprep.mubr.bf16.mxu0 %v2035_v33 }
  0x86   :  { %1412 = vmatprep.mubr.bf16.mxu1 %v2037_v34 }
  0x87   :  { %1446 = vmatpush1.bf16.msra.mxu0 %v2032_v35 }
  0x88   :  { %1797 = vmatpush1.bf16.msra.mxu1 %v2032_v35  ;;  %1447 = vmatprep.subr.bf16.mxu0 %v2043_v37 }
  0x89   :  { %1790 = vmatprep.subr.bf16.mxu1 %v2043_v37 }
  0x8a   :  { %1340 = vmatmul.mubr.bf16.gmra.mxu0 %v2039_v38 }
  0x8b   :  { %1413 = vmatmul.mubr.bf16.gmra.mxu1 %v2040_v39  ;;  %1448 = vmatpush1.bf16.msra.mxu0 %v2041_v40 }
  0x8c   :  { %1798 = vmatpush1.bf16.msra.mxu1 %v2041_v40  ;;  %1449 = vmatprep.subr.bf16.mxu0 %v2046_v41 }
  0x8d   :  { %1791 = vmatprep.subr.bf16.mxu1 %v2046_v41  ;;  %1349 = vmatprep.mubr.bf16.mxu0 %v2047_v42 }
  0x8e   :  { %1422 = vmatprep.mubr.bf16.mxu1 %v2049_v43 }
  0x8f   :  { %1450 = vmatpush1.bf16.msra.mxu0 %v2044_v44 }
  0x90   :  { %1799 = vmatpush1.bf16.msra.mxu1 %v2044_v44  ;;  %1451 = vmatprep.subr.bf16.mxu0 %v2055_v45 }
  0x91   :  { %1792 = vmatprep.subr.bf16.mxu1 %v2055_v45 }
  0x92   :  { %1350 = vmatmul.mubr.bf16.gmra.mxu0 %v2051_v46 }
  0x93   :  { %1423 = vmatmul.mubr.bf16.gmra.mxu1 %v2052_v47  ;;  %1452 = vmatpush1.bf16.msra.mxu0 %v2053_v48 }
  0x94   :  { %1800 = vmatpush1.bf16.msra.mxu1 %v2053_v48  ;;  %1453 = vmatprep.subr.bf16.mxu0 %v2058_v49 }
  0x95   :  { %1793 = vmatprep.subr.bf16.mxu1 %v2058_v49  ;;  %1359 = vmatprep.mubr.bf16.mxu0 %v2059_v50 }
  0x96   :  { %1432 = vmatprep.mubr.bf16.mxu1 %v2061_v51 }
  0x97   :  { %1454 = vmatpush1.bf16.msra.mxu0 %v2056_v52 }
  0x98   :  { %1801 = vmatpush1.bf16.msra.mxu1 %v2056_v52  ;;  %1455 = vmatprep.subr.bf16.mxu0 %v2067_v53 }
  0x99   :  { %1794 = vmatprep.subr.bf16.mxu1 %v2067_v53 }
  0x9a   :  { %1360 = vmatmul.mubr.bf16.gmra.mxu0 %v2063_v54 }
  0x9b   :  { %1433 = vmatmul.mubr.bf16.gmra.mxu1 %v2064_v55  ;;  %1456 = vmatpush1.bf16.msra.mxu0 %v2065_v56 }
  0x9c   :  { %1802 = vmatpush1.bf16.msra.mxu1 %v2065_v56  ;;  %1457 = vmatprep.subr.bf16.mxu0 %v2070_v57 }
  0x9d   :  { %1795 = vmatprep.subr.bf16.mxu1 %v2070_v57  ;;  %1475 = vmatprep.mubr.bf16.mxu0 %v2075_v8 }
  0x9e   :  { %1495 = vmatprep.mubr.bf16.mxu1 %v2075_v8 }
  0x9f   :  { %1458 = vmatpush1.bf16.msra.mxu0 %v2068_v58 }
  0xa0   :  { %1803 = vmatpush1.bf16.msra.mxu1 %v2068_v58 }
  0xa2   :  { %1476 = vmatmul.mubr.bf16.vlgmr.msra.gmra.mxu0 %v2071_v59 }
  0xa3   :  { %1496 = vmatmul.mubr.bf16.vlgmr.msra.gmra.mxu1 %v2072_v60  ;;  %1485 = vmatprep.mubr.bf16.mxu0 %v2075_v8 }
  0xa4   :  { %1505 = vmatprep.mubr.bf16.mxu1 %v2075_v8 }
  0xaa   :  { %1486 = vmatmul.mubr.bf16.gmra.mxu0 %v2073_v61 }
  0xab   :  { %1506 = vmatmul.mubr.bf16.gmra.mxu1 %v2074_v62 }
  0xb8   :  { %v210_v39 = vpop.permute.xlu0 %209 }
  0xbd   :  { %v215_v46 = vpop.permute.xlu0 %214 }
  0xc2   :  { %v220_v47 = vpop.permute.xlu1 %219 }
  0xc9   :  { %v225_v55 = vpop.permute.xlu1 %224 }
  0xca   :  { %v230_v52 = vpop.permute.xlu0 %229 }
 0x102   :  { %v1185_v63 = vpop.f32.mrf.mxu0 }
 0x103   :  { %v2666_v0 = vpop.f32.mrf.mxu1  ;;  %v1186_v58 = vadd.f32 %v1185_v63, %v210_v39 }
 0x104   :  { %v1187_v1 = vpop.f32.mrf.mxu0 }
 0x105   :  { %v2668_v2 = vpop.f32.mrf.mxu1  ;;  %v1188_v60 = vadd.f32 %v1187_v1, %v210_v39 }
 0x106   :  { %v1189_v3 = vpop.f32.mrf.mxu0 }
 0x107   :  { %v2670_v4 = vpop.f32.mrf.mxu1  ;;  %v1190_v61 = vadd.f32 %v1189_v3, %v215_v46  ;;  %v1261_v1 = vadd.f32 %v2668_v2, %v1188_v60 }
 0x108   :  { %v1191_v8 = vpop.f32.mrf.mxu0 }
 0x109   :  { %v2672_v5 = vpop.f32.mrf.mxu1  ;;  %v1263_v3 = vadd.f32 %v2670_v4, %v1190_v61 }
 0x10a   :  { %v1195_v6 = vpop.f32.mrf.mxu0 }
 0x10b   :  { %v2674_v7 = vpop.f32.mrf.mxu1 }
 0x10c   :  { %v1197_v9 = vpop.f32.mrf.mxu0 }
 0x10d   :  { %v2676_v10 = vpop.f32.mrf.mxu1 }
 0x10e   :  { %v1199_v11 = vpop.f32.mrf.mxu0 }
 0x10f   :  { %v2678_v12 = vpop.f32.mrf.mxu1 }
 0x110   :  { %v1201_v13 = vpop.f32.mrf.mxu0 }
 0x111   :  { %v2680_v14 = vpop.f32.mrf.mxu1 }
 0x112   :  { %v1205_v15 = vpop.f32.mrf.mxu0 }
 0x113   :  { %v1278_v16 = vpop.f32.mrf.mxu1  ;;  %v1206_v59 = vadd.f32 %v1205_v15, %v230_v52 }
 0x114   :  { %v1207_v17 = vpop.f32.mrf.mxu0 }
 0x115   :  { %v2682_v18 = vpop.f32.mrf.mxu1  ;;  %v1279_v63 = vadd.f32 %v1278_v16, %v1206_v59 }
 0x116   :  { %v1209_v19 = vpop.f32.mrf.mxu0 }
 0x117   :  { %v2684_v20 = vpop.f32.mrf.mxu1 }
 0x118   :  { %v1211_v21 = vpop.f32.mrf.mxu0 }
 0x119   :  { %v2686_v22 = vpop.f32.mrf.mxu1 }
 0x11a   :  { %v1215_v23 = vpop.f32.mrf.mxu0 }
 0x11b   :  { %v2688_v24 = vpop.f32.mrf.mxu1 }
 0x11c   :  { %v2690_v25 = vpop.f32.mrf.mxu0 }
 0x11d   :  { %v2692_v26 = vpop.f32.mrf.mxu1 }
 0x11e   :  { %v2694_v27 = vpop.f32.mrf.mxu0 }
 0x11f   :  { %v2696_v28 = vpop.f32.mrf.mxu1 }
 0x120   :  { %2808 = vst [vmem:[#allocation2_spill] sm:$0xff] %v2696_v28  ;;  %v2698_v29 = vpop.f32.mrf.mxu0  ;;  %v1200_v28 = vadd.f32 %v1199_v11, %v225_v55 }
 0x121   :  { %v2700_v30 = vpop.f32.mrf.mxu1 }
 0x122   :  { %2809 = vst [vmem:[#allocation3_spill] sm:$0xff] %v2700_v30  ;;  %v1259_v30 = vadd.f32 %v2666_v0, %v1186_v58 }
 0x142   :  { %v1331_v31 = vpop.f32.mrf.mxu0 }
 0x143   :  { %v2702_v32 = vpop.f32.mrf.mxu1 }
 0x144   :  { %v1333_v33 = vpop.f32.mrf.mxu0 }
 0x145   :  { %v2704_v34 = vpop.f32.mrf.mxu1 }
 0x146   :  { %v2706_v35 = vpop.f32.mrf.mxu0 }
 0x147   :  { %v2708_v36 = vpop.f32.mrf.mxu1 }
 0x148   :  { %2810 = vst [vmem:[#allocation4_spill] sm:$0xff] %v2708_v36  ;;  %v2710_v37 = vpop.f32.mrf.mxu0 }
 0x149   :  { %v2712_v38 = vpop.f32.mrf.mxu1 }
 0x14a   :  { %2811 = vst [vmem:[#allocation5_spill] sm:$0xff] %v2712_v38  ;;  %v2714_v40 = vpop.f32.mrf.mxu0  ;;  %v1198_v38 = vadd.f32 %v1197_v9, %v220_v47  ;;  %v1332_v9 = vadd.f32 %v1331_v31, %v1259_v30 }
 0x14b   :  { %v2716_v41 = vpop.f32.mrf.mxu1 }
 0x14c   :  { %2812 = vst [vmem:[#allocation6_spill] sm:$0xff] %v2716_v41  ;;  %v2718_v42 = vpop.f32.mrf.mxu0  ;;  %v1196_v41 = vadd.f32 %v1195_v6, %v220_v47 }
 0x14d   :  { %2813 = vst [vmem:[#allocation7_spill] sm:$0xff] %v2718_v42  ;;  %v2720_v43 = vpop.f32.mrf.mxu1 }
 0x14e   :  { %2814 = vst [vmem:[#allocation8_spill] sm:$0xff] %v2720_v43  ;;  %v2722_v44 = vpop.f32.mrf.mxu0  ;;  %v240_v43 = vpop.permute.xlu0 %239  ;;  %v1269_v11 = vadd.f32 %v2674_v7, %v1196_v41  ;;  %v1336_v41 = vadd.f32 %v2706_v35, %v1263_v3  ;;  %v2822_v35 = vld [vmem:[#allocation3_spill] sm:$0xff] }
 0x14f   :  { %2815 = vst [vmem:[#allocation9_spill] sm:$0xff] %v2722_v44  ;;  %v2724_v45 = vpop.f32.mrf.mxu1  ;;  %v235_v44 = vpop.permute.xlu1 %234  ;;  %v1216_v6 = vadd.f32 %v1215_v23, %v240_v43  ;;  %v1218_v2 = vadd.f32 %v2690_v25, %v240_v43  ;;  %v1334_v23 = vadd.f32 %v1333_v33, %v1261_v1  ;;  %v1405_v25 = vadd.f32 %v2702_v32, %v1332_v9  ;;  %v2821_v32 = vld [vmem:[#allocation2_spill] sm:$0xff] }
 0x150   :  { %2816 = vst [vmem:[#allocation10_spill] sm:$0xff] %v2724_v45  ;;  %v2726_v48 = vpop.f32.mrf.mxu0  ;;  %v1210_v15 = vadd.f32 %v1209_v19, %v235_v44  ;;  %v1212_v39 = vadd.f32 %v1211_v21, %v235_v44  ;;  %v1273_v19 = vadd.f32 %v2678_v12, %v1200_v28 }
 0x151   :  { %2817 = vst [vmem:[#allocation11_spill] sm:$0xff] %v2726_v48  ;;  %v2728_v49 = vpop.f32.mrf.mxu1  ;;  %v1208_v48 = vadd.f32 %v1207_v17, %v230_v52  ;;  %v2825_v59 = vld [vmem:[#allocation5_spill] sm:$0xff] }
 0x152   :  { %2818 = vst [vmem:[#allocation12_spill] sm:$0xff] %v2728_v49  ;;  %v1351_v50 = vpop.f32.mrf.mxu0  ;;  %v1192_v49 = vadd.f32 %v1191_v8, %v215_v46  ;;  %v1283_v31 = vadd.f32 %v2684_v20, %v1210_v15  ;;  %v1342_v20 = vadd.f32 %v2714_v40, %v1269_v11  ;;  %v2824_v40 = vld [vmem:[#allocation4_spill] sm:$0xff] }
 0x153   :  { %v1424_v51 = vpop.f32.mrf.mxu1  ;;  %v245_v8 = vpop.permute.xlu1 %244  ;;  %v1352_v46 = vadd.f32 %v1351_v50, %v1279_v63  ;;  %v1281_v47 = vadd.f32 %v2682_v18, %v1208_v48  ;;  %v1285_v18 = vadd.f32 %v2686_v22, %v1212_v39  ;;  %v1291_v22 = vadd.f32 %v2692_v26, %v1218_v2 }
 0x154   :  { %v1353_v53 = vpop.f32.mrf.mxu0  ;;  %v1265_v0 = vadd.f32 %v2672_v5, %v1192_v49  ;;  %v1220_v5 = vadd.f32 %v2694_v27, %v245_v8  ;;  %v1222_v7 = vadd.f32 %v2698_v29, %v245_v8  ;;  %v1407_v29 = vadd.f32 %v2704_v34, %v1334_v23  ;;  %v2823_v52 = vld [vmem:[#allocation7_spill] sm:$0xff]  ;;  %v2826_v34 = vld [vmem:[#allocation6_spill] sm:$0xff] }
 0x155   :  { %v1426_v54 = vpop.f32.mrf.mxu1  ;;  %v1354_v30 = vadd.f32 %v1353_v53, %v1281_v47  ;;  %v1425_v12 = vadd.f32 %v1424_v51, %v1352_v46  ;;  %v2828_v9 = vld [vmem:[#allocation8_spill] sm:$0xff] }
 0x156   :  { %v1355_v56 = vpop.f32.mrf.mxu0  ;;  %v1338_v28 = vadd.f32 %v2710_v37, %v1265_v0  ;;  %v1293_v50 = vadd.f32 %v2821_v32, %v1220_v5  ;;  %v1295_v51 = vadd.f32 %v2822_v35, %v1222_v7  ;;  %v2830_v23 = vld [vmem:[#allocation9_spill] sm:$0xff] }
 0x157   :  { %v2730_v57 = vpop.f32.mrf.mxu1  ;;  %v1356_v33 = vadd.f32 %v1355_v56, %v1283_v31  ;;  %v1427_v44 = vadd.f32 %v1426_v54, %v1354_v30  ;;  %v1409_v56 = vadd.f32 %v2824_v40, %v1336_v41  ;;  %v1415_v54 = vadd.f32 %v2826_v34, %v1342_v20 }
 0x158   :  { %2819 = vst [vmem:[#allocation13_spill] sm:$0xff] %v2730_v57  ;;  %v1357_v62 = vpop.f32.mrf.mxu0  ;;  %v1202_v57 = vadd.f32 %v1201_v13, %v225_v55  ;;  %v1271_v13 = vadd.f32 %v2676_v10, %v1198_v38  ;;  %v1411_v60 = vadd.f32 %v2825_v59, %v1338_v28  ;;  %v1346_v30 = vadd.f32 %v2830_v23, %v1273_v19  ;;  %v2831_v5 = vld [vmem:[#allocation11_spill] sm:$0xff] }
 0x159   :  { %v2732_v45 = vpop.f32.mrf.mxu1  ;;  %v1358_v53 = vadd.f32 %v1357_v62, %v1285_v18 }
 0x15a   :  { %2820 = vst [vmem:[#allocation14_spill] sm:$0xff] %v2732_v45  ;;  %v1361_v36 = vpop.f32.mrf.mxu0  ;;  %v1275_v21 = vadd.f32 %v2680_v14, %v1202_v57  ;;  %v1289_v14 = vadd.f32 %v2688_v24, %v1216_v6  ;;  %v1344_v24 = vadd.f32 %v2823_v52, %v1271_v13 }
 0x15b   :  { %v2734_v42 = vpop.f32.mrf.mxu1 }
 0x15c   :  { %v1363_v45 = vpop.f32.mrf.mxu0  ;;  %v1362_v57 = vadd.f32 %v1361_v36, %v1289_v14  ;;  %v1417_v46 = vadd.f32 %v2828_v9, %v1344_v24  ;;  %v1348_v7 = vadd.f32 %v2831_v5, %v1275_v21 }
 0x15d   :  { %v2739_v17 = vpop.f32.mrf.mxu1  ;;  %v1364_v1 = vadd.f32 %v1363_v45, %v1291_v22 }
 0x15e   :  { %v1365_v4 = vpop.f32.mrf.mxu0  ;;  %v1435_v31 = vadd.f32 %v2734_v42, %v1362_v57 }
 0x15f   :  { %v2746_v16 = vpop.f32.mrf.mxu1  ;;  %v2827_v61 = vld [vmem:[#allocation13_spill] sm:$0xff]  ;;  %v1437_v20 = vadd.f32 %v2739_v17, %v1364_v1  ;;  %v2832_v17 = vld [vmem:[#allocation10_spill] sm:$0xff] }
 0x160   :  { %v1367_v10 = vpop.f32.mrf.mxu0  ;;  %v1429_v63 = vadd.f32 %v2827_v61, %v1356_v33 }
 0x161   :  { %v2754_v38 = vpop.f32.mrf.mxu1  ;;  %v2829_v47 = vld [vmem:[#allocation14_spill] sm:$0xff]  ;;  %v1368_v33 = vadd.f32 %v1367_v10, %v1295_v51  ;;  %v1419_v10 = vadd.f32 %v2832_v17, %v1346_v30 }
 0x162   :  { %v1477_v27 = vpop.f32.mrf.mxu0  ;;  %v1431_v0 = vadd.f32 %v2829_v47, %v1358_v53 }
 0x163   :  { %v1497_v43 = vpop.f32.mrf.mxu1  ;;  %v1478_v48 = vadd.f32 %v1477_v27, %v1405_v25  ;;  %v1366_v25 = vadd.f32 %v1365_v4, %v1293_v50 }
 0x164   :  { %v1498_v49 = vadd.f32 %v1497_v43, %v1425_v12  ;;  %v1479_v37 = vpop.f32.mrf.mxu0 }
 0x165   :  { %v1499_v55 = vpop.f32.mrf.mxu1  ;;  %v1480_v26 = vadd.f32 %v1479_v37, %v1407_v29  ;;  %v1516_v39 = vmax.f32 %v1478_v48, 0.0 }
 0x166   :  { %v1500_v58 = vadd.f32 %v1499_v55, %v1427_v44  ;;  %v1481_v3 = vpop.f32.mrf.mxu0  ;;  %v1524_v8 = vmax.f32 %v1498_v49, 0.0  ;;  %v1439_v49 = vadd.f32 %v2746_v16, %v1366_v25  ;;  %v2833_v55 = vld [vmem:[#allocation12_spill] sm:$0xff] }
 0x167   :  { %v1501_v15 = vpop.f32.mrf.mxu1  ;;  %v1517_v6 = vmax.f32 %v1480_v26, 0.0  ;;  %v1482_v36 = vadd.f32 %v1481_v3, %v1409_v56  ;;  %v1421_v40 = vadd.f32 %v2833_v55, %v1348_v7  ;;  %v1441_v56 = vadd.f32 %v2754_v38, %v1368_v33 }
 0x168   :  { %v1525_v62 = vmax.f32 %v1500_v58, 0.0  ;;  %v1502_v11 = vadd.f32 %v1501_v15, %v1429_v63  ;;  %v1483_v13 = vpop.f32.mrf.mxu0 }
 0x169   :  { %v1503_v2 = vpop.f32.mrf.mxu1  ;;  %v1780_v18 = vpack.c.bf16 %v1517_v6, %v1516_v39  ;;  %v1484_v41 = vadd.f32 %v1483_v13, %v1411_v60  ;;  %v1518_v22 = vmax.f32 %v1482_v36, 0.0 }
 0x16a   :  { %v1784_v45 = vpack.c.bf16 %v1525_v62, %v1524_v8  ;;  %v1504_v12 = vadd.f32 %v1503_v2, %v1431_v0  ;;  %v1487_v14 = vpop.f32.mrf.mxu0  ;;  %v1526_v21 = vmax.f32 %v1502_v11, 0.0 }
 0x16b   :  { %v1507_v28 = vpop.f32.mrf.mxu1  ;;  %1580 = vst [vmem:[%s2807_s3] sm:$0xff] %v1780_v18  ;;  %v1488_v42 = vadd.f32 %v1487_v14, %v1415_v54  ;;  %v1519_v4 = vmax.f32 %v1484_v41, 0.0 }
 0x16c   :  { %1584 = vst [vmem:[%s2807_s3 + $0x20] sm:$0xff] %v1784_v45  ;;  %v1508_v19 = vadd.f32 %v1507_v28, %v1435_v31  ;;  %v1527_v27 = vmax.f32 %v1504_v12, 0.0  ;;  %v1489_v43 = vpop.f32.mrf.mxu0 }
 0x16d   :  { %v1509_v29 = vpop.f32.mrf.mxu1  ;;  %v1490_v44 = vadd.f32 %v1489_v43, %v1417_v46  ;;  %v1781_v32 = vpack.c.bf16 %v1519_v4, %v1518_v22  ;;  %v1520_v52 = vmax.f32 %v1488_v42, 0.0 }
 0x16e   :  { %v1510_v48 = vadd.f32 %v1509_v29, %v1437_v20  ;;  %v1785_v50 = vpack.c.bf16 %v1527_v27, %v1526_v21  ;;  %v1491_v35 = vpop.f32.mrf.mxu0  ;;  %v1528_v24 = vmax.f32 %v1508_v19, 0.0 }
 0x16f   :  { %v1511_v51 = vpop.f32.mrf.mxu1  ;;  %v1521_v53 = vmax.f32 %v1490_v44, 0.0  ;;  %1581 = vst [vmem:[%s2807_s3 + $0x8] sm:$0xff] %v1781_v32  ;;  %v1492_v16 = vadd.f32 %v1491_v35, %v1419_v10 }
 0x170   :  { %v1529_v37 = vmax.f32 %v1510_v48, 0.0  ;;  %1585 = vst [vmem:[%s2807_s3 + $0x28] sm:$0xff] %v1785_v50  ;;  %v1512_v57 = vadd.f32 %v1511_v51, %v1439_v49  ;;  %v1493_v26 = vpop.f32.mrf.mxu0 }
 0x171   :  { %v1513_v58 = vpop.f32.mrf.mxu1  ;;  %v1782_v59 = vpack.c.bf16 %v1521_v53, %v1520_v52  ;;  %v1494_v34 = vadd.f32 %v1493_v26, %v1421_v40  ;;  %v1522_v38 = vmax.f32 %v1492_v16, 0.0 }
 0x172   :  { %v1786_v60 = vpack.c.bf16 %v1529_v37, %v1528_v24  ;;  %v1514_v54 = vadd.f32 %v1513_v58, %v1441_v56  ;;  %v1530_v61 = vmax.f32 %v1512_v57, 0.0 }
 0x173   :  { %1582 = vst [vmem:[%s2807_s3 + $0x10] sm:$0xff] %v1782_v59  ;;  %v1523_v63 = vmax.f32 %v1494_v34, 0.0 }
 0x174   :  { %1586 = vst [vmem:[%s2807_s3 + $0x30] sm:$0xff] %v1786_v60  ;;  %v1531_v1 = vmax.f32 %v1514_v54, 0.0 }
 0x175   :  { %v1783_v3 = vpack.c.bf16 %v1523_v63, %v1522_v38 }
 0x176   :  { %v1787_v15 = vpack.c.bf16 %v1531_v1, %v1530_v61 }
 0x177   :  { %1583 = vst [vmem:[%s2807_s3 + $0x18] sm:$0xff] %v1783_v3 }
 0x178   :  { %1587 = vst [vmem:[%s2807_s3 + $0x38] sm:$0xff] %v1787_v15 }

</bundles_post_ra>
